<compile_context>
chip_gen: v7x
topology: tpu7x:2x2x1
jax: 0.10.0
libtpu: 0.0.40
codegen_flags: <defaults>
</compile_context>

<pallas_src>
import functools

import numpy as np
import jax
import jax.numpy as jnp
from jax.experimental import pallas as pl
from jax.experimental.pallas import tpu as pltpu


# --------------------------------------------------------------------------
# Bilinear (align_corners=True) interpolation matrix, PyTorch semantics.
# --------------------------------------------------------------------------
def _interp_matrix(out_size, in_size):
    m = np.zeros((out_size, in_size), np.float32)
    if out_size == 1:
        m[0, 0] = 1.0
        return m
    scale = (in_size - 1) / (out_size - 1)
    for i in range(out_size):
        src = i * scale
        lo = int(np.floor(src))
        hi = min(lo + 1, in_size - 1)
        f = src - lo
        m[i, lo] += 1.0 - f
        m[i, hi] += f
    return m


# --------------------------------------------------------------------------
# Banded conv weights: fold the kw (dw) taps and the zero padding in W into
# k matrices of shape (W*Cin, W*Cout).  With activations laid out lane-dense
# as (H, W*Cin), a 'same' conv becomes   sum_dh  act_shifted_dh @ band[dh].
# Out-of-range W taps simply have no (zero) rows, which reproduces the zero
# padding exactly.
# --------------------------------------------------------------------------
def _band_weight(w_hwio, W, pad):
    w_np = np.asarray(w_hwio, np.float32)
    k, _, cin, cout = w_np.shape
    bands = np.zeros((k, W * cin, W * cout), np.float32)
    for dh in range(k):
        for wo in range(W):
            for dw in range(k):
                wi = wo - pad + dw
                if 0 <= wi < W:
                    bands[dh, wi * cin:(wi + 1) * cin,
                          wo * cout:(wo + 1) * cout] = w_np[dh, dw]
    return jnp.asarray(bands, jnp.bfloat16)


def _tiled_bias(b, W):
    # bias row laid out to match the lane-dense output: index w*Cout + co
    return jnp.asarray(np.tile(np.asarray(b, np.float32), W).reshape(1, -1))


# --------------------------------------------------------------------------
# Fully fused Head kernel: one grid step == one image.
#
# ref order:
#   inputs : x_0 .. x_{nb-1}                      (1, H, W*C) lane-dense blocks
#            wh    (Himg, H)                      resize row matrix   (f32)
#            wwblk ((nb+1)*W, (nb+1)*Wimg)        blockdiag(Ww^T)     (f32)
#            per branch: w1,b1,w2,b2,w3,b3,wp,bp  banded bf16 weights / f32 bias
#            wf0,bf0,wf1,bf1                      final 5x5 and 3x3 conv
#   outputs: out (1, Himg, (nb+1)*Wimg)           lane-dense slab of all maps
#   scratch: pad_ref  (offh+H+pmaxh, W*C) bf16    sublane-haloed activation
#            maps_ref (H, (nb+1)*W)       f32     pre-resize predict maps
# --------------------------------------------------------------------------
def _head_kernel(*refs, n_branch, kps, H, W, C, offh, pmaxh):
    WC = W * C
    pos = 0
    x_refs = refs[pos:pos + n_branch]; pos += n_branch
    wh_ref = refs[pos]; pos += 1
    wwblk_ref = refs[pos]; pos += 1
    br_refs = []
    for _ in range(n_branch):
        br_refs.append(refs[pos:pos + 8]); pos += 8
    wf0_ref, bf0_ref, wf1_ref, bf1_ref = refs[pos:pos + 4]; pos += 4
    out_ref = refs[pos]; pos += 1
    pad_ref = refs[pos]; pos += 1
    maps_ref = refs[pos]

    # Only the sublane halo rows the convs actually read must be zero; the
    # interior rows are rewritten before every conv.  Re-zeroing just these
    # few rows per image is ~2 tiny stores and stays correct for any
    # core-sharding of the batch grid (scratch is per-TensorCore).
    pad_ref[0:offh, :] = jnp.zeros((offh, WC), jnp.bfloat16)
    pad_ref[offh + H:offh + H + pmaxh, :] = jnp.zeros((pmaxh, WC), jnp.bfloat16)

    def conv_same(act, wband_ref, bias_ref, k, p, relu):
        """'same' conv on a lane-dense (H, W*Cin) activation.

        k sublane-shifted bf16 reads of the halo scratch, k MXU matmuls with
        the banded weights, f32 accumulation.  Result is (H, W*Cout) and stays
        lane-dense for the next layer.
        """
        pad_ref[offh:offh + H, :] = act.astype(jnp.bfloat16)
        acc = None
        for dh in range(k):
            lhs = pad_ref[offh - p + dh:offh - p + dh + H, :]
            m = jnp.dot(lhs, wband_ref[dh], preferred_element_type=jnp.float32)
            acc = m if acc is None else acc + m
        acc = acc + bias_ref[...]
        return jnp.maximum(acc, 0.0) if relu else acc

    fin = None
    for b in range(n_branch):
        k, p = kps[b]
        w1, b1, w2, b2, w3, b3, wp, bp = br_refs[b]
        act = x_refs[b][0]                                   # (H, W*C) f32
        act = conv_same(act, w1, b1, k, p, True)
        act = conv_same(act, w2, b2, k, p, True)
        act = conv_same(act, w3, b3, k, p, True)
        # chained relu(add) exactly as the PyTorch module does
        fin = act if b == 0 else jnp.maximum(fin + act, 0.0)
        # predict conv: Conv2d(C, 1, 3, 1, 1)  ->  (H, W) map, stash in slab
        maps_ref[:, b * W:(b + 1) * W] = conv_same(act, wp, bp, 3, 1, False)

    f = conv_same(fin, wf0_ref, bf0_ref, 5, 2, True)          # Conv2d(C, C, 5, 1, 2)
    maps_ref[:, n_branch * W:(n_branch + 1) * W] = \
        conv_same(f, wf1_ref, bf1_ref, 3, 1, False)           # Conv2d(C, 1, 3, 1, 1)

    # Batched separable bilinear resize of all nb+1 maps at once:
    #   out[:, m*Wimg:(m+1)*Wimg] = Wh @ maps[:, m*W:(m+1)*W] @ Ww^T
    # The second factor is block-diagonal so the result is one lane-dense
    # (Himg, (nb+1)*Wimg) slab, stored with a single contiguous write.
    t = jnp.dot(wh_ref[...], maps_ref[...], preferred_element_type=jnp.float32)
    out_ref[0] = jnp.dot(t, wwblk_ref[...], preferred_element_type=jnp.float32)


# --------------------------------------------------------------------------
# Head module (JAX/Pallas version)
# --------------------------------------------------------------------------
class HeadPallas:
    def __init__(self, cfgs, conv_cfgs, ff_arch, img_hw, key):
        self.cfgs = cfgs
        self.conv_cfgs = conv_cfgs
        self.ff_arch = ff_arch
        self.img_hw = img_hw
        self.C = cfgs[0][0]
        self.n_branch = len(cfgs[1])
        C = self.C

        keys = iter(jax.random.split(key, 8 * self.n_branch + 4))

        def conv_param(cin, cout, ksz):
            kw_, kb_ = next(keys), next(keys)
            bound = 1.0 / np.sqrt(cin * ksz * ksz)   # torch Conv2d default init
            w = jax.random.uniform(kw_, (ksz, ksz, cin, cout), jnp.float32,
                                   -bound, bound)    # HWIO
            b = jax.random.uniform(kb_, (cout,), jnp.float32, -bound, bound)
            return w, b

        # f32 HWIO parameters (also consumed by the pure-JAX reference)
        self.convs = []       # per branch: [(w, b)] * 3
        self.predicts = []    # per branch: (w, b) for Conv2d(C, 1, 3, 1, 1)
        for i in range(self.n_branch):
            ksz, pad = conv_cfgs[i]
            # TODO(synk): only 'same' convs supported (k == 2p+1); general
            #             (k, p) with changing spatial size not implemented.
            assert ksz == 2 * pad + 1, "only 'same' branch convs supported"
            self.convs.append([conv_param(C, C, ksz) for _ in range(3)])
            self.predicts.append(conv_param(C, 1, 3))
        self.final0 = conv_param(C, C, 5)             # Conv2d(C, C, 5, 1, 2)
        self.final1 = conv_param(C, 1, 3)             # Conv2d(C, 1, 3, 1, 1)

        self._packed_cache = {}                       # banded weights, keyed by W

    def _packed_params(self, W):
        if W in self._packed_cache:
            return self._packed_cache[W]
        packed_branches = []
        for i in range(self.n_branch):
            _, pad = self.conv_cfgs[i]
            ps = []
            for (w, b) in self.convs[i]:
                ps.append(_band_weight(w, W, pad))
                ps.append(_tiled_bias(b, W))
            pw, pb = self.predicts[i]
            ps.append(_band_weight(pw, W, 1))
            ps.append(_tiled_bias(pb, W))
            packed_branches.append(ps)                # [w1,b1,w2,b2,w3,b3,wp,bp]
        packed_final = [_band_weight(self.final0[0], W, 2),
                        _tiled_bias(self.final0[1], W),
                        _band_weight(self.final1[0], W, 1),
                        _tiled_bias(self.final1[1], W)]
        self._packed_cache[W] = (packed_branches, packed_final)
        return self._packed_cache[W]

    def __call__(self, features_nchw):
        # convert PyTorch NCHW inputs to NHWC for the kernel (glue only)
        feats = [jnp.transpose(f, (0, 2, 3, 1)) for f in features_nchw]
        outs = self.ff_arch(feats)
        assert len(outs) == self.n_branch
        N, H, W, C = outs[0].shape
        assert C == self.C
        assert all(o.shape == (N, H, W, C) for o in outs)
        Himg, Wimg = self.img_hw
        nb = self.n_branch

        # lane-dense activation layout: (N, H, W*C), lane index = w*C + c
        feats_flat = [o.reshape(N, H, W * C) for o in outs]

        # separable align_corners=True resize constants (kept in f32)
        wh = jnp.asarray(_interp_matrix(Himg, H))                 # (Himg, H)
        ww = _interp_matrix(Wimg, W)                              # (Wimg, W)
        wwblk_np = np.zeros(((nb + 1) * W, (nb + 1) * Wimg), np.float32)
        for m in range(nb + 1):
            wwblk_np[m * W:(m + 1) * W, m * Wimg:(m + 1) * Wimg] = ww.T
        wwblk = jnp.asarray(wwblk_np)                 # blockdiag(Ww^T)

        packed_branches, packed_final = self._packed_params(W)

        pmaxh = max([2] + [p for (_, p) in self.conv_cfgs[:nb]])
        offh = ((pmaxh + 7) // 8) * 8                 # sublane-aligned interior

        inputs = list(feats_flat) + [wh, wwblk]
        for ps in packed_branches:
            inputs.extend(ps)
        inputs.extend(packed_final)

        in_specs = [pl.BlockSpec((1, H, W * C), lambda n: (n, 0, 0))
                    for _ in range(nb)]
        for a in inputs[nb:]:                         # grid-invariant constants
            nd = a.ndim
            in_specs.append(pl.BlockSpec(a.shape, lambda n, _nd=nd: (0,) * _nd))

        kern = functools.partial(
            _head_kernel,
            n_branch=nb,
            kps=tuple((int(k), int(p))
                      for (k, p) in self.conv_cfgs[:nb]),
            H=H, W=W, C=C, offh=offh, pmaxh=pmaxh)

        out = pl.pallas_call(
            kern,
            out_shape=jax.ShapeDtypeStruct((N, Himg, (nb + 1) * Wimg),
                                           jnp.float32),
            grid=(N,),
            in_specs=in_specs,
            out_specs=pl.BlockSpec((1, Himg, (nb + 1) * Wimg),
                                   lambda n: (n, 0, 0)),
            scratch_shapes=[
                pltpu.VMEM((offh + H + pmaxh, W * C), jnp.bfloat16),  # halo
                pltpu.VMEM((H, (nb + 1) * W), jnp.float32),           # maps
            ],
            compiler_params=pltpu.CompilerParams(
                dimension_semantics=("parallel",),
                vmem_limit_bytes=64 * 1024 * 1024),
        )(*inputs)

        # lane-dense slab -> PyTorch NCHW layout (pure wrapper glue)
        out4 = out.reshape(N, Himg, nb + 1, Wimg).transpose(0, 2, 1, 3)
        predicts = [out4[:, i:i + 1] for i in range(nb)]
        final = out4[:, nb:nb + 1]
        return predicts, final


# --------------------------------------------------------------------------
# Pure-JAX reference (mirrors the kernel's bf16-in / f32-accumulate numerics)
# --------------------------------------------------------------------------
def _ref_conv(x, w, b, pad, relu):
    out = jax.lax.conv_general_dilated(
        x.astype(jnp.bfloat16), w.astype(jnp.bfloat16), (1, 1),
        [(pad, pad), (pad, pad)],
        dimension_numbers=("NHWC", "HWIO", "NHWC"),
        preferred_element_type=jnp.float32) + b
    return jnp.maximum(out, 0.0) if relu else out


def _ref_head(head, features_nchw):
    feats = [jnp.transpose(f, (0, 2, 3, 1)) for f in features_nchw]
    outs = head.ff_arch(feats)
    _, H, W, _ = outs[0].shape
    Himg, Wimg = head.img_hw
    wh = jnp.asarray(_interp_matrix(Himg, H))
    ww = jnp.asarray(_interp_matrix(Wimg, W))

    def resize(p):  # p: (N, H, W, 1)
        return jnp.einsum('ih,nhwc,jw->nijc', wh, p, ww,
                          precision=jax.lax.Precision.HIGHEST)

    predicts, temp = [], []
    for i, out in enumerate(outs):
        _, pad = head.conv_cfgs[i]
        for (w, b) in head.convs[i]:
            out = _ref_conv(out, w, b, pad, True)
        temp.append(out)
        pw, pb = head.predicts[i]
        predicts.append(resize(_ref_conv(out, pw, pb, 1, False)))
    fin = temp[0]
    for i in range(1, len(temp)):
        fin = jnp.maximum(fin + temp[i], 0.0)
    fin = _ref_conv(fin, head.final0[0], head.final0[1], 2, True)
    fin = _ref_conv(fin, head.final1[0], head.final1[1], 1, False)
    fin = resize(fin)
    predicts = [jnp.transpose(p, (0, 3, 1, 2)) for p in predicts]
    fin = jnp.transpose(fin, (0, 3, 1, 2))
    return predicts, fin


# --------------------------------------------------------------------------
if __name__ == "__main__":
    key = jax.random.PRNGKey(0)
    N, C, H, W = 2, 8, 16, 16               # W*C == 128 -> fully lane-dense
    img_hw = (32, 32)
    cfgs = ([C], [0, 1, 2])                 # cfgs[0][0]=channels, 3 branches
    conv_cfgs = [(3, 1), (3, 1), (5, 2)]    # (kernel, padding) per branch
    # TODO(synk): ff_arch is an external fusion module passed to __init__;
    #             identity stand-in (all branches at the same HxW).
    ff_arch = lambda feats: feats

    k_param, k_feat = jax.random.split(key)
    head = HeadPallas(cfgs, conv_cfgs, ff_arch, img_hw, k_param)

    fkeys = jax.random.split(k_feat, len(cfgs[1]))
    features = [jax.random.normal(fk, (N, C, H, W), jnp.float32)
                for fk in fkeys]            # PyTorch NCHW inputs

    predicts, final = head(features)
    for p in predicts:
        jax.block_until_ready(p)
    jax.block_until_ready(final)

    assert final.shape == (N, 1, *img_hw)
    assert all(p.shape == (N, 1, *img_hw) for p in predicts)

    # end-to-end numerical check against a pure-JAX reference
    ref_predicts, ref_final = _ref_head(head, features)
    for got, ref in list(zip(predicts, ref_predicts)) + [(final, ref_final)]:
        np.testing.assert_allclose(np.asarray(got), np.asarray(ref),
                                   rtol=2e-3, atol=2e-3)

    print("KERNEL_OK")
</pallas_src>

<mosaic_0001>
module attributes {stable_mosaic.version = 11 : i64} {
  func.func @_head_kernel(%arg0: i32, %arg1: memref<1x16x128xf32, #tpu.memory_space<vmem>>, %arg2: memref<1x16x128xf32, #tpu.memory_space<vmem>>, %arg3: memref<1x16x128xf32, #tpu.memory_space<vmem>>, %arg4: memref<32x16xf32, #tpu.memory_space<vmem>>, %arg5: memref<64x128xf32, #tpu.memory_space<vmem>>, %arg6: memref<3x128x128xbf16, #tpu.memory_space<vmem>>, %arg7: memref<1x128xf32, #tpu.memory_space<vmem>>, %arg8: memref<3x128x128xbf16, #tpu.memory_space<vmem>>, %arg9: memref<1x128xf32, #tpu.memory_space<vmem>>, %arg10: memref<3x128x128xbf16, #tpu.memory_space<vmem>>, %arg11: memref<1x128xf32, #tpu.memory_space<vmem>>, %arg12: memref<3x128x16xbf16, #tpu.memory_space<vmem>>, %arg13: memref<1x16xf32, #tpu.memory_space<vmem>>, %arg14: memref<3x128x128xbf16, #tpu.memory_space<vmem>>, %arg15: memref<1x128xf32, #tpu.memory_space<vmem>>, %arg16: memref<3x128x128xbf16, #tpu.memory_space<vmem>>, %arg17: memref<1x128xf32, #tpu.memory_space<vmem>>, %arg18: memref<3x128x128xbf16, #tpu.memory_space<vmem>>, %arg19: memref<1x128xf32, #tpu.memory_space<vmem>>, %arg20: memref<3x128x16xbf16, #tpu.memory_space<vmem>>, %arg21: memref<1x16xf32, #tpu.memory_space<vmem>>, %arg22: memref<5x128x128xbf16, #tpu.memory_space<vmem>>, %arg23: memref<1x128xf32, #tpu.memory_space<vmem>>, %arg24: memref<5x128x128xbf16, #tpu.memory_space<vmem>>, %arg25: memref<1x128xf32, #tpu.memory_space<vmem>>, %arg26: memref<5x128x128xbf16, #tpu.memory_space<vmem>>, %arg27: memref<1x128xf32, #tpu.memory_space<vmem>>, %arg28: memref<3x128x16xbf16, #tpu.memory_space<vmem>>, %arg29: memref<1x16xf32, #tpu.memory_space<vmem>>, %arg30: memref<5x128x128xbf16, #tpu.memory_space<vmem>>, %arg31: memref<1x128xf32, #tpu.memory_space<vmem>>, %arg32: memref<3x128x16xbf16, #tpu.memory_space<vmem>>, %arg33: memref<1x16xf32, #tpu.memory_space<vmem>>, %arg34: memref<1x32x128xf32, #tpu.memory_space<vmem>>, %arg35: memref<26x128xbf16, #tpu.memory_space<vmem>>, %arg36: memref<16x64xf32, #tpu.memory_space<vmem>>) attributes {dimension_semantics = [#tpu.dimension_semantics<parallel>], iteration_bounds = array<i64: 2>, scalar_prefetch = 0 : i64, scratch_operands = 2 : i64, tpu.core_type = #tpu.core_type<tc>, window_params = [{transform_indices = @transform_0, window_bounds = array<i64: 1, 16, 128>}, {transform_indices = @transform_1, window_bounds = array<i64: 1, 16, 128>}, {transform_indices = @transform_2, window_bounds = array<i64: 1, 16, 128>}, {pipeline_mode = #tpu.pipeline_mode<synchronous>, transform_indices = @transform_3, window_bounds = array<i64: 32, 16>}, {pipeline_mode = #tpu.pipeline_mode<synchronous>, transform_indices = @transform_4, window_bounds = array<i64: 64, 128>}, {pipeline_mode = #tpu.pipeline_mode<synchronous>, transform_indices = @transform_5, window_bounds = array<i64: 3, 128, 128>}, {pipeline_mode = #tpu.pipeline_mode<synchronous>, transform_indices = @transform_6, window_bounds = array<i64: 1, 128>}, {pipeline_mode = #tpu.pipeline_mode<synchronous>, transform_indices = @transform_7, window_bounds = array<i64: 3, 128, 128>}, {pipeline_mode = #tpu.pipeline_mode<synchronous>, transform_indices = @transform_8, window_bounds = array<i64: 1, 128>}, {pipeline_mode = #tpu.pipeline_mode<synchronous>, transform_indices = @transform_9, window_bounds = array<i64: 3, 128, 128>}, {pipeline_mode = #tpu.pipeline_mode<synchronous>, transform_indices = @transform_10, window_bounds = array<i64: 1, 128>}, {pipeline_mode = #tpu.pipeline_mode<synchronous>, transform_indices = @transform_11, window_bounds = array<i64: 3, 128, 16>}, {pipeline_mode = #tpu.pipeline_mode<synchronous>, transform_indices = @transform_12, window_bounds = array<i64: 1, 16>}, {pipeline_mode = #tpu.pipeline_mode<synchronous>, transform_indices = @transform_13, window_bounds = array<i64: 3, 128, 128>}, {pipeline_mode = #tpu.pipeline_mode<synchronous>, transform_indices = @transform_14, window_bounds = array<i64: 1, 128>}, {pipeline_mode = #tpu.pipeline_mode<synchronous>, transform_indices = @transform_15, window_bounds = array<i64: 3, 128, 128>}, {pipeline_mode = #tpu.pipeline_mode<synchronous>, transform_indices = @transform_16, window_bounds = array<i64: 1, 128>}, {pipeline_mode = #tpu.pipeline_mode<synchronous>, transform_indices = @transform_17, window_bounds = array<i64: 3, 128, 128>}, {pipeline_mode = #tpu.pipeline_mode<synchronous>, transform_indices = @transform_18, window_bounds = array<i64: 1, 128>}, {pipeline_mode = #tpu.pipeline_mode<synchronous>, transform_indices = @transform_19, window_bounds = array<i64: 3, 128, 16>}, {pipeline_mode = #tpu.pipeline_mode<synchronous>, transform_indices = @transform_20, window_bounds = array<i64: 1, 16>}, {pipeline_mode = #tpu.pipeline_mode<synchronous>, transform_indices = @transform_21, window_bounds = array<i64: 5, 128, 128>}, {pipeline_mode = #tpu.pipeline_mode<synchronous>, transform_indices = @transform_22, window_bounds = array<i64: 1, 128>}, {pipeline_mode = #tpu.pipeline_mode<synchronous>, transform_indices = @transform_23, window_bounds = array<i64: 5, 128, 128>}, {pipeline_mode = #tpu.pipeline_mode<synchronous>, transform_indices = @transform_24, window_bounds = array<i64: 1, 128>}, {pipeline_mode = #tpu.pipeline_mode<synchronous>, transform_indices = @transform_25, window_bounds = array<i64: 5, 128, 128>}, {pipeline_mode = #tpu.pipeline_mode<synchronous>, transform_indices = @transform_26, window_bounds = array<i64: 1, 128>}, {pipeline_mode = #tpu.pipeline_mode<synchronous>, transform_indices = @transform_27, window_bounds = array<i64: 3, 128, 16>}, {pipeline_mode = #tpu.pipeline_mode<synchronous>, transform_indices = @transform_28, window_bounds = array<i64: 1, 16>}, {pipeline_mode = #tpu.pipeline_mode<synchronous>, transform_indices = @transform_29, window_bounds = array<i64: 5, 128, 128>}, {pipeline_mode = #tpu.pipeline_mode<synchronous>, transform_indices = @transform_30, window_bounds = array<i64: 1, 128>}, {pipeline_mode = #tpu.pipeline_mode<synchronous>, transform_indices = @transform_31, window_bounds = array<i64: 3, 128, 16>}, {pipeline_mode = #tpu.pipeline_mode<synchronous>, transform_indices = @transform_32, window_bounds = array<i64: 1, 16>}, {transform_indices = @transform_33, window_bounds = array<i64: 1, 32, 128>}]} {
    %cst = arith.constant 0.000000e+00 : bf16
    %0 = vector.broadcast %cst : bf16 to vector<8x128xbf16>
    %c0 = arith.constant 0 : index
    %c0_0 = arith.constant 0 : index
    %1 = vector.load %arg35[%c0, %c0_0] : memref<26x128xbf16, #tpu.memory_space<vmem>>, vector<8x128xbf16>
    tpu.vector_store %arg35[%c0, %c0_0], %0 {strides = array<i32>} : memref<26x128xbf16, #tpu.memory_space<vmem>>, vector<8x128xbf16>,
    %cst_1 = arith.constant 0.000000e+00 : bf16
    %2 = vector.broadcast %cst_1 : bf16 to vector<2x128xbf16>
    %c24 = arith.constant 24 : index
    %c0_2 = arith.constant 0 : index
    %3 = vector.load %arg35[%c24, %c0_2] : memref<26x128xbf16, #tpu.memory_space<vmem>>, vector<2x128xbf16>
    tpu.vector_store %arg35[%c24, %c0_2], %2 {strides = array<i32>} : memref<26x128xbf16, #tpu.memory_space<vmem>>, vector<2x128xbf16>,
    %c0_3 = arith.constant 0 : index
    %c0_4 = arith.constant 0 : index
    %c0_5 = arith.constant 0 : index
    %4 = vector.load %arg1[%c0_3, %c0_4, %c0_5] : memref<1x16x128xf32, #tpu.memory_space<vmem>>, vector<1x16x128xf32>
    %5 = vector.shape_cast %4 : vector<1x16x128xf32> to vector<16x128xf32>
    %6 = arith.truncf %5 : vector<16x128xf32> to vector<16x128xbf16>
    %c8 = arith.constant 8 : index
    %c0_6 = arith.constant 0 : index
    %7 = vector.load %arg35[%c8, %c0_6] : memref<26x128xbf16, #tpu.memory_space<vmem>>, vector<16x128xbf16>
    tpu.vector_store %arg35[%c8, %c0_6], %6 {strides = array<i32>} : memref<26x128xbf16, #tpu.memory_space<vmem>>, vector<16x128xbf16>,
    %c7 = arith.constant 7 : index
    %c0_7 = arith.constant 0 : index
    %8 = vector.load %arg35[%c7, %c0_7] : memref<26x128xbf16, #tpu.memory_space<vmem>>, vector<16x128xbf16>
    %c0_8 = arith.constant 0 : index
    %c0_9 = arith.constant 0 : index
    %c0_10 = arith.constant 0 : index
    %9 = vector.load %arg6[%c0_8, %c0_9, %c0_10] : memref<3x128x128xbf16, #tpu.memory_space<vmem>>, vector<1x128x128xbf16>
    %10 = vector.shape_cast %9 : vector<1x128x128xbf16> to vector<128x128xbf16>
    %cst_11 = arith.constant dense<0.000000e+00> : vector<16x128xf32>
    %11 = tpu.matmul %8, %10, %cst_11 {dimension_numbers = #tpu.dot_dimension_numbers<[1], [0], [0], [1], [0, 0, 1, 1], [], []>} : vector<16x128xbf16>, vector<128x128xbf16>, vector<16x128xf32> -> vector<16x128xf32>
    %c8_12 = arith.constant 8 : index
    %c0_13 = arith.constant 0 : index
    %12 = vector.load %arg35[%c8_12, %c0_13] : memref<26x128xbf16, #tpu.memory_space<vmem>>, vector<16x128xbf16>
    %c1 = arith.constant 1 : index
    %c0_14 = arith.constant 0 : index
    %c0_15 = arith.constant 0 : index
    %13 = vector.load %arg6[%c1, %c0_14, %c0_15] : memref<3x128x128xbf16, #tpu.memory_space<vmem>>, vector<1x128x128xbf16>
    %14 = vector.shape_cast %13 : vector<1x128x128xbf16> to vector<128x128xbf16>
    %cst_16 = arith.constant dense<0.000000e+00> : vector<16x128xf32>
    %15 = tpu.matmul %12, %14, %cst_16 {dimension_numbers = #tpu.dot_dimension_numbers<[1], [0], [0], [1], [0, 0, 1, 1], [], []>} : vector<16x128xbf16>, vector<128x128xbf16>, vector<16x128xf32> -> vector<16x128xf32>
    %16 = arith.addf %11, %15 : vector<16x128xf32>
    %c9 = arith.constant 9 : index
    %c0_17 = arith.constant 0 : index
    %17 = vector.load %arg35[%c9, %c0_17] : memref<26x128xbf16, #tpu.memory_space<vmem>>, vector<16x128xbf16>
    %c2 = arith.constant 2 : index
    %c0_18 = arith.constant 0 : index
    %c0_19 = arith.constant 0 : index
    %18 = vector.load %arg6[%c2, %c0_18, %c0_19] : memref<3x128x128xbf16, #tpu.memory_space<vmem>>, vector<1x128x128xbf16>
    %19 = vector.shape_cast %18 : vector<1x128x128xbf16> to vector<128x128xbf16>
    %cst_20 = arith.constant dense<0.000000e+00> : vector<16x128xf32>
    %20 = tpu.matmul %17, %19, %cst_20 {dimension_numbers = #tpu.dot_dimension_numbers<[1], [0], [0], [1], [0, 0, 1, 1], [], []>} : vector<16x128xbf16>, vector<128x128xbf16>, vector<16x128xf32> -> vector<16x128xf32>
    %21 = arith.addf %16, %20 : vector<16x128xf32>
    %c0_21 = arith.constant 0 : index
    %c0_22 = arith.constant 0 : index
    %22 = vector.load %arg7[%c0_21, %c0_22] : memref<1x128xf32, #tpu.memory_space<vmem>>, vector<1x128xf32>
    %23 = vector.broadcast %22 : vector<1x128xf32> to vector<16x128xf32>
    %24 = arith.addf %21, %23 : vector<16x128xf32>
    %cst_23 = arith.constant 0.000000e+00 : f32
    %25 = vector.broadcast %cst_23 : f32 to vector<16x128xf32>
    %26 = arith.maximumf %24, %25 : vector<16x128xf32>
    %27 = arith.truncf %26 : vector<16x128xf32> to vector<16x128xbf16>
    %c8_24 = arith.constant 8 : index
    %c0_25 = arith.constant 0 : index
    %28 = vector.load %arg35[%c8_24, %c0_25] : memref<26x128xbf16, #tpu.memory_space<vmem>>, vector<16x128xbf16>
    tpu.vector_store %arg35[%c8_24, %c0_25], %27 {strides = array<i32>} : memref<26x128xbf16, #tpu.memory_space<vmem>>, vector<16x128xbf16>,
    %c7_26 = arith.constant 7 : index
    %c0_27 = arith.constant 0 : index
    %29 = vector.load %arg35[%c7_26, %c0_27] : memref<26x128xbf16, #tpu.memory_space<vmem>>, vector<16x128xbf16>
    %c0_28 = arith.constant 0 : index
    %c0_29 = arith.constant 0 : index
    %c0_30 = arith.constant 0 : index
    %30 = vector.load %arg8[%c0_28, %c0_29, %c0_30] : memref<3x128x128xbf16, #tpu.memory_space<vmem>>, vector<1x128x128xbf16>
    %31 = vector.shape_cast %30 : vector<1x128x128xbf16> to vector<128x128xbf16>
    %cst_31 = arith.constant dense<0.000000e+00> : vector<16x128xf32>
    %32 = tpu.matmul %29, %31, %cst_31 {dimension_numbers = #tpu.dot_dimension_numbers<[1], [0], [0], [1], [0, 0, 1, 1], [], []>} : vector<16x128xbf16>, vector<128x128xbf16>, vector<16x128xf32> -> vector<16x128xf32>
    %c8_32 = arith.constant 8 : index
    %c0_33 = arith.constant 0 : index
    %33 = vector.load %arg35[%c8_32, %c0_33] : memref<26x128xbf16, #tpu.memory_space<vmem>>, vector<16x128xbf16>
    %c1_34 = arith.constant 1 : index
    %c0_35 = arith.constant 0 : index
    %c0_36 = arith.constant 0 : index
    %34 = vector.load %arg8[%c1_34, %c0_35, %c0_36] : memref<3x128x128xbf16, #tpu.memory_space<vmem>>, vector<1x128x128xbf16>
    %35 = vector.shape_cast %34 : vector<1x128x128xbf16> to vector<128x128xbf16>
    %cst_37 = arith.constant dense<0.000000e+00> : vector<16x128xf32>
    %36 = tpu.matmul %33, %35, %cst_37 {dimension_numbers = #tpu.dot_dimension_numbers<[1], [0], [0], [1], [0, 0, 1, 1], [], []>} : vector<16x128xbf16>, vector<128x128xbf16>, vector<16x128xf32> -> vector<16x128xf32>
    %37 = arith.addf %32, %36 : vector<16x128xf32>
    %c9_38 = arith.constant 9 : index
    %c0_39 = arith.constant 0 : index
    %38 = vector.load %arg35[%c9_38, %c0_39] : memref<26x128xbf16, #tpu.memory_space<vmem>>, vector<16x128xbf16>
    %c2_40 = arith.constant 2 : index
    %c0_41 = arith.constant 0 : index
    %c0_42 = arith.constant 0 : index
    %39 = vector.load %arg8[%c2_40, %c0_41, %c0_42] : memref<3x128x128xbf16, #tpu.memory_space<vmem>>, vector<1x128x128xbf16>
    %40 = vector.shape_cast %39 : vector<1x128x128xbf16> to vector<128x128xbf16>
    %cst_43 = arith.constant dense<0.000000e+00> : vector<16x128xf32>
    %41 = tpu.matmul %38, %40, %cst_43 {dimension_numbers = #tpu.dot_dimension_numbers<[1], [0], [0], [1], [0, 0, 1, 1], [], []>} : vector<16x128xbf16>, vector<128x128xbf16>, vector<16x128xf32> -> vector<16x128xf32>
    %42 = arith.addf %37, %41 : vector<16x128xf32>
    %c0_44 = arith.constant 0 : index
    %c0_45 = arith.constant 0 : index
    %43 = vector.load %arg9[%c0_44, %c0_45] : memref<1x128xf32, #tpu.memory_space<vmem>>, vector<1x128xf32>
    %44 = vector.broadcast %43 : vector<1x128xf32> to vector<16x128xf32>
    %45 = arith.addf %42, %44 : vector<16x128xf32>
    %cst_46 = arith.constant 0.000000e+00 : f32
    %46 = vector.broadcast %cst_46 : f32 to vector<16x128xf32>
    %47 = arith.maximumf %45, %46 : vector<16x128xf32>
    %48 = arith.truncf %47 : vector<16x128xf32> to vector<16x128xbf16>
    %c8_47 = arith.constant 8 : index
    %c0_48 = arith.constant 0 : index
    %49 = vector.load %arg35[%c8_47, %c0_48] : memref<26x128xbf16, #tpu.memory_space<vmem>>, vector<16x128xbf16>
    tpu.vector_store %arg35[%c8_47, %c0_48], %48 {strides = array<i32>} : memref<26x128xbf16, #tpu.memory_space<vmem>>, vector<16x128xbf16>,
    %c7_49 = arith.constant 7 : index
    %c0_50 = arith.constant 0 : index
    %50 = vector.load %arg35[%c7_49, %c0_50] : memref<26x128xbf16, #tpu.memory_space<vmem>>, vector<16x128xbf16>
    %c0_51 = arith.constant 0 : index
    %c0_52 = arith.constant 0 : index
    %c0_53 = arith.constant 0 : index
    %51 = vector.load %arg10[%c0_51, %c0_52, %c0_53] : memref<3x128x128xbf16, #tpu.memory_space<vmem>>, vector<1x128x128xbf16>
    %52 = vector.shape_cast %51 : vector<1x128x128xbf16> to vector<128x128xbf16>
    %cst_54 = arith.constant dense<0.000000e+00> : vector<16x128xf32>
    %53 = tpu.matmul %50, %52, %cst_54 {dimension_numbers = #tpu.dot_dimension_numbers<[1], [0], [0], [1], [0, 0, 1, 1], [], []>} : vector<16x128xbf16>, vector<128x128xbf16>, vector<16x128xf32> -> vector<16x128xf32>
    %c8_55 = arith.constant 8 : index
    %c0_56 = arith.constant 0 : index
    %54 = vector.load %arg35[%c8_55, %c0_56] : memref<26x128xbf16, #tpu.memory_space<vmem>>, vector<16x128xbf16>
    %c1_57 = arith.constant 1 : index
    %c0_58 = arith.constant 0 : index
    %c0_59 = arith.constant 0 : index
    %55 = vector.load %arg10[%c1_57, %c0_58, %c0_59] : memref<3x128x128xbf16, #tpu.memory_space<vmem>>, vector<1x128x128xbf16>
    %56 = vector.shape_cast %55 : vector<1x128x128xbf16> to vector<128x128xbf16>
    %cst_60 = arith.constant dense<0.000000e+00> : vector<16x128xf32>
    %57 = tpu.matmul %54, %56, %cst_60 {dimension_numbers = #tpu.dot_dimension_numbers<[1], [0], [0], [1], [0, 0, 1, 1], [], []>} : vector<16x128xbf16>, vector<128x128xbf16>, vector<16x128xf32> -> vector<16x128xf32>
    %58 = arith.addf %53, %57 : vector<16x128xf32>
    %c9_61 = arith.constant 9 : index
    %c0_62 = arith.constant 0 : index
    %59 = vector.load %arg35[%c9_61, %c0_62] : memref<26x128xbf16, #tpu.memory_space<vmem>>, vector<16x128xbf16>
    %c2_63 = arith.constant 2 : index
    %c0_64 = arith.constant 0 : index
    %c0_65 = arith.constant 0 : index
    %60 = vector.load %arg10[%c2_63, %c0_64, %c0_65] : memref<3x128x128xbf16, #tpu.memory_space<vmem>>, vector<1x128x128xbf16>
    %61 = vector.shape_cast %60 : vector<1x128x128xbf16> to vector<128x128xbf16>
    %cst_66 = arith.constant dense<0.000000e+00> : vector<16x128xf32>
    %62 = tpu.matmul %59, %61, %cst_66 {dimension_numbers = #tpu.dot_dimension_numbers<[1], [0], [0], [1], [0, 0, 1, 1], [], []>} : vector<16x128xbf16>, vector<128x128xbf16>, vector<16x128xf32> -> vector<16x128xf32>
    %63 = arith.addf %58, %62 : vector<16x128xf32>
    %c0_67 = arith.constant 0 : index
    %c0_68 = arith.constant 0 : index
    %64 = vector.load %arg11[%c0_67, %c0_68] : memref<1x128xf32, #tpu.memory_space<vmem>>, vector<1x128xf32>
    %65 = vector.broadcast %64 : vector<1x128xf32> to vector<16x128xf32>
    %66 = arith.addf %63, %65 : vector<16x128xf32>
    %cst_69 = arith.constant 0.000000e+00 : f32
    %67 = vector.broadcast %cst_69 : f32 to vector<16x128xf32>
    %68 = arith.maximumf %66, %67 : vector<16x128xf32>
    %69 = arith.truncf %68 : vector<16x128xf32> to vector<16x128xbf16>
    %c8_70 = arith.constant 8 : index
    %c0_71 = arith.constant 0 : index
    %70 = vector.load %arg35[%c8_70, %c0_71] : memref<26x128xbf16, #tpu.memory_space<vmem>>, vector<16x128xbf16>
    tpu.vector_store %arg35[%c8_70, %c0_71], %69 {strides = array<i32>} : memref<26x128xbf16, #tpu.memory_space<vmem>>, vector<16x128xbf16>,
    %c7_72 = arith.constant 7 : index
    %c0_73 = arith.constant 0 : index
    %71 = vector.load %arg35[%c7_72, %c0_73] : memref<26x128xbf16, #tpu.memory_space<vmem>>, vector<16x128xbf16>
    %c0_74 = arith.constant 0 : index
    %c0_75 = arith.constant 0 : index
    %c0_76 = arith.constant 0 : index
    %72 = vector.load %arg12[%c0_74, %c0_75, %c0_76] : memref<3x128x16xbf16, #tpu.memory_space<vmem>>, vector<1x128x16xbf16>
    %73 = vector.shape_cast %72 : vector<1x128x16xbf16> to vector<128x16xbf16>
    %cst_77 = arith.constant dense<0.000000e+00> : vector<16x16xf32>
    %74 = tpu.matmul %71, %73, %cst_77 {dimension_numbers = #tpu.dot_dimension_numbers<[1], [0], [0], [1], [0, 0, 1, 1], [], []>} : vector<16x128xbf16>, vector<128x16xbf16>, vector<16x16xf32> -> vector<16x16xf32>
    %c8_78 = arith.constant 8 : index
    %c0_79 = arith.constant 0 : index
    %75 = vector.load %arg35[%c8_78, %c0_79] : memref<26x128xbf16, #tpu.memory_space<vmem>>, vector<16x128xbf16>
    %c1_80 = arith.constant 1 : index
    %c0_81 = arith.constant 0 : index
    %c0_82 = arith.constant 0 : index
    %76 = vector.load %arg12[%c1_80, %c0_81, %c0_82] : memref<3x128x16xbf16, #tpu.memory_space<vmem>>, vector<1x128x16xbf16>
    %77 = vector.shape_cast %76 : vector<1x128x16xbf16> to vector<128x16xbf16>
    %cst_83 = arith.constant dense<0.000000e+00> : vector<16x16xf32>
    %78 = tpu.matmul %75, %77, %cst_83 {dimension_numbers = #tpu.dot_dimension_numbers<[1], [0], [0], [1], [0, 0, 1, 1], [], []>} : vector<16x128xbf16>, vector<128x16xbf16>, vector<16x16xf32> -> vector<16x16xf32>
    %79 = arith.addf %74, %78 : vector<16x16xf32>
    %c9_84 = arith.constant 9 : index
    %c0_85 = arith.constant 0 : index
    %80 = vector.load %arg35[%c9_84, %c0_85] : memref<26x128xbf16, #tpu.memory_space<vmem>>, vector<16x128xbf16>
    %c2_86 = arith.constant 2 : index
    %c0_87 = arith.constant 0 : index
    %c0_88 = arith.constant 0 : index
    %81 = vector.load %arg12[%c2_86, %c0_87, %c0_88] : memref<3x128x16xbf16, #tpu.memory_space<vmem>>, vector<1x128x16xbf16>
    %82 = vector.shape_cast %81 : vector<1x128x16xbf16> to vector<128x16xbf16>
    %cst_89 = arith.constant dense<0.000000e+00> : vector<16x16xf32>
    %83 = tpu.matmul %80, %82, %cst_89 {dimension_numbers = #tpu.dot_dimension_numbers<[1], [0], [0], [1], [0, 0, 1, 1], [], []>} : vector<16x128xbf16>, vector<128x16xbf16>, vector<16x16xf32> -> vector<16x16xf32>
    %84 = arith.addf %79, %83 : vector<16x16xf32>
    %c0_90 = arith.constant 0 : index
    %c0_91 = arith.constant 0 : index
    %85 = vector.load %arg13[%c0_90, %c0_91] : memref<1x16xf32, #tpu.memory_space<vmem>>, vector<1x16xf32>
    %86 = vector.broadcast %85 : vector<1x16xf32> to vector<16x16xf32>
    %87 = arith.addf %84, %86 : vector<16x16xf32>
    %c0_92 = arith.constant 0 : index
    %c0_93 = arith.constant 0 : index
    %88 = vector.load %arg36[%c0_92, %c0_93] : memref<16x64xf32, #tpu.memory_space<vmem>>, vector<16x16xf32>
    tpu.vector_store %arg36[%c0_92, %c0_93], %87 {strides = array<i32>} : memref<16x64xf32, #tpu.memory_space<vmem>>, vector<16x16xf32>,
    %c0_94 = arith.constant 0 : index
    %c0_95 = arith.constant 0 : index
    %c0_96 = arith.constant 0 : index
    %89 = vector.load %arg2[%c0_94, %c0_95, %c0_96] : memref<1x16x128xf32, #tpu.memory_space<vmem>>, vector<1x16x128xf32>
    %90 = vector.shape_cast %89 : vector<1x16x128xf32> to vector<16x128xf32>
    %91 = arith.truncf %90 : vector<16x128xf32> to vector<16x128xbf16>
    %c8_97 = arith.constant 8 : index
    %c0_98 = arith.constant 0 : index
    %92 = vector.load %arg35[%c8_97, %c0_98] : memref<26x128xbf16, #tpu.memory_space<vmem>>, vector<16x128xbf16>
    tpu.vector_store %arg35[%c8_97, %c0_98], %91 {strides = array<i32>} : memref<26x128xbf16, #tpu.memory_space<vmem>>, vector<16x128xbf16>,
    %c7_99 = arith.constant 7 : index
    %c0_100 = arith.constant 0 : index
    %93 = vector.load %arg35[%c7_99, %c0_100] : memref<26x128xbf16, #tpu.memory_space<vmem>>, vector<16x128xbf16>
    %c0_101 = arith.constant 0 : index
    %c0_102 = arith.constant 0 : index
    %c0_103 = arith.constant 0 : index
    %94 = vector.load %arg14[%c0_101, %c0_102, %c0_103] : memref<3x128x128xbf16, #tpu.memory_space<vmem>>, vector<1x128x128xbf16>
    %95 = vector.shape_cast %94 : vector<1x128x128xbf16> to vector<128x128xbf16>
    %cst_104 = arith.constant dense<0.000000e+00> : vector<16x128xf32>
    %96 = tpu.matmul %93, %95, %cst_104 {dimension_numbers = #tpu.dot_dimension_numbers<[1], [0], [0], [1], [0, 0, 1, 1], [], []>} : vector<16x128xbf16>, vector<128x128xbf16>, vector<16x128xf32> -> vector<16x128xf32>
    %c8_105 = arith.constant 8 : index
    %c0_106 = arith.constant 0 : index
    %97 = vector.load %arg35[%c8_105, %c0_106] : memref<26x128xbf16, #tpu.memory_space<vmem>>, vector<16x128xbf16>
    %c1_107 = arith.constant 1 : index
    %c0_108 = arith.constant 0 : index
    %c0_109 = arith.constant 0 : index
    %98 = vector.load %arg14[%c1_107, %c0_108, %c0_109] : memref<3x128x128xbf16, #tpu.memory_space<vmem>>, vector<1x128x128xbf16>
    %99 = vector.shape_cast %98 : vector<1x128x128xbf16> to vector<128x128xbf16>
    %cst_110 = arith.constant dense<0.000000e+00> : vector<16x128xf32>
    %100 = tpu.matmul %97, %99, %cst_110 {dimension_numbers = #tpu.dot_dimension_numbers<[1], [0], [0], [1], [0, 0, 1, 1], [], []>} : vector<16x128xbf16>, vector<128x128xbf16>, vector<16x128xf32> -> vector<16x128xf32>
    %101 = arith.addf %96, %100 : vector<16x128xf32>
    %c9_111 = arith.constant 9 : index
    %c0_112 = arith.constant 0 : index
    %102 = vector.load %arg35[%c9_111, %c0_112] : memref<26x128xbf16, #tpu.memory_space<vmem>>, vector<16x128xbf16>
    %c2_113 = arith.constant 2 : index
    %c0_114 = arith.constant 0 : index
    %c0_115 = arith.constant 0 : index
    %103 = vector.load %arg14[%c2_113, %c0_114, %c0_115] : memref<3x128x128xbf16, #tpu.memory_space<vmem>>, vector<1x128x128xbf16>
    %104 = vector.shape_cast %103 : vector<1x128x128xbf16> to vector<128x128xbf16>
    %cst_116 = arith.constant dense<0.000000e+00> : vector<16x128xf32>
    %105 = tpu.matmul %102, %104, %cst_116 {dimension_numbers = #tpu.dot_dimension_numbers<[1], [0], [0], [1], [0, 0, 1, 1], [], []>} : vector<16x128xbf16>, vector<128x128xbf16>, vector<16x128xf32> -> vector<16x128xf32>
    %106 = arith.addf %101, %105 : vector<16x128xf32>
    %c0_117 = arith.constant 0 : index
    %c0_118 = arith.constant 0 : index
    %107 = vector.load %arg15[%c0_117, %c0_118] : memref<1x128xf32, #tpu.memory_space<vmem>>, vector<1x128xf32>
    %108 = vector.broadcast %107 : vector<1x128xf32> to vector<16x128xf32>
    %109 = arith.addf %106, %108 : vector<16x128xf32>
    %cst_119 = arith.constant 0.000000e+00 : f32
    %110 = vector.broadcast %cst_119 : f32 to vector<16x128xf32>
    %111 = arith.maximumf %109, %110 : vector<16x128xf32>
    %112 = arith.truncf %111 : vector<16x128xf32> to vector<16x128xbf16>
    %c8_120 = arith.constant 8 : index
    %c0_121 = arith.constant 0 : index
    %113 = vector.load %arg35[%c8_120, %c0_121] : memref<26x128xbf16, #tpu.memory_space<vmem>>, vector<16x128xbf16>
    tpu.vector_store %arg35[%c8_120, %c0_121], %112 {strides = array<i32>} : memref<26x128xbf16, #tpu.memory_space<vmem>>, vector<16x128xbf16>,
    %c7_122 = arith.constant 7 : index
    %c0_123 = arith.constant 0 : index
    %114 = vector.load %arg35[%c7_122, %c0_123] : memref<26x128xbf16, #tpu.memory_space<vmem>>, vector<16x128xbf16>
    %c0_124 = arith.constant 0 : index
    %c0_125 = arith.constant 0 : index
    %c0_126 = arith.constant 0 : index
    %115 = vector.load %arg16[%c0_124, %c0_125, %c0_126] : memref<3x128x128xbf16, #tpu.memory_space<vmem>>, vector<1x128x128xbf16>
    %116 = vector.shape_cast %115 : vector<1x128x128xbf16> to vector<128x128xbf16>
    %cst_127 = arith.constant dense<0.000000e+00> : vector<16x128xf32>
    %117 = tpu.matmul %114, %116, %cst_127 {dimension_numbers = #tpu.dot_dimension_numbers<[1], [0], [0], [1], [0, 0, 1, 1], [], []>} : vector<16x128xbf16>, vector<128x128xbf16>, vector<16x128xf32> -> vector<16x128xf32>
    %c8_128 = arith.constant 8 : index
    %c0_129 = arith.constant 0 : index
    %118 = vector.load %arg35[%c8_128, %c0_129] : memref<26x128xbf16, #tpu.memory_space<vmem>>, vector<16x128xbf16>
    %c1_130 = arith.constant 1 : index
    %c0_131 = arith.constant 0 : index
    %c0_132 = arith.constant 0 : index
    %119 = vector.load %arg16[%c1_130, %c0_131, %c0_132] : memref<3x128x128xbf16, #tpu.memory_space<vmem>>, vector<1x128x128xbf16>
    %120 = vector.shape_cast %119 : vector<1x128x128xbf16> to vector<128x128xbf16>
    %cst_133 = arith.constant dense<0.000000e+00> : vector<16x128xf32>
    %121 = tpu.matmul %118, %120, %cst_133 {dimension_numbers = #tpu.dot_dimension_numbers<[1], [0], [0], [1], [0, 0, 1, 1], [], []>} : vector<16x128xbf16>, vector<128x128xbf16>, vector<16x128xf32> -> vector<16x128xf32>
    %122 = arith.addf %117, %121 : vector<16x128xf32>
    %c9_134 = arith.constant 9 : index
    %c0_135 = arith.constant 0 : index
    %123 = vector.load %arg35[%c9_134, %c0_135] : memref<26x128xbf16, #tpu.memory_space<vmem>>, vector<16x128xbf16>
    %c2_136 = arith.constant 2 : index
    %c0_137 = arith.constant 0 : index
    %c0_138 = arith.constant 0 : index
    %124 = vector.load %arg16[%c2_136, %c0_137, %c0_138] : memref<3x128x128xbf16, #tpu.memory_space<vmem>>, vector<1x128x128xbf16>
    %125 = vector.shape_cast %124 : vector<1x128x128xbf16> to vector<128x128xbf16>
    %cst_139 = arith.constant dense<0.000000e+00> : vector<16x128xf32>
    %126 = tpu.matmul %123, %125, %cst_139 {dimension_numbers = #tpu.dot_dimension_numbers<[1], [0], [0], [1], [0, 0, 1, 1], [], []>} : vector<16x128xbf16>, vector<128x128xbf16>, vector<16x128xf32> -> vector<16x128xf32>
    %127 = arith.addf %122, %126 : vector<16x128xf32>
    %c0_140 = arith.constant 0 : index
    %c0_141 = arith.constant 0 : index
    %128 = vector.load %arg17[%c0_140, %c0_141] : memref<1x128xf32, #tpu.memory_space<vmem>>, vector<1x128xf32>
    %129 = vector.broadcast %128 : vector<1x128xf32> to vector<16x128xf32>
    %130 = arith.addf %127, %129 : vector<16x128xf32>
    %cst_142 = arith.constant 0.000000e+00 : f32
    %131 = vector.broadcast %cst_142 : f32 to vector<16x128xf32>
    %132 = arith.maximumf %130, %131 : vector<16x128xf32>
    %133 = arith.truncf %132 : vector<16x128xf32> to vector<16x128xbf16>
    %c8_143 = arith.constant 8 : index
    %c0_144 = arith.constant 0 : index
    %134 = vector.load %arg35[%c8_143, %c0_144] : memref<26x128xbf16, #tpu.memory_space<vmem>>, vector<16x128xbf16>
    tpu.vector_store %arg35[%c8_143, %c0_144], %133 {strides = array<i32>} : memref<26x128xbf16, #tpu.memory_space<vmem>>, vector<16x128xbf16>,
    %c7_145 = arith.constant 7 : index
    %c0_146 = arith.constant 0 : index
    %135 = vector.load %arg35[%c7_145, %c0_146] : memref<26x128xbf16, #tpu.memory_space<vmem>>, vector<16x128xbf16>
    %c0_147 = arith.constant 0 : index
    %c0_148 = arith.constant 0 : index
    %c0_149 = arith.constant 0 : index
    %136 = vector.load %arg18[%c0_147, %c0_148, %c0_149] : memref<3x128x128xbf16, #tpu.memory_space<vmem>>, vector<1x128x128xbf16>
    %137 = vector.shape_cast %136 : vector<1x128x128xbf16> to vector<128x128xbf16>
    %cst_150 = arith.constant dense<0.000000e+00> : vector<16x128xf32>
    %138 = tpu.matmul %135, %137, %cst_150 {dimension_numbers = #tpu.dot_dimension_numbers<[1], [0], [0], [1], [0, 0, 1, 1], [], []>} : vector<16x128xbf16>, vector<128x128xbf16>, vector<16x128xf32> -> vector<16x128xf32>
    %c8_151 = arith.constant 8 : index
    %c0_152 = arith.constant 0 : index
    %139 = vector.load %arg35[%c8_151, %c0_152] : memref<26x128xbf16, #tpu.memory_space<vmem>>, vector<16x128xbf16>
    %c1_153 = arith.constant 1 : index
    %c0_154 = arith.constant 0 : index
    %c0_155 = arith.constant 0 : index
    %140 = vector.load %arg18[%c1_153, %c0_154, %c0_155] : memref<3x128x128xbf16, #tpu.memory_space<vmem>>, vector<1x128x128xbf16>
    %141 = vector.shape_cast %140 : vector<1x128x128xbf16> to vector<128x128xbf16>
    %cst_156 = arith.constant dense<0.000000e+00> : vector<16x128xf32>
    %142 = tpu.matmul %139, %141, %cst_156 {dimension_numbers = #tpu.dot_dimension_numbers<[1], [0], [0], [1], [0, 0, 1, 1], [], []>} : vector<16x128xbf16>, vector<128x128xbf16>, vector<16x128xf32> -> vector<16x128xf32>
    %143 = arith.addf %138, %142 : vector<16x128xf32>
    %c9_157 = arith.constant 9 : index
    %c0_158 = arith.constant 0 : index
    %144 = vector.load %arg35[%c9_157, %c0_158] : memref<26x128xbf16, #tpu.memory_space<vmem>>, vector<16x128xbf16>
    %c2_159 = arith.constant 2 : index
    %c0_160 = arith.constant 0 : index
    %c0_161 = arith.constant 0 : index
    %145 = vector.load %arg18[%c2_159, %c0_160, %c0_161] : memref<3x128x128xbf16, #tpu.memory_space<vmem>>, vector<1x128x128xbf16>
    %146 = vector.shape_cast %145 : vector<1x128x128xbf16> to vector<128x128xbf16>
    %cst_162 = arith.constant dense<0.000000e+00> : vector<16x128xf32>
    %147 = tpu.matmul %144, %146, %cst_162 {dimension_numbers = #tpu.dot_dimension_numbers<[1], [0], [0], [1], [0, 0, 1, 1], [], []>} : vector<16x128xbf16>, vector<128x128xbf16>, vector<16x128xf32> -> vector<16x128xf32>
    %148 = arith.addf %143, %147 : vector<16x128xf32>
    %c0_163 = arith.constant 0 : index
    %c0_164 = arith.constant 0 : index
    %149 = vector.load %arg19[%c0_163, %c0_164] : memref<1x128xf32, #tpu.memory_space<vmem>>, vector<1x128xf32>
    %150 = vector.broadcast %149 : vector<1x128xf32> to vector<16x128xf32>
    %151 = arith.addf %148, %150 : vector<16x128xf32>
    %cst_165 = arith.constant 0.000000e+00 : f32
    %152 = vector.broadcast %cst_165 : f32 to vector<16x128xf32>
    %153 = arith.maximumf %151, %152 : vector<16x128xf32>
    %154 = arith.addf %68, %153 : vector<16x128xf32>
    %cst_166 = arith.constant 0.000000e+00 : f32
    %155 = vector.broadcast %cst_166 : f32 to vector<16x128xf32>
    %156 = arith.maximumf %154, %155 : vector<16x128xf32>
    %157 = arith.truncf %153 : vector<16x128xf32> to vector<16x128xbf16>
    %c8_167 = arith.constant 8 : index
    %c0_168 = arith.constant 0 : index
    %158 = vector.load %arg35[%c8_167, %c0_168] : memref<26x128xbf16, #tpu.memory_space<vmem>>, vector<16x128xbf16>
    tpu.vector_store %arg35[%c8_167, %c0_168], %157 {strides = array<i32>} : memref<26x128xbf16, #tpu.memory_space<vmem>>, vector<16x128xbf16>,
    %c7_169 = arith.constant 7 : index
    %c0_170 = arith.constant 0 : index
    %159 = vector.load %arg35[%c7_169, %c0_170] : memref<26x128xbf16, #tpu.memory_space<vmem>>, vector<16x128xbf16>
    %c0_171 = arith.constant 0 : index
    %c0_172 = arith.constant 0 : index
    %c0_173 = arith.constant 0 : index
    %160 = vector.load %arg20[%c0_171, %c0_172, %c0_173] : memref<3x128x16xbf16, #tpu.memory_space<vmem>>, vector<1x128x16xbf16>
    %161 = vector.shape_cast %160 : vector<1x128x16xbf16> to vector<128x16xbf16>
    %cst_174 = arith.constant dense<0.000000e+00> : vector<16x16xf32>
    %162 = tpu.matmul %159, %161, %cst_174 {dimension_numbers = #tpu.dot_dimension_numbers<[1], [0], [0], [1], [0, 0, 1, 1], [], []>} : vector<16x128xbf16>, vector<128x16xbf16>, vector<16x16xf32> -> vector<16x16xf32>
    %c8_175 = arith.constant 8 : index
    %c0_176 = arith.constant 0 : index
    %163 = vector.load %arg35[%c8_175, %c0_176] : memref<26x128xbf16, #tpu.memory_space<vmem>>, vector<16x128xbf16>
    %c1_177 = arith.constant 1 : index
    %c0_178 = arith.constant 0 : index
    %c0_179 = arith.constant 0 : index
    %164 = vector.load %arg20[%c1_177, %c0_178, %c0_179] : memref<3x128x16xbf16, #tpu.memory_space<vmem>>, vector<1x128x16xbf16>
    %165 = vector.shape_cast %164 : vector<1x128x16xbf16> to vector<128x16xbf16>
    %cst_180 = arith.constant dense<0.000000e+00> : vector<16x16xf32>
    %166 = tpu.matmul %163, %165, %cst_180 {dimension_numbers = #tpu.dot_dimension_numbers<[1], [0], [0], [1], [0, 0, 1, 1], [], []>} : vector<16x128xbf16>, vector<128x16xbf16>, vector<16x16xf32> -> vector<16x16xf32>
    %167 = arith.addf %162, %166 : vector<16x16xf32>
    %c9_181 = arith.constant 9 : index
    %c0_182 = arith.constant 0 : index
    %168 = vector.load %arg35[%c9_181, %c0_182] : memref<26x128xbf16, #tpu.memory_space<vmem>>, vector<16x128xbf16>
    %c2_183 = arith.constant 2 : index
    %c0_184 = arith.constant 0 : index
    %c0_185 = arith.constant 0 : index
    %169 = vector.load %arg20[%c2_183, %c0_184, %c0_185] : memref<3x128x16xbf16, #tpu.memory_space<vmem>>, vector<1x128x16xbf16>
    %170 = vector.shape_cast %169 : vector<1x128x16xbf16> to vector<128x16xbf16>
    %cst_186 = arith.constant dense<0.000000e+00> : vector<16x16xf32>
    %171 = tpu.matmul %168, %170, %cst_186 {dimension_numbers = #tpu.dot_dimension_numbers<[1], [0], [0], [1], [0, 0, 1, 1], [], []>} : vector<16x128xbf16>, vector<128x16xbf16>, vector<16x16xf32> -> vector<16x16xf32>
    %172 = arith.addf %167, %171 : vector<16x16xf32>
    %c0_187 = arith.constant 0 : index
    %c0_188 = arith.constant 0 : index
    %173 = vector.load %arg21[%c0_187, %c0_188] : memref<1x16xf32, #tpu.memory_space<vmem>>, vector<1x16xf32>
    %174 = vector.broadcast %173 : vector<1x16xf32> to vector<16x16xf32>
    %175 = arith.addf %172, %174 : vector<16x16xf32>
    %c0_189 = arith.constant 0 : index
    %c16 = arith.constant 16 : index
    %176 = vector.load %arg36[%c0_189, %c16] : memref<16x64xf32, #tpu.memory_space<vmem>>, vector<16x16xf32>
    tpu.vector_store %arg36[%c0_189, %c16], %175 {strides = array<i32>} : memref<16x64xf32, #tpu.memory_space<vmem>>, vector<16x16xf32>,
    %c0_190 = arith.constant 0 : index
    %c0_191 = arith.constant 0 : index
    %c0_192 = arith.constant 0 : index
    %177 = vector.load %arg3[%c0_190, %c0_191, %c0_192] : memref<1x16x128xf32, #tpu.memory_space<vmem>>, vector<1x16x128xf32>
    %178 = vector.shape_cast %177 : vector<1x16x128xf32> to vector<16x128xf32>
    %179 = arith.truncf %178 : vector<16x128xf32> to vector<16x128xbf16>
    %c8_193 = arith.constant 8 : index
    %c0_194 = arith.constant 0 : index
    %180 = vector.load %arg35[%c8_193, %c0_194] : memref<26x128xbf16, #tpu.memory_space<vmem>>, vector<16x128xbf16>
    tpu.vector_store %arg35[%c8_193, %c0_194], %179 {strides = array<i32>} : memref<26x128xbf16, #tpu.memory_space<vmem>>, vector<16x128xbf16>,
    %c6 = arith.constant 6 : index
    %c0_195 = arith.constant 0 : index
    %181 = vector.load %arg35[%c6, %c0_195] : memref<26x128xbf16, #tpu.memory_space<vmem>>, vector<16x128xbf16>
    %c0_196 = arith.constant 0 : index
    %c0_197 = arith.constant 0 : index
    %c0_198 = arith.constant 0 : index
    %182 = vector.load %arg22[%c0_196, %c0_197, %c0_198] : memref<5x128x128xbf16, #tpu.memory_space<vmem>>, vector<1x128x128xbf16>
    %183 = vector.shape_cast %182 : vector<1x128x128xbf16> to vector<128x128xbf16>
    %cst_199 = arith.constant dense<0.000000e+00> : vector<16x128xf32>
    %184 = tpu.matmul %181, %183, %cst_199 {dimension_numbers = #tpu.dot_dimension_numbers<[1], [0], [0], [1], [0, 0, 1, 1], [], []>} : vector<16x128xbf16>, vector<128x128xbf16>, vector<16x128xf32> -> vector<16x128xf32>
    %c7_200 = arith.constant 7 : index
    %c0_201 = arith.constant 0 : index
    %185 = vector.load %arg35[%c7_200, %c0_201] : memref<26x128xbf16, #tpu.memory_space<vmem>>, vector<16x128xbf16>
    %c1_202 = arith.constant 1 : index
    %c0_203 = arith.constant 0 : index
    %c0_204 = arith.constant 0 : index
    %186 = vector.load %arg22[%c1_202, %c0_203, %c0_204] : memref<5x128x128xbf16, #tpu.memory_space<vmem>>, vector<1x128x128xbf16>
    %187 = vector.shape_cast %186 : vector<1x128x128xbf16> to vector<128x128xbf16>
    %cst_205 = arith.constant dense<0.000000e+00> : vector<16x128xf32>
    %188 = tpu.matmul %185, %187, %cst_205 {dimension_numbers = #tpu.dot_dimension_numbers<[1], [0], [0], [1], [0, 0, 1, 1], [], []>} : vector<16x128xbf16>, vector<128x128xbf16>, vector<16x128xf32> -> vector<16x128xf32>
    %189 = arith.addf %184, %188 : vector<16x128xf32>
    %c8_206 = arith.constant 8 : index
    %c0_207 = arith.constant 0 : index
    %190 = vector.load %arg35[%c8_206, %c0_207] : memref<26x128xbf16, #tpu.memory_space<vmem>>, vector<16x128xbf16>
    %c2_208 = arith.constant 2 : index
    %c0_209 = arith.constant 0 : index
    %c0_210 = arith.constant 0 : index
    %191 = vector.load %arg22[%c2_208, %c0_209, %c0_210] : memref<5x128x128xbf16, #tpu.memory_space<vmem>>, vector<1x128x128xbf16>
    %192 = vector.shape_cast %191 : vector<1x128x128xbf16> to vector<128x128xbf16>
    %cst_211 = arith.constant dense<0.000000e+00> : vector<16x128xf32>
    %193 = tpu.matmul %190, %192, %cst_211 {dimension_numbers = #tpu.dot_dimension_numbers<[1], [0], [0], [1], [0, 0, 1, 1], [], []>} : vector<16x128xbf16>, vector<128x128xbf16>, vector<16x128xf32> -> vector<16x128xf32>
    %194 = arith.addf %189, %193 : vector<16x128xf32>
    %c9_212 = arith.constant 9 : index
    %c0_213 = arith.constant 0 : index
    %195 = vector.load %arg35[%c9_212, %c0_213] : memref<26x128xbf16, #tpu.memory_space<vmem>>, vector<16x128xbf16>
    %c3 = arith.constant 3 : index
    %c0_214 = arith.constant 0 : index
    %c0_215 = arith.constant 0 : index
    %196 = vector.load %arg22[%c3, %c0_214, %c0_215] : memref<5x128x128xbf16, #tpu.memory_space<vmem>>, vector<1x128x128xbf16>
    %197 = vector.shape_cast %196 : vector<1x128x128xbf16> to vector<128x128xbf16>
    %cst_216 = arith.constant dense<0.000000e+00> : vector<16x128xf32>
    %198 = tpu.matmul %195, %197, %cst_216 {dimension_numbers = #tpu.dot_dimension_numbers<[1], [0], [0], [1], [0, 0, 1, 1], [], []>} : vector<16x128xbf16>, vector<128x128xbf16>, vector<16x128xf32> -> vector<16x128xf32>
    %199 = arith.addf %194, %198 : vector<16x128xf32>
    %c10 = arith.constant 10 : index
    %c0_217 = arith.constant 0 : index
    %200 = vector.load %arg35[%c10, %c0_217] : memref<26x128xbf16, #tpu.memory_space<vmem>>, vector<16x128xbf16>
    %c4 = arith.constant 4 : index
    %c0_218 = arith.constant 0 : index
    %c0_219 = arith.constant 0 : index
    %201 = vector.load %arg22[%c4, %c0_218, %c0_219] : memref<5x128x128xbf16, #tpu.memory_space<vmem>>, vector<1x128x128xbf16>
    %202 = vector.shape_cast %201 : vector<1x128x128xbf16> to vector<128x128xbf16>
    %cst_220 = arith.constant dense<0.000000e+00> : vector<16x128xf32>
    %203 = tpu.matmul %200, %202, %cst_220 {dimension_numbers = #tpu.dot_dimension_numbers<[1], [0], [0], [1], [0, 0, 1, 1], [], []>} : vector<16x128xbf16>, vector<128x128xbf16>, vector<16x128xf32> -> vector<16x128xf32>
    %204 = arith.addf %199, %203 : vector<16x128xf32>
    %c0_221 = arith.constant 0 : index
    %c0_222 = arith.constant 0 : index
    %205 = vector.load %arg23[%c0_221, %c0_222] : memref<1x128xf32, #tpu.memory_space<vmem>>, vector<1x128xf32>
    %206 = vector.broadcast %205 : vector<1x128xf32> to vector<16x128xf32>
    %207 = arith.addf %204, %206 : vector<16x128xf32>
    %cst_223 = arith.constant 0.000000e+00 : f32
    %208 = vector.broadcast %cst_223 : f32 to vector<16x128xf32>
    %209 = arith.maximumf %207, %208 : vector<16x128xf32>
    %210 = arith.truncf %209 : vector<16x128xf32> to vector<16x128xbf16>
    %c8_224 = arith.constant 8 : index
    %c0_225 = arith.constant 0 : index
    %211 = vector.load %arg35[%c8_224, %c0_225] : memref<26x128xbf16, #tpu.memory_space<vmem>>, vector<16x128xbf16>
    tpu.vector_store %arg35[%c8_224, %c0_225], %210 {strides = array<i32>} : memref<26x128xbf16, #tpu.memory_space<vmem>>, vector<16x128xbf16>,
    %c6_226 = arith.constant 6 : index
    %c0_227 = arith.constant 0 : index
    %212 = vector.load %arg35[%c6_226, %c0_227] : memref<26x128xbf16, #tpu.memory_space<vmem>>, vector<16x128xbf16>
    %c0_228 = arith.constant 0 : index
    %c0_229 = arith.constant 0 : index
    %c0_230 = arith.constant 0 : index
    %213 = vector.load %arg24[%c0_228, %c0_229, %c0_230] : memref<5x128x128xbf16, #tpu.memory_space<vmem>>, vector<1x128x128xbf16>
    %214 = vector.shape_cast %213 : vector<1x128x128xbf16> to vector<128x128xbf16>
    %cst_231 = arith.constant dense<0.000000e+00> : vector<16x128xf32>
    %215 = tpu.matmul %212, %214, %cst_231 {dimension_numbers = #tpu.dot_dimension_numbers<[1], [0], [0], [1], [0, 0, 1, 1], [], []>} : vector<16x128xbf16>, vector<128x128xbf16>, vector<16x128xf32> -> vector<16x128xf32>
    %c7_232 = arith.constant 7 : index
    %c0_233 = arith.constant 0 : index
    %216 = vector.load %arg35[%c7_232, %c0_233] : memref<26x128xbf16, #tpu.memory_space<vmem>>, vector<16x128xbf16>
    %c1_234 = arith.constant 1 : index
    %c0_235 = arith.constant 0 : index
    %c0_236 = arith.constant 0 : index
    %217 = vector.load %arg24[%c1_234, %c0_235, %c0_236] : memref<5x128x128xbf16, #tpu.memory_space<vmem>>, vector<1x128x128xbf16>
    %218 = vector.shape_cast %217 : vector<1x128x128xbf16> to vector<128x128xbf16>
    %cst_237 = arith.constant dense<0.000000e+00> : vector<16x128xf32>
    %219 = tpu.matmul %216, %218, %cst_237 {dimension_numbers = #tpu.dot_dimension_numbers<[1], [0], [0], [1], [0, 0, 1, 1], [], []>} : vector<16x128xbf16>, vector<128x128xbf16>, vector<16x128xf32> -> vector<16x128xf32>
    %220 = arith.addf %215, %219 : vector<16x128xf32>
    %c8_238 = arith.constant 8 : index
    %c0_239 = arith.constant 0 : index
    %221 = vector.load %arg35[%c8_238, %c0_239] : memref<26x128xbf16, #tpu.memory_space<vmem>>, vector<16x128xbf16>
    %c2_240 = arith.constant 2 : index
    %c0_241 = arith.constant 0 : index
    %c0_242 = arith.constant 0 : index
    %222 = vector.load %arg24[%c2_240, %c0_241, %c0_242] : memref<5x128x128xbf16, #tpu.memory_space<vmem>>, vector<1x128x128xbf16>
    %223 = vector.shape_cast %222 : vector<1x128x128xbf16> to vector<128x128xbf16>
    %cst_243 = arith.constant dense<0.000000e+00> : vector<16x128xf32>
    %224 = tpu.matmul %221, %223, %cst_243 {dimension_numbers = #tpu.dot_dimension_numbers<[1], [0], [0], [1], [0, 0, 1, 1], [], []>} : vector<16x128xbf16>, vector<128x128xbf16>, vector<16x128xf32> -> vector<16x128xf32>
    %225 = arith.addf %220, %224 : vector<16x128xf32>
    %c9_244 = arith.constant 9 : index
    %c0_245 = arith.constant 0 : index
    %226 = vector.load %arg35[%c9_244, %c0_245] : memref<26x128xbf16, #tpu.memory_space<vmem>>, vector<16x128xbf16>
    %c3_246 = arith.constant 3 : index
    %c0_247 = arith.constant 0 : index
    %c0_248 = arith.constant 0 : index
    %227 = vector.load %arg24[%c3_246, %c0_247, %c0_248] : memref<5x128x128xbf16, #tpu.memory_space<vmem>>, vector<1x128x128xbf16>
    %228 = vector.shape_cast %227 : vector<1x128x128xbf16> to vector<128x128xbf16>
    %cst_249 = arith.constant dense<0.000000e+00> : vector<16x128xf32>
    %229 = tpu.matmul %226, %228, %cst_249 {dimension_numbers = #tpu.dot_dimension_numbers<[1], [0], [0], [1], [0, 0, 1, 1], [], []>} : vector<16x128xbf16>, vector<128x128xbf16>, vector<16x128xf32> -> vector<16x128xf32>
    %230 = arith.addf %225, %229 : vector<16x128xf32>
    %c10_250 = arith.constant 10 : index
    %c0_251 = arith.constant 0 : index
    %231 = vector.load %arg35[%c10_250, %c0_251] : memref<26x128xbf16, #tpu.memory_space<vmem>>, vector<16x128xbf16>
    %c4_252 = arith.constant 4 : index
    %c0_253 = arith.constant 0 : index
    %c0_254 = arith.constant 0 : index
    %232 = vector.load %arg24[%c4_252, %c0_253, %c0_254] : memref<5x128x128xbf16, #tpu.memory_space<vmem>>, vector<1x128x128xbf16>
    %233 = vector.shape_cast %232 : vector<1x128x128xbf16> to vector<128x128xbf16>
    %cst_255 = arith.constant dense<0.000000e+00> : vector<16x128xf32>
    %234 = tpu.matmul %231, %233, %cst_255 {dimension_numbers = #tpu.dot_dimension_numbers<[1], [0], [0], [1], [0, 0, 1, 1], [], []>} : vector<16x128xbf16>, vector<128x128xbf16>, vector<16x128xf32> -> vector<16x128xf32>
    %235 = arith.addf %230, %234 : vector<16x128xf32>
    %c0_256 = arith.constant 0 : index
    %c0_257 = arith.constant 0 : index
    %236 = vector.load %arg25[%c0_256, %c0_257] : memref<1x128xf32, #tpu.memory_space<vmem>>, vector<1x128xf32>
    %237 = vector.broadcast %236 : vector<1x128xf32> to vector<16x128xf32>
    %238 = arith.addf %235, %237 : vector<16x128xf32>
    %cst_258 = arith.constant 0.000000e+00 : f32
    %239 = vector.broadcast %cst_258 : f32 to vector<16x128xf32>
    %240 = arith.maximumf %238, %239 : vector<16x128xf32>
    %241 = arith.truncf %240 : vector<16x128xf32> to vector<16x128xbf16>
    %c8_259 = arith.constant 8 : index
    %c0_260 = arith.constant 0 : index
    %242 = vector.load %arg35[%c8_259, %c0_260] : memref<26x128xbf16, #tpu.memory_space<vmem>>, vector<16x128xbf16>
    tpu.vector_store %arg35[%c8_259, %c0_260], %241 {strides = array<i32>} : memref<26x128xbf16, #tpu.memory_space<vmem>>, vector<16x128xbf16>,
    %c6_261 = arith.constant 6 : index
    %c0_262 = arith.constant 0 : index
    %243 = vector.load %arg35[%c6_261, %c0_262] : memref<26x128xbf16, #tpu.memory_space<vmem>>, vector<16x128xbf16>
    %c0_263 = arith.constant 0 : index
    %c0_264 = arith.constant 0 : index
    %c0_265 = arith.constant 0 : index
    %244 = vector.load %arg26[%c0_263, %c0_264, %c0_265] : memref<5x128x128xbf16, #tpu.memory_space<vmem>>, vector<1x128x128xbf16>
    %245 = vector.shape_cast %244 : vector<1x128x128xbf16> to vector<128x128xbf16>
    %cst_266 = arith.constant dense<0.000000e+00> : vector<16x128xf32>
    %246 = tpu.matmul %243, %245, %cst_266 {dimension_numbers = #tpu.dot_dimension_numbers<[1], [0], [0], [1], [0, 0, 1, 1], [], []>} : vector<16x128xbf16>, vector<128x128xbf16>, vector<16x128xf32> -> vector<16x128xf32>
    %c7_267 = arith.constant 7 : index
    %c0_268 = arith.constant 0 : index
    %247 = vector.load %arg35[%c7_267, %c0_268] : memref<26x128xbf16, #tpu.memory_space<vmem>>, vector<16x128xbf16>
    %c1_269 = arith.constant 1 : index
    %c0_270 = arith.constant 0 : index
    %c0_271 = arith.constant 0 : index
    %248 = vector.load %arg26[%c1_269, %c0_270, %c0_271] : memref<5x128x128xbf16, #tpu.memory_space<vmem>>, vector<1x128x128xbf16>
    %249 = vector.shape_cast %248 : vector<1x128x128xbf16> to vector<128x128xbf16>
    %cst_272 = arith.constant dense<0.000000e+00> : vector<16x128xf32>
    %250 = tpu.matmul %247, %249, %cst_272 {dimension_numbers = #tpu.dot_dimension_numbers<[1], [0], [0], [1], [0, 0, 1, 1], [], []>} : vector<16x128xbf16>, vector<128x128xbf16>, vector<16x128xf32> -> vector<16x128xf32>
    %251 = arith.addf %246, %250 : vector<16x128xf32>
    %c8_273 = arith.constant 8 : index
    %c0_274 = arith.constant 0 : index
    %252 = vector.load %arg35[%c8_273, %c0_274] : memref<26x128xbf16, #tpu.memory_space<vmem>>, vector<16x128xbf16>
    %c2_275 = arith.constant 2 : index
    %c0_276 = arith.constant 0 : index
    %c0_277 = arith.constant 0 : index
    %253 = vector.load %arg26[%c2_275, %c0_276, %c0_277] : memref<5x128x128xbf16, #tpu.memory_space<vmem>>, vector<1x128x128xbf16>
    %254 = vector.shape_cast %253 : vector<1x128x128xbf16> to vector<128x128xbf16>
    %cst_278 = arith.constant dense<0.000000e+00> : vector<16x128xf32>
    %255 = tpu.matmul %252, %254, %cst_278 {dimension_numbers = #tpu.dot_dimension_numbers<[1], [0], [0], [1], [0, 0, 1, 1], [], []>} : vector<16x128xbf16>, vector<128x128xbf16>, vector<16x128xf32> -> vector<16x128xf32>
    %256 = arith.addf %251, %255 : vector<16x128xf32>
    %c9_279 = arith.constant 9 : index
    %c0_280 = arith.constant 0 : index
    %257 = vector.load %arg35[%c9_279, %c0_280] : memref<26x128xbf16, #tpu.memory_space<vmem>>, vector<16x128xbf16>
    %c3_281 = arith.constant 3 : index
    %c0_282 = arith.constant 0 : index
    %c0_283 = arith.constant 0 : index
    %258 = vector.load %arg26[%c3_281, %c0_282, %c0_283] : memref<5x128x128xbf16, #tpu.memory_space<vmem>>, vector<1x128x128xbf16>
    %259 = vector.shape_cast %258 : vector<1x128x128xbf16> to vector<128x128xbf16>
    %cst_284 = arith.constant dense<0.000000e+00> : vector<16x128xf32>
    %260 = tpu.matmul %257, %259, %cst_284 {dimension_numbers = #tpu.dot_dimension_numbers<[1], [0], [0], [1], [0, 0, 1, 1], [], []>} : vector<16x128xbf16>, vector<128x128xbf16>, vector<16x128xf32> -> vector<16x128xf32>
    %261 = arith.addf %256, %260 : vector<16x128xf32>
    %c10_285 = arith.constant 10 : index
    %c0_286 = arith.constant 0 : index
    %262 = vector.load %arg35[%c10_285, %c0_286] : memref<26x128xbf16, #tpu.memory_space<vmem>>, vector<16x128xbf16>
    %c4_287 = arith.constant 4 : index
    %c0_288 = arith.constant 0 : index
    %c0_289 = arith.constant 0 : index
    %263 = vector.load %arg26[%c4_287, %c0_288, %c0_289] : memref<5x128x128xbf16, #tpu.memory_space<vmem>>, vector<1x128x128xbf16>
    %264 = vector.shape_cast %263 : vector<1x128x128xbf16> to vector<128x128xbf16>
    %cst_290 = arith.constant dense<0.000000e+00> : vector<16x128xf32>
    %265 = tpu.matmul %262, %264, %cst_290 {dimension_numbers = #tpu.dot_dimension_numbers<[1], [0], [0], [1], [0, 0, 1, 1], [], []>} : vector<16x128xbf16>, vector<128x128xbf16>, vector<16x128xf32> -> vector<16x128xf32>
    %266 = arith.addf %261, %265 : vector<16x128xf32>
    %c0_291 = arith.constant 0 : index
    %c0_292 = arith.constant 0 : index
    %267 = vector.load %arg27[%c0_291, %c0_292] : memref<1x128xf32, #tpu.memory_space<vmem>>, vector<1x128xf32>
    %268 = vector.broadcast %267 : vector<1x128xf32> to vector<16x128xf32>
    %269 = arith.addf %266, %268 : vector<16x128xf32>
    %cst_293 = arith.constant 0.000000e+00 : f32
    %270 = vector.broadcast %cst_293 : f32 to vector<16x128xf32>
    %271 = arith.maximumf %269, %270 : vector<16x128xf32>
    %272 = arith.addf %156, %271 : vector<16x128xf32>
    %cst_294 = arith.constant 0.000000e+00 : f32
    %273 = vector.broadcast %cst_294 : f32 to vector<16x128xf32>
    %274 = arith.maximumf %272, %273 : vector<16x128xf32>
    %275 = arith.truncf %271 : vector<16x128xf32> to vector<16x128xbf16>
    %c8_295 = arith.constant 8 : index
    %c0_296 = arith.constant 0 : index
    %276 = vector.load %arg35[%c8_295, %c0_296] : memref<26x128xbf16, #tpu.memory_space<vmem>>, vector<16x128xbf16>
    tpu.vector_store %arg35[%c8_295, %c0_296], %275 {strides = array<i32>} : memref<26x128xbf16, #tpu.memory_space<vmem>>, vector<16x128xbf16>,
    %c7_297 = arith.constant 7 : index
    %c0_298 = arith.constant 0 : index
    %277 = vector.load %arg35[%c7_297, %c0_298] : memref<26x128xbf16, #tpu.memory_space<vmem>>, vector<16x128xbf16>
    %c0_299 = arith.constant 0 : index
    %c0_300 = arith.constant 0 : index
    %c0_301 = arith.constant 0 : index
    %278 = vector.load %arg28[%c0_299, %c0_300, %c0_301] : memref<3x128x16xbf16, #tpu.memory_space<vmem>>, vector<1x128x16xbf16>
    %279 = vector.shape_cast %278 : vector<1x128x16xbf16> to vector<128x16xbf16>
    %cst_302 = arith.constant dense<0.000000e+00> : vector<16x16xf32>
    %280 = tpu.matmul %277, %279, %cst_302 {dimension_numbers = #tpu.dot_dimension_numbers<[1], [0], [0], [1], [0, 0, 1, 1], [], []>} : vector<16x128xbf16>, vector<128x16xbf16>, vector<16x16xf32> -> vector<16x16xf32>
    %c8_303 = arith.constant 8 : index
    %c0_304 = arith.constant 0 : index
    %281 = vector.load %arg35[%c8_303, %c0_304] : memref<26x128xbf16, #tpu.memory_space<vmem>>, vector<16x128xbf16>
    %c1_305 = arith.constant 1 : index
    %c0_306 = arith.constant 0 : index
    %c0_307 = arith.constant 0 : index
    %282 = vector.load %arg28[%c1_305, %c0_306, %c0_307] : memref<3x128x16xbf16, #tpu.memory_space<vmem>>, vector<1x128x16xbf16>
    %283 = vector.shape_cast %282 : vector<1x128x16xbf16> to vector<128x16xbf16>
    %cst_308 = arith.constant dense<0.000000e+00> : vector<16x16xf32>
    %284 = tpu.matmul %281, %283, %cst_308 {dimension_numbers = #tpu.dot_dimension_numbers<[1], [0], [0], [1], [0, 0, 1, 1], [], []>} : vector<16x128xbf16>, vector<128x16xbf16>, vector<16x16xf32> -> vector<16x16xf32>
    %285 = arith.addf %280, %284 : vector<16x16xf32>
    %c9_309 = arith.constant 9 : index
    %c0_310 = arith.constant 0 : index
    %286 = vector.load %arg35[%c9_309, %c0_310] : memref<26x128xbf16, #tpu.memory_space<vmem>>, vector<16x128xbf16>
    %c2_311 = arith.constant 2 : index
    %c0_312 = arith.constant 0 : index
    %c0_313 = arith.constant 0 : index
    %287 = vector.load %arg28[%c2_311, %c0_312, %c0_313] : memref<3x128x16xbf16, #tpu.memory_space<vmem>>, vector<1x128x16xbf16>
    %288 = vector.shape_cast %287 : vector<1x128x16xbf16> to vector<128x16xbf16>
    %cst_314 = arith.constant dense<0.000000e+00> : vector<16x16xf32>
    %289 = tpu.matmul %286, %288, %cst_314 {dimension_numbers = #tpu.dot_dimension_numbers<[1], [0], [0], [1], [0, 0, 1, 1], [], []>} : vector<16x128xbf16>, vector<128x16xbf16>, vector<16x16xf32> -> vector<16x16xf32>
    %290 = arith.addf %285, %289 : vector<16x16xf32>
    %c0_315 = arith.constant 0 : index
    %c0_316 = arith.constant 0 : index
    %291 = vector.load %arg29[%c0_315, %c0_316] : memref<1x16xf32, #tpu.memory_space<vmem>>, vector<1x16xf32>
    %292 = vector.broadcast %291 : vector<1x16xf32> to vector<16x16xf32>
    %293 = arith.addf %290, %292 : vector<16x16xf32>
    %c0_317 = arith.constant 0 : index
    %c32 = arith.constant 32 : index
    %294 = vector.load %arg36[%c0_317, %c32] : memref<16x64xf32, #tpu.memory_space<vmem>>, vector<16x16xf32>
    tpu.vector_store %arg36[%c0_317, %c32], %293 {strides = array<i32>} : memref<16x64xf32, #tpu.memory_space<vmem>>, vector<16x16xf32>,
    %295 = arith.truncf %274 : vector<16x128xf32> to vector<16x128xbf16>
    %c8_318 = arith.constant 8 : index
    %c0_319 = arith.constant 0 : index
    %296 = vector.load %arg35[%c8_318, %c0_319] : memref<26x128xbf16, #tpu.memory_space<vmem>>, vector<16x128xbf16>
    tpu.vector_store %arg35[%c8_318, %c0_319], %295 {strides = array<i32>} : memref<26x128xbf16, #tpu.memory_space<vmem>>, vector<16x128xbf16>,
    %c6_320 = arith.constant 6 : index
    %c0_321 = arith.constant 0 : index
    %297 = vector.load %arg35[%c6_320, %c0_321] : memref<26x128xbf16, #tpu.memory_space<vmem>>, vector<16x128xbf16>
    %c0_322 = arith.constant 0 : index
    %c0_323 = arith.constant 0 : index
    %c0_324 = arith.constant 0 : index
    %298 = vector.load %arg30[%c0_322, %c0_323, %c0_324] : memref<5x128x128xbf16, #tpu.memory_space<vmem>>, vector<1x128x128xbf16>
    %299 = vector.shape_cast %298 : vector<1x128x128xbf16> to vector<128x128xbf16>
    %cst_325 = arith.constant dense<0.000000e+00> : vector<16x128xf32>
    %300 = tpu.matmul %297, %299, %cst_325 {dimension_numbers = #tpu.dot_dimension_numbers<[1], [0], [0], [1], [0, 0, 1, 1], [], []>} : vector<16x128xbf16>, vector<128x128xbf16>, vector<16x128xf32> -> vector<16x128xf32>
    %c7_326 = arith.constant 7 : index
    %c0_327 = arith.constant 0 : index
    %301 = vector.load %arg35[%c7_326, %c0_327] : memref<26x128xbf16, #tpu.memory_space<vmem>>, vector<16x128xbf16>
    %c1_328 = arith.constant 1 : index
    %c0_329 = arith.constant 0 : index
    %c0_330 = arith.constant 0 : index
    %302 = vector.load %arg30[%c1_328, %c0_329, %c0_330] : memref<5x128x128xbf16, #tpu.memory_space<vmem>>, vector<1x128x128xbf16>
    %303 = vector.shape_cast %302 : vector<1x128x128xbf16> to vector<128x128xbf16>
    %cst_331 = arith.constant dense<0.000000e+00> : vector<16x128xf32>
    %304 = tpu.matmul %301, %303, %cst_331 {dimension_numbers = #tpu.dot_dimension_numbers<[1], [0], [0], [1], [0, 0, 1, 1], [], []>} : vector<16x128xbf16>, vector<128x128xbf16>, vector<16x128xf32> -> vector<16x128xf32>
    %305 = arith.addf %300, %304 : vector<16x128xf32>
    %c8_332 = arith.constant 8 : index
    %c0_333 = arith.constant 0 : index
    %306 = vector.load %arg35[%c8_332, %c0_333] : memref<26x128xbf16, #tpu.memory_space<vmem>>, vector<16x128xbf16>
    %c2_334 = arith.constant 2 : index
    %c0_335 = arith.constant 0 : index
    %c0_336 = arith.constant 0 : index
    %307 = vector.load %arg30[%c2_334, %c0_335, %c0_336] : memref<5x128x128xbf16, #tpu.memory_space<vmem>>, vector<1x128x128xbf16>
    %308 = vector.shape_cast %307 : vector<1x128x128xbf16> to vector<128x128xbf16>
    %cst_337 = arith.constant dense<0.000000e+00> : vector<16x128xf32>
    %309 = tpu.matmul %306, %308, %cst_337 {dimension_numbers = #tpu.dot_dimension_numbers<[1], [0], [0], [1], [0, 0, 1, 1], [], []>} : vector<16x128xbf16>, vector<128x128xbf16>, vector<16x128xf32> -> vector<16x128xf32>
    %310 = arith.addf %305, %309 : vector<16x128xf32>
    %c9_338 = arith.constant 9 : index
    %c0_339 = arith.constant 0 : index
    %311 = vector.load %arg35[%c9_338, %c0_339] : memref<26x128xbf16, #tpu.memory_space<vmem>>, vector<16x128xbf16>
    %c3_340 = arith.constant 3 : index
    %c0_341 = arith.constant 0 : index
    %c0_342 = arith.constant 0 : index
    %312 = vector.load %arg30[%c3_340, %c0_341, %c0_342] : memref<5x128x128xbf16, #tpu.memory_space<vmem>>, vector<1x128x128xbf16>
    %313 = vector.shape_cast %312 : vector<1x128x128xbf16> to vector<128x128xbf16>
    %cst_343 = arith.constant dense<0.000000e+00> : vector<16x128xf32>
    %314 = tpu.matmul %311, %313, %cst_343 {dimension_numbers = #tpu.dot_dimension_numbers<[1], [0], [0], [1], [0, 0, 1, 1], [], []>} : vector<16x128xbf16>, vector<128x128xbf16>, vector<16x128xf32> -> vector<16x128xf32>
    %315 = arith.addf %310, %314 : vector<16x128xf32>
    %c10_344 = arith.constant 10 : index
    %c0_345 = arith.constant 0 : index
    %316 = vector.load %arg35[%c10_344, %c0_345] : memref<26x128xbf16, #tpu.memory_space<vmem>>, vector<16x128xbf16>
    %c4_346 = arith.constant 4 : index
    %c0_347 = arith.constant 0 : index
    %c0_348 = arith.constant 0 : index
    %317 = vector.load %arg30[%c4_346, %c0_347, %c0_348] : memref<5x128x128xbf16, #tpu.memory_space<vmem>>, vector<1x128x128xbf16>
    %318 = vector.shape_cast %317 : vector<1x128x128xbf16> to vector<128x128xbf16>
    %cst_349 = arith.constant dense<0.000000e+00> : vector<16x128xf32>
    %319 = tpu.matmul %316, %318, %cst_349 {dimension_numbers = #tpu.dot_dimension_numbers<[1], [0], [0], [1], [0, 0, 1, 1], [], []>} : vector<16x128xbf16>, vector<128x128xbf16>, vector<16x128xf32> -> vector<16x128xf32>
    %320 = arith.addf %315, %319 : vector<16x128xf32>
    %c0_350 = arith.constant 0 : index
    %c0_351 = arith.constant 0 : index
    %321 = vector.load %arg31[%c0_350, %c0_351] : memref<1x128xf32, #tpu.memory_space<vmem>>, vector<1x128xf32>
    %322 = vector.broadcast %321 : vector<1x128xf32> to vector<16x128xf32>
    %323 = arith.addf %320, %322 : vector<16x128xf32>
    %cst_352 = arith.constant 0.000000e+00 : f32
    %324 = vector.broadcast %cst_352 : f32 to vector<16x128xf32>
    %325 = arith.maximumf %323, %324 : vector<16x128xf32>
    %326 = arith.truncf %325 : vector<16x128xf32> to vector<16x128xbf16>
    %c8_353 = arith.constant 8 : index
    %c0_354 = arith.constant 0 : index
    %327 = vector.load %arg35[%c8_353, %c0_354] : memref<26x128xbf16, #tpu.memory_space<vmem>>, vector<16x128xbf16>
    tpu.vector_store %arg35[%c8_353, %c0_354], %326 {strides = array<i32>} : memref<26x128xbf16, #tpu.memory_space<vmem>>, vector<16x128xbf16>,
    %c7_355 = arith.constant 7 : index
    %c0_356 = arith.constant 0 : index
    %328 = vector.load %arg35[%c7_355, %c0_356] : memref<26x128xbf16, #tpu.memory_space<vmem>>, vector<16x128xbf16>
    %c0_357 = arith.constant 0 : index
    %c0_358 = arith.constant 0 : index
    %c0_359 = arith.constant 0 : index
    %329 = vector.load %arg32[%c0_357, %c0_358, %c0_359] : memref<3x128x16xbf16, #tpu.memory_space<vmem>>, vector<1x128x16xbf16>
    %330 = vector.shape_cast %329 : vector<1x128x16xbf16> to vector<128x16xbf16>
    %cst_360 = arith.constant dense<0.000000e+00> : vector<16x16xf32>
    %331 = tpu.matmul %328, %330, %cst_360 {dimension_numbers = #tpu.dot_dimension_numbers<[1], [0], [0], [1], [0, 0, 1, 1], [], []>} : vector<16x128xbf16>, vector<128x16xbf16>, vector<16x16xf32> -> vector<16x16xf32>
    %c8_361 = arith.constant 8 : index
    %c0_362 = arith.constant 0 : index
    %332 = vector.load %arg35[%c8_361, %c0_362] : memref<26x128xbf16, #tpu.memory_space<vmem>>, vector<16x128xbf16>
    %c1_363 = arith.constant 1 : index
    %c0_364 = arith.constant 0 : index
    %c0_365 = arith.constant 0 : index
    %333 = vector.load %arg32[%c1_363, %c0_364, %c0_365] : memref<3x128x16xbf16, #tpu.memory_space<vmem>>, vector<1x128x16xbf16>
    %334 = vector.shape_cast %333 : vector<1x128x16xbf16> to vector<128x16xbf16>
    %cst_366 = arith.constant dense<0.000000e+00> : vector<16x16xf32>
    %335 = tpu.matmul %332, %334, %cst_366 {dimension_numbers = #tpu.dot_dimension_numbers<[1], [0], [0], [1], [0, 0, 1, 1], [], []>} : vector<16x128xbf16>, vector<128x16xbf16>, vector<16x16xf32> -> vector<16x16xf32>
    %336 = arith.addf %331, %335 : vector<16x16xf32>
    %c9_367 = arith.constant 9 : index
    %c0_368 = arith.constant 0 : index
    %337 = vector.load %arg35[%c9_367, %c0_368] : memref<26x128xbf16, #tpu.memory_space<vmem>>, vector<16x128xbf16>
    %c2_369 = arith.constant 2 : index
    %c0_370 = arith.constant 0 : index
    %c0_371 = arith.constant 0 : index
    %338 = vector.load %arg32[%c2_369, %c0_370, %c0_371] : memref<3x128x16xbf16, #tpu.memory_space<vmem>>, vector<1x128x16xbf16>
    %339 = vector.shape_cast %338 : vector<1x128x16xbf16> to vector<128x16xbf16>
    %cst_372 = arith.constant dense<0.000000e+00> : vector<16x16xf32>
    %340 = tpu.matmul %337, %339, %cst_372 {dimension_numbers = #tpu.dot_dimension_numbers<[1], [0], [0], [1], [0, 0, 1, 1], [], []>} : vector<16x128xbf16>, vector<128x16xbf16>, vector<16x16xf32> -> vector<16x16xf32>
    %341 = arith.addf %336, %340 : vector<16x16xf32>
    %c0_373 = arith.constant 0 : index
    %c0_374 = arith.constant 0 : index
    %342 = vector.load %arg33[%c0_373, %c0_374] : memref<1x16xf32, #tpu.memory_space<vmem>>, vector<1x16xf32>
    %343 = vector.broadcast %342 : vector<1x16xf32> to vector<16x16xf32>
    %344 = arith.addf %341, %343 : vector<16x16xf32>
    %c0_375 = arith.constant 0 : index
    %c48 = arith.constant 48 : index
    %345 = vector.load %arg36[%c0_375, %c48] : memref<16x64xf32, #tpu.memory_space<vmem>>, vector<16x16xf32>
    tpu.vector_store %arg36[%c0_375, %c48], %344 {strides = array<i32>} : memref<16x64xf32, #tpu.memory_space<vmem>>, vector<16x16xf32>,
    %c0_376 = arith.constant 0 : index
    %c0_377 = arith.constant 0 : index
    %346 = vector.load %arg4[%c0_376, %c0_377] : memref<32x16xf32, #tpu.memory_space<vmem>>, vector<32x16xf32>
    %c0_378 = arith.constant 0 : index
    %c0_379 = arith.constant 0 : index
    %347 = vector.load %arg36[%c0_378, %c0_379] : memref<16x64xf32, #tpu.memory_space<vmem>>, vector<16x64xf32>
    %cst_380 = arith.constant dense<0.000000e+00> : vector<32x64xf32>
    %348 = tpu.matmul %346, %347, %cst_380 {dimension_numbers = #tpu.dot_dimension_numbers<[1], [0], [0], [1], [0, 0, 1, 1], [], []>} : vector<32x16xf32>, vector<16x64xf32>, vector<32x64xf32> -> vector<32x64xf32>
    %c0_381 = arith.constant 0 : index
    %c0_382 = arith.constant 0 : index
    %349 = vector.load %arg5[%c0_381, %c0_382] : memref<64x128xf32, #tpu.memory_space<vmem>>, vector<64x128xf32>
    %cst_383 = arith.constant dense<0.000000e+00> : vector<32x128xf32>
    %350 = tpu.matmul %348, %349, %cst_383 {dimension_numbers = #tpu.dot_dimension_numbers<[1], [0], [0], [1], [0, 0, 1, 1], [], []>} : vector<32x64xf32>, vector<64x128xf32>, vector<32x128xf32> -> vector<32x128xf32>
    %c0_384 = arith.constant 0 : index
    %c0_385 = arith.constant 0 : index
    %c0_386 = arith.constant 0 : index
    %351 = vector.load %arg34[%c0_384, %c0_385, %c0_386] : memref<1x32x128xf32, #tpu.memory_space<vmem>>, vector<1x32x128xf32>
    %352 = vector.shape_cast %351 : vector<1x32x128xf32> to vector<32x128xf32>
    %353 = vector.shape_cast %350 : vector<32x128xf32> to vector<1x32x128xf32>
    tpu.vector_store %arg34[%c0_384, %c0_385, %c0_386], %353 {strides = array<i32>} : memref<1x32x128xf32, #tpu.memory_space<vmem>>, vector<1x32x128xf32>,
    return
  }
  func.func @transform_0(%arg0: i32) -> (i32, i32, i32) {
    %c0_i32 = arith.constant 0 : i32
    %c0_i32_0 = arith.constant 0 : i32
    %c0_i32_1 = arith.constant 0 : i32
    return %arg0, %c0_i32, %c0_i32_0 : i32, i32, i32
  }
  func.func @transform_1(%arg0: i32) -> (i32, i32, i32) {
    %c0_i32 = arith.constant 0 : i32
    %c0_i32_0 = arith.constant 0 : i32
    %c0_i32_1 = arith.constant 0 : i32
    return %arg0, %c0_i32, %c0_i32_0 : i32, i32, i32
  }
  func.func @transform_2(%arg0: i32) -> (i32, i32, i32) {
    %c0_i32 = arith.constant 0 : i32
    %c0_i32_0 = arith.constant 0 : i32
    %c0_i32_1 = arith.constant 0 : i32
    return %arg0, %c0_i32, %c0_i32_0 : i32, i32, i32
  }
  func.func @transform_3(%arg0: i32) -> (i32, i32) {
    %c0_i32 = arith.constant 0 : i32
    %c0_i32_0 = arith.constant 0 : i32
    %c0_i32_1 = arith.constant 0 : i32
    return %c0_i32, %c0_i32_0 : i32, i32
  }
  func.func @transform_4(%arg0: i32) -> (i32, i32) {
    %c0_i32 = arith.constant 0 : i32
    %c0_i32_0 = arith.constant 0 : i32
    %c0_i32_1 = arith.constant 0 : i32
    return %c0_i32, %c0_i32_0 : i32, i32
  }
  func.func @transform_5(%arg0: i32) -> (i32, i32, i32) {
    %c0_i32 = arith.constant 0 : i32
    %c0_i32_0 = arith.constant 0 : i32
    %c0_i32_1 = arith.constant 0 : i32
    %c0_i32_2 = arith.constant 0 : i32
    return %c0_i32, %c0_i32_0, %c0_i32_1 : i32, i32, i32
  }
  func.func @transform_6(%arg0: i32) -> (i32, i32) {
    %c0_i32 = arith.constant 0 : i32
    %c0_i32_0 = arith.constant 0 : i32
    %c0_i32_1 = arith.constant 0 : i32
    return %c0_i32, %c0_i32_0 : i32, i32
  }
  func.func @transform_7(%arg0: i32) -> (i32, i32, i32) {
    %c0_i32 = arith.constant 0 : i32
    %c0_i32_0 = arith.constant 0 : i32
    %c0_i32_1 = arith.constant 0 : i32
    %c0_i32_2 = arith.constant 0 : i32
    return %c0_i32, %c0_i32_0, %c0_i32_1 : i32, i32, i32
  }
  func.func @transform_8(%arg0: i32) -> (i32, i32) {
    %c0_i32 = arith.constant 0 : i32
    %c0_i32_0 = arith.constant 0 : i32
    %c0_i32_1 = arith.constant 0 : i32
    return %c0_i32, %c0_i32_0 : i32, i32
  }
  func.func @transform_9(%arg0: i32) -> (i32, i32, i32) {
    %c0_i32 = arith.constant 0 : i32
    %c0_i32_0 = arith.constant 0 : i32
    %c0_i32_1 = arith.constant 0 : i32
    %c0_i32_2 = arith.constant 0 : i32
    return %c0_i32, %c0_i32_0, %c0_i32_1 : i32, i32, i32
  }
  func.func @transform_10(%arg0: i32) -> (i32, i32) {
    %c0_i32 = arith.constant 0 : i32
    %c0_i32_0 = arith.constant 0 : i32
    %c0_i32_1 = arith.constant 0 : i32
    return %c0_i32, %c0_i32_0 : i32, i32
  }
  func.func @transform_11(%arg0: i32) -> (i32, i32, i32) {
    %c0_i32 = arith.constant 0 : i32
    %c0_i32_0 = arith.constant 0 : i32
    %c0_i32_1 = arith.constant 0 : i32
    %c0_i32_2 = arith.constant 0 : i32
    return %c0_i32, %c0_i32_0, %c0_i32_1 : i32, i32, i32
  }
  func.func @transform_12(%arg0: i32) -> (i32, i32) {
    %c0_i32 = arith.constant 0 : i32
    %c0_i32_0 = arith.constant 0 : i32
    %c0_i32_1 = arith.constant 0 : i32
    return %c0_i32, %c0_i32_0 : i32, i32
  }
  func.func @transform_13(%arg0: i32) -> (i32, i32, i32) {
    %c0_i32 = arith.constant 0 : i32
    %c0_i32_0 = arith.constant 0 : i32
    %c0_i32_1 = arith.constant 0 : i32
    %c0_i32_2 = arith.constant 0 : i32
    return %c0_i32, %c0_i32_0, %c0_i32_1 : i32, i32, i32
  }
  func.func @transform_14(%arg0: i32) -> (i32, i32) {
    %c0_i32 = arith.constant 0 : i32
    %c0_i32_0 = arith.constant 0 : i32
    %c0_i32_1 = arith.constant 0 : i32
    return %c0_i32, %c0_i32_0 : i32, i32
  }
  func.func @transform_15(%arg0: i32) -> (i32, i32, i32) {
    %c0_i32 = arith.constant 0 : i32
    %c0_i32_0 = arith.constant 0 : i32
    %c0_i32_1 = arith.constant 0 : i32
    %c0_i32_2 = arith.constant 0 : i32
    return %c0_i32, %c0_i32_0, %c0_i32_1 : i32, i32, i32
  }
  func.func @transform_16(%arg0: i32) -> (i32, i32) {
    %c0_i32 = arith.constant 0 : i32
    %c0_i32_0 = arith.constant 0 : i32
    %c0_i32_1 = arith.constant 0 : i32
    return %c0_i32, %c0_i32_0 : i32, i32
  }
  func.func @transform_17(%arg0: i32) -> (i32, i32, i32) {
    %c0_i32 = arith.constant 0 : i32
    %c0_i32_0 = arith.constant 0 : i32
    %c0_i32_1 = arith.constant 0 : i32
    %c0_i32_2 = arith.constant 0 : i32
    return %c0_i32, %c0_i32_0, %c0_i32_1 : i32, i32, i32
  }
  func.func @transform_18(%arg0: i32) -> (i32, i32) {
    %c0_i32 = arith.constant 0 : i32
    %c0_i32_0 = arith.constant 0 : i32
    %c0_i32_1 = arith.constant 0 : i32
    return %c0_i32, %c0_i32_0 : i32, i32
  }
  func.func @transform_19(%arg0: i32) -> (i32, i32, i32) {
    %c0_i32 = arith.constant 0 : i32
    %c0_i32_0 = arith.constant 0 : i32
    %c0_i32_1 = arith.constant 0 : i32
    %c0_i32_2 = arith.constant 0 : i32
    return %c0_i32, %c0_i32_0, %c0_i32_1 : i32, i32, i32
  }
  func.func @transform_20(%arg0: i32) -> (i32, i32) {
    %c0_i32 = arith.constant 0 : i32
    %c0_i32_0 = arith.constant 0 : i32
    %c0_i32_1 = arith.constant 0 : i32
    return %c0_i32, %c0_i32_0 : i32, i32
  }
  func.func @transform_21(%arg0: i32) -> (i32, i32, i32) {
    %c0_i32 = arith.constant 0 : i32
    %c0_i32_0 = arith.constant 0 : i32
    %c0_i32_1 = arith.constant 0 : i32
    %c0_i32_2 = arith.constant 0 : i32
    return %c0_i32, %c0_i32_0, %c0_i32_1 : i32, i32, i32
  }
  func.func @transform_22(%arg0: i32) -> (i32, i32) {
    %c0_i32 = arith.constant 0 : i32
    %c0_i32_0 = arith.constant 0 : i32
    %c0_i32_1 = arith.constant 0 : i32
    return %c0_i32, %c0_i32_0 : i32, i32
  }
  func.func @transform_23(%arg0: i32) -> (i32, i32, i32) {
    %c0_i32 = arith.constant 0 : i32
    %c0_i32_0 = arith.constant 0 : i32
    %c0_i32_1 = arith.constant 0 : i32
    %c0_i32_2 = arith.constant 0 : i32
    return %c0_i32, %c0_i32_0, %c0_i32_1 : i32, i32, i32
  }
  func.func @transform_24(%arg0: i32) -> (i32, i32) {
    %c0_i32 = arith.constant 0 : i32
    %c0_i32_0 = arith.constant 0 : i32
    %c0_i32_1 = arith.constant 0 : i32
    return %c0_i32, %c0_i32_0 : i32, i32
  }
  func.func @transform_25(%arg0: i32) -> (i32, i32, i32) {
    %c0_i32 = arith.constant 0 : i32
    %c0_i32_0 = arith.constant 0 : i32
    %c0_i32_1 = arith.constant 0 : i32
    %c0_i32_2 = arith.constant 0 : i32
    return %c0_i32, %c0_i32_0, %c0_i32_1 : i32, i32, i32
  }
  func.func @transform_26(%arg0: i32) -> (i32, i32) {
    %c0_i32 = arith.constant 0 : i32
    %c0_i32_0 = arith.constant 0 : i32
    %c0_i32_1 = arith.constant 0 : i32
    return %c0_i32, %c0_i32_0 : i32, i32
  }
  func.func @transform_27(%arg0: i32) -> (i32, i32, i32) {
    %c0_i32 = arith.constant 0 : i32
    %c0_i32_0 = arith.constant 0 : i32
    %c0_i32_1 = arith.constant 0 : i32
    %c0_i32_2 = arith.constant 0 : i32
    return %c0_i32, %c0_i32_0, %c0_i32_1 : i32, i32, i32
  }
  func.func @transform_28(%arg0: i32) -> (i32, i32) {
    %c0_i32 = arith.constant 0 : i32
    %c0_i32_0 = arith.constant 0 : i32
    %c0_i32_1 = arith.constant 0 : i32
    return %c0_i32, %c0_i32_0 : i32, i32
  }
  func.func @transform_29(%arg0: i32) -> (i32, i32, i32) {
    %c0_i32 = arith.constant 0 : i32
    %c0_i32_0 = arith.constant 0 : i32
    %c0_i32_1 = arith.constant 0 : i32
    %c0_i32_2 = arith.constant 0 : i32
    return %c0_i32, %c0_i32_0, %c0_i32_1 : i32, i32, i32
  }
  func.func @transform_30(%arg0: i32) -> (i32, i32) {
    %c0_i32 = arith.constant 0 : i32
    %c0_i32_0 = arith.constant 0 : i32
    %c0_i32_1 = arith.constant 0 : i32
    return %c0_i32, %c0_i32_0 : i32, i32
  }
  func.func @transform_31(%arg0: i32) -> (i32, i32, i32) {
    %c0_i32 = arith.constant 0 : i32
    %c0_i32_0 = arith.constant 0 : i32
    %c0_i32_1 = arith.constant 0 : i32
    %c0_i32_2 = arith.constant 0 : i32
    return %c0_i32, %c0_i32_0, %c0_i32_1 : i32, i32, i32
  }
  func.func @transform_32(%arg0: i32) -> (i32, i32) {
    %c0_i32 = arith.constant 0 : i32
    %c0_i32_0 = arith.constant 0 : i32
    %c0_i32_1 = arith.constant 0 : i32
    return %c0_i32, %c0_i32_0 : i32, i32
  }
  func.func @transform_33(%arg0: i32) -> (i32, i32, i32) {
    %c0_i32 = arith.constant 0 : i32
    %c0_i32_0 = arith.constant 0 : i32
    %c0_i32_1 = arith.constant 0 : i32
    return %arg0, %c0_i32, %c0_i32_0 : i32, i32, i32
  }
}

</mosaic_0001>

<bundles_post_ra>
// kernel: tpu_custom_call.1
= control target key start
LH: loop header
LB: loop body
LE: loop exit
PB: predicated region body
PF: predicated region fallthrough
CT: control target
= control target key end

     0   :  { %s12785_s6 = smov 1   ;;  %s12786_s10 = smov 2   ;;  %s14361_s0 = inlined_call_operand.smem [shape: u32[34], index: -1, kind: input, shape index: {}] }
   0x1   :  { %s12872_s5 = sld [smem:[%s14361_s0]]   ;;  %s12787_s14 = smov 3  }
   0x2   :  { %s12877_s9 = sld [smem:[%s14361_s0 + %s12785_s6]]   ;;  %s12788_s18 = smov 4  }
   0x3   :  { %s12882_s13 = sld [smem:[%s14361_s0 + %s12786_s10]]   ;;  %s12789_s22 = smov 5  }
   0x4   :  { %s12887_s17 = sld [smem:[%s14361_s0 + %s12787_s14]]   ;;  %s12790_s26 = smov 6  }
   0x5   :  { %s12892_s21 = sld [smem:[%s14361_s0 + %s12788_s18]]   ;;  %s12791_s30 = smov 7  }
   0x6   :  { %s12897_s25 = sld [smem:[%s14361_s0 + %s12789_s22]]   ;;  %s12792_s4 = smov 8  }
   0x7   :  { %14424 = sst [smem:[#allocation74_spill]] %s12872_s5  ;;  %s12793_s10 = smov 9  }
   0x8   :  { %14425 = sst [smem:[#allocation75_spill]] %s12877_s9  ;;  %s12794_s15 = smov 10  }
   0x9   :  { %14426 = sst [smem:[#allocation76_spill]] %s12882_s13  ;;  %s12795_s20 = smov 11  }
   0xa   :  { %14427 = sst [smem:[#allocation77_spill]] %s12887_s17  ;;  %s12797_s1 = smov 13  }
   0xb   :  { %14428 = sst [smem:[#allocation78_spill]] %s12892_s21  ;;  %s12798_s7 = smov 14  }
   0xc   :  { %14429 = sst [smem:[#allocation79_spill]] %s12897_s25  ;;  %s12800_s22 = smov 16  }
   0xd   :  { %s12902_s29 = sld [smem:[%s14361_s0 + %s12790_s26]]   ;;  %s12796_s26 = smov 12  }
   0xe   :  { %s12907_s3 = sld [smem:[%s14361_s0 + %s12791_s30]]   ;;  %s12801_s28 = smov 17  }
   0xf   :  { %s12912_s8 = sld [smem:[%s14361_s0 + %s12792_s4]]  }
  0x10   :  { %s12917_s14 = sld [smem:[%s14361_s0 + %s12793_s10]]  }
  0x11   :  { %s12922_s19 = sld [smem:[%s14361_s0 + %s12794_s15]]   ;;  %s12799_s15 = smov 15  }
  0x12   :  { %s12927_s24 = sld [smem:[%s14361_s0 + %s12795_s20]]  }
  0x13   :  { %14430 = sst [smem:[#allocation80_spill]] %s12902_s29 }
  0x14   :  { %14431 = sst [smem:[#allocation81_spill]] %s12907_s3 }
  0x15   :  { %14432 = sst [smem:[#allocation82_spill]] %s12912_s8 }
  0x16   :  { %14433 = sst [smem:[#allocation83_spill]] %s12917_s14 }
  0x17   :  { %14434 = sst [smem:[#allocation84_spill]] %s12922_s19 }
  0x18   :  { %14435 = sst [smem:[#allocation85_spill]] %s12927_s24 }
  0x19   :  { %s12932_s30 = sld [smem:[%s14361_s0 + %s12796_s26]]  }
  0x1a   :  { %s12937_s6 = sld [smem:[%s14361_s0 + %s12797_s1]]  }
  0x1b   :  { %s12942_s12 = sld [smem:[%s14361_s0 + %s12798_s7]]   ;;  %s12802_s7 = smov 18  }
  0x1c   :  { %s12947_s20 = sld [smem:[%s14361_s0 + %s12799_s15]]   ;;  %s12803_s15 = smov 19  }
  0x1d   :  { %s12952_s27 = sld [smem:[%s14361_s0 + %s12800_s22]]   ;;  %s12804_s22 = smov 20  }
  0x1e   :  { %s12957_s4 = sld [smem:[%s14361_s0 + %s12801_s28]]   ;;  %s12805_s28 = smov 21  }
  0x1f   :  { %14436 = sst [smem:[#allocation86_spill]] %s12932_s30 }
  0x20   :  { %14437 = sst [smem:[#allocation87_spill]] %s12937_s6 }
  0x21   :  { %14438 = sst [smem:[#allocation88_spill]] %s12942_s12 }
  0x22   :  { %14439 = sst [smem:[#allocation89_spill]] %s12947_s20 }
  0x23   :  { %14440 = sst [smem:[#allocation90_spill]] %s12952_s27 }
  0x24   :  { %14441 = sst [smem:[#allocation91_spill]] %s12957_s4 }
  0x25   :  { %s12962_s13 = sld [smem:[%s14361_s0 + %s12802_s7]]   ;;  %s12806_s7 = smov 22  }
  0x26   :  { %s12967_s5 = sld [smem:[%s14361_s0 + %s12803_s15]]   ;;  %s12807_s15 = smov 23  }
  0x27   :  { %s12972_s27 = sld [smem:[%s14361_s0 + %s12804_s22]]   ;;  %s12808_s22 = smov 24  }
  0x28   :  { %s12977_s12 = sld [smem:[%s14361_s0 + %s12805_s28]]   ;;  %s12809_s28 = smov 25  }
  0x29   :  { %s12987_s30 = sld [smem:[%s14361_s0 + %s12807_s15]]   ;;  %s12811_s15 = smov 27  }
  0x2a   :  { %s12997_s19 = sld [smem:[%s14361_s0 + %s12809_s28]]   ;;  %s12813_s28 = smov 29  }
  0x2b   :  { %14442 = sst [smem:[#allocation92_spill]] %s12962_s13 }
  0x2c   :  { %14443 = sst [smem:[#allocation93_spill]] %s12967_s5 }
  0x2d   :  { %14444 = sst [smem:[#allocation94_spill]] %s12972_s27 }
  0x2e   :  { %14445 = sst [smem:[#allocation95_spill]] %s12977_s12 }
  0x2f   :  { %s12982_s13 = sld [smem:[%s14361_s0 + %s12806_s7]]   ;;  %s12810_s7 = smov 26  }
  0x30   :  { %14447 = sst [smem:[#allocation97_spill]] %s12987_s30 }
  0x31   :  { %s12992_s27 = sld [smem:[%s14361_s0 + %s12808_s22]]   ;;  %s12812_s22 = smov 28  }
  0x32   :  { %14449 = sst [smem:[#allocation99_spill]] %s12997_s19 }
  0x33   :  { %s13007_s8 = sld [smem:[%s14361_s0 + %s12811_s15]]   ;;  %s12815_s15 = smov 31  }
  0x34   :  { %s13017_s29 = sld [smem:[%s14361_s0 + %s12813_s28]]   ;;  %s12817_s28 = smov 33  }
  0x35   :  { %14446 = sst [smem:[#allocation96_spill]] %s12982_s13 }
  0x36   :  { %s13002_s13 = sld [smem:[%s14361_s0 + %s12810_s7]]   ;;  %s12814_s7 = smov 30  }
  0x37   :  { %14448 = sst [smem:[#allocation98_spill]] %s12992_s27 }
  0x38   :  { %s13012_s27 = sld [smem:[%s14361_s0 + %s12812_s22]]   ;;  %s12816_s22 = smov 32  }
  0x39   :  { %14451 = sst [smem:[#allocation101_spill]] %s13007_s8 }
  0x3a   :  { %14453 = sst [smem:[#allocation103_spill]] %s13017_s29 }
  0x3b   :  { %s13027_s21 = sld [smem:[%s14361_s0 + %s12815_s15]]  }
  0x3c   :  { %14450 = sst [smem:[#allocation100_spill]] %s13002_s13 }
  0x3d   :  { %s13022_s13 = sld [smem:[%s14361_s0 + %s12814_s7]]  }
  0x3e   :  { %14452 = sst [smem:[#allocation102_spill]] %s13012_s27 }
  0x3f   :  { %s13032_s27 = sld [smem:[%s14361_s0 + %s12816_s22]]  }
  0x40   :  { %s13037_s9 = sld [smem:[%s14361_s0 + %s12817_s28]]  }
  0x41   :  { %14454 = sst [smem:[#allocation104_spill]] %s13027_s21 }
  0x46   :  { %14455 = sst [smem:[#allocation105_spill]] %s13037_s9 }
  0x47   :  { %72 = vsyncpa [#allocation5], 0 }
  0x48   :  { %74 = vsyncpa [#allocation5 + $0x1], 0 }
  0x49   :  { %75 = vsyncpa [#allocation8], 0 }
  0x4a   :  { %77 = vsyncpa [#allocation8 + $0x1], 0 }
  0x4b   :  { %78 = vsyncpa [#allocation11], 0 }
  0x4c   :  { %79 = vsyncpa [#allocation14], 0 }
  0x4d   :  { %80 = vsyncpa [#allocation17], 0 }
  0x4e   :  { %81 = vsyncpa [#allocation20], 0 }
  0x4f   :  { %82 = vsyncpa [#allocation23], 0 }
  0x50   :  { %83 = vsyncpa [#allocation26], 0 }
  0x51   :  { %84 = vsyncpa [#allocation29], 0 }
  0x52   :  { %85 = vsyncpa [#allocation32], 0 }
  0x53   :  { %86 = vsyncpa [#allocation35], 0 }
  0x54   :  { %87 = vsyncpa [#allocation38], 0 }
  0x55   :  { %88 = vsyncpa [#allocation41], 0 }
  0x56   :  { %89 = vsyncpa [#allocation44], 0 }
  0x57   :  { %90 = vsyncpa [#allocation47], 0 }
  0x58   :  { %91 = vsyncpa [#allocation50], 0 }
  0x59   :  { %92 = vsyncpa [#allocation53], 0 }
  0x5a   :  { %93 = vsyncpa [#allocation6], 0 }
  0x5b   :  { %95 = vsyncpa [#allocation6 + $0x1], 0  ;;  %s13039_s0 = smov 0   ;;  %s13041_s7 = smov 0  }
  0x5c   :  { %s13043_s10 = smov 0   ;;  %s13045_s11 = smov 0  }
  0x5d LB: > { %s14456_s30 = sld [smem:[#allocation97_spill]]  ;;  %s14457_s29 = sld [smem:[#allocation103_spill]]  ;;  %s12779_s10 = sphi %s13043_s10, %s14542_s10   ;;  %s12775_s7 = sphi %s13041_s7, %s14541_s7   ;;  %s12771_s0 = sphi %s13039_s0, %s14540_s0   ;;  %s12783_s11 = sphi %s13045_s11, %s14543_s11  }
  0x5e   : > { %s14458_s24 = sld [smem:[#allocation85_spill]]  ;;  %s14459_s21 = sld [smem:[#allocation104_spill]] }
  0x5f   : > { %s14460_s20 = sld [smem:[#allocation89_spill]]  ;;  %s14461_s19 = sld [smem:[#allocation99_spill]] }
  0x60   : > { %s14462_s14 = sld [smem:[#allocation83_spill]]  ;;  %s14463_s12 = sld [smem:[#allocation95_spill]] }
  0x61   : > { %s14464_s8 = sld [smem:[#allocation101_spill]]  ;;  %s14465_s6 = sld [smem:[#allocation87_spill]] }
  0x62   : > { %s14466_s5 = sld [smem:[#allocation93_spill]]  ;;  %s14467_s4 = sld [smem:[#allocation91_spill]] }
  0x63   : > { %s14468_s3 = sld [smem:[#allocation81_spill]]  ;;  %s14469_s25 = sld [smem:[#allocation79_spill]] }
  0x64   : > { %s14470_s17 = sld [smem:[#allocation77_spill]]  ;;  %s12818_s15 = smov [#allocation10]  }
  0x65   : > { %s852_s16 = sshll.u32 %s12818_s15, 4  ;;  %s13060_s18 = sadd.s32 4294967295, %s12783_s11   ;;  %s13065_s16 = int_to_ptr.vmem [resolvable:$true] %s852_s16 }
  0x66   : > { %p8686_p0 = scmp.ge.s32.totalorder %s12783_s11, 1  ;;  %p14379_p1 = scmp.eq.s32.totalorder %s13060_s18, 0 }
  0x67   : > { %p840_p2 = scmp.lt.s32.totalorder %s12783_s11, 3  ;;  %s12819_s23 = smov [#allocation13]  }
  0x68   : > { %s878_s26 = sshll.u32 %s12819_s23, 4  ;;  %s12820_s1 = smov [#allocation16]   ;;  %s13080_s26 = int_to_ptr.vmem [resolvable:$true] %s878_s26 }
  0x69   : > { %p13067_p3 = pnand %p8686_p0, %p840_p2  ;;  %s13082_s2 = sshll.u32 %s12820_s1, 4  ;;  %s903_s2 = int_to_ptr.vmem [resolvable:$true] %s13082_s2 }
  0x6a   : > { %s11723_s15 = scalar_lea.hbm %s14470_s17, 512 }
  0x6b   : > { %s14471_s22 = scalar_select %p13067_p3, 1, 0 }
  0x6c   : > { %p10975_p5 = pneg %p13067_p3  ;;  %p11724_p7 = scmp.ne.s32.totalorder %s14470_s17, %s11723_s15 }
  0x6d   : > { %14472 = sst [smem:[#allocation106_spill]] %s14471_s22  ;;  %p11730_p11 = scmp.lt.u32.totalorder %s11723_s15, %s14470_s17 }
  0x6e   : > { %p13076_p6 = pnand %p10975_p5, %p14379_p1 }
  0x70   : > { %s14473_s28 = scalar_select %p13076_p6, 1, 0 }
  0x71   : > { %p13088_p8 = pneg %p13076_p6 }
  0x73   : > { %s14474_s9 = scalar_select %p13088_p8, 1, 0 }
  0x74   : > { %p11726_p9 = pnand %p13088_p8, %p11724_p7 }
  0x76   : > { %p11727_p10 = pneg %p11726_p9 }
  0x78   : > { %p11732_p12 = pnand %p11730_p11, %p11727_p10 }
  0x7a   : > { %11735 = shalt.err (!%p11732_p12)
}
  0x7b   : > { %s11736_s23 = scalar_lea.vmem %s13065_s16, 512  ;;  %p11744_p5 = scmp.lt.s32.totalorder %s13065_s16, %s13065_s16 }
  0x7c   : > { %p11737_p13 = scmp.ne.s32.totalorder %s13065_s16, %s11736_s23  ;;  %p11745_p4 = scmp.lt.s32.totalorder %s11736_s23, %s11736_s23 }
  0x7e   : > { %p11739_p0 = pnand %p11737_p13, %p13088_p8  ;;  %p11746_p1 = por %p11745_p4, %p11744_p5 }
  0x80   : > { %p11740_p2 = pneg %p11739_p0 }
  0x82   : > { %p11747_p3 = pnand %p11746_p1, %p11740_p2 }
  0x84   : > { %11750 = shalt.err (!%p11747_p3)
}
  0x85   : > { %s14382_s1 = smov 128   ;;  %s14384_s15 = smov 8  }
  0x86   : > { %10978 = dma.hbm_to_vmem [thread:$0]  (!%p13076_p6), %s14470_s17, 512, %s13065_s16, [#allocation11], %s14382_s1, %s14382_s1, %s14384_s15  }
  0x87   : > { %s11751_s22 = scalar_lea.hbm %s14469_s25, 3072 }
  0x88   : > { %p11752_p7 = scmp.ne.s32.totalorder %s14469_s25, %s11751_s22  ;;  %p11758_p3 = scmp.lt.u32.totalorder %s11751_s22, %s14469_s25 }
  0x8a   : > { %p11754_p4 = pnand %p11752_p7, %p13088_p8 }
  0x8c   : > { %p11755_p1 = pneg %p11754_p4 }
  0x8e   : > { %p11760_p9 = pnand %p11758_p3, %p11755_p1 }
  0x90   : > { %11763 = shalt.err (!%p11760_p9)
}
  0x91   : > { %s11764_s23 = scalar_lea.vmem %s13080_s26, 3072  ;;  %p11772_p13 = scmp.lt.s32.totalorder %s13080_s26, %s13080_s26 }
  0x92   : > { %p11765_p10 = scmp.ne.s32.totalorder %s13080_s26, %s11764_s23  ;;  %p11773_p0 = scmp.lt.s32.totalorder %s11764_s23, %s11764_s23 }
  0x94   : > { %p11767_p11 = pnand %p11765_p10, %p13088_p8  ;;  %p11774_p2 = por %p11773_p0, %p11772_p13 }
  0x96   : > { %p11768_p12 = pneg %p11767_p11 }
  0x98   : > { %p11775_p5 = pnand %p11774_p2, %p11768_p12 }
  0x9a   : > { %11778 = shalt.err (!%p11775_p5)
}
  0x9b   : > { %s12823_s16 = smov 64   ;;  %s12824_s22 = smov 4  }
  0x9c   : > { %10984 = dma.hbm_to_vmem [thread:$0]  (!%p13076_p6), %s14469_s25, 3072, %s13080_s26, [#allocation14], %s12823_s16, %s12823_s16, %s12824_s22  }
  0x9d   : > { %s11779_s23 = scalar_lea.hbm %s14468_s3, 3072 }
  0x9e   : > { %p11780_p7 = scmp.ne.s32.totalorder %s14468_s3, %s11779_s23  ;;  %p11786_p3 = scmp.lt.u32.totalorder %s11779_s23, %s14468_s3 }
  0xa0   : > { %p11782_p4 = pnand %p11780_p7, %p13088_p8 }
  0xa2   : > { %p11783_p1 = pneg %p11782_p4 }
  0xa4   : > { %p11788_p9 = pnand %p11786_p3, %p11783_p1 }
  0xa6   : > { %11791 = shalt.err (!%p11788_p9)
}
  0xa7   : > { %s11792_s1 = scalar_lea.vmem %s903_s2, 3072  ;;  %p11800_p13 = scmp.lt.s32.totalorder %s903_s2, %s903_s2 }
  0xa8   : > { %p11793_p10 = scmp.ne.s32.totalorder %s903_s2, %s11792_s1  ;;  %p11801_p0 = scmp.lt.s32.totalorder %s11792_s1, %s11792_s1 }
  0xaa   : > { %p11795_p11 = pnand %p11793_p10, %p13088_p8  ;;  %p11802_p2 = por %p11801_p0, %p11800_p13 }
  0xac   : > { %p11796_p12 = pneg %p11795_p11 }
  0xae   : > { %p11803_p5 = pnand %p11802_p2, %p11796_p12 }
  0xb0   : > { %11806 = shalt.err (!%p11803_p5)
}
  0xb1   : > { %10990 = dma.hbm_to_vmem [thread:$0]  (!%p13076_p6), %s14468_s3, 3072, %s903_s2, [#allocation17], %s12823_s16, %s12823_s16, %s12824_s22  }
  0xb2   : > { %s12825_s26 = smov [#allocation19]   ;;  %s12826_s15 = smov [#allocation22]  }
  0xb3   : > { %s926_s23 = sshll.u32 %s12825_s26, 4  ;;  %s950_s17 = sshll.u32 %s12826_s15, 4  ;;  %s927_s23 = int_to_ptr.vmem [resolvable:$true] %s926_s23  ;;  %s951_s17 = int_to_ptr.vmem [resolvable:$true] %s950_s17 }
  0xb4   : > { %s11807_s1 = scalar_lea.hbm %s14462_s14, 3072 }
  0xb5   : > { %p11808_p7 = scmp.ne.s32.totalorder %s14462_s14, %s11807_s1  ;;  %p11814_p3 = scmp.lt.u32.totalorder %s11807_s1, %s14462_s14 }
  0xb7   : > { %p11810_p4 = pnand %p11808_p7, %p13088_p8 }
  0xb9   : > { %p11811_p1 = pneg %p11810_p4 }
  0xbb   : > { %p11816_p9 = pnand %p11814_p3, %p11811_p1 }
  0xbd   : > { %11819 = shalt.err (!%p11816_p9)
}
  0xbe   : > { %s11820_s25 = scalar_lea.vmem %s927_s23, 3072  ;;  %p11828_p13 = scmp.lt.s32.totalorder %s927_s23, %s927_s23 }
  0xbf   : > { %p11821_p10 = scmp.ne.s32.totalorder %s927_s23, %s11820_s25  ;;  %p11829_p0 = scmp.lt.s32.totalorder %s11820_s25, %s11820_s25 }
  0xc1   : > { %p11823_p11 = pnand %p11821_p10, %p13088_p8  ;;  %p11830_p2 = por %p11829_p0, %p11828_p13 }
  0xc3   : > { %p11824_p12 = pneg %p11823_p11 }
  0xc5   : > { %p11831_p5 = pnand %p11830_p2, %p11824_p12 }
  0xc7   : > { %11834 = shalt.err (!%p11831_p5)
}
  0xc8   : > { %10996 = dma.hbm_to_vmem [thread:$0]  (!%p13076_p6), %s14462_s14, 3072, %s927_s23, [#allocation20], %s12823_s16, %s12823_s16, %s12824_s22  }
  0xc9   : > { %s11835_s2 = scalar_lea.hbm %s14458_s24, 3072 }
  0xca   : > { %p11836_p7 = scmp.ne.s32.totalorder %s14458_s24, %s11835_s2  ;;  %p11842_p3 = scmp.lt.u32.totalorder %s11835_s2, %s14458_s24 }
  0xcc   : > { %p11838_p4 = pnand %p11836_p7, %p13088_p8 }
  0xce   : > { %p11839_p1 = pneg %p11838_p4 }
  0xd0   : > { %p11844_p9 = pnand %p11842_p3, %p11839_p1 }
  0xd2   : > { %11847 = shalt.err (!%p11844_p9)
}
  0xd3   : > { %s11848_s25 = scalar_lea.vmem %s951_s17, 3072  ;;  %p11856_p13 = scmp.lt.s32.totalorder %s951_s17, %s951_s17 }
  0xd4   : > { %p11849_p10 = scmp.ne.s32.totalorder %s951_s17, %s11848_s25  ;;  %p11857_p0 = scmp.lt.s32.totalorder %s11848_s25, %s11848_s25 }
  0xd6   : > { %p11851_p11 = pnand %p11849_p10, %p13088_p8  ;;  %p11858_p2 = por %p11857_p0, %p11856_p13 }
  0xd8   : > { %p11852_p12 = pneg %p11851_p11 }
  0xda   : > { %p11859_p5 = pnand %p11858_p2, %p11852_p12 }
  0xdc   : > { %11862 = shalt.err (!%p11859_p5)
}
  0xdd   : > { %11002 = dma.hbm_to_vmem [thread:$0]  (!%p13076_p6), %s14458_s24, 3072, %s951_s17, [#allocation23], %s12823_s16, %s12823_s16, %s12824_s22  }
  0xde   : > { %s12827_s15 = smov [#allocation25]   ;;  %s12828_s23 = smov [#allocation28]  }
  0xdf   : > { %s974_s26 = sshll.u32 %s12827_s15, 4  ;;  %s998_s1 = sshll.u32 %s12828_s23, 4  ;;  %s975_s26 = int_to_ptr.vmem [resolvable:$true] %s974_s26  ;;  %s999_s1 = int_to_ptr.vmem [resolvable:$true] %s998_s1 }
  0xe0   : > { %s11863_s2 = scalar_lea.hbm %s14465_s6, 3072 }
  0xe1   : > { %p11864_p7 = scmp.ne.s32.totalorder %s14465_s6, %s11863_s2  ;;  %p11870_p3 = scmp.lt.u32.totalorder %s11863_s2, %s14465_s6 }
  0xe3   : > { %p11866_p4 = pnand %p11864_p7, %p13088_p8 }
  0xe5   : > { %p11867_p1 = pneg %p11866_p4 }
  0xe7   : > { %p11872_p9 = pnand %p11870_p3, %p11867_p1 }
  0xe9   : > { %11875 = shalt.err (!%p11872_p9)
}
  0xea   : > { %s11876_s25 = scalar_lea.vmem %s975_s26, 3072  ;;  %p11884_p13 = scmp.lt.s32.totalorder %s975_s26, %s975_s26 }
  0xeb   : > { %p11877_p10 = scmp.ne.s32.totalorder %s975_s26, %s11876_s25  ;;  %p11885_p0 = scmp.lt.s32.totalorder %s11876_s25, %s11876_s25 }
  0xed   : > { %p11879_p11 = pnand %p11877_p10, %p13088_p8  ;;  %p11886_p2 = por %p11885_p0, %p11884_p13 }
  0xef   : > { %p11880_p12 = pneg %p11879_p11 }
  0xf1   : > { %p11887_p5 = pnand %p11886_p2, %p11880_p12 }
  0xf3   : > { %11890 = shalt.err (!%p11887_p5)
}
  0xf4   : > { %11008 = dma.hbm_to_vmem [thread:$0]  (!%p13076_p6), %s14465_s6, 3072, %s975_s26, [#allocation26], %s12823_s16, %s12823_s16, %s12824_s22  }
  0xf5   : > { %s11891_s17 = scalar_lea.hbm %s14460_s20, 3072 }
  0xf6   : > { %p11892_p7 = scmp.ne.s32.totalorder %s14460_s20, %s11891_s17  ;;  %p11898_p3 = scmp.lt.u32.totalorder %s11891_s17, %s14460_s20 }
  0xf8   : > { %p11894_p4 = pnand %p11892_p7, %p13088_p8 }
  0xfa   : > { %p11895_p1 = pneg %p11894_p4 }
  0xfc   : > { %p11900_p9 = pnand %p11898_p3, %p11895_p1 }
  0xfe   : > { %11903 = shalt.err (!%p11900_p9)
}
  0xff   : > { %s11904_s15 = scalar_lea.vmem %s999_s1, 3072  ;;  %p11912_p13 = scmp.lt.s32.totalorder %s999_s1, %s999_s1 }
 0x100   : > { %p11905_p10 = scmp.ne.s32.totalorder %s999_s1, %s11904_s15  ;;  %p11913_p0 = scmp.lt.s32.totalorder %s11904_s15, %s11904_s15 }
 0x102   : > { %p11907_p11 = pnand %p11905_p10, %p13088_p8  ;;  %p11914_p2 = por %p11913_p0, %p11912_p13 }
 0x104   : > { %p11908_p12 = pneg %p11907_p11 }
 0x106   : > { %p11915_p5 = pnand %p11914_p2, %p11908_p12 }
 0x108   : > { %11918 = shalt.err (!%p11915_p5)
}
 0x109   : > { %11014 = dma.hbm_to_vmem [thread:$0]  (!%p13076_p6), %s14460_s20, 3072, %s999_s1, [#allocation29], %s12823_s16, %s12823_s16, %s12824_s22  }
 0x10a   : > { %s12829_s26 = smov [#allocation31]   ;;  %s12830_s2 = smov [#allocation34]  }
 0x10b   : > { %s1022_s23 = sshll.u32 %s12829_s26, 4  ;;  %s1046_s25 = sshll.u32 %s12830_s2, 4  ;;  %s1023_s23 = int_to_ptr.vmem [resolvable:$true] %s1022_s23  ;;  %s1047_s25 = int_to_ptr.vmem [resolvable:$true] %s1046_s25 }
 0x10c   : > { %s11919_s17 = scalar_lea.hbm %s14467_s4, 3072 }
 0x10d   : > { %p11920_p7 = scmp.ne.s32.totalorder %s14467_s4, %s11919_s17  ;;  %p11926_p3 = scmp.lt.u32.totalorder %s11919_s17, %s14467_s4 }
 0x10f   : > { %p11922_p4 = pnand %p11920_p7, %p13088_p8 }
 0x111   : > { %p11923_p1 = pneg %p11922_p4 }
 0x113   : > { %p11928_p9 = pnand %p11926_p3, %p11923_p1 }
 0x115   : > { %11931 = shalt.err (!%p11928_p9)
}
 0x116   : > { %s11932_s15 = scalar_lea.vmem %s1023_s23, 3072  ;;  %p11940_p13 = scmp.lt.s32.totalorder %s1023_s23, %s1023_s23 }
 0x117   : > { %p11933_p10 = scmp.ne.s32.totalorder %s1023_s23, %s11932_s15  ;;  %p11941_p0 = scmp.lt.s32.totalorder %s11932_s15, %s11932_s15 }
 0x119   : > { %p11935_p11 = pnand %p11933_p10, %p13088_p8  ;;  %p11942_p2 = por %p11941_p0, %p11940_p13 }
 0x11b   : > { %p11936_p12 = pneg %p11935_p11 }
 0x11d   : > { %p11943_p5 = pnand %p11942_p2, %p11936_p12 }
 0x11f   : > { %11946 = shalt.err (!%p11943_p5)
}
 0x120   : > { %11020 = dma.hbm_to_vmem [thread:$0]  (!%p13076_p6), %s14467_s4, 3072, %s1023_s23, [#allocation32], %s12823_s16, %s12823_s16, %s12824_s22  }
 0x121   : > { %s11947_s1 = scalar_lea.hbm %s14466_s5, 3072 }
 0x122   : > { %p11948_p7 = scmp.ne.s32.totalorder %s14466_s5, %s11947_s1  ;;  %p11954_p3 = scmp.lt.u32.totalorder %s11947_s1, %s14466_s5 }
 0x124   : > { %p11950_p4 = pnand %p11948_p7, %p13088_p8 }
 0x126   : > { %p11951_p1 = pneg %p11950_p4 }
 0x128   : > { %p11956_p9 = pnand %p11954_p3, %p11951_p1 }
 0x12a   : > { %11959 = shalt.err (!%p11956_p9)
}
 0x12b   : > { %s11960_s26 = scalar_lea.vmem %s1047_s25, 3072  ;;  %p11968_p13 = scmp.lt.s32.totalorder %s1047_s25, %s1047_s25 }
 0x12c   : > { %p11961_p10 = scmp.ne.s32.totalorder %s1047_s25, %s11960_s26  ;;  %p11969_p0 = scmp.lt.s32.totalorder %s11960_s26, %s11960_s26 }
 0x12e   : > { %p11963_p11 = pnand %p11961_p10, %p13088_p8  ;;  %p11970_p2 = por %p11969_p0, %p11968_p13 }
 0x130   : > { %p11964_p12 = pneg %p11963_p11 }
 0x132   : > { %p11971_p5 = pnand %p11970_p2, %p11964_p12 }
 0x134   : > { %11974 = shalt.err (!%p11971_p5)
}
 0x135   : > { %11026 = dma.hbm_to_vmem [thread:$0]  (!%p13076_p6), %s14466_s5, 3072, %s1047_s25, [#allocation35], %s12823_s16, %s12823_s16, %s12824_s22  }
 0x136   : > { %s12831_s23 = smov [#allocation37]   ;;  %s12832_s17 = smov [#allocation40]  }
 0x137   : > { %s1070_s2 = sshll.u32 %s12831_s23, 4  ;;  %s1094_s15 = sshll.u32 %s12832_s17, 4  ;;  %s1071_s2 = int_to_ptr.vmem [resolvable:$true] %s1070_s2  ;;  %s1095_s15 = int_to_ptr.vmem [resolvable:$true] %s1094_s15 }
 0x138   : > { %s11975_s1 = scalar_lea.hbm %s14463_s12, 5120 }
 0x139   : > { %p11976_p7 = scmp.ne.s32.totalorder %s14463_s12, %s11975_s1  ;;  %p11982_p3 = scmp.lt.u32.totalorder %s11975_s1, %s14463_s12 }
 0x13b   : > { %p11978_p4 = pnand %p11976_p7, %p13088_p8 }
 0x13d   : > { %p11979_p1 = pneg %p11978_p4 }
 0x13f   : > { %p11984_p9 = pnand %p11982_p3, %p11979_p1 }
 0x141   : > { %11987 = shalt.err (!%p11984_p9)
}
 0x142   : > { %s11988_s26 = scalar_lea.vmem %s1071_s2, 5120  ;;  %p11996_p13 = scmp.lt.s32.totalorder %s1071_s2, %s1071_s2 }
 0x143   : > { %p11989_p10 = scmp.ne.s32.totalorder %s1071_s2, %s11988_s26  ;;  %p11997_p0 = scmp.lt.s32.totalorder %s11988_s26, %s11988_s26 }
 0x145   : > { %p11991_p11 = pnand %p11989_p10, %p13088_p8  ;;  %p11998_p2 = por %p11997_p0, %p11996_p13 }
 0x147   : > { %p11992_p12 = pneg %p11991_p11 }
 0x149   : > { %p11999_p5 = pnand %p11998_p2, %p11992_p12 }
 0x14b   : > { %12002 = shalt.err (!%p11999_p5)
}
 0x14c   : > { %11032 = dma.hbm_to_vmem [thread:$0]  (!%p13076_p6), %s14463_s12, 5120, %s1071_s2, [#allocation38], %s12823_s16, %s12823_s16, %s12824_s22  }
 0x14d   : > { %s12003_s25 = scalar_lea.hbm %s14456_s30, 5120 }
 0x14e   : > { %p12004_p7 = scmp.ne.s32.totalorder %s14456_s30, %s12003_s25  ;;  %p12010_p3 = scmp.lt.u32.totalorder %s12003_s25, %s14456_s30 }
 0x150   : > { %p12006_p4 = pnand %p12004_p7, %p13088_p8 }
 0x152   : > { %p12007_p1 = pneg %p12006_p4 }
 0x154   : > { %p12012_p9 = pnand %p12010_p3, %p12007_p1 }
 0x156   : > { %12015 = shalt.err (!%p12012_p9)
}
 0x157   : > { %s12016_s23 = scalar_lea.vmem %s1095_s15, 5120  ;;  %p12024_p13 = scmp.lt.s32.totalorder %s1095_s15, %s1095_s15 }
 0x158   : > { %p12017_p10 = scmp.ne.s32.totalorder %s1095_s15, %s12016_s23  ;;  %p12025_p0 = scmp.lt.s32.totalorder %s12016_s23, %s12016_s23 }
 0x15a   : > { %p12019_p11 = pnand %p12017_p10, %p13088_p8  ;;  %p12026_p2 = por %p12025_p0, %p12024_p13 }
 0x15c   : > { %p12020_p12 = pneg %p12019_p11 }
 0x15e   : > { %p12027_p5 = pnand %p12026_p2, %p12020_p12 }
 0x160   : > { %12030 = shalt.err (!%p12027_p5)
}
 0x161   : > { %11038 = dma.hbm_to_vmem [thread:$0]  (!%p13076_p6), %s14456_s30, 5120, %s1095_s15, [#allocation41], %s12823_s16, %s12823_s16, %s12824_s22  }
 0x162   : > { %s12833_s2 = smov [#allocation43]   ;;  %s12834_s1 = smov [#allocation46]  }
 0x163   : > { %s1118_s17 = sshll.u32 %s12833_s2, 4  ;;  %s1142_s26 = sshll.u32 %s12834_s1, 4  ;;  %s1119_s17 = int_to_ptr.vmem [resolvable:$true] %s1118_s17  ;;  %s1143_s26 = int_to_ptr.vmem [resolvable:$true] %s1142_s26 }
 0x164   : > { %s12031_s25 = scalar_lea.hbm %s14461_s19, 5120 }
 0x165   : > { %p12032_p7 = scmp.ne.s32.totalorder %s14461_s19, %s12031_s25  ;;  %p12038_p3 = scmp.lt.u32.totalorder %s12031_s25, %s14461_s19 }
 0x167   : > { %p12034_p4 = pnand %p12032_p7, %p13088_p8 }
 0x169   : > { %p12035_p1 = pneg %p12034_p4 }
 0x16b   : > { %p12040_p9 = pnand %p12038_p3, %p12035_p1 }
 0x16d   : > { %12043 = shalt.err (!%p12040_p9)
}
 0x16e   : > { %s12044_s23 = scalar_lea.vmem %s1119_s17, 5120  ;;  %p12052_p13 = scmp.lt.s32.totalorder %s1119_s17, %s1119_s17 }
 0x16f   : > { %p12045_p10 = scmp.ne.s32.totalorder %s1119_s17, %s12044_s23  ;;  %p12053_p0 = scmp.lt.s32.totalorder %s12044_s23, %s12044_s23 }
 0x171   : > { %p12047_p11 = pnand %p12045_p10, %p13088_p8  ;;  %p12054_p2 = por %p12053_p0, %p12052_p13 }
 0x173   : > { %p12048_p12 = pneg %p12047_p11 }
 0x175   : > { %p12055_p5 = pnand %p12054_p2, %p12048_p12 }
 0x177   : > { %12058 = shalt.err (!%p12055_p5)
}
 0x178   : > { %11044 = dma.hbm_to_vmem [thread:$0]  (!%p13076_p6), %s14461_s19, 5120, %s1119_s17, [#allocation44], %s12823_s16, %s12823_s16, %s12824_s22  }
 0x179   : > { %s12059_s15 = scalar_lea.hbm %s14464_s8, 3072 }
 0x17a   : > { %p12060_p7 = scmp.ne.s32.totalorder %s14464_s8, %s12059_s15  ;;  %p12066_p3 = scmp.lt.u32.totalorder %s12059_s15, %s14464_s8 }
 0x17c   : > { %p12062_p4 = pnand %p12060_p7, %p13088_p8 }
 0x17e   : > { %p12063_p1 = pneg %p12062_p4 }
 0x180   : > { %p12068_p9 = pnand %p12066_p3, %p12063_p1 }
 0x182   : > { %12071 = shalt.err (!%p12068_p9)
}
 0x183   : > { %s12072_s2 = scalar_lea.vmem %s1143_s26, 3072  ;;  %p12080_p13 = scmp.lt.s32.totalorder %s1143_s26, %s1143_s26 }
 0x184   : > { %p12073_p10 = scmp.ne.s32.totalorder %s1143_s26, %s12072_s2  ;;  %p12081_p0 = scmp.lt.s32.totalorder %s12072_s2, %s12072_s2 }
 0x186   : > { %p12075_p11 = pnand %p12073_p10, %p13088_p8  ;;  %p12082_p2 = por %p12081_p0, %p12080_p13 }
 0x188   : > { %p12076_p12 = pneg %p12075_p11 }
 0x18a   : > { %p12083_p5 = pnand %p12082_p2, %p12076_p12 }
 0x18c   : > { %12086 = shalt.err (!%p12083_p5)
}
 0x18d   : > { %11050 = dma.hbm_to_vmem [thread:$0]  (!%p13076_p6), %s14464_s8, 3072, %s1143_s26, [#allocation47], %s12823_s16, %s12823_s16, %s12824_s22  }
 0x18e   : > { %s12835_s17 = smov [#allocation49]   ;;  %s12836_s25 = smov [#allocation52]  }
 0x18f   : > { %s1166_s1 = sshll.u32 %s12835_s17, 4  ;;  %s1190_s23 = sshll.u32 %s12836_s25, 4  ;;  %s1167_s1 = int_to_ptr.vmem [resolvable:$true] %s1166_s1  ;;  %s1191_s23 = int_to_ptr.vmem [resolvable:$true] %s1190_s23 }
 0x190   : > { %s12087_s15 = scalar_lea.hbm %s14457_s29, 5120 }
 0x191   : > { %p12088_p7 = scmp.ne.s32.totalorder %s14457_s29, %s12087_s15  ;;  %p12094_p3 = scmp.lt.u32.totalorder %s12087_s15, %s14457_s29 }
 0x193   : > { %p12090_p4 = pnand %p12088_p7, %p13088_p8 }
 0x195   : > { %p12091_p1 = pneg %p12090_p4 }
 0x197   : > { %p12096_p9 = pnand %p12094_p3, %p12091_p1 }
 0x199   : > { %12099 = shalt.err (!%p12096_p9)
}
 0x19a   : > { %s12100_s2 = scalar_lea.vmem %s1167_s1, 5120  ;;  %p12108_p13 = scmp.lt.s32.totalorder %s1167_s1, %s1167_s1 }
 0x19b   : > { %p12101_p10 = scmp.ne.s32.totalorder %s1167_s1, %s12100_s2  ;;  %p12109_p0 = scmp.lt.s32.totalorder %s12100_s2, %s12100_s2 }
 0x19d   : > { %p12103_p11 = pnand %p12101_p10, %p13088_p8  ;;  %p12110_p2 = por %p12109_p0, %p12108_p13 }
 0x19f   : > { %p12104_p12 = pneg %p12103_p11 }
 0x1a1   : > { %p12111_p5 = pnand %p12110_p2, %p12104_p12 }
 0x1a3   : > { %12114 = shalt.err (!%p12111_p5)
}
 0x1a4   : > { %11056 = dma.hbm_to_vmem [thread:$0]  (!%p13076_p6), %s14457_s29, 5120, %s1167_s1, [#allocation50], %s12823_s16, %s12823_s16, %s12824_s22  }
 0x1a5   : > { %s12115_s26 = scalar_lea.hbm %s14459_s21, 3072 }
 0x1a6   : > { %p12116_p7 = scmp.ne.s32.totalorder %s14459_s21, %s12115_s26  ;;  %p12122_p3 = scmp.lt.u32.totalorder %s12115_s26, %s14459_s21 }
 0x1a8   : > { %p12118_p4 = pnand %p12116_p7, %p13088_p8 }
 0x1aa   : > { %p12119_p1 = pneg %p12118_p4 }
 0x1ac   : > { %p12124_p9 = pnand %p12122_p3, %p12119_p1 }
 0x1ae   : > { %12127 = shalt.err (!%p12124_p9)
}
 0x1af   : > { %s12128_s17 = scalar_lea.vmem %s1191_s23, 3072  ;;  %p12136_p13 = scmp.lt.s32.totalorder %s1191_s23, %s1191_s23 }
 0x1b0   : > { %p12129_p10 = scmp.ne.s32.totalorder %s1191_s23, %s12128_s17  ;;  %p12137_p0 = scmp.lt.s32.totalorder %s12128_s17, %s12128_s17 }
 0x1b2   : > { %p12131_p11 = pnand %p12129_p10, %p13088_p8  ;;  %p12138_p2 = por %p12137_p0, %p12136_p13 }
 0x1b4   : > { %p12132_p12 = pneg %p12131_p11 }
 0x1b6   : > { %p12139_p5 = pnand %p12138_p2, %p12132_p12 }
 0x1b8   : > { %12142 = shalt.err (!%p12139_p5)
}
 0x1b9   : > { %11062 = dma.hbm_to_vmem [thread:$0]  (!%p13076_p6), %s14459_s21, 3072, %s1191_s23, [#allocation53], %s12823_s16, %s12823_s16, %s12824_s22  }
 0x1ba   : > { %s8685_s1 = sadd.s32 4294967294, %s12783_s11   ;;  %s13298_s25 = sadd.s32 1, %s12783_s11  }
 0x1bb   : > { %s108_s15 = sadd.s32 1, %s12779_s10  ;;  %s105_s2 = ssub.s32 %s12783_s11, %s13298_s25 }
 0x1bc   : > { %p115_p7 = scmp.ne.s32.totalorder %s12779_s10, %s12775_s7  ;;  %p106_p4 = scmp.eq.s32.totalorder %s105_s2, 0 }
 0x1bd   : > { %s14475_s26 = sld [smem:[#allocation75_spill]]  ;;  %p116_p1 = scmp.eq.s32.totalorder %s12783_s11, 0 }
 0x1be   : > { %p121_p3 = scmp.ne.s32.totalorder %s12775_s7, %s12771_s0  ;;  %p827_p9 = scmp.eq.s32.totalorder %s13060_s18, 1 }
 0x1bf   : > { %s13310_s17 = scalar_select %p106_p4, %s12779_s10, %s108_s15  }
 0x1c0   : > { %p117_p10 = por %p116_p1, %p115_p7  ;;  %p14476_p11 = scmp.eq.s32.totalorder %s13060_s18, 0 }
 0x1c1   : > { %p13318_p13 = por %p827_p9, %p115_p7  ;;  %p833_p0 = scmp.eq.s32.totalorder %s8685_s1, 1 }
 0x1c2   : > { %p13314_p12 = por %p14476_p11, %p121_p3  ;;  %p11110_p2 = scmp.lt.s32.totalorder %s12783_s11, 2 }
 0x1c3   : > { %s14478_s22 = scalar_select %p13318_p13, 1, 0 }
 0x1c4   : > { %s14477_s16 = scalar_select %p13314_p12, 1, 0 }
 0x1c5   : > { %s14393_s23 = sand.u32 1, %s12779_s10   ;;  %p13324_p5 = por %p833_p0, %p121_p3 }
 0x1c6   : > { %s13330_s15 = sshll.u32 %s14393_s23, 4  ;;  %s13333_s3 = sshll.u32 %s12783_s11, 8 }
 0x1c7   : > { %s14479_s2 = scalar_select %p13324_p5, 1, 0 }
 0x1c8   : > { %p13335_p7 = pnand %p11110_p2, %p117_p10  ;;  %s1236_s1 = sand.u32 1, %s12783_s11  }
 0x1c9   : > { %s13342_s5 = scalar_lea.hbm %s14475_s26, %s13333_s3  ;;  %s1240_s6 = scalar_lea.vmem [#allocation7], %s13330_s15 }
 0x1ca   : > { %s14480_s4 = scalar_select %p13335_p7, 1, 0 }
 0x1cb   : > { %s1247_s8 = sshll.u32 %s1240_s6, 4  ;;  %s13347_s23 = scalar_lea.sflag [#allocation8], %s1236_s1  ;;  %s13345_s8 = int_to_ptr.vmem [resolvable:$true] %s1247_s8 }
 0x1cc   : > { %s12143_s12 = scalar_lea.hbm %s13342_s5, 256  ;;  %p13353_p1 = pneg %p13335_p7 }
 0x1cd   : > { %p12144_p4 = scmp.ne.s32.totalorder %s13342_s5, %s12143_s12  ;;  %s12148_s19 = scalar_lea.hbm %s14475_s26, 512 }
 0x1ce   : > { %s14481_s14 = scalar_select %p13353_p1, 1, 0 }
 0x1cf   : > { %p12146_p3 = pnand %p13353_p1, %p12144_p4  ;;  %p12149_p10 = scmp.lt.u32.totalorder %s13342_s5, %s14475_s26 }
 0x1d0   : > { %p12150_p11 = scmp.lt.u32.totalorder %s12148_s19, %s12143_s12  ;;  %p12152_p2 = scmp.lt.u32.totalorder %s12143_s12, %s13342_s5 }
 0x1d1   : > { %p12147_p9 = pneg %p12146_p3 }
 0x1d2   : > { %p12151_p0 = por %p12150_p11, %p12149_p10 }
 0x1d4   : > { %p12153_p5 = por %p12152_p2, %p12151_p0 }
 0x1d6   : > { %p12154_p13 = pnand %p12153_p5, %p12147_p9 }
 0x1d8   : > { %12157 = shalt.err (!%p12154_p13)
}
 0x1d9   : > { %s12158_s6 = scalar_lea.vmem %s13345_s8, 256  ;;  %s12837_s1 = smov [#allocation7]  }
 0x1da   : > { %p12159_p12 = scmp.ne.s32.totalorder %s13345_s8, %s12158_s6  ;;  %s12163_s20 = sshll.u32 %s12837_s1, 4  ;;  %s12164_s20 = int_to_ptr.vmem [resolvable:$false] %s12163_s20 }
 0x1db   : > { %s12165_s21 = scalar_lea.vmem %s12164_s20, 512  ;;  %p12166_p4 = scmp.lt.s32.totalorder %s13345_s8, %s12164_s20 }
 0x1dc   : > { %p12161_p6 = pnand %p12159_p12, %p13353_p1  ;;  %p12167_p3 = scmp.lt.s32.totalorder %s12165_s21, %s12158_s6 }
 0x1de   : > { %p12162_p8 = pneg %p12161_p6  ;;  %p12168_p10 = por %p12167_p3, %p12166_p4 }
 0x1e0   : > { %p12169_p11 = pnand %p12168_p10, %p12162_p8 }
 0x1e2   : > { %12172 = shalt.err (!%p12169_p11)
}
 0x1e3   : > { %s14482_s19 = smov 8   ;;  %s14483_s12 = smov 128  }
 0x1e4   : > { %s14484_s24 = sld [smem:[#allocation78_spill]]  ;;  %s12838_s1 = smov [#allocation12]  }
 0x1e5   : > { %11072 = dma.hbm_to_vmem [thread:$0]  (!%p13335_p7), %s13342_s5, 256, %s13345_s8, %s13347_s23, %s14483_s12, %s14483_s12, %s14482_s19  }
 0x1e6   : > { %s865_s26 = sshll.u32 %s12838_s1, 4  ;;  %s12839_s21 = smov [#allocation15]   ;;  %s866_s26 = int_to_ptr.vmem [resolvable:$true] %s865_s26 }
 0x1e7   : > { %s892_s20 = sshll.u32 %s12839_s21, 4  ;;  %p14485_p8 = scmp.ne.s32.totalorder %s14474_s9, 0  ;;  %s893_s20 = int_to_ptr.vmem [resolvable:$true] %s892_s20 }
 0x1ea   : > { %s12173_s6 = scalar_lea.hbm %s14484_s24, 1024 }
 0x1eb   : > { %p12174_p6 = scmp.ne.s32.totalorder %s14484_s24, %s12173_s6  ;;  %p12180_p5 = scmp.lt.u32.totalorder %s12173_s6, %s14484_s24 }
 0x1ed   : > { %p12176_p12 = pnand %p12174_p6, %p14485_p8 }
 0x1ef   : > { %p12177_p13 = pneg %p12176_p12 }
 0x1f1   : > { %p12182_p9 = pnand %p12180_p5, %p12177_p13 }
 0x1f3   : > { %12185 = shalt.err (!%p12182_p9)
}
 0x1f4   : > { %s12186_s29 = scalar_lea.vmem %s866_s26, 1024  ;;  %p12194_p3 = scmp.lt.s32.totalorder %s866_s26, %s866_s26 }
 0x1f5   : > { %p12187_p0 = scmp.ne.s32.totalorder %s866_s26, %s12186_s29  ;;  %p12195_p10 = scmp.lt.s32.totalorder %s12186_s29, %s12186_s29 }
 0x1f7   : > { %p12189_p2 = pnand %p12187_p0, %p14485_p8  ;;  %p12196_p11 = por %p12195_p10, %p12194_p3 }
 0x1f9   : > { %p12190_p4 = pneg %p12189_p2 }
 0x1fb   : > { %p12197_p7 = pnand %p12196_p11, %p12190_p4 }
 0x1fd   : > { %12200 = shalt.err (!%p12197_p7)
}
 0x1fe   : > { %p14486_p1 = scmp.ne.s32.totalorder %s14473_s28, 0  ;;  %s14487_s5 = sld [smem:[#allocation80_spill]] }
 0x200   : > { %10981 = dma.hbm_to_vmem [thread:$0]  (!%p14486_p1), %s14484_s24, 1024, %s866_s26, [#allocation11], %s14483_s12, %s14483_s12, %s14482_s19  }
 0x204   : > { %s12201_s8 = scalar_lea.hbm %s14487_s5, 16 }
 0x205   : > { %p12202_p6 = scmp.ne.s32.totalorder %s14487_s5, %s12201_s8  ;;  %p12208_p5 = scmp.lt.u32.totalorder %s12201_s8, %s14487_s5 }
 0x207   : > { %p12204_p12 = pnand %p12202_p6, %p14485_p8 }
 0x209   : > { %p12205_p13 = pneg %p12204_p12 }
 0x20b   : > { %p12210_p9 = pnand %p12208_p5, %p12205_p13 }
 0x20d   : > { %12213 = shalt.err (!%p12210_p9)
}
 0x20e   : > { %s12214_s29 = scalar_lea.vmem %s893_s20, 16  ;;  %s12221_s1 = scalar_lea.vmem %s893_s20, 32 }
 0x20f   : > { %p12215_p7 = scmp.ne.s32.totalorder %s893_s20, %s12214_s29  ;;  %p12222_p4 = scmp.lt.s32.totalorder %s893_s20, %s893_s20 }
 0x210   : > { %p12223_p3 = scmp.lt.s32.totalorder %s12221_s1, %s12214_s29 }
 0x211   : > { %p12217_p0 = pnand %p12215_p7, %p14485_p8 }
 0x212   : > { %p12224_p10 = por %p12223_p3, %p12222_p4 }
 0x213   : > { %p12218_p2 = pneg %p12217_p0 }
 0x215   : > { %p12225_p11 = pnand %p12224_p10, %p12218_p2 }
 0x217   : > { %12228 = shalt.err (!%p12225_p11)
}
 0x218   : > { %s14488_s26 = sld [smem:[#allocation82_spill]]  ;;  %s12840_s21 = smov [#allocation18]  }
 0x219   : > { %10987 = dma.hbm_to_vmem [thread:$0]  (!%p14486_p1), %s14487_s5, 16, %s893_s20, [#allocation14]  }
 0x21a   : > { %s916_s6 = sshll.u32 %s12840_s21, 4  ;;  %s12841_s8 = smov [#allocation21]   ;;  %s917_s6 = int_to_ptr.vmem [resolvable:$true] %s916_s6 }
 0x21b   : > { %s940_s24 = sshll.u32 %s12841_s8, 4  ;;  %s941_s24 = int_to_ptr.vmem [resolvable:$true] %s940_s24 }
 0x21e   : > { %s12229_s30 = scalar_lea.hbm %s14488_s26, 16 }
 0x21f   : > { %p12230_p6 = scmp.ne.s32.totalorder %s14488_s26, %s12229_s30  ;;  %p12236_p5 = scmp.lt.u32.totalorder %s12229_s30, %s14488_s26 }
 0x221   : > { %p12232_p12 = pnand %p12230_p6, %p14485_p8 }
 0x223   : > { %p12233_p13 = pneg %p12232_p12 }
 0x225   : > { %p12238_p9 = pnand %p12236_p5, %p12233_p13 }
 0x227   : > { %12241 = shalt.err (!%p12238_p9)
}
 0x228   : > { %s12242_s29 = scalar_lea.vmem %s917_s6, 16  ;;  %s12249_s20 = scalar_lea.vmem %s917_s6, 32 }
 0x229   : > { %p12243_p7 = scmp.ne.s32.totalorder %s917_s6, %s12242_s29  ;;  %p12250_p4 = scmp.lt.s32.totalorder %s917_s6, %s917_s6 }
 0x22a   : > { %p12251_p3 = scmp.lt.s32.totalorder %s12249_s20, %s12242_s29 }
 0x22b   : > { %p12245_p0 = pnand %p12243_p7, %p14485_p8 }
 0x22c   : > { %p12252_p10 = por %p12251_p3, %p12250_p4 }
 0x22d   : > { %p12246_p2 = pneg %p12245_p0 }
 0x22f   : > { %p12253_p11 = pnand %p12252_p10, %p12246_p2 }
 0x231   : > { %12256 = shalt.err (!%p12253_p11)
}
 0x232   : > { %s14489_s1 = sld [smem:[#allocation84_spill]] }
 0x233   : > { %10993 = dma.hbm_to_vmem [thread:$0]  (!%p14486_p1), %s14488_s26, 16, %s917_s6, [#allocation17]  }
 0x238   : > { %s12257_s30 = scalar_lea.hbm %s14489_s1, 16 }
 0x239   : > { %p12258_p6 = scmp.ne.s32.totalorder %s14489_s1, %s12257_s30  ;;  %p12264_p5 = scmp.lt.u32.totalorder %s12257_s30, %s14489_s1 }
 0x23b   : > { %p12260_p12 = pnand %p12258_p6, %p14485_p8 }
 0x23d   : > { %p12261_p13 = pneg %p12260_p12 }
 0x23f   : > { %p12266_p9 = pnand %p12264_p5, %p12261_p13 }
 0x241   : > { %12269 = shalt.err (!%p12266_p9)
}
 0x242   : > { %s12270_s21 = scalar_lea.vmem %s941_s24, 16  ;;  %s12277_s8 = scalar_lea.vmem %s941_s24, 32 }
 0x243   : > { %p12271_p7 = scmp.ne.s32.totalorder %s941_s24, %s12270_s21  ;;  %p12278_p4 = scmp.lt.s32.totalorder %s941_s24, %s941_s24 }
 0x244   : > { %p12279_p3 = scmp.lt.s32.totalorder %s12277_s8, %s12270_s21 }
 0x245   : > { %p12273_p0 = pnand %p12271_p7, %p14485_p8 }
 0x246   : > { %p12280_p10 = por %p12279_p3, %p12278_p4 }
 0x247   : > { %p12274_p2 = pneg %p12273_p0 }
 0x249   : > { %p12281_p11 = pnand %p12280_p10, %p12274_p2 }
 0x24b   : > { %12284 = shalt.err (!%p12281_p11)
}
 0x24c   : > { %s14490_s6 = sld [smem:[#allocation86_spill]]  ;;  %s12842_s29 = smov [#allocation24]  }
 0x24d   : > { %10999 = dma.hbm_to_vmem [thread:$0]  (!%p14486_p1), %s14489_s1, 16, %s941_s24, [#allocation20]  }
 0x24e   : > { %s964_s20 = sshll.u32 %s12842_s29, 4  ;;  %s12843_s30 = smov [#allocation27]   ;;  %s965_s20 = int_to_ptr.vmem [resolvable:$true] %s964_s20 }
 0x24f   : > { %s988_s5 = sshll.u32 %s12843_s30, 4  ;;  %s989_s5 = int_to_ptr.vmem [resolvable:$true] %s988_s5 }
 0x252   : > { %s12285_s26 = scalar_lea.hbm %s14490_s6, 16 }
 0x253   : > { %p12286_p6 = scmp.ne.s32.totalorder %s14490_s6, %s12285_s26  ;;  %p12292_p5 = scmp.lt.u32.totalorder %s12285_s26, %s14490_s6 }
 0x255   : > { %p12288_p12 = pnand %p12286_p6, %p14485_p8 }
 0x257   : > { %p12289_p13 = pneg %p12288_p12 }
 0x259   : > { %p12294_p9 = pnand %p12292_p5, %p12289_p13 }
 0x25b   : > { %12297 = shalt.err (!%p12294_p9)
}
 0x25c   : > { %s12298_s21 = scalar_lea.vmem %s965_s20, 16  ;;  %s12305_s24 = scalar_lea.vmem %s965_s20, 32 }
 0x25d   : > { %p12299_p7 = scmp.ne.s32.totalorder %s965_s20, %s12298_s21  ;;  %p12306_p4 = scmp.lt.s32.totalorder %s965_s20, %s965_s20 }
 0x25e   : > { %p12307_p3 = scmp.lt.s32.totalorder %s12305_s24, %s12298_s21 }
 0x25f   : > { %p12301_p0 = pnand %p12299_p7, %p14485_p8 }
 0x260   : > { %p12308_p10 = por %p12307_p3, %p12306_p4 }
 0x261   : > { %p12302_p2 = pneg %p12301_p0 }
 0x263   : > { %p12309_p11 = pnand %p12308_p10, %p12302_p2 }
 0x265   : > { %12312 = shalt.err (!%p12309_p11)
}
 0x266   : > { %s14491_s8 = sld [smem:[#allocation88_spill]] }
 0x267   : > { %11005 = dma.hbm_to_vmem [thread:$0]  (!%p14486_p1), %s14490_s6, 16, %s965_s20, [#allocation23]  }
 0x26c   : > { %s12313_s26 = scalar_lea.hbm %s14491_s8, 16 }
 0x26d   : > { %p12314_p6 = scmp.ne.s32.totalorder %s14491_s8, %s12313_s26  ;;  %p12320_p5 = scmp.lt.u32.totalorder %s12313_s26, %s14491_s8 }
 0x26f   : > { %p12316_p12 = pnand %p12314_p6, %p14485_p8 }
 0x271   : > { %p12317_p13 = pneg %p12316_p12 }
 0x273   : > { %p12322_p9 = pnand %p12320_p5, %p12317_p13 }
 0x275   : > { %12325 = shalt.err (!%p12322_p9)
}
 0x276   : > { %s12326_s29 = scalar_lea.vmem %s989_s5, 16  ;;  %s12333_s30 = scalar_lea.vmem %s989_s5, 32 }
 0x277   : > { %p12327_p7 = scmp.ne.s32.totalorder %s989_s5, %s12326_s29  ;;  %p12334_p4 = scmp.lt.s32.totalorder %s989_s5, %s989_s5 }
 0x278   : > { %p12335_p3 = scmp.lt.s32.totalorder %s12333_s30, %s12326_s29 }
 0x279   : > { %p12329_p0 = pnand %p12327_p7, %p14485_p8 }
 0x27a   : > { %p12336_p10 = por %p12335_p3, %p12334_p4 }
 0x27b   : > { %p12330_p2 = pneg %p12329_p0 }
 0x27d   : > { %p12337_p11 = pnand %p12336_p10, %p12330_p2 }
 0x27f   : > { %12340 = shalt.err (!%p12337_p11)
}
 0x280   : > { %s14492_s20 = sld [smem:[#allocation90_spill]]  ;;  %s12844_s21 = smov [#allocation30]  }
 0x281   : > { %11011 = dma.hbm_to_vmem [thread:$0]  (!%p14486_p1), %s14491_s8, 16, %s989_s5, [#allocation26]  }
 0x282   : > { %s1012_s24 = sshll.u32 %s12844_s21, 4  ;;  %s12845_s26 = smov [#allocation33]   ;;  %s1013_s24 = int_to_ptr.vmem [resolvable:$true] %s1012_s24 }
 0x283   : > { %s1036_s1 = sshll.u32 %s12845_s26, 4  ;;  %s1037_s1 = int_to_ptr.vmem [resolvable:$true] %s1036_s1 }
 0x286   : > { %s12341_s6 = scalar_lea.hbm %s14492_s20, 16 }
 0x287   : > { %p12342_p6 = scmp.ne.s32.totalorder %s14492_s20, %s12341_s6  ;;  %p12348_p5 = scmp.lt.u32.totalorder %s12341_s6, %s14492_s20 }
 0x289   : > { %p12344_p12 = pnand %p12342_p6, %p14485_p8 }
 0x28b   : > { %p12345_p13 = pneg %p12344_p12 }
 0x28d   : > { %p12350_p9 = pnand %p12348_p5, %p12345_p13 }
 0x28f   : > { %12353 = shalt.err (!%p12350_p9)
}
 0x290   : > { %s12354_s29 = scalar_lea.vmem %s1013_s24, 16  ;;  %s12361_s5 = scalar_lea.vmem %s1013_s24, 32 }
 0x291   : > { %p12355_p7 = scmp.ne.s32.totalorder %s1013_s24, %s12354_s29  ;;  %p12362_p4 = scmp.lt.s32.totalorder %s1013_s24, %s1013_s24 }
 0x292   : > { %p12363_p3 = scmp.lt.s32.totalorder %s12361_s5, %s12354_s29 }
 0x293   : > { %p12357_p0 = pnand %p12355_p7, %p14485_p8 }
 0x294   : > { %p12364_p10 = por %p12363_p3, %p12362_p4 }
 0x295   : > { %p12358_p2 = pneg %p12357_p0 }
 0x297   : > { %p12365_p11 = pnand %p12364_p10, %p12358_p2 }
 0x299   : > { %12368 = shalt.err (!%p12365_p11)
}
 0x29a   : > { %s14493_s30 = sld [smem:[#allocation92_spill]] }
 0x29b   : > { %11017 = dma.hbm_to_vmem [thread:$0]  (!%p14486_p1), %s14492_s20, 16, %s1013_s24, [#allocation29]  }
 0x2a0   : > { %s12369_s6 = scalar_lea.hbm %s14493_s30, 16 }
 0x2a1   : > { %p12370_p6 = scmp.ne.s32.totalorder %s14493_s30, %s12369_s6  ;;  %p12376_p5 = scmp.lt.u32.totalorder %s12369_s6, %s14493_s30 }
 0x2a3   : > { %p12372_p12 = pnand %p12370_p6, %p14485_p8 }
 0x2a5   : > { %p12373_p13 = pneg %p12372_p12 }
 0x2a7   : > { %p12378_p9 = pnand %p12376_p5, %p12373_p13 }
 0x2a9   : > { %12381 = shalt.err (!%p12378_p9)
}
 0x2aa   : > { %s12382_s21 = scalar_lea.vmem %s1037_s1, 16  ;;  %s12389_s26 = scalar_lea.vmem %s1037_s1, 32 }
 0x2ab   : > { %p12383_p7 = scmp.ne.s32.totalorder %s1037_s1, %s12382_s21  ;;  %p12390_p4 = scmp.lt.s32.totalorder %s1037_s1, %s1037_s1 }
 0x2ac   : > { %p12391_p3 = scmp.lt.s32.totalorder %s12389_s26, %s12382_s21 }
 0x2ad   : > { %p12385_p0 = pnand %p12383_p7, %p14485_p8 }
 0x2ae   : > { %p12392_p10 = por %p12391_p3, %p12390_p4 }
 0x2af   : > { %p12386_p2 = pneg %p12385_p0 }
 0x2b1   : > { %p12393_p11 = pnand %p12392_p10, %p12386_p2 }
 0x2b3   : > { %12396 = shalt.err (!%p12393_p11)
}
 0x2b4   : > { %s14494_s24 = sld [smem:[#allocation94_spill]]  ;;  %s12846_s29 = smov [#allocation36]  }
 0x2b5   : > { %11023 = dma.hbm_to_vmem [thread:$0]  (!%p14486_p1), %s14493_s30, 16, %s1037_s1, [#allocation32]  }
 0x2b6   : > { %s1060_s5 = sshll.u32 %s12846_s29, 4  ;;  %s12847_s6 = smov [#allocation39]   ;;  %s1061_s5 = int_to_ptr.vmem [resolvable:$true] %s1060_s5 }
 0x2b7   : > { %s1084_s8 = sshll.u32 %s12847_s6, 4  ;;  %s1085_s8 = int_to_ptr.vmem [resolvable:$true] %s1084_s8 }
 0x2ba   : > { %s12397_s20 = scalar_lea.hbm %s14494_s24, 16 }
 0x2bb   : > { %p12398_p6 = scmp.ne.s32.totalorder %s14494_s24, %s12397_s20  ;;  %p12404_p5 = scmp.lt.u32.totalorder %s12397_s20, %s14494_s24 }
 0x2bd   : > { %p12400_p12 = pnand %p12398_p6, %p14485_p8 }
 0x2bf   : > { %p12401_p13 = pneg %p12400_p12 }
 0x2c1   : > { %p12406_p9 = pnand %p12404_p5, %p12401_p13 }
 0x2c3   : > { %12409 = shalt.err (!%p12406_p9)
}
 0x2c4   : > { %s12410_s21 = scalar_lea.vmem %s1061_s5, 16  ;;  %s12417_s1 = scalar_lea.vmem %s1061_s5, 32 }
 0x2c5   : > { %p12411_p7 = scmp.ne.s32.totalorder %s1061_s5, %s12410_s21  ;;  %p12418_p4 = scmp.lt.s32.totalorder %s1061_s5, %s1061_s5 }
 0x2c6   : > { %p12419_p3 = scmp.lt.s32.totalorder %s12417_s1, %s12410_s21 }
 0x2c7   : > { %p12413_p0 = pnand %p12411_p7, %p14485_p8 }
 0x2c8   : > { %p12420_p10 = por %p12419_p3, %p12418_p4 }
 0x2c9   : > { %p12414_p2 = pneg %p12413_p0 }
 0x2cb   : > { %p12421_p11 = pnand %p12420_p10, %p12414_p2 }
 0x2cd   : > { %12424 = shalt.err (!%p12421_p11)
}
 0x2ce   : > { %s14495_s26 = sld [smem:[#allocation96_spill]] }
 0x2cf   : > { %11029 = dma.hbm_to_vmem [thread:$0]  (!%p14486_p1), %s14494_s24, 16, %s1061_s5, [#allocation35]  }
 0x2d4   : > { %s12425_s20 = scalar_lea.hbm %s14495_s26, 16 }
 0x2d5   : > { %p12426_p6 = scmp.ne.s32.totalorder %s14495_s26, %s12425_s20  ;;  %p12432_p5 = scmp.lt.u32.totalorder %s12425_s20, %s14495_s26 }
 0x2d7   : > { %p12428_p12 = pnand %p12426_p6, %p14485_p8 }
 0x2d9   : > { %p12429_p13 = pneg %p12428_p12 }
 0x2db   : > { %p12434_p9 = pnand %p12432_p5, %p12429_p13 }
 0x2dd   : > { %12437 = shalt.err (!%p12434_p9)
}
 0x2de   : > { %s12438_s29 = scalar_lea.vmem %s1085_s8, 16  ;;  %s12445_s6 = scalar_lea.vmem %s1085_s8, 32 }
 0x2df   : > { %p12439_p7 = scmp.ne.s32.totalorder %s1085_s8, %s12438_s29  ;;  %p12446_p4 = scmp.lt.s32.totalorder %s1085_s8, %s1085_s8 }
 0x2e0   : > { %p12447_p3 = scmp.lt.s32.totalorder %s12445_s6, %s12438_s29 }
 0x2e1   : > { %p12441_p0 = pnand %p12439_p7, %p14485_p8 }
 0x2e2   : > { %p12448_p10 = por %p12447_p3, %p12446_p4 }
 0x2e3   : > { %p12442_p2 = pneg %p12441_p0 }
 0x2e5   : > { %p12449_p11 = pnand %p12448_p10, %p12442_p2 }
 0x2e7   : > { %12452 = shalt.err (!%p12449_p11)
}
 0x2e8   : > { %s14496_s5 = sld [smem:[#allocation98_spill]]  ;;  %s12848_s21 = smov [#allocation42]  }
 0x2e9   : > { %11035 = dma.hbm_to_vmem [thread:$0]  (!%p14486_p1), %s14495_s26, 16, %s1085_s8, [#allocation38]  }
 0x2ea   : > { %s1108_s1 = sshll.u32 %s12848_s21, 4  ;;  %s12849_s20 = smov [#allocation45]   ;;  %s1109_s1 = int_to_ptr.vmem [resolvable:$true] %s1108_s1 }
 0x2eb   : > { %s1132_s24 = sshll.u32 %s12849_s20, 4  ;;  %s1133_s24 = int_to_ptr.vmem [resolvable:$true] %s1132_s24 }
 0x2ee   : > { %s12453_s30 = scalar_lea.hbm %s14496_s5, 16 }
 0x2ef   : > { %p12454_p6 = scmp.ne.s32.totalorder %s14496_s5, %s12453_s30  ;;  %p12460_p5 = scmp.lt.u32.totalorder %s12453_s30, %s14496_s5 }
 0x2f1   : > { %p12456_p12 = pnand %p12454_p6, %p14485_p8 }
 0x2f3   : > { %p12457_p13 = pneg %p12456_p12 }
 0x2f5   : > { %p12462_p9 = pnand %p12460_p5, %p12457_p13 }
 0x2f7   : > { %12465 = shalt.err (!%p12462_p9)
}
 0x2f8   : > { %s12466_s29 = scalar_lea.vmem %s1109_s1, 16  ;;  %s12473_s8 = scalar_lea.vmem %s1109_s1, 32 }
 0x2f9   : > { %p12467_p7 = scmp.ne.s32.totalorder %s1109_s1, %s12466_s29  ;;  %p12474_p4 = scmp.lt.s32.totalorder %s1109_s1, %s1109_s1 }
 0x2fa   : > { %p12475_p3 = scmp.lt.s32.totalorder %s12473_s8, %s12466_s29 }
 0x2fb   : > { %p12469_p0 = pnand %p12467_p7, %p14485_p8 }
 0x2fc   : > { %p12476_p10 = por %p12475_p3, %p12474_p4 }
 0x2fd   : > { %p12470_p2 = pneg %p12469_p0 }
 0x2ff   : > { %p12477_p11 = pnand %p12476_p10, %p12470_p2 }
 0x301   : > { %12480 = shalt.err (!%p12477_p11)
}
 0x302   : > { %s14497_s6 = sld [smem:[#allocation100_spill]] }
 0x303   : > { %11041 = dma.hbm_to_vmem [thread:$0]  (!%p14486_p1), %s14496_s5, 16, %s1109_s1, [#allocation41]  }
 0x308   : > { %s12481_s30 = scalar_lea.hbm %s14497_s6, 16 }
 0x309   : > { %p12482_p6 = scmp.ne.s32.totalorder %s14497_s6, %s12481_s30  ;;  %p12488_p5 = scmp.lt.u32.totalorder %s12481_s30, %s14497_s6 }
 0x30b   : > { %p12484_p12 = pnand %p12482_p6, %p14485_p8 }
 0x30d   : > { %p12485_p13 = pneg %p12484_p12 }
 0x30f   : > { %p12490_p9 = pnand %p12488_p5, %p12485_p13 }
 0x311   : > { %12493 = shalt.err (!%p12490_p9)
}
 0x312   : > { %s12494_s21 = scalar_lea.vmem %s1133_s24, 16  ;;  %s12501_s20 = scalar_lea.vmem %s1133_s24, 32 }
 0x313   : > { %p12495_p7 = scmp.ne.s32.totalorder %s1133_s24, %s12494_s21  ;;  %p12502_p4 = scmp.lt.s32.totalorder %s1133_s24, %s1133_s24 }
 0x314   : > { %p12503_p3 = scmp.lt.s32.totalorder %s12501_s20, %s12494_s21 }
 0x315   : > { %p12497_p0 = pnand %p12495_p7, %p14485_p8 }
 0x316   : > { %p12504_p10 = por %p12503_p3, %p12502_p4 }
 0x317   : > { %p12498_p2 = pneg %p12497_p0 }
 0x319   : > { %p12505_p11 = pnand %p12504_p10, %p12498_p2 }
 0x31b   : > { %12508 = shalt.err (!%p12505_p11)
}
 0x31c   : > { %s14498_s1 = sld [smem:[#allocation102_spill]]  ;;  %s12850_s29 = smov [#allocation48]  }
 0x31d   : > { %11047 = dma.hbm_to_vmem [thread:$0]  (!%p14486_p1), %s14497_s6, 16, %s1133_s24, [#allocation44]  }
 0x31e   : > { %s1156_s8 = sshll.u32 %s12850_s29, 4  ;;  %s12851_s30 = smov [#allocation51]   ;;  %s1157_s8 = int_to_ptr.vmem [resolvable:$true] %s1156_s8 }
 0x31f   : > { %s1180_s5 = sshll.u32 %s12851_s30, 4  ;;  %s1181_s5 = int_to_ptr.vmem [resolvable:$true] %s1180_s5 }
 0x322   : > { %s12509_s26 = scalar_lea.hbm %s14498_s1, 16 }
 0x323   : > { %p12510_p6 = scmp.ne.s32.totalorder %s14498_s1, %s12509_s26  ;;  %p12516_p5 = scmp.lt.u32.totalorder %s12509_s26, %s14498_s1 }
 0x325   : > { %p12512_p12 = pnand %p12510_p6, %p14485_p8 }
 0x327   : > { %p12513_p13 = pneg %p12512_p12 }
 0x329   : > { %p12518_p9 = pnand %p12516_p5, %p12513_p13 }
 0x32b   : > { %12521 = shalt.err (!%p12518_p9)
}
 0x32c   : > { %s12522_s21 = scalar_lea.vmem %s1157_s8, 16  ;;  %s12529_s24 = scalar_lea.vmem %s1157_s8, 32 }
 0x32d   : > { %p12523_p7 = scmp.ne.s32.totalorder %s1157_s8, %s12522_s21  ;;  %p12530_p4 = scmp.lt.s32.totalorder %s1157_s8, %s1157_s8 }
 0x32e   : > { %p12531_p3 = scmp.lt.s32.totalorder %s12529_s24, %s12522_s21 }
 0x32f   : > { %p12525_p0 = pnand %p12523_p7, %p14485_p8 }
 0x330   : > { %p12532_p10 = por %p12531_p3, %p12530_p4 }
 0x331   : > { %p12526_p2 = pneg %p12525_p0 }
 0x333   : > { %p12533_p11 = pnand %p12532_p10, %p12526_p2 }
 0x335   : > { %12536 = shalt.err (!%p12533_p11)
}
 0x336   : > { %11053 = dma.hbm_to_vmem [thread:$0]  (!%p14486_p1), %s14498_s1, 16, %s1157_s8, [#allocation47]  }
 0x337   : > { %s12537_s26 = scalar_lea.hbm %s13022_s13, 16 }
 0x338   : > { %p12538_p6 = scmp.ne.s32.totalorder %s13022_s13, %s12537_s26  ;;  %p12544_p5 = scmp.lt.u32.totalorder %s12537_s26, %s13022_s13 }
 0x33a   : > { %p12540_p12 = pnand %p12538_p6, %p14485_p8 }
 0x33c   : > { %p12541_p13 = pneg %p12540_p12 }
 0x33e   : > { %p12546_p9 = pnand %p12544_p5, %p12541_p13 }
 0x340   : > { %12549 = shalt.err (!%p12546_p9)
}
 0x341   : > { %s12550_s20 = scalar_lea.vmem %s1181_s5, 16  ;;  %s12557_s29 = scalar_lea.vmem %s1181_s5, 32 }
 0x342   : > { %p12551_p7 = scmp.ne.s32.totalorder %s1181_s5, %s12550_s20  ;;  %p12558_p4 = scmp.lt.s32.totalorder %s1181_s5, %s1181_s5 }
 0x343   : > { %p12559_p3 = scmp.lt.s32.totalorder %s12557_s29, %s12550_s20 }
 0x344   : > { %p12553_p0 = pnand %p12551_p7, %p14485_p8 }
 0x345   : > { %p12560_p10 = por %p12559_p3, %p12558_p4 }
 0x346   : > { %p12554_p2 = pneg %p12553_p0 }
 0x348   : > { %p12561_p11 = pnand %p12560_p10, %p12554_p2 }
 0x34a   : > { %12564 = shalt.err (!%p12561_p11)
}
 0x34b   : > { %11059 = dma.hbm_to_vmem [thread:$0]  (!%p14486_p1), %s13022_s13, 16, %s1181_s5, [#allocation50]  }
 0x34c   : > { %s12852_s8 = smov [#allocation54]   ;;  %s12565_s21 = scalar_lea.hbm %s13032_s27, 16 }
 0x34d   : > { %s1204_s30 = sshll.u32 %s12852_s8, 4  ;;  %p12566_p6 = scmp.ne.s32.totalorder %s13032_s27, %s12565_s21  ;;  %s1205_s30 = int_to_ptr.vmem [resolvable:$true] %s1204_s30 }
 0x34e   : > { %p12572_p5 = scmp.lt.u32.totalorder %s12565_s21, %s13032_s27 }
 0x34f   : > { %p12568_p12 = pnand %p12566_p6, %p14485_p8 }
 0x351   : > { %p12569_p13 = pneg %p12568_p12 }
 0x353   : > { %p12574_p9 = pnand %p12572_p5, %p12569_p13 }
 0x355   : > { %12577 = shalt.err (!%p12574_p9)
}
 0x356   : > { %s12578_s24 = scalar_lea.vmem %s1205_s30, 16  ;;  %s12585_s26 = scalar_lea.vmem %s1205_s30, 32 }
 0x357   : > { %p12579_p7 = scmp.ne.s32.totalorder %s1205_s30, %s12578_s24  ;;  %p12586_p4 = scmp.lt.s32.totalorder %s1205_s30, %s1205_s30 }
 0x358   : > { %p12587_p3 = scmp.lt.s32.totalorder %s12585_s26, %s12578_s24 }
 0x359   : > { %p12581_p0 = pnand %p12579_p7, %p14485_p8 }
 0x35a   : > { %p12588_p10 = por %p12587_p3, %p12586_p4 }
 0x35b   : > { %p12582_p2 = pneg %p12581_p0 }
 0x35d   : > { %p12589_p11 = pnand %p12588_p10, %p12582_p2 }
 0x35f   : > { %12592 = shalt.err (!%p12589_p11)
}
 0x360   : > { %s14499_s5 = sld [smem:[#allocation74_spill]]  ;;  %s1219_s20 = scalar_lea.vmem [#allocation4], %s13330_s15 }
 0x361   : > { %11065 = dma.hbm_to_vmem [thread:$0]  (!%p14486_p1), %s13032_s27, 16, %s1205_s30, [#allocation53]  }
 0x362   : > { %s1226_s29 = sshll.u32 %s1219_s20, 4  ;;  %s14500_s28 = sand.u32 1, %s12779_s10   ;;  %s13534_s29 = int_to_ptr.vmem [resolvable:$true] %s1226_s29 }
 0x363   : > { %s13538_s8 = scalar_lea.sflag [#allocation5], %s14500_s28  ;;  %p14501_p6 = scmp.ne.s32.totalorder %s14481_s14, 0 }
 0x366   : > { %s13531_s9 = scalar_lea.hbm %s14499_s5, %s13333_s3  ;;  %s12598_s24 = scalar_lea.hbm %s14499_s5, 512 }
 0x367   : > { %s12593_s21 = scalar_lea.hbm %s13531_s9, 256  ;;  %p12599_p1 = scmp.lt.u32.totalorder %s13531_s9, %s14499_s5 }
 0x368   : > { %p12594_p8 = scmp.ne.s32.totalorder %s13531_s9, %s12593_s21  ;;  %p12600_p5 = scmp.lt.u32.totalorder %s12598_s24, %s12593_s21 }
 0x369   : > { %p12602_p7 = scmp.lt.u32.totalorder %s12593_s21, %s13531_s9 }
 0x36a   : > { %p12596_p12 = pnand %p12594_p8, %p14501_p6  ;;  %p12601_p9 = por %p12600_p5, %p12599_p1 }
 0x36c   : > { %p12597_p13 = pneg %p12596_p12  ;;  %p12603_p0 = por %p12602_p7, %p12601_p9 }
 0x36e   : > { %p12604_p2 = pnand %p12603_p0, %p12597_p13 }
 0x370   : > { %12607 = shalt.err (!%p12604_p2)
}
 0x371   : > { %s12608_s30 = scalar_lea.vmem %s13534_s29, 256  ;;  %s12853_s26 = smov [#allocation4]  }
 0x372   : > { %p12609_p4 = scmp.ne.s32.totalorder %s13534_s29, %s12608_s30  ;;  %s12613_s20 = sshll.u32 %s12853_s26, 4  ;;  %s12614_s20 = int_to_ptr.vmem [resolvable:$false] %s12613_s20 }
 0x373   : > { %s12615_s28 = scalar_lea.vmem %s12614_s20, 512  ;;  %p12616_p11 = scmp.lt.s32.totalorder %s13534_s29, %s12614_s20 }
 0x374   : > { %p12611_p3 = pnand %p12609_p4, %p14501_p6  ;;  %p12617_p8 = scmp.lt.s32.totalorder %s12615_s28, %s12608_s30 }
 0x376   : > { %p12612_p10 = pneg %p12611_p3  ;;  %p12618_p12 = por %p12617_p8, %p12616_p11 }
 0x378   : > { %p12619_p1 = pnand %p12618_p12, %p12612_p10 }
 0x37a   : > { %12622 = shalt.err (!%p12619_p1)
}
 0x37b   : > { %p14502_p13 = scmp.ne.s32.totalorder %s14480_s4, 0  ;;  %s14503_s21 = sld [smem:[#allocation76_spill]] }
 0x37c   : > { %s1261_s30 = scalar_lea.vmem [#allocation9], %s13330_s15 }
 0x37d   : > { %11069 = dma.hbm_to_vmem [thread:$0]  (!%p14502_p13), %s13531_s9, 256, %s13534_s29, %s13538_s8, %s14483_s12, %s14483_s12, %s14482_s19  }
 0x37e   : > { %s1268_s26 = sshll.u32 %s1261_s30, 4  ;;  %s13566_s26 = int_to_ptr.vmem [resolvable:$true] %s1268_s26 }
 0x381   : > { %s13563_s24 = scalar_lea.hbm %s14503_s21, %s13333_s3  ;;  %s12628_s28 = scalar_lea.hbm %s14503_s21, 512 }
 0x382   : > { %s12623_s20 = scalar_lea.hbm %s13563_s24, 256  ;;  %p12629_p0 = scmp.lt.u32.totalorder %s13563_s24, %s14503_s21 }
 0x383   : > { %p12624_p5 = scmp.ne.s32.totalorder %s13563_s24, %s12623_s20  ;;  %p12630_p2 = scmp.lt.u32.totalorder %s12628_s28, %s12623_s20 }
 0x384   : > { %p12632_p3 = scmp.lt.u32.totalorder %s12623_s20, %s13563_s24 }
 0x385   : > { %p12626_p9 = pnand %p12624_p5, %p14501_p6  ;;  %p12631_p4 = por %p12630_p2, %p12629_p0 }
 0x387   : > { %p12627_p7 = pneg %p12626_p9  ;;  %p12633_p10 = por %p12632_p3, %p12631_p4 }
 0x389   : > { %p12634_p11 = pnand %p12633_p10, %p12627_p7 }
 0x38b   : > { %12637 = shalt.err (!%p12634_p11)
}
 0x38c   : > { %s12638_s3 = scalar_lea.vmem %s13566_s26, 256  ;;  %s12854_s15 = smov [#allocation9]  }
 0x38d   : > { %p12639_p8 = scmp.ne.s32.totalorder %s13566_s26, %s12638_s3  ;;  %s12643_s9 = sshll.u32 %s12854_s15, 4  ;;  %s12644_s9 = int_to_ptr.vmem [resolvable:$false] %s12643_s9 }
 0x38e   : > { %s12645_s29 = scalar_lea.vmem %s12644_s9, 512  ;;  %p12646_p5 = scmp.lt.s32.totalorder %s13566_s26, %s12644_s9 }
 0x38f   : > { %p12641_p12 = pnand %p12639_p8, %p14501_p6  ;;  %p12647_p9 = scmp.lt.s32.totalorder %s12645_s29, %s12638_s3 }
 0x391   : > { %p12642_p1 = pneg %p12641_p12  ;;  %p12648_p0 = por %p12647_p9, %p12646_p5 }
 0x393   : > { %p12649_p2 = pnand %p12648_p0, %p12642_p1 }
 0x395   : > { %12652 = shalt.err (!%p12649_p2)
}
 0x396   : > { %11075 = dma.hbm_to_vmem [thread:$0]  (!%p14502_p13), %s13563_s24, 256, %s13566_s26, %s13347_s23, %s14483_s12, %s14483_s12, %s14482_s19  }
 0x397   : > { %s14504_s14 = sld [smem:[#allocation106_spill]] }
 0x39d   : > { %p14505_p6 = scmp.ne.s32.totalorder %s14504_s14, 0 }
 0x39e   : > { %s13592_s8 = sand.u32 (!%p14505_p6), 1, %s12775_s7   ;;  %p14506_p7 = scmp.ne.s32.totalorder (!%p14505_p6), %s14477_s16, 0 }
 0x39f   : > { %1280 = sbr.rel (%p14505_p6) target bundleno = 4745 (0x1289), region = 152  ;;  %s13595_s30 = sshll.u32 (!%p14505_p6), %s13592_s8, 4 }
 0x3a0   : > { %s1283_s4 = scalar_lea.sflag (!%p14505_p6), [#allocation5], %s13592_s8  ;;  %s1286_s20 = scalar_lea.vmem (!%p14505_p6), [#allocation4], %s13595_s30 }
 0x3a6   : > { %12698 = dma.done.wait (%p14506_p7), %s1283_s4, 256  }
 0x3a7   : > { %12700 = vsyncadd (%p14506_p7), %s1283_s4, 4294967040  ;;  %s1291_s23 = sand.u32 1, %s13060_s18   ;;  %s1295_s12 = scalar_lea.vmem [#allocation7], %s13595_s30 }
 0x3a8   : > { %s1292_s19 = scalar_lea.sflag [#allocation8], %s1291_s23 }
 0x3a9   : > { %12702 = dma.done.wait (%p14506_p7), %s1292_s19, 512  }
 0x3aa   : > { %12704 = vsyncadd (%p14506_p7), %s1292_s19, 4294966784  ;;  %s1304_s24 = scalar_lea.vmem [#allocation9], %s13595_s30  ;;  %p14507_p13 = scmp.eq.s32.totalorder %s13060_s18, 0 }
 0x3ac   : > { %12706 = dma.done.wait (%p14507_p13), [#allocation11], 1536   ;;  %p14508_p4 = pmov %p14507_p13 }
 0x3ae   : > { %12708 = vsyncadd (%p14508_p4), [#allocation11], 4294965760  ;;  %p14509_p3 = pmov %p14508_p4 }
 0x3b0   : > { %12710 = dma.done.wait (%p14509_p3), [#allocation14], 3088   ;;  %p14510_p10 = pmov %p14509_p3 }
 0x3b1   : > { %p14511_p11 = pmov %p14509_p3 }
 0x3b2   : > { %12712 = vsyncadd (%p14510_p10), [#allocation14], 4294964208 }
 0x3b3   : > { %12714 = dma.done.wait (%p14511_p11), [#allocation17], 3088   ;;  %p14512_p8 = pmov %p14509_p3 }
 0x3b4   : > { %p14513_p12 = pmov %p14509_p3 }
 0x3b5   : > { %12716 = vsyncadd (%p14512_p8), [#allocation17], 4294964208 }
 0x3b6   : > { %12718 = dma.done.wait (%p14513_p12), [#allocation20], 3088   ;;  %p14514_p1 = pmov %p14509_p3 }
 0x3b8   : > { %12720 = vsyncadd (%p14514_p1), [#allocation20], 4294964208  ;;  %p14515_p5 = pmov %p14514_p1 }
 0x3b9   : > { %p14516_p9 = pmov %p14514_p1 }
 0x3ba   : > { %12722 = dma.done.wait (%p14515_p5), [#allocation23], 3088  }
 0x3bb   : > { %12724 = vsyncadd (%p14516_p9), [#allocation23], 4294964208  ;;  %p14517_p0 = pmov %p14514_p1 }
 0x3bd   : > { %12726 = dma.done.wait (%p14517_p0), [#allocation26], 3088   ;;  %p14518_p2 = pmov %p14517_p0 }
 0x3be   : > { %p14519_p6 = pmov %p14517_p0 }
 0x3bf   : > { %12728 = vsyncadd (%p14518_p2), [#allocation26], 4294964208 }
 0x3c0   : > { %12730 = dma.done.wait (%p14519_p6), [#allocation29], 3088   ;;  %p14520_p7 = pmov %p14517_p0 }
 0x3c1   : > { %p14521_p13 = pmov %p14517_p0 }
 0x3c2   : > { %12732 = vsyncadd (%p14520_p7), [#allocation29], 4294964208 }
 0x3c3   : > { %12734 = dma.done.wait (%p14521_p13), [#allocation32], 3088   ;;  %p14522_p4 = pmov %p14517_p0 }
 0x3c4   : > { %p14523_p3 = pmov %p14517_p0 }
 0x3c5   : > { %12736 = vsyncadd (%p14522_p4), [#allocation32], 4294964208 }
 0x3c6   : > { %12738 = dma.done.wait (%p14523_p3), [#allocation35], 3088   ;;  %p14524_p10 = pmov %p14517_p0 }
 0x3c7   : > { %p14525_p11 = pmov %p14517_p0 }
 0x3c8   : > { %12740 = vsyncadd (%p14524_p10), [#allocation35], 4294964208 }
 0x3c9   : > { %12742 = dma.done.wait (%p14525_p11), [#allocation38], 5136   ;;  %p14526_p8 = pmov %p14517_p0 }
 0x3ca   : > { %p14527_p12 = pmov %p14517_p0 }
 0x3cb   : > { %12744 = vsyncadd (%p14526_p8), [#allocation38], 4294962160 }
 0x3cc   : > { %12746 = dma.done.wait (%p14527_p12), [#allocation41], 5136   ;;  %p14528_p1 = pmov %p14517_p0 }
 0x3cd   : > { %p14529_p5 = pmov %p14517_p0 }
 0x3ce   : > { %12748 = vsyncadd (%p14528_p1), [#allocation41], 4294962160 }
 0x3cf   : > { %12750 = dma.done.wait (%p14529_p5), [#allocation44], 5136   ;;  %p14530_p9 = pmov %p14517_p0 }
 0x3d1   : > { %12752 = vsyncadd (%p14530_p9), [#allocation44], 4294962160 }
 0x3d2   : > { %12754 = dma.done.wait (%p14517_p0), [#allocation47], 3088   ;;  %p14531_p2 = pmov %p14517_p0 }
 0x3d3   : > { %p14532_p6 = pmov %p14517_p0 }
 0x3d4   : > { %12756 = vsyncadd (%p14531_p2), [#allocation47], 4294964208 }
 0x3d5   : > { %12758 = dma.done.wait (%p14532_p6), [#allocation50], 5136   ;;  %p14533_p7 = pmov %p14517_p0 }
 0x3d6   : > { %p14534_p13 = pmov %p14517_p0 }
 0x3d7   : > { %12760 = vsyncadd (%p14533_p7), [#allocation50], 4294962160 }
 0x3d8   : > { %12762 = dma.done.wait (%p14534_p13), [#allocation53], 3088   ;;  %p14535_p4 = pmov %p14517_p0 }
 0x3d9   : > { %v12855_v0 = vmov 0.0   ;;  %v12856_v1 = vmov 0   ;;  %vm12857_vm0 = vmmov 0   ;;  %v11249_v2 = vld [vmem:[#allocation13 + $0x40] sm:$0xff]   ;;  %v11251_v4 = vld [vmem:[#allocation13 + $0x48] sm:$0xff]   ;;  %v11253_v6 = vld [vmem:[#allocation13 + $0x50] sm:$0xff]  }
 0x3da   : > { %12764 = vsyncadd (%p14535_p4), [#allocation53], 4294964208  ;;  %9795 = vmatprep.subr.bf16.mxu0 %v12855_v0  ;;  %9815 = vmatprep.subr.bf16.mxu1 %v12855_v0  ;;  %1518 = vst [vmem:[#allocation2] sm:$0xf] %v12856_v1  ;;  %v11250_v3 = vld [vmem:[#allocation13] sm:$0xff]   ;;  %v11252_v5 = vld [vmem:[#allocation13 + $0x8] sm:$0xff]  }
 0x3db   : > { %1519 = vst [vmem:[#allocation2 + $0xc] sm:$0x1] %v12856_v1  ;;  %9811 = vmatprep.mubr.msk.bf16.mxu0 %vm12857_vm0, %v12855_v0  ;;  %9831 = vmatprep.mubr.msk.bf16.mxu1 %vm12857_vm0, %v12855_v0  ;;  %v11254_v7 = vld [vmem:[#allocation13 + $0x10] sm:$0xff]   ;;  %v11255_v8 = vld [vmem:[#allocation13 + $0x58] sm:$0xff]   ;;  %v11257_v10 = vld [vmem:[#allocation13 + $0x60] sm:$0xff]   ;;  %vm3102_vm3 = vcmask 130048  }
 0x3dc   : > { %9796 = vmatpush3.bf16.msra.mxu0 %v11249_v2  ;;  %9816 = vmatpush3.bf16.msra.mxu1 %v11250_v3  ;;  %v11256_v9 = vld [vmem:[#allocation13 + $0x18] sm:$0xff]   ;;  %v11258_v11 = vld [vmem:[#allocation13 + $0x20] sm:$0xff]   ;;  %v11259_v16 = vld [vmem:[#allocation13 + $0x68] sm:$0xff]   ;;  %vm1667_vm1 = vsmask.f32 4352  ;;  %vm4867_vm4 = vcmask 1044480  }
 0x3dd   : > { %9797 = vmatprep.subr.bf16.mxu0 %v12855_v0  ;;  %9817 = vmatprep.subr.bf16.mxu1 %v12855_v0  ;;  %v1520_v12 = vld [vmem:[%s1286_s20] sm:$0xff]  ;;  %v1521_v13 = vld [vmem:[%s1286_s20 + $0x8] sm:$0xff]  ;;  %vm1803_vm2 = vsmask.f32 7424  ;;  %vm5224_vm5 = vcmask 1046528   ;;  %s12858_s16 = smov 16  }
 0x3de   : > { %v9298_v14 = vpack.c.bf16 %v1520_v12, %v1520_v12  ;;  %v9299_v15 = vpack.c.bf16 %v1521_v13, %v1521_v13  ;;  %v11260_v17 = vld [vmem:[#allocation13 + $0x28] sm:$0xff]   ;;  %v11261_v18 = vld [vmem:[#allocation13 + $0x70] sm:$0xff]   ;;  %v11263_v20 = vld [vmem:[#allocation13 + $0x78] sm:$0xff]   ;;  %vm4697_vm6 = vcmask 261248   ;;  %s12859_s26 = smov 32   ;;  %vm6990_vm7 = vcmask 392448  }
 0x3df   : > { %v11262_v19 = vld [vmem:[#allocation13 + $0x30] sm:$0xff]   ;;  %v11264_v22 = vld [vmem:[#allocation13 + $0x38] sm:$0xff]   ;;  %v11267_v35 = vld [vmem:[#allocation13 + $0x80] sm:$0xff]   ;;  %s12860_s28 = smov 48   ;;  %vm8021_vm8 = vcmask 523648   ;;  %vm8135_vm9 = vcmask 523264  }
 0x3e0   : > { %9798 = vmatpush3.bf16.msra.mxu0 %v11251_v4  ;;  %9818 = vmatpush3.bf16.msra.mxu1 %v11252_v5  ;;  %1530 = vst [vmem:[#allocation2 + $0x4] sm:$0xf] %v9298_v14  ;;  %1531 = vst [vmem:[#allocation2 + $0x8] sm:$0xf] %v9299_v15  ;;  %v11268_v42 = vld [vmem:[#allocation13 + $0x88] sm:$0xff]   ;;  %v11269_v48 = vld [vmem:[#allocation13 + $0x90] sm:$0xff]  }
 0x3e1   : > { %9799 = vmatprep.subr.bf16.mxu0 %v12855_v0  ;;  %9819 = vmatprep.subr.bf16.mxu1 %v12855_v0  ;;  %v1532_v21 = vld [vmem:[#allocation2] sm:$0x8]  ;;  %v11270_v49 = vld [vmem:[#allocation13 + $0x98] sm:$0xff]   ;;  %v11272_v51 = vld [vmem:[#allocation13 + $0xa8] sm:$0xff]   ;;  %s14536_s3 = sld [smem:[#allocation105_spill]]  ;;  %s8761_s15 = sshll.u32 %s13592_s8, 5 }
 0x3e2   : > { %v11276_v23 = vld [vmem:[#allocation2 + $0xc] ss:$0 sps:$4 sm:$0x11]   ;;  %v11271_v50 = vld [vmem:[#allocation13 + $0xa0] sm:$0xff]   ;;  %v11273_v52 = vld [vmem:[#allocation13 + $0xb0] sm:$0xff]   ;;  %s1516_s9 = scalar_lea.vmem [#allocation55], %s8761_s15 }
 0x3e3   : > { %v1812_v29 = vshll.u32 %v11276_v23, 16  ;;  %v11274_v53 = vld [vmem:[#allocation13 + $0xb8] sm:$0xff]   ;;  %v11277_v56 = vld [vmem:[#allocation16 + $0x40] sm:$0xff]   ;;  %v11278_v57 = vld [vmem:[#allocation16 + $0x48] sm:$0xff]   ;;  %s8251_s29 = sshll.u32 %s1516_s9, 4  ;;  %s9326_s14 = sshll.u32 %s13060_s18, 9  ;;  %s14318_s29 = int_to_ptr.vmem [resolvable:$true] %s8251_s29 }
 0x3e4   : > { %9800 = vmatpush3.bf16.msra.mxu0 %v11253_v6  ;;  %9820 = vmatpush3.bf16.msra.mxu1 %v11254_v7  ;;  %v11280_v58 = vld [vmem:[#allocation16] sm:$0xff]   ;;  %v11279_v59 = vld [vmem:[#allocation16 + $0x50] sm:$0xff]   ;;  %v11281_v60 = vld [vmem:[#allocation16 + $0x58] sm:$0xff]   ;;  %s8238_s4 = scalar_lea.sflag [#allocation6], %s13592_s8  ;;  %s12653_s20 = scalar_lea.vmem %s14318_s29, 512 }
 0x3e5   : > { %9801 = vmatprep.subr.bf16.mxu0 %v12855_v0  ;;  %9821 = vmatprep.subr.bf16.mxu1 %v12855_v0  ;;  %v1814_v44 = vrot.slane %v1812_v29, 1  ;;  %v11282_v61 = vld [vmem:[#allocation16 + $0x8] sm:$0xff]   ;;  %v11283_v62 = vld [vmem:[#allocation16 + $0x60] sm:$0xff]   ;;  %v11284_v63 = vld [vmem:[#allocation16 + $0x10] sm:$0xff]   ;;  %p12654_p3 = scmp.ne.s32.totalorder %s14318_s29, %s12653_s20  ;;  %p14537_p10 = scmp.ne.s32.totalorder %s14478_s22, 0 }
 0x3e6   : > { %v11285_v1 = vld [vmem:[#allocation16 + $0x68] sm:$0xff]   ;;  %v11286_v2 = vld [vmem:[#allocation16 + $0x18] sm:$0xff]   ;;  %v11287_v3 = vld [vmem:[#allocation16 + $0x70] sm:$0xff]   ;;  %s12861_s18 = smov [#allocation55]  }
 0x3e7   : > { %v1533_v24 = vld [vmem:[#allocation2 + $0x4] sm:$0xf]  ;;  %v1534_v25 = vld [vmem:[#allocation2 + $0x8] sm:$0xf]  ;;  %v11289_v5 = vld [vmem:[#allocation16 + $0x78] sm:$0xff]   ;;  %s14321_s30 = scalar_lea.hbm %s14536_s3, %s9326_s14  ;;  %p12655_p11 = pnand %p12654_p3, %p14537_p10 }
 0x3e8   : > { %9802 = vmatpush3.bf16.msra.mxu0 %v11255_v8  ;;  %9822 = vmatpush3.bf16.msra.mxu1 %v11256_v9  ;;  %v8773_v26 = vcombine.low %v1532_v21, %v1533_v24  ;;  %v8774_v27 = vcombine.low %v1534_v25, %v1534_v25  ;;  %v11275_v28 = vld [vmem:[#allocation2 + $0x4] sm:$0xff]   ;;  %v8764_v30 = vcombine.low %v1533_v24, %v1534_v25  ;;  %v11291_v7 = vld [vmem:[#allocation16 + $0x30] sm:$0xff]   ;;  %v11293_v8 = vld [vmem:[#allocation16 + $0x38] sm:$0xff]   ;;  %s12657_s23 = sshll.u32 %s12861_s18, 4  ;;  %s12658_s23 = int_to_ptr.vmem [resolvable:$false] %s12657_s23 }
 0x3e9   : > { %9803 = vmatprep.subr.bf16.mxu0 %v12855_v0  ;;  %9823 = vmatprep.subr.bf16.mxu1 %v12855_v0  ;;  %v1805_v36 = vshrl.u32 %v11275_v28, 16  ;;  %v1807_v37 = vshll.u32 %v11275_v28, 16  ;;  %v11288_v4 = vld [vmem:[#allocation16 + $0x20] sm:$0xff]   ;;  %v11290_v6 = vld [vmem:[#allocation16 + $0x28] sm:$0xff]   ;;  %p12656_p8 = pneg %p12655_p11  ;;  %s12659_s19 = scalar_lea.vmem %s12658_s23, 1024 }
 0x3ea   : > { %v1669_v31 = vshrl.u32 %v8773_v26, 16  ;;  %v1672_v32 = vshll.u32 %v8773_v26, 16  ;;  %v1677_v33 = vshrl.u32 %v8774_v27, 16  ;;  %v1680_v34 = vshll.u32 %v8774_v27, 16  ;;  %p12660_p12 = scmp.lt.s32.totalorder %s14318_s29, %s12658_s23  ;;  %p12661_p1 = scmp.lt.s32.totalorder %s12659_s19, %s12653_s20 }
 0x3eb   : > { %v1809_v43 = vrot.slane %v1807_v37, 1 }
 0x3ec   : > { %9804 = vmatpush3.bf16.msra.mxu0 %v11257_v10  ;;  %9824 = vmatpush3.bf16.msra.mxu1 %v11258_v11  ;;  %v1671_v38 = vrot.slane %v1669_v31, 3  ;;  %v1674_v39 = vrot.slane %v1672_v32, 4  ;;  %v1679_v40 = vrot.slane %v1677_v33, 3  ;;  %v1682_v41 = vrot.slane %v1680_v34, 4  ;;  %v1929_v32 = vld [vmem:[#allocation2] sm:$0x8]  ;;  %p12662_p5 = por %p12661_p1, %p12660_p12 }
 0x3ed   : > { %9805 = vmatprep.subr.bf16.mxu0 %v12855_v0  ;;  %9825 = vmatprep.subr.bf16.mxu1 %v12855_v0  ;;  %v1810_v54 = vor.u32 %v1809_v43, %v1805_v36  ;;  %v11292_v36 = vld [vmem:[#allocation16 + $0x80] sm:$0xff]  }
 0x3ee   : > { %v1675_v45 = vor.u32 %v1674_v39, %v1671_v38  ;;  %v1683_v46 = vor.u32 %v1682_v41, %v1679_v40  ;;  %p12663_p9 = pnand %p12662_p5, %p12656_p8 }
 0x3ef   : > { %v1815_v55 = vsel %vm1803_vm2, %v1810_v54, %v1814_v44  ;;  %v11299_v54 = vld [vmem:[#allocation16 + $0xa0] sm:$0xff]  }
 0x3f0   : > { %9806 = vmatpush3.bf16.msra.mxu0 %v11259_v16  ;;  %9826 = vmatpush3.bf16.msra.mxu1 %v11260_v17  ;;  %v1684_v47 = vsel %vm1667_vm1, %v1675_v45, %v1683_v46  ;;  %v11294_v45 = vld [vmem:[#allocation16 + $0x88] sm:$0xff]  }
 0x3f1   : > { %9807 = vmatprep.subr.bf16.mxu0 %v12855_v0  ;;  %9827 = vmatprep.subr.bf16.mxu1 %v12855_v0 }
 0x3f4   : > { %9808 = vmatpush3.bf16.msra.mxu0 %v11261_v18  ;;  %9828 = vmatpush3.bf16.msra.mxu1 %v11262_v19  ;;  %v8793_v19 = vld [vmem:[#allocation15] ss:$0 sm:$0xff] }
 0x3f5   : > { %9809 = vmatprep.subr.bf16.mxu0 %v12855_v0  ;;  %9829 = vmatprep.subr.bf16.mxu1 %v12855_v0 }
 0x3f8   : > { %9810 = vmatpush3.bf16.msra.mxu0 %v11263_v20  ;;  %9830 = vmatpush3.bf16.msra.mxu1 %v11264_v22 }
 0x3f9   : > { %9835 = vmatprep.subr.bf16.mxu0 %v12855_v0  ;;  %9855 = vmatprep.subr.bf16.mxu1 %v12855_v0 }
 0x3fb   : > { %9812 = vmatmul.mubr.bf16.vlgmr.msra.gmra.mrb[0].mxu0 %v8764_v30  ;;  %9832 = vmatmul.mubr.bf16.vlgmr.msra.gmra.mrb[0].mxu1 %v1684_v47 }
 0x3fc   : > { %9836 = vmatpush3.bf16.msra.mxu0 %v11267_v35  ;;  %9851 = vmatprep.mubr.msk.bf16.mxu0 %vm12857_vm0, %v12855_v0 }
 0x3fd   : > { %9837 = vmatprep.subr.bf16.mxu0 %v12855_v0  ;;  %9871 = vmatprep.mubr.msk.bf16.mxu1 %vm12857_vm0, %v12855_v0 }
 0x3fe   : > { %9856 = vmatpush3.bf16.msra.mxu1 %v11277_v56 }
 0x3ff   : > { %9857 = vmatprep.subr.bf16.mxu1 %v12855_v0 }
 0x400   : > { %9838 = vmatpush3.bf16.msra.mxu0 %v11268_v42 }
 0x401   : > { %9839 = vmatprep.subr.bf16.mxu0 %v12855_v0 }
 0x402   : > { %9858 = vmatpush3.bf16.msra.mxu1 %v11278_v57  ;;  %v11300_v57 = vld [vmem:[#allocation16 + $0xa8] sm:$0xff]  }
 0x403   : > { %9859 = vmatprep.subr.bf16.mxu1 %v12855_v0 }
 0x404   : > { %9840 = vmatpush3.bf16.msra.mxu0 %v11269_v48 }
 0x405   : > { %9841 = vmatprep.subr.bf16.mxu0 %v12855_v0 }
 0x406   : > { %9860 = vmatpush3.bf16.msra.mxu1 %v11279_v59 }
 0x407   : > { %9861 = vmatprep.subr.bf16.mxu1 %v12855_v0 }
 0x408   : > { %9842 = vmatpush3.bf16.msra.mxu0 %v11270_v49 }
 0x409   : > { %9843 = vmatprep.subr.bf16.mxu0 %v12855_v0 }
 0x40a   : > { %9862 = vmatpush3.bf16.msra.mxu1 %v11281_v60  ;;  %v11301_v60 = vld [vmem:[#allocation16 + $0xb0] sm:$0xff]  }
 0x40b   : > { %9863 = vmatprep.subr.bf16.mxu1 %v12855_v0 }
 0x40c   : > { %9844 = vmatpush3.bf16.msra.mxu0 %v11271_v50  ;;  %v11297_v50 = vld [vmem:[#allocation16 + $0x90] sm:$0xff]  }
 0x40d   : > { %9845 = vmatprep.subr.bf16.mxu0 %v12855_v0 }
 0x40e   : > { %9864 = vmatpush3.bf16.msra.mxu1 %v11283_v62 }
 0x40f   : > { %9865 = vmatprep.subr.bf16.mxu1 %v12855_v0 }
 0x410   : > { %9846 = vmatpush3.bf16.msra.mxu0 %v11272_v51 }
 0x411   : > { %9847 = vmatprep.subr.bf16.mxu0 %v12855_v0 }
 0x412   : > { %9866 = vmatpush3.bf16.msra.mxu1 %v11285_v1 }
 0x413   : > { %9867 = vmatprep.subr.bf16.mxu1 %v12855_v0 }
 0x414   : > { %9848 = vmatpush3.bf16.msra.mxu0 %v11273_v52  ;;  %v11298_v52 = vld [vmem:[#allocation16 + $0x98] sm:$0xff]  }
 0x415   : > { %9849 = vmatprep.subr.bf16.mxu0 %v12855_v0 }
 0x416   : > { %9868 = vmatpush3.bf16.msra.mxu1 %v11287_v3 }
 0x417   : > { %9869 = vmatprep.subr.bf16.mxu1 %v12855_v0 }
 0x418   : > { %9850 = vmatpush3.bf16.msra.mxu0 %v11274_v53 }
 0x419   : > { %9875 = vmatprep.subr.bf16.mxu0 %v12855_v0 }
 0x41a   : > { %9870 = vmatpush3.bf16.msra.mxu1 %v11289_v5  ;;  %v11304_v5 = vld [vmem:[#allocation19 + $0x40] sm:$0xff]  }
 0x41b   : > { %9852 = vmatmul.mubr.bf16.vlgmr.msra.gmra.mrb[4].mxu0 %v1815_v55  ;;  %9895 = vmatprep.subr.bf16.mxu1 %v12855_v0 }
 0x41c   : > { %9891 = vmatprep.mubr.msk.bf16.mxu0 %vm12857_vm0, %v12855_v0  ;;  %9876 = vmatpush3.bf16.msra.mxu0 %v11280_v58  ;;  %v11303_v58 = vld [vmem:[#allocation2 + $0xc] ss:$0 sps:$4 sm:$0x11]  }
 0x41d   : > { %9877 = vmatprep.subr.bf16.mxu0 %v12855_v0  ;;  %v2207_v62 = vshll.u32 %v11303_v58, 16 }
 0x41f   : > { %v2209_v3 = vrot.slane %v2207_v62, 1  ;;  %v11325_v62 = vld [vmem:[#allocation19 + $0x90] sm:$0xff]  }
 0x420   : > { %9878 = vmatpush3.bf16.msra.mxu0 %v11282_v61 }
 0x421   : > { %9879 = vmatprep.subr.bf16.mxu0 %v12855_v0 }
 0x424   : > { %9880 = vmatpush3.bf16.msra.mxu0 %v11284_v63  ;;  %v11302_v63 = vld [vmem:[#allocation16 + $0xb8] sm:$0xff]  }
 0x425   : > { %9881 = vmatprep.subr.bf16.mxu0 %v12855_v0 }
 0x428   : > { %9882 = vmatpush3.bf16.msra.mxu0 %v11286_v2 }
 0x429   : > { %9883 = vmatprep.subr.bf16.mxu0 %v12855_v0 }
 0x42c   : > { %9884 = vmatpush3.bf16.msra.mxu0 %v11288_v4 }
 0x42d   : > { %9885 = vmatprep.subr.bf16.mxu0 %v12855_v0 }
 0x430   : > { %9886 = vmatpush3.bf16.msra.mxu0 %v11290_v6  ;;  %v11307_v6 = vld [vmem:[#allocation19] sm:$0xff]  }
 0x431   : > { %9887 = vmatprep.subr.bf16.mxu0 %v12855_v0 }
 0x434   : > { %9888 = vmatpush3.bf16.msra.mxu0 %v11291_v7  ;;  %v11305_v7 = vld [vmem:[#allocation19 + $0x48] sm:$0xff]  }
 0x435   : > { %9889 = vmatprep.subr.bf16.mxu0 %v12855_v0 }
 0x438   : > { %9890 = vmatpush3.bf16.msra.mxu0 %v11293_v8  ;;  %v11306_v8 = vld [vmem:[#allocation19 + $0x50] sm:$0xff]  }
 0x439   : > { %9915 = vmatprep.subr.bf16.mxu0 %v12855_v0 }
 0x4ce   : > { %v1656_v9 = vpop.f32.mrb[0].mxu0  ;;  %v1768_v12 = vpop.f32.mrb[0].mxu1 }
 0x4cf   : > { %v9813_v10 = vpop.f32.mrb[1].mxu0  ;;  %v1769_v14 = vadd.f32 %v1768_v12, %v1656_v9  ;;  %v9833_v15 = vpop.f32.mrb[1].mxu1  ;;  %v11308_v9 = vld [vmem:[#allocation19 + $0x58] sm:$0xff]   ;;  %v11311_v12 = vld [vmem:[#allocation19 + $0x10] sm:$0xff]  }
 0x4d0   : > { %v1659_v11 = vpop.f32.mrb[2].mxu0  ;;  %v1771_v16 = vpop.f32.mrb[2].mxu1  ;;  %v11309_v10 = vld [vmem:[#allocation19 + $0x8] sm:$0xff]   ;;  %v11314_v15 = vld [vmem:[#allocation19 + $0x70] sm:$0xff]  }
 0x4d1   : > { %v9814_v13 = vpop.f32.mrb[3].mxu0  ;;  %v1772_v17 = vadd.f32 %v1771_v16, %v1659_v11  ;;  %v9834_v18 = vpop.f32.mrb[3].mxu1  ;;  %v11310_v11 = vld [vmem:[#allocation19 + $0x60] sm:$0xff]  }
 0x4d2   : > { %v11312_v13 = vld [vmem:[#allocation19 + $0x68] sm:$0xff]   ;;  %v11315_v16 = vld [vmem:[#allocation19 + $0x20] sm:$0xff]  }
 0x4d3   : > { %v11317_v18 = vld [vmem:[#allocation19 + $0x28] sm:$0xff]  }
 0x4ee   : > { %v1899_v20 = vpop.f32.mrb[4].mxu0 }
 0x4ef   : > { %v1906_v21 = vadd.f32 %v1899_v20, %v1769_v14  ;;  %v9853_v22 = vpop.f32.mrb[5].mxu0  ;;  %v11313_v14 = vld [vmem:[#allocation19 + $0x18] sm:$0xff]  }
 0x4f0   : > { %v1902_v23 = vpop.f32.mrb[6].mxu0  ;;  %v11321_v20 = vld [vmem:[#allocation19 + $0x38] sm:$0xff]  }
 0x4f1   : > { %v1915_v24 = vadd.f32 %v8793_v19, %v1906_v21  ;;  %v1907_v25 = vadd.f32 %v1902_v23, %v1772_v17  ;;  %v9854_v26 = vpop.f32.mrb[7].mxu0  ;;  %v11316_v17 = vld [vmem:[#allocation19 + $0x78] sm:$0xff]  }
 0x4f3   : > { %v1917_v27 = vmax.f32 %v1915_v24, 0.0  ;;  %v1916_v28 = vadd.f32 %v8793_v19, %v1907_v25  ;;  %v11319_v19 = vld [vmem:[#allocation19 + $0x30] sm:$0xff]  }
 0x4f5   : > { %v9300_v29 = vpack.c.bf16 %v1917_v27, %v1917_v27  ;;  %v1918_v30 = vmax.f32 %v1916_v28, 0.0 }
 0x4f7   : > { %1927 = vst [vmem:[#allocation2 + $0x4] sm:$0xf] %v9300_v29  ;;  %v9301_v31 = vpack.c.bf16 %v1918_v30, %v1918_v30 }
 0x4f9   : > { %1928 = vst [vmem:[#allocation2 + $0x8] sm:$0xf] %v9301_v31 }
 0x4fe   : > { %v1930_v33 = vld [vmem:[#allocation2 + $0x4] sm:$0xf] }
 0x4ff   : > { %v8805_v34 = vcombine.low %v1929_v32, %v1930_v33  ;;  %v2171_v55 = vld [vmem:[#allocation2 + $0x4] sm:$0xf]  ;;  %v8825_v32 = vld [vmem:[#allocation18] ss:$0 sm:$0xff] }
 0x500   : > { %v1931_v35 = vld [vmem:[#allocation2 + $0x8] sm:$0xf] }
 0x501   : > { %v8796_v37 = vcombine.low %v1930_v33, %v1931_v35  ;;  %v8806_v38 = vcombine.low %v1931_v35, %v1931_v35  ;;  %v2065_v39 = vshrl.u32 %v8805_v34, 16  ;;  %v2068_v40 = vshll.u32 %v8805_v34, 16  ;;  %v2172_v53 = vld [vmem:[#allocation2 + $0x8] sm:$0xf] }
 0x502   : > { %v8815_v56 = vcombine.low %v2171_v55, %v2172_v53 }
 0x503   : > { %9872 = vmatmul.mubr.bf16.vlgmr.msra.gmra.mrb[4].mxu1 %v8796_v37  ;;  %v2067_v41 = vrot.slane %v2065_v39, 3  ;;  %v2070_v42 = vrot.slane %v2068_v40, 4  ;;  %v2073_v43 = vshrl.u32 %v8806_v38, 16  ;;  %v2076_v44 = vshll.u32 %v8806_v38, 16 }
 0x504   : > { %9896 = vmatpush3.bf16.msra.mxu1 %v11292_v36  ;;  %9911 = vmatprep.mubr.msk.bf16.mxu1 %vm12857_vm0, %v12855_v0  ;;  %v2202_v59 = vshll.u32 %v8815_v56, 16  ;;  %v2200_v1 = vshrl.u32 %v8815_v56, 16 }
 0x505   : > { %9897 = vmatprep.subr.bf16.mxu1 %v12855_v0  ;;  %v2075_v46 = vrot.slane %v2073_v43, 3  ;;  %v2078_v47 = vrot.slane %v2076_v44, 4  ;;  %v2071_v48 = vor.u32 %v2070_v42, %v2067_v41  ;;  %v2324_v44 = vld [vmem:[#allocation2] sm:$0x8] }
 0x506   : > { %v2204_v61 = vrot.slane %v2202_v59, 1 }
 0x507   : > { %v2079_v49 = vor.u32 %v2078_v47, %v2075_v46 }
 0x508   : > { %9898 = vmatpush3.bf16.msra.mxu1 %v11294_v45  ;;  %v2205_v2 = vor.u32 %v2204_v61, %v2200_v1  ;;  %v11326_v1 = vld [vmem:[#allocation19 + $0x98] sm:$0xff]  }
 0x509   : > { %v2080_v51 = vsel %vm1667_vm1, %v2071_v48, %v2079_v49  ;;  %9899 = vmatprep.subr.bf16.mxu1 %v12855_v0  ;;  %v11320_v48 = vld [vmem:[#allocation19 + $0x80] sm:$0xff]  }
 0x50a   : > { %9892 = vmatmul.mubr.bf16.vlgmr.msra.gmra.mrb[8].mxu0 %v2080_v51  ;;  %v2210_v4 = vsel %vm1803_vm2, %v2205_v2, %v2209_v3  ;;  %v11327_v2 = vld [vmem:[#allocation19 + $0xa0] sm:$0xff]  }
 0x50b   : > { %9931 = vmatprep.mubr.msk.bf16.mxu0 %vm12857_vm0, %v12855_v0  ;;  %9916 = vmatpush3.bf16.msra.mxu0 %v11304_v5  ;;  %v11332_v5 = vld [vmem:[#allocation2 + $0xc] ss:$0 sps:$4 sm:$0x11]  }
 0x50c   : > { %9900 = vmatpush3.bf16.msra.mxu1 %v11297_v50  ;;  %9917 = vmatprep.subr.bf16.mxu0 %v12855_v0 }
 0x50d   : > { %9901 = vmatprep.subr.bf16.mxu1 %v12855_v0 }
 0x50f   : > { %9918 = vmatpush3.bf16.msra.mxu0 %v11305_v7  ;;  %v11329_v7 = vld [vmem:[#allocation19 + $0xb0] sm:$0xff]  }
 0x510   : > { %9902 = vmatpush3.bf16.msra.mxu1 %v11298_v52  ;;  %9919 = vmatprep.subr.bf16.mxu0 %v12855_v0 }
 0x511   : > { %9903 = vmatprep.subr.bf16.mxu1 %v12855_v0 }
 0x513   : > { %9920 = vmatpush3.bf16.msra.mxu0 %v11306_v8 }
 0x514   : > { %9904 = vmatpush3.bf16.msra.mxu1 %v11299_v54  ;;  %9921 = vmatprep.subr.bf16.mxu0 %v12855_v0 }
 0x515   : > { %9905 = vmatprep.subr.bf16.mxu1 %v12855_v0 }
 0x517   : > { %9922 = vmatpush3.bf16.msra.mxu0 %v11308_v9  ;;  %v2602_v9 = vshll.u32 %v11332_v5, 16 }
 0x518   : > { %9906 = vmatpush3.bf16.msra.mxu1 %v11300_v57  ;;  %9923 = vmatprep.subr.bf16.mxu0 %v12855_v0  ;;  %v11322_v57 = vld [vmem:[#allocation19 + $0x88] sm:$0xff]  }
 0x519   : > { %9907 = vmatprep.subr.bf16.mxu1 %v12855_v0 }
 0x51b   : > { %9924 = vmatpush3.bf16.msra.mxu0 %v11310_v11 }
 0x51c   : > { %9908 = vmatpush3.bf16.msra.mxu1 %v11301_v60  ;;  %9925 = vmatprep.subr.bf16.mxu0 %v12855_v0 }
 0x51d   : > { %9909 = vmatprep.subr.bf16.mxu1 %v12855_v0 }
 0x51f   : > { %9926 = vmatpush3.bf16.msra.mxu0 %v11312_v13  ;;  %v2604_v13 = vrot.slane %v2602_v9, 1  ;;  %v11351_v9 = vld [vmem:[#allocation22 + $0x88] sm:$0xff]  }
 0x520   : > { %9910 = vmatpush3.bf16.msra.mxu1 %v11302_v63  ;;  %9927 = vmatprep.subr.bf16.mxu0 %v12855_v0 }
 0x521   : > { %9935 = vmatprep.subr.bf16.mxu1 %v12855_v0 }
 0x523   : > { %9912 = vmatmul.mubr.bf16.vlgmr.msra.gmra.mrb[8].mxu1 %v2210_v4  ;;  %9928 = vmatpush3.bf16.msra.mxu0 %v11314_v15  ;;  %v11328_v4 = vld [vmem:[#allocation19 + $0xa8] sm:$0xff]  }
 0x524   : > { %9951 = vmatprep.mubr.msk.bf16.mxu1 %vm12857_vm0, %v12855_v0  ;;  %9936 = vmatpush3.bf16.msra.mxu1 %v11307_v6  ;;  %v11333_v15 = vld [vmem:[#allocation22 + $0x40] sm:$0xff]  }
 0x525   : > { %9937 = vmatprep.subr.bf16.mxu1 %v12855_v0  ;;  %9929 = vmatprep.subr.bf16.mxu0 %v12855_v0 }
 0x527   : > { %9930 = vmatpush3.bf16.msra.mxu0 %v11316_v17  ;;  %v11334_v17 = vld [vmem:[#allocation22 + $0x48] sm:$0xff]  }
 0x528   : > { %9938 = vmatpush3.bf16.msra.mxu1 %v11309_v10  ;;  %9955 = vmatprep.subr.bf16.mxu0 %v12855_v0  ;;  %v11330_v10 = vld [vmem:[#allocation19 + $0xb8] sm:$0xff]  }
 0x529   : > { %9939 = vmatprep.subr.bf16.mxu1 %v12855_v0 }
 0x52c   : > { %9940 = vmatpush3.bf16.msra.mxu1 %v11311_v12 }
 0x52d   : > { %9941 = vmatprep.subr.bf16.mxu1 %v12855_v0 }
 0x530   : > { %9942 = vmatpush3.bf16.msra.mxu1 %v11313_v14 }
 0x531   : > { %9943 = vmatprep.subr.bf16.mxu1 %v12855_v0 }
 0x534   : > { %9944 = vmatpush3.bf16.msra.mxu1 %v11315_v16  ;;  %v11335_v16 = vld [vmem:[#allocation22] sm:$0xff]  }
 0x535   : > { %9945 = vmatprep.subr.bf16.mxu1 %v12855_v0 }
 0x538   : > { %9946 = vmatpush3.bf16.msra.mxu1 %v11317_v18  ;;  %v11336_v18 = vld [vmem:[#allocation22 + $0x50] sm:$0xff]  }
 0x539   : > { %9947 = vmatprep.subr.bf16.mxu1 %v12855_v0 }
 0x53c   : > { %9948 = vmatpush3.bf16.msra.mxu1 %v11319_v19  ;;  %v11337_v19 = vld [vmem:[#allocation22 + $0x8] sm:$0xff]  }
 0x53d   : > { %9949 = vmatprep.subr.bf16.mxu1 %v12855_v0 }
 0x540   : > { %9950 = vmatpush3.bf16.msra.mxu1 %v11321_v20  ;;  %v11338_v20 = vld [vmem:[#allocation22 + $0x58] sm:$0xff]  }
 0x541   : > { %9975 = vmatprep.subr.bf16.mxu1 %v12855_v0 }
 0x5d6   : > { %v2053_v21 = vpop.f32.mrb[4].mxu1 }
 0x5d7   : > { %v9873_v22 = vpop.f32.mrb[5].mxu1 }
 0x5d8   : > { %v2056_v23 = vpop.f32.mrb[6].mxu1  ;;  %v11340_v22 = vld [vmem:[#allocation22 + $0x60] sm:$0xff]  }
 0x5d9   : > { %v9874_v24 = vpop.f32.mrb[7].mxu1 }
 0x5da   : > { %v11342_v24 = vld [vmem:[#allocation22 + $0x68] sm:$0xff]  }
 0x5dd   : > { %v2164_v25 = vpop.f32.mrb[8].mxu0 }
 0x5de   : > { %v2165_v26 = vadd.f32 %v2164_v25, %v2053_v21  ;;  %v9893_v27 = vpop.f32.mrb[9].mxu0  ;;  %v11339_v21 = vld [vmem:[#allocation22 + $0x10] sm:$0xff]   ;;  %v11343_v25 = vld [vmem:[#allocation22 + $0x20] sm:$0xff]  }
 0x5df   : > { %v2167_v28 = vpop.f32.mrb[10].mxu0  ;;  %v11345_v27 = vld [vmem:[#allocation22 + $0x28] sm:$0xff]  }
 0x5e0   : > { %v2168_v29 = vadd.f32 %v2167_v28, %v2056_v23  ;;  %v9894_v30 = vpop.f32.mrb[11].mxu0  ;;  %v11341_v23 = vld [vmem:[#allocation22 + $0x18] sm:$0xff]  }
 0x5e1   : > { %v11346_v28 = vld [vmem:[#allocation22 + $0x78] sm:$0xff]  }
 0x5e2   : > { %v11350_v30 = vld [vmem:[#allocation22 + $0x38] sm:$0xff]  }
 0x5f6   : > { %v2294_v31 = vpop.f32.mrb[8].mxu1 }
 0x5f7   : > { %v2301_v33 = vadd.f32 %v2294_v31, %v2165_v26  ;;  %v9913_v34 = vpop.f32.mrb[9].mxu1  ;;  %v11344_v26 = vld [vmem:[#allocation22 + $0x70] sm:$0xff]  }
 0x5f8   : > { %v2297_v35 = vpop.f32.mrb[10].mxu1 }
 0x5f9   : > { %v2310_v36 = vadd.f32 %v8825_v32, %v2301_v33  ;;  %v2302_v37 = vadd.f32 %v2297_v35, %v2168_v29  ;;  %v9914_v38 = vpop.f32.mrb[11].mxu1  ;;  %v11347_v29 = vld [vmem:[#allocation22 + $0x30] sm:$0xff]  }
 0x5fb   : > { %v2312_v39 = vmax.f32 %v2310_v36, 0.0  ;;  %v2311_v40 = vadd.f32 %v8825_v32, %v2302_v37 }
 0x5fd   : > { %v9302_v41 = vpack.c.bf16 %v2312_v39, %v2312_v39  ;;  %v2313_v42 = vmax.f32 %v2311_v40, 0.0 }
 0x5ff   : > { %2322 = vst [vmem:[#allocation2 + $0x4] sm:$0xf] %v9302_v41  ;;  %v9303_v43 = vpack.c.bf16 %v2313_v42, %v2313_v42  ;;  %v8857_v42 = vld [vmem:[#allocation21] ss:$0 sm:$0xff] }
 0x601   : > { %2323 = vst [vmem:[#allocation2 + $0x8] sm:$0xf] %v9303_v43 }
 0x606   : > { %v2325_v45 = vld [vmem:[#allocation2 + $0x4] sm:$0xf] }
 0x607   : > { %v8837_v46 = vcombine.low %v2324_v44, %v2325_v45 }
 0x608   : > { %v2326_v47 = vld [vmem:[#allocation2 + $0x8] sm:$0xf] }
 0x609   : > { %v8828_v49 = vcombine.low %v2325_v45, %v2326_v47  ;;  %v8838_v50 = vcombine.low %v2326_v47, %v2326_v47  ;;  %v2460_v51 = vshrl.u32 %v8837_v46, 16  ;;  %v2463_v52 = vshll.u32 %v8837_v46, 16  ;;  %v11331_v3 = vld [vmem:[#allocation2 + $0x4] sm:$0xff]  }
 0x60a   : > { %v2597_v6 = vshll.u32 %v11331_v3, 16  ;;  %v2595_v11 = vshrl.u32 %v11331_v3, 16 }
 0x60b   : > { %9932 = vmatmul.mubr.bf16.vlgmr.msra.gmra.mrb[12].mxu0 %v8828_v49  ;;  %v2462_v53 = vrot.slane %v2460_v51, 3  ;;  %v2465_v54 = vrot.slane %v2463_v52, 4  ;;  %v2468_v55 = vshrl.u32 %v8838_v50, 16  ;;  %v2471_v56 = vshll.u32 %v8838_v50, 16 }
 0x60c   : > { %9956 = vmatpush3.bf16.msra.mxu0 %v11320_v48  ;;  %9971 = vmatprep.mubr.msk.bf16.mxu0 %vm12857_vm0, %v12855_v0  ;;  %v2599_v8 = vrot.slane %v2597_v6, 1 }
 0x60d   : > { %9957 = vmatprep.subr.bf16.mxu0 %v12855_v0  ;;  %v2470_v58 = vrot.slane %v2468_v55, 3  ;;  %v2473_v59 = vrot.slane %v2471_v56, 4  ;;  %v2466_v60 = vor.u32 %v2465_v54, %v2462_v53  ;;  %v3105_v54 = vld [vmem:[%s1295_s12] sm:$0xff]  ;;  %v3106_v55 = vld [vmem:[%s1295_s12 + $0x8] sm:$0xff] }
 0x60e   : > { %v2600_v12 = vor.u32 %v2599_v8, %v2595_v11  ;;  %v2719_v56 = vld [vmem:[#allocation2] sm:$0x8] }
 0x60f   : > { %v2474_v61 = vor.u32 %v2473_v59, %v2470_v58  ;;  %v9307_v58 = vpack.c.bf16 %v3106_v55, %v3106_v55 }
 0x610   : > { %9958 = vmatpush3.bf16.msra.mxu0 %v11322_v57  ;;  %v2605_v14 = vsel %vm1803_vm2, %v2600_v12, %v2604_v13  ;;  %v9306_v57 = vpack.c.bf16 %v3105_v54, %v3105_v54  ;;  %v11380_v54 = vld [vmem:[#allocation25 + $0x28] sm:$0xff]  }
 0x611   : > { %v2475_v63 = vsel %vm1667_vm1, %v2466_v60, %v2474_v61  ;;  %9959 = vmatprep.subr.bf16.mxu0 %v12855_v0  ;;  %v11349_v60 = vld [vmem:[#allocation22 + $0x80] sm:$0xff]  }
 0x612   : > { %9952 = vmatmul.mubr.bf16.vlgmr.msra.gmra.mrb[12].mxu1 %v2475_v63 }
 0x613   : > { %9991 = vmatprep.mubr.msk.bf16.mxu1 %vm12857_vm0, %v12855_v0  ;;  %9976 = vmatpush3.bf16.msra.mxu1 %v11333_v15  ;;  %v11355_v15 = vld [vmem:[#allocation22 + $0x90] sm:$0xff]  }
 0x614   : > { %9960 = vmatpush3.bf16.msra.mxu0 %v11325_v62  ;;  %9977 = vmatprep.subr.bf16.mxu1 %v12855_v0 }
 0x615   : > { %9961 = vmatprep.subr.bf16.mxu0 %v12855_v0 }
 0x617   : > { %9978 = vmatpush3.bf16.msra.mxu1 %v11334_v17  ;;  %v11356_v17 = vld [vmem:[#allocation25 + $0x48] sm:$0xff]  }
 0x618   : > { %9962 = vmatpush3.bf16.msra.mxu0 %v11326_v1  ;;  %9979 = vmatprep.subr.bf16.mxu1 %v12855_v0 }
 0x619   : > { %9963 = vmatprep.subr.bf16.mxu0 %v12855_v0 }
 0x61b   : > { %9980 = vmatpush3.bf16.msra.mxu1 %v11336_v18  ;;  %v11357_v18 = vld [vmem:[#allocation22 + $0x98] sm:$0xff]  }
 0x61c   : > { %9964 = vmatpush3.bf16.msra.mxu0 %v11327_v2  ;;  %9981 = vmatprep.subr.bf16.mxu1 %v12855_v0 }
 0x61d   : > { %9965 = vmatprep.subr.bf16.mxu0 %v12855_v0 }
 0x61f   : > { %9982 = vmatpush3.bf16.msra.mxu1 %v11338_v20  ;;  %v11359_v20 = vld [vmem:[#allocation22 + $0xa0] sm:$0xff]  }
 0x620   : > { %9966 = vmatpush3.bf16.msra.mxu0 %v11328_v4  ;;  %9983 = vmatprep.subr.bf16.mxu1 %v12855_v0 }
 0x621   : > { %9967 = vmatprep.subr.bf16.mxu0 %v12855_v0 }
 0x623   : > { %9984 = vmatpush3.bf16.msra.mxu1 %v11340_v22  ;;  %v11361_v22 = vld [vmem:[#allocation22 + $0xa8] sm:$0xff]  }
 0x624   : > { %9968 = vmatpush3.bf16.msra.mxu0 %v11329_v7  ;;  %9985 = vmatprep.subr.bf16.mxu1 %v12855_v0 }
 0x625   : > { %9969 = vmatprep.subr.bf16.mxu0 %v12855_v0 }
 0x627   : > { %9986 = vmatpush3.bf16.msra.mxu1 %v11342_v24 }
 0x628   : > { %9970 = vmatpush3.bf16.msra.mxu0 %v11330_v10  ;;  %9987 = vmatprep.subr.bf16.mxu1 %v12855_v0 }
 0x629   : > { %9995 = vmatprep.subr.bf16.mxu0 %v12855_v0 }
 0x62b   : > { %9972 = vmatmul.mubr.bf16.vlgmr.msra.gmra.mrb[16].mxu0 %v2605_v14  ;;  %9988 = vmatpush3.bf16.msra.mxu1 %v11344_v26  ;;  %v11354_v14 = vld [vmem:[#allocation25 + $0x40] sm:$0xff]   ;;  %v11363_v26 = vld [vmem:[#allocation22 + $0xb0] sm:$0xff]  }
 0x62c   : > { %10011 = vmatprep.mubr.msk.bf16.mxu0 %vm12857_vm0, %v12855_v0  ;;  %9996 = vmatpush3.bf16.msra.mxu0 %v11335_v16 }
 0x62d   : > { %9997 = vmatprep.subr.bf16.mxu0 %v12855_v0  ;;  %9989 = vmatprep.subr.bf16.mxu1 %v12855_v0 }
 0x62f   : > { %9990 = vmatpush3.bf16.msra.mxu1 %v11346_v28 }
 0x630   : > { %9998 = vmatpush3.bf16.msra.mxu0 %v11337_v19  ;;  %10015 = vmatprep.subr.bf16.mxu1 %v12855_v0  ;;  %v11358_v19 = vld [vmem:[#allocation25 + $0x50] sm:$0xff]  }
 0x631   : > { %9999 = vmatprep.subr.bf16.mxu0 %v12855_v0 }
 0x634   : > { %10000 = vmatpush3.bf16.msra.mxu0 %v11339_v21  ;;  %v11360_v21 = vld [vmem:[#allocation25 + $0x58] sm:$0xff]  }
 0x635   : > { %10001 = vmatprep.subr.bf16.mxu0 %v12855_v0 }
 0x638   : > { %10002 = vmatpush3.bf16.msra.mxu0 %v11341_v23  ;;  %v11367_v23 = vld [vmem:[#allocation2 + $0xc] ss:$0 sps:$4 sm:$0x11]  }
 0x639   : > { %10003 = vmatprep.subr.bf16.mxu0 %v12855_v0  ;;  %v2997_v28 = vshll.u32 %v11367_v23, 16  ;;  %v11396_v23 = vld [vmem:[#allocation28 + $0x8] sm:$0xff]  }
 0x63c   : > { %10004 = vmatpush3.bf16.msra.mxu0 %v11343_v25  ;;  %v11362_v25 = vld [vmem:[#allocation25 + $0x60] sm:$0xff]  }
 0x63d   : > { %10005 = vmatprep.subr.bf16.mxu0 %v12855_v0 }
 0x640   : > { %10006 = vmatpush3.bf16.msra.mxu0 %v11345_v27 }
 0x641   : > { %10007 = vmatprep.subr.bf16.mxu0 %v12855_v0 }
 0x644   : > { %10008 = vmatpush3.bf16.msra.mxu0 %v11347_v29  ;;  %v11364_v29 = vld [vmem:[#allocation25 + $0x68] sm:$0xff]  }
 0x645   : > { %10009 = vmatprep.subr.bf16.mxu0 %v12855_v0 }
 0x648   : > { %10010 = vmatpush3.bf16.msra.mxu0 %v11350_v30  ;;  %v11365_v30 = vld [vmem:[#allocation22 + $0xb8] sm:$0xff]  }
 0x649   : > { %10035 = vmatprep.subr.bf16.mxu0 %v12855_v0 }
 0x6de   : > { %v2448_v31 = vpop.f32.mrb[12].mxu0 }
 0x6df   : > { %v9933_v32 = vpop.f32.mrb[13].mxu0 }
 0x6e0   : > { %v2451_v33 = vpop.f32.mrb[14].mxu0 }
 0x6e1   : > { %v9934_v34 = vpop.f32.mrb[15].mxu0 }
 0x6e2   : > { %v11368_v34 = vld [vmem:[#allocation25 + $0x70] sm:$0xff]  }
 0x6e5   : > { %v2559_v35 = vpop.f32.mrb[12].mxu1 }
 0x6e6   : > { %v2560_v36 = vadd.f32 %v2559_v35, %v2448_v31  ;;  %v9953_v37 = vpop.f32.mrb[13].mxu1  ;;  %v11369_v35 = vld [vmem:[#allocation25] sm:$0xff]  }
 0x6e7   : > { %v2562_v38 = vpop.f32.mrb[14].mxu1  ;;  %v11370_v37 = vld [vmem:[#allocation25 + $0x78] sm:$0xff]  }
 0x6e8   : > { %v2563_v39 = vadd.f32 %v2562_v38, %v2451_v33  ;;  %v9954_v40 = vpop.f32.mrb[15].mxu1  ;;  %v2999_v33 = vrot.slane %v2997_v28, 1  ;;  %v11401_v28 = vld [vmem:[#allocation28 + $0x70] sm:$0xff]  }
 0x6e9   : > { %v11371_v40 = vld [vmem:[#allocation25 + $0x8] sm:$0xff]  }
 0x6fe   : > { %v2689_v41 = vpop.f32.mrb[16].mxu0 }
 0x6ff   : > { %v2696_v43 = vadd.f32 %v2689_v41, %v2560_v36  ;;  %v9973_v44 = vpop.f32.mrb[17].mxu0 }
 0x700   : > { %v2692_v45 = vpop.f32.mrb[18].mxu0  ;;  %v11375_v44 = vld [vmem:[#allocation25 + $0x88] sm:$0xff]  }
 0x701   : > { %v2705_v46 = vadd.f32 %v8857_v42, %v2696_v43  ;;  %v2697_v47 = vadd.f32 %v2692_v45, %v2563_v39  ;;  %v9974_v48 = vpop.f32.mrb[19].mxu0  ;;  %v11374_v43 = vld [vmem:[#allocation25 + $0x10] sm:$0xff]   ;;  %v11376_v45 = vld [vmem:[#allocation25 + $0x18] sm:$0xff]  }
 0x702   : > { %v11378_v48 = vld [vmem:[#allocation25 + $0x20] sm:$0xff]  }
 0x703   : > { %v13792_v49 = vmax.f32 %v2705_v46, 0.0  ;;  %v2706_v50 = vadd.f32 %v8857_v42, %v2697_v47  ;;  %v11373_v42 = vld [vmem:[#allocation25 + $0x80] sm:$0xff]   ;;  %v3117_v46 = vld [vmem:[#allocation2] sm:$0x8]  ;;  %v11377_v47 = vld [vmem:[#allocation25 + $0x90] sm:$0xff]  }
 0x705   : > { %v9304_v51 = vpack.c.bf16 %v13792_v49, %v13792_v49  ;;  %v13796_v52 = vmax.f32 %v2706_v50, 0.0 }
 0x707   : > { %2717 = vst [vmem:[#allocation2 + $0x4] sm:$0xf] %v9304_v51  ;;  %v9305_v53 = vpack.c.bf16 %v13796_v52, %v13796_v52 }
 0x709   : > { %2718 = vst [vmem:[#allocation2 + $0x8] sm:$0xf] %v9305_v53  ;;  %v11379_v53 = vld [vmem:[#allocation25 + $0x98] sm:$0xff]  }
 0x70e   : > { %v2720_v59 = vld [vmem:[#allocation2 + $0x4] sm:$0xf] }
 0x70f   : > { %v8869_v61 = vcombine.low %v2719_v56, %v2720_v59 }
 0x710   : > { %v2721_v62 = vld [vmem:[#allocation2 + $0x8] sm:$0xf] }
 0x711   : > { %v13804_v63 = vld [vmem:[#allocation2 + $0x4] sm:$0xff]   ;;  %v8860_v1 = vcombine.low %v2720_v59, %v2721_v62  ;;  %v8870_v2 = vcombine.low %v2721_v62, %v2721_v62  ;;  %v2855_v3 = vshrl.u32 %v8869_v61, 16  ;;  %v2858_v4 = vshll.u32 %v8869_v61, 16  ;;  %v11382_v61 = vld [vmem:[#allocation25 + $0x30] sm:$0xff]  }
 0x712   : > { %3115 = vst [vmem:[#allocation2 + $0x4] sm:$0xf] %v9306_v57  ;;  %3116 = vst [vmem:[#allocation2 + $0x8] sm:$0xf] %v9307_v58  ;;  %v2992_v24 = vshll.u32 %v13804_v63, 16  ;;  %v2990_v31 = vshrl.u32 %v13804_v63, 16 }
 0x713   : > { %9992 = vmatmul.mubr.bf16.vlgmr.msra.gmra.mrb[16].mxu1 %v8860_v1  ;;  %v2857_v5 = vrot.slane %v2855_v3, 3  ;;  %v2860_v6 = vrot.slane %v2858_v4, 4  ;;  %v2863_v7 = vshrl.u32 %v8870_v2, 16  ;;  %v2866_v8 = vshll.u32 %v8870_v2, 16  ;;  %v11381_v59 = vld [vmem:[#allocation25 + $0xa0] sm:$0xff]   ;;  %v11383_v3 = vld [vmem:[#allocation25 + $0xa8] sm:$0xff]  }
 0x714   : > { %10016 = vmatpush3.bf16.msra.mxu1 %v11349_v60  ;;  %10031 = vmatprep.mubr.msk.bf16.mxu1 %vm12857_vm0, %v12855_v0  ;;  %v2994_v27 = vrot.slane %v2992_v24, 1  ;;  %v11390_v4 = vld [vmem:[#allocation2 + $0xc] ss:$0 sps:$4 sm:$0x11]  }
 0x715   : > { %10017 = vmatprep.subr.bf16.mxu1 %v12855_v0  ;;  %v2865_v10 = vrot.slane %v2863_v7, 3  ;;  %v2868_v11 = vrot.slane %v2866_v8, 4  ;;  %v2861_v12 = vor.u32 %v2860_v6, %v2857_v5  ;;  %v11384_v6 = vld [vmem:[#allocation25 + $0x38] sm:$0xff]   ;;  %v11397_v24 = vld [vmem:[#allocation28 + $0x60] sm:$0xff]  }
 0x716   : > { %v2995_v32 = vor.u32 %v2994_v27, %v2990_v31  ;;  %v11400_v27 = vld [vmem:[#allocation28 + $0x18] sm:$0xff]   ;;  %v11404_v31 = vld [vmem:[#allocation28 + $0x28] sm:$0xff]  }
 0x717   : > { %v2869_v13 = vor.u32 %v2868_v11, %v2865_v10 }
 0x718   : > { %10018 = vmatpush3.bf16.msra.mxu1 %v11351_v9  ;;  %v3000_v36 = vsel %vm1803_vm2, %v2995_v32, %v2999_v33  ;;  %v11387_v9 = vld [vmem:[#allocation25 + $0xb0] sm:$0xff]   ;;  %v11408_v33 = vld [vmem:[#allocation28 + $0x38] sm:$0xff]  }
 0x719   : > { %v2870_v16 = vsel %vm1667_vm1, %v2861_v12, %v2869_v13  ;;  %10019 = vmatprep.subr.bf16.mxu1 %v12855_v0  ;;  %v3118_v38 = vld [vmem:[#allocation2 + $0x4] sm:$0xf]  ;;  %v3119_v39 = vld [vmem:[#allocation2 + $0x8] sm:$0xf]  ;;  %v3395_v12 = vshll.u32 %v11390_v4, 16  ;;  %v11406_v32 = vld [vmem:[#allocation28 + $0x30] sm:$0xff]  }
 0x71a   : > { %10012 = vmatmul.mubr.bf16.vlgmr.msra.gmra.mrb[20].mxu0 %v2870_v16  ;;  %v8892_v41 = vcombine.low %v3118_v38, %v3119_v39  ;;  %v8901_v50 = vcombine.low %v3117_v46, %v3118_v38  ;;  %v8902_v51 = vcombine.low %v3119_v39, %v3119_v39  ;;  %v11389_v60 = vld [vmem:[#allocation2 + $0x4] sm:$0xff]  }
 0x71b   : > { %10036 = vmatpush3.bf16.msra.mxu0 %v11354_v14  ;;  %10051 = vmatprep.mubr.msk.bf16.mxu0 %vm12857_vm0, %v12855_v0  ;;  %v3390_v5 = vshll.u32 %v11389_v60, 16  ;;  %v3388_v10 = vshrl.u32 %v11389_v60, 16  ;;  %v11388_v14 = vld [vmem:[#allocation25 + $0xb8] sm:$0xff]   ;;  %v3397_v16 = vrot.slane %v3395_v12, 1 }
 0x71c   : > { %10020 = vmatpush3.bf16.msra.mxu1 %v11355_v15  ;;  %10037 = vmatprep.subr.bf16.mxu0 %v12855_v0  ;;  %v3253_v55 = vshrl.u32 %v8901_v50, 16  ;;  %v3256_v56 = vshll.u32 %v8901_v50, 16  ;;  %v3261_v57 = vshrl.u32 %v8902_v51, 16  ;;  %v3264_v58 = vshll.u32 %v8902_v51, 16 }
 0x71d   : > { %10021 = vmatprep.subr.bf16.mxu1 %v12855_v0  ;;  %v3392_v11 = vrot.slane %v3390_v5, 1 }
 0x71e   : > { %v3255_v62 = vrot.slane %v3253_v55, 3  ;;  %v3258_v63 = vrot.slane %v3256_v56, 4  ;;  %v3263_v1 = vrot.slane %v3261_v57, 3  ;;  %v3266_v2 = vrot.slane %v3264_v58, 4 }
 0x71f   : > { %10038 = vmatpush3.bf16.msra.mxu0 %v11356_v17  ;;  %v3393_v15 = vor.u32 %v3392_v11, %v3388_v10 }
 0x720   : > { %10022 = vmatpush3.bf16.msra.mxu1 %v11357_v18  ;;  %10039 = vmatprep.subr.bf16.mxu0 %v12855_v0  ;;  %v3259_v7 = vor.u32 %v3258_v63, %v3255_v62  ;;  %v3267_v8 = vor.u32 %v3266_v2, %v3263_v1  ;;  %v11391_v18 = vld [vmem:[#allocation28 + $0x40] sm:$0xff]  }
 0x721   : > { %10023 = vmatprep.subr.bf16.mxu1 %v12855_v0  ;;  %v3398_v17 = vsel %vm1803_vm2, %v3393_v15, %v3397_v16  ;;  %v3512_v15 = vld [vmem:[#allocation2] sm:$0x8] }
 0x722   : > { %v3268_v13 = vsel %vm1667_vm1, %v3259_v7, %v3267_v8 }
 0x723   : > { %10040 = vmatpush3.bf16.msra.mxu0 %v11358_v19  ;;  %v11392_v19 = vld [vmem:[#allocation28 + $0x48] sm:$0xff]  }
 0x724   : > { %10024 = vmatpush3.bf16.msra.mxu1 %v11359_v20  ;;  %10041 = vmatprep.subr.bf16.mxu0 %v12855_v0  ;;  %v11393_v20 = vld [vmem:[#allocation28 + $0x50] sm:$0xff]  }
 0x725   : > { %10025 = vmatprep.subr.bf16.mxu1 %v12855_v0 }
 0x727   : > { %10042 = vmatpush3.bf16.msra.mxu0 %v11360_v21  ;;  %v11394_v21 = vld [vmem:[#allocation28] sm:$0xff]  }
 0x728   : > { %10026 = vmatpush3.bf16.msra.mxu1 %v11361_v22  ;;  %10043 = vmatprep.subr.bf16.mxu0 %v12855_v0  ;;  %v11395_v22 = vld [vmem:[#allocation28 + $0x58] sm:$0xff]  }
 0x729   : > { %10027 = vmatprep.subr.bf16.mxu1 %v12855_v0 }
 0x72b   : > { %10044 = vmatpush3.bf16.msra.mxu0 %v11362_v25  ;;  %v11398_v25 = vld [vmem:[#allocation28 + $0x10] sm:$0xff]  }
 0x72c   : > { %10028 = vmatpush3.bf16.msra.mxu1 %v11363_v26  ;;  %10045 = vmatprep.subr.bf16.mxu0 %v12855_v0  ;;  %v11399_v26 = vld [vmem:[#allocation28 + $0x68] sm:$0xff]  }
 0x72d   : > { %10029 = vmatprep.subr.bf16.mxu1 %v12855_v0 }
 0x72f   : > { %10046 = vmatpush3.bf16.msra.mxu0 %v11364_v29  ;;  %v11402_v29 = vld [vmem:[#allocation28 + $0x20] sm:$0xff]  }
 0x730   : > { %10030 = vmatpush3.bf16.msra.mxu1 %v11365_v30  ;;  %10047 = vmatprep.subr.bf16.mxu0 %v12855_v0  ;;  %v11403_v30 = vld [vmem:[#allocation28 + $0x78] sm:$0xff]  }
 0x731   : > { %10055 = vmatprep.subr.bf16.mxu1 %v12855_v0 }
 0x733   : > { %10032 = vmatmul.mubr.bf16.vlgmr.msra.gmra.mrb[20].mxu1 %v3000_v36  ;;  %10048 = vmatpush3.bf16.msra.mxu0 %v11368_v34 }
 0x734   : > { %10056 = vmatpush3.bf16.msra.mxu1 %v11369_v35  ;;  %10049 = vmatprep.subr.bf16.mxu0 %v12855_v0 }
 0x735   : > { %10057 = vmatprep.subr.bf16.mxu1 %v12855_v0  ;;  %10071 = vmatprep.mubr.msk.bf16.mxu1 %vm12857_vm0, %v12855_v0 }
 0x737   : > { %10050 = vmatpush3.bf16.msra.mxu0 %v11370_v37 }
 0x738   : > { %10058 = vmatpush3.bf16.msra.mxu1 %v11371_v40  ;;  %10075 = vmatprep.subr.bf16.mxu0 %v12855_v0 }
 0x739   : > { %10059 = vmatprep.subr.bf16.mxu1 %v12855_v0 }
 0x73a   : > { %10052 = vmatmul.mubr.bf16.vlgmr.msra.gmra.mrb[24].mxu0 %v8892_v41 }
 0x73b   : > { %10076 = vmatpush3.bf16.msra.mxu0 %v11373_v42  ;;  %10091 = vmatprep.mubr.msk.bf16.mxu0 %vm12857_vm0, %v12855_v0 }
 0x73c   : > { %10060 = vmatpush3.bf16.msra.mxu1 %v11374_v43  ;;  %10077 = vmatprep.subr.bf16.mxu0 %v12855_v0 }
 0x73d   : > { %10061 = vmatprep.subr.bf16.mxu1 %v12855_v0 }
 0x73f   : > { %10078 = vmatpush3.bf16.msra.mxu0 %v11375_v44 }
 0x740   : > { %10062 = vmatpush3.bf16.msra.mxu1 %v11376_v45  ;;  %10079 = vmatprep.subr.bf16.mxu0 %v12855_v0  ;;  %v8889_v45 = vld [vmem:[#allocation24] ss:$0 sm:$0xff] }
 0x741   : > { %10063 = vmatprep.subr.bf16.mxu1 %v12855_v0 }
 0x743   : > { %10080 = vmatpush3.bf16.msra.mxu0 %v11377_v47 }
 0x744   : > { %10064 = vmatpush3.bf16.msra.mxu1 %v11378_v48  ;;  %10081 = vmatprep.subr.bf16.mxu0 %v12855_v0 }
 0x745   : > { %10065 = vmatprep.subr.bf16.mxu1 %v12855_v0 }
 0x747   : > { %10082 = vmatpush3.bf16.msra.mxu0 %v11379_v53 }
 0x748   : > { %10066 = vmatpush3.bf16.msra.mxu1 %v11380_v54  ;;  %10083 = vmatprep.subr.bf16.mxu0 %v12855_v0 }
 0x749   : > { %10067 = vmatprep.subr.bf16.mxu1 %v12855_v0 }
 0x74b   : > { %10084 = vmatpush3.bf16.msra.mxu0 %v11381_v59 }
 0x74c   : > { %10068 = vmatpush3.bf16.msra.mxu1 %v11382_v61  ;;  %10085 = vmatprep.subr.bf16.mxu0 %v12855_v0 }
 0x74d   : > { %10069 = vmatprep.subr.bf16.mxu1 %v12855_v0 }
 0x74f   : > { %10086 = vmatpush3.bf16.msra.mxu0 %v11383_v3  ;;  %v8921_v3 = vld [vmem:[#allocation27] ss:$0 sm:$0xff] }
 0x750   : > { %10070 = vmatpush3.bf16.msra.mxu1 %v11384_v6  ;;  %10087 = vmatprep.subr.bf16.mxu0 %v12855_v0 }
 0x751   : > { %10095 = vmatprep.subr.bf16.mxu1 %v12855_v0 }
 0x753   : > { %10072 = vmatmul.mubr.bf16.vlgmr.msra.gmra.mrb[24].mxu1 %v3268_v13  ;;  %10088 = vmatpush3.bf16.msra.mxu0 %v11387_v9 }
 0x754   : > { %10089 = vmatprep.subr.bf16.mxu0 %v12855_v0  ;;  %10111 = vmatprep.mubr.msk.bf16.mxu1 %vm12857_vm0, %v12855_v0 }
 0x755   : > { %10096 = vmatpush3.bf16.msra.mxu1 %v11391_v18 }
 0x756   : > { %10097 = vmatprep.subr.bf16.mxu1 %v12855_v0 }
 0x757   : > { %10090 = vmatpush3.bf16.msra.mxu0 %v11388_v14 }
 0x758   : > { %10115 = vmatprep.subr.bf16.mxu0 %v12855_v0 }
 0x759   : > { %10098 = vmatpush3.bf16.msra.mxu1 %v11392_v19  ;;  %v11407_v19 = vld [vmem:[#allocation28 + $0x80] sm:$0xff]  }
 0x75a   : > { %10092 = vmatmul.mubr.bf16.vlgmr.msra.gmra.mrb[28].mxu0 %v3398_v17  ;;  %10099 = vmatprep.subr.bf16.mxu1 %v12855_v0 }
 0x75b   : > { %10131 = vmatprep.mubr.msk.bf16.mxu0 %vm12857_vm0, %v12855_v0  ;;  %10116 = vmatpush3.bf16.msra.mxu0 %v11394_v21 }
 0x75c   : > { %10117 = vmatprep.subr.bf16.mxu0 %v12855_v0 }
 0x75d   : > { %10100 = vmatpush3.bf16.msra.mxu1 %v11393_v20 }
 0x75e   : > { %10101 = vmatprep.subr.bf16.mxu1 %v12855_v0 }
 0x75f   : > { %10118 = vmatpush3.bf16.msra.mxu0 %v11396_v23 }
 0x760   : > { %10119 = vmatprep.subr.bf16.mxu0 %v12855_v0 }
 0x761   : > { %10102 = vmatpush3.bf16.msra.mxu1 %v11395_v22 }
 0x762   : > { %10103 = vmatprep.subr.bf16.mxu1 %v12855_v0 }
 0x763   : > { %10120 = vmatpush3.bf16.msra.mxu0 %v11398_v25 }
 0x764   : > { %10121 = vmatprep.subr.bf16.mxu0 %v12855_v0 }
 0x765   : > { %10104 = vmatpush3.bf16.msra.mxu1 %v11397_v24 }
 0x766   : > { %10105 = vmatprep.subr.bf16.mxu1 %v12855_v0 }
 0x767   : > { %10122 = vmatpush3.bf16.msra.mxu0 %v11400_v27 }
 0x768   : > { %10123 = vmatprep.subr.bf16.mxu0 %v12855_v0 }
 0x769   : > { %10106 = vmatpush3.bf16.msra.mxu1 %v11399_v26 }
 0x76a   : > { %10107 = vmatprep.subr.bf16.mxu1 %v12855_v0 }
 0x76b   : > { %10124 = vmatpush3.bf16.msra.mxu0 %v11402_v29 }
 0x76c   : > { %10125 = vmatprep.subr.bf16.mxu0 %v12855_v0 }
 0x76d   : > { %10108 = vmatpush3.bf16.msra.mxu1 %v11401_v28  ;;  %v11409_v28 = vld [vmem:[#allocation28 + $0x88] sm:$0xff]  }
 0x76e   : > { %10109 = vmatprep.subr.bf16.mxu1 %v12855_v0 }
 0x76f   : > { %10126 = vmatpush3.bf16.msra.mxu0 %v11404_v31 }
 0x770   : > { %10127 = vmatprep.subr.bf16.mxu0 %v12855_v0 }
 0x771   : > { %10110 = vmatpush3.bf16.msra.mxu1 %v11403_v30 }
 0x772   : > { %10135 = vmatprep.subr.bf16.mxu1 %v12855_v0 }
 0x773   : > { %10128 = vmatpush3.bf16.msra.mxu0 %v11406_v32 }
 0x774   : > { %10129 = vmatprep.subr.bf16.mxu0 %v12855_v0 }
 0x777   : > { %10130 = vmatpush3.bf16.msra.mxu0 %v11408_v33  ;;  %v11412_v33 = vld [vmem:[#allocation28 + $0x90] sm:$0xff]  }
 0x778   : > { %10155 = vmatprep.subr.bf16.mxu0 %v12855_v0 }
 0x7e6   : > { %v2843_v34 = vpop.f32.mrb[16].mxu1 }
 0x7e7   : > { %v9993_v35 = vpop.f32.mrb[17].mxu1 }
 0x7e8   : > { %v2846_v36 = vpop.f32.mrb[18].mxu1  ;;  %v11413_v35 = vld [vmem:[#allocation28 + $0x98] sm:$0xff]  }
 0x7e9   : > { %v9994_v37 = vpop.f32.mrb[19].mxu1 }
 0x7ed   : > { %v2954_v38 = vpop.f32.mrb[20].mxu0 }
 0x7ee   : > { %v2955_v39 = vadd.f32 %v2954_v38, %v2843_v34  ;;  %v10013_v40 = vpop.f32.mrb[21].mxu0  ;;  %v11415_v38 = vld [vmem:[#allocation28 + $0xa8] sm:$0xff]  }
 0x7ef   : > { %v2957_v41 = vpop.f32.mrb[22].mxu0 }
 0x7f0   : > { %v2958_v42 = vadd.f32 %v2957_v41, %v2846_v36  ;;  %v10014_v43 = vpop.f32.mrb[23].mxu0  ;;  %v11414_v36 = vld [vmem:[#allocation28 + $0xa0] sm:$0xff]   ;;  %v11416_v41 = vld [vmem:[#allocation28 + $0xb0] sm:$0xff]  }
 0x806   : > { %v3084_v44 = vpop.f32.mrb[20].mxu1 }
 0x807   : > { %v3091_v46 = vadd.f32 %v3084_v44, %v2955_v39  ;;  %v10033_v47 = vpop.f32.mrb[21].mxu1  ;;  %v11419_v39 = vld [vmem:[#allocation2 + $0xc] ss:$0 sps:$4 sm:$0x11]   ;;  %v11417_v44 = vld [vmem:[#allocation28 + $0xb8] sm:$0xff]  }
 0x808   : > { %v3087_v48 = vpop.f32.mrb[22].mxu1  ;;  %v3790_v43 = vshll.u32 %v11419_v39, 16 }
 0x809   : > { %v3100_v50 = vadd.f32 %v8889_v45, %v3091_v46  ;;  %v3092_v51 = vadd.f32 %v3087_v48, %v2958_v42  ;;  %v10034_v53 = vpop.f32.mrb[23].mxu1 }
 0x80a   : > { %v3792_v47 = vrot.slane %v3790_v43, 1  ;;  %v11421_v53 = vld [vmem:[#allocation31 + $0x48] sm:$0xff]  }
 0x80b   : > { %3103 = vst.msk [vmem:[#allocation3] sm:$0xff] %vm3102_vm3, %v3100_v50  ;;  %v3101_v54 = vadd.f32 %v8889_v45, %v3092_v51  ;;  %v11420_v50 = vld [vmem:[#allocation31 + $0x40] sm:$0xff]  }
 0x80c   : > { %v11423_v51 = vld [vmem:[#allocation31] sm:$0xff]  }
 0x80d   : > { %3104 = vst.msk [vmem:[#allocation3 + $0x8] sm:$0xff] %vm3102_vm3, %v3101_v54  ;;  %v3241_v55 = vpop.f32.mrb[24].mxu0  ;;  %v11422_v54 = vld [vmem:[#allocation31 + $0x50] sm:$0xff]  }
 0x80e   : > { %v10053_v56 = vpop.f32.mrb[25].mxu0 }
 0x80f   : > { %v3244_v57 = vpop.f32.mrb[26].mxu0  ;;  %v11425_v56 = vld [vmem:[#allocation31 + $0x8] sm:$0xff]  }
 0x810   : > { %v10054_v58 = vpop.f32.mrb[27].mxu0 }
 0x811   : > { %v11427_v58 = vld [vmem:[#allocation31 + $0x10] sm:$0xff]  }
 0x826   : > { %v3352_v59 = vpop.f32.mrb[24].mxu1 }
 0x827   : > { %v3353_v60 = vadd.f32 %v3352_v59, %v3241_v55  ;;  %v10073_v61 = vpop.f32.mrb[25].mxu1  ;;  %v11424_v55 = vld [vmem:[#allocation31 + $0x58] sm:$0xff]   ;;  %v11428_v59 = vld [vmem:[#allocation31 + $0x68] sm:$0xff]  }
 0x828   : > { %v3355_v62 = vpop.f32.mrb[26].mxu1  ;;  %v11430_v61 = vld [vmem:[#allocation31 + $0x70] sm:$0xff]  }
 0x829   : > { %v3356_v63 = vadd.f32 %v3355_v62, %v3244_v57  ;;  %v10074_v1 = vpop.f32.mrb[27].mxu1  ;;  %v11426_v57 = vld [vmem:[#allocation31 + $0x60] sm:$0xff]  }
 0x82a   : > { %v11431_v62 = vld [vmem:[#allocation31 + $0x20] sm:$0xff]   ;;  %v11433_v1 = vld [vmem:[#allocation31 + $0x28] sm:$0xff]  }
 0x82d   : > { %v3482_v2 = vpop.f32.mrb[28].mxu0 }
 0x82e   : > { %v3489_v4 = vadd.f32 %v3482_v2, %v3353_v60  ;;  %v10093_v5 = vpop.f32.mrb[29].mxu0  ;;  %v11429_v60 = vld [vmem:[#allocation31 + $0x18] sm:$0xff]   ;;  %v11435_v2 = vld [vmem:[#allocation31 + $0x30] sm:$0xff]  }
 0x82f   : > { %v3485_v6 = vpop.f32.mrb[30].mxu0 }
 0x830   : > { %v3498_v7 = vadd.f32 %v8921_v3, %v3489_v4  ;;  %v3490_v8 = vadd.f32 %v3485_v6, %v3356_v63  ;;  %v10094_v9 = vpop.f32.mrb[31].mxu0  ;;  %v11432_v63 = vld [vmem:[#allocation31 + $0x78] sm:$0xff]  }
 0x832   : > { %v3500_v10 = vmax.f32 %v3498_v7, 0.0  ;;  %v3499_v11 = vadd.f32 %v8921_v3, %v3490_v8  ;;  %v11437_v3 = vld [vmem:[#allocation31 + $0x38] sm:$0xff]  }
 0x834   : > { %v9308_v12 = vpack.c.bf16 %v3500_v10, %v3500_v10  ;;  %v3501_v13 = vmax.f32 %v3499_v11, 0.0 }
 0x836   : > { %3510 = vst [vmem:[#allocation2 + $0x4] sm:$0xf] %v9308_v12  ;;  %v9309_v14 = vpack.c.bf16 %v3501_v13, %v3501_v13 }
 0x838   : > { %3511 = vst [vmem:[#allocation2 + $0x8] sm:$0xf] %v9309_v14 }
 0x83d   : > { %v3513_v16 = vld [vmem:[#allocation2 + $0x4] sm:$0xf] }
 0x83e   : > { %v8933_v17 = vcombine.low %v3512_v15, %v3513_v16  ;;  %v8953_v15 = vld [vmem:[#allocation30] ss:$0 sm:$0xff] }
 0x83f   : > { %v3514_v18 = vld [vmem:[#allocation2 + $0x8] sm:$0xf] }
 0x840   : > { %v8924_v20 = vcombine.low %v3513_v16, %v3514_v18  ;;  %v8934_v21 = vcombine.low %v3514_v18, %v3514_v18  ;;  %v3648_v22 = vshrl.u32 %v8933_v17, 16  ;;  %v3651_v23 = vshll.u32 %v8933_v17, 16  ;;  %v11418_v37 = vld [vmem:[#allocation2 + $0x4] sm:$0xff]  }
 0x841   : > { %v3785_v40 = vshll.u32 %v11418_v37, 16  ;;  %v3783_v45 = vshrl.u32 %v11418_v37, 16 }
 0x842   : > { %10112 = vmatmul.mubr.bf16.vlgmr.msra.gmra.mrb[28].mxu1 %v8924_v20  ;;  %v3650_v24 = vrot.slane %v3648_v22, 3  ;;  %v3653_v25 = vrot.slane %v3651_v23, 4  ;;  %v3656_v26 = vshrl.u32 %v8934_v21, 16  ;;  %v3659_v27 = vshll.u32 %v8934_v21, 16 }
 0x843   : > { %10136 = vmatpush3.bf16.msra.mxu1 %v11407_v19  ;;  %10151 = vmatprep.mubr.msk.bf16.mxu1 %vm12857_vm0, %v12855_v0  ;;  %v3787_v42 = vrot.slane %v3785_v40, 1  ;;  %v11438_v40 = vld [vmem:[#allocation31 + $0x88] sm:$0xff]  }
 0x844   : > { %10137 = vmatprep.subr.bf16.mxu1 %v12855_v0  ;;  %v3658_v29 = vrot.slane %v3656_v26, 3  ;;  %v3661_v30 = vrot.slane %v3659_v27, 4  ;;  %v3654_v31 = vor.u32 %v3653_v25, %v3650_v24  ;;  %v3907_v27 = vld [vmem:[#allocation2] sm:$0x8] }
 0x845   : > { %v3788_v46 = vor.u32 %v3787_v42, %v3783_v45  ;;  %v11441_v45 = vld [vmem:[#allocation31 + $0x90] sm:$0xff]  }
 0x846   : > { %v3662_v32 = vor.u32 %v3661_v30, %v3658_v29 }
 0x847   : > { %10138 = vmatpush3.bf16.msra.mxu1 %v11409_v28  ;;  %v3793_v48 = vsel %vm1803_vm2, %v3788_v46, %v3792_v47  ;;  %v11442_v47 = vld [vmem:[#allocation31 + $0x98] sm:$0xff]  }
 0x848   : > { %v3663_v34 = vsel %vm1667_vm1, %v3654_v31, %v3662_v32  ;;  %10139 = vmatprep.subr.bf16.mxu1 %v12855_v0  ;;  %v11436_v31 = vld [vmem:[#allocation31 + $0x80] sm:$0xff]  }
 0x849   : > { %10132 = vmatmul.mubr.bf16.vlgmr.msra.gmra.mrb[32].mxu0 %v3663_v34 }
 0x84a   : > { %10171 = vmatprep.mubr.msk.bf16.mxu0 %vm12857_vm0, %v12855_v0  ;;  %10156 = vmatpush3.bf16.msra.mxu0 %v11420_v50 }
 0x84b   : > { %10140 = vmatpush3.bf16.msra.mxu1 %v11412_v33  ;;  %10157 = vmatprep.subr.bf16.mxu0 %v12855_v0 }
 0x84c   : > { %10141 = vmatprep.subr.bf16.mxu1 %v12855_v0 }
 0x84e   : > { %10158 = vmatpush3.bf16.msra.mxu0 %v11421_v53  ;;  %v11448_v53 = vld [vmem:[#allocation2 + $0xc] ss:$0 sps:$4 sm:$0x11]  }
 0x84f   : > { %10142 = vmatpush3.bf16.msra.mxu1 %v11413_v35  ;;  %10159 = vmatprep.subr.bf16.mxu0 %v12855_v0 }
 0x850   : > { %10143 = vmatprep.subr.bf16.mxu1 %v12855_v0 }
 0x852   : > { %10160 = vmatpush3.bf16.msra.mxu0 %v11422_v54 }
 0x853   : > { %10144 = vmatpush3.bf16.msra.mxu1 %v11414_v36  ;;  %10161 = vmatprep.subr.bf16.mxu0 %v12855_v0 }
 0x854   : > { %10145 = vmatprep.subr.bf16.mxu1 %v12855_v0 }
 0x856   : > { %10162 = vmatpush3.bf16.msra.mxu0 %v11424_v55  ;;  %v11445_v55 = vld [vmem:[#allocation31 + $0xb0] sm:$0xff]  }
 0x857   : > { %10146 = vmatpush3.bf16.msra.mxu1 %v11415_v38  ;;  %10163 = vmatprep.subr.bf16.mxu0 %v12855_v0 }
 0x858   : > { %10147 = vmatprep.subr.bf16.mxu1 %v12855_v0 }
 0x85a   : > { %10164 = vmatpush3.bf16.msra.mxu0 %v11426_v57  ;;  %v4185_v57 = vshll.u32 %v11448_v53, 16 }
 0x85b   : > { %10148 = vmatpush3.bf16.msra.mxu1 %v11416_v41  ;;  %10165 = vmatprep.subr.bf16.mxu0 %v12855_v0 }
 0x85c   : > { %10149 = vmatprep.subr.bf16.mxu1 %v12855_v0 }
 0x85e   : > { %10166 = vmatpush3.bf16.msra.mxu0 %v11428_v59 }
 0x85f   : > { %10150 = vmatpush3.bf16.msra.mxu1 %v11417_v44  ;;  %10167 = vmatprep.subr.bf16.mxu0 %v12855_v0 }
 0x860   : > { %10175 = vmatprep.subr.bf16.mxu1 %v12855_v0 }
 0x862   : > { %10152 = vmatmul.mubr.bf16.vlgmr.msra.gmra.mrb[32].mxu1 %v3793_v48  ;;  %10168 = vmatpush3.bf16.msra.mxu0 %v11430_v61  ;;  %v11443_v48 = vld [vmem:[#allocation31 + $0xa0] sm:$0xff]   ;;  %v4187_v61 = vrot.slane %v4185_v57, 1 }
 0x863   : > { %10191 = vmatprep.mubr.msk.bf16.mxu1 %vm12857_vm0, %v12855_v0  ;;  %10176 = vmatpush3.bf16.msra.mxu1 %v11423_v51  ;;  %v11444_v51 = vld [vmem:[#allocation31 + $0xa8] sm:$0xff]  }
 0x864   : > { %10177 = vmatprep.subr.bf16.mxu1 %v12855_v0  ;;  %10169 = vmatprep.subr.bf16.mxu0 %v12855_v0 }
 0x866   : > { %10170 = vmatpush3.bf16.msra.mxu0 %v11432_v63  ;;  %v11449_v63 = vld [vmem:[#allocation34 + $0x40] sm:$0xff]  }
 0x867   : > { %10178 = vmatpush3.bf16.msra.mxu1 %v11425_v56  ;;  %10195 = vmatprep.subr.bf16.mxu0 %v12855_v0 }
 0x868   : > { %10179 = vmatprep.subr.bf16.mxu1 %v12855_v0 }
 0x86b   : > { %10180 = vmatpush3.bf16.msra.mxu1 %v11427_v58  ;;  %v11446_v58 = vld [vmem:[#allocation31 + $0xb8] sm:$0xff]  }
 0x86c   : > { %10181 = vmatprep.subr.bf16.mxu1 %v12855_v0 }
 0x86f   : > { %10182 = vmatpush3.bf16.msra.mxu1 %v11429_v60 }
 0x870   : > { %10183 = vmatprep.subr.bf16.mxu1 %v12855_v0 }
 0x873   : > { %10184 = vmatpush3.bf16.msra.mxu1 %v11431_v62 }
 0x874   : > { %10185 = vmatprep.subr.bf16.mxu1 %v12855_v0 }
 0x877   : > { %10186 = vmatpush3.bf16.msra.mxu1 %v11433_v1  ;;  %v11451_v1 = vld [vmem:[#allocation34] sm:$0xff]  }
 0x878   : > { %10187 = vmatprep.subr.bf16.mxu1 %v12855_v0 }
 0x87b   : > { %10188 = vmatpush3.bf16.msra.mxu1 %v11435_v2  ;;  %v11450_v2 = vld [vmem:[#allocation34 + $0x48] sm:$0xff]  }
 0x87c   : > { %10189 = vmatprep.subr.bf16.mxu1 %v12855_v0 }
 0x87f   : > { %10190 = vmatpush3.bf16.msra.mxu1 %v11437_v3  ;;  %v11452_v3 = vld [vmem:[#allocation34 + $0x50] sm:$0xff]  }
 0x880   : > { %10215 = vmatprep.subr.bf16.mxu1 %v12855_v0 }
 0x915   : > { %v3636_v4 = vpop.f32.mrb[28].mxu1 }
 0x916   : > { %v10113_v5 = vpop.f32.mrb[29].mxu1 }
 0x917   : > { %v3639_v6 = vpop.f32.mrb[30].mxu1  ;;  %v11454_v5 = vld [vmem:[#allocation34 + $0x58] sm:$0xff]  }
 0x918   : > { %v10114_v7 = vpop.f32.mrb[31].mxu1 }
 0x919   : > { %v11456_v7 = vld [vmem:[#allocation34 + $0x60] sm:$0xff]  }
 0x91c   : > { %v3747_v8 = vpop.f32.mrb[32].mxu0 }
 0x91d   : > { %v3748_v9 = vadd.f32 %v3747_v8, %v3636_v4  ;;  %v10133_v10 = vpop.f32.mrb[33].mxu0  ;;  %v11453_v4 = vld [vmem:[#allocation34 + $0x8] sm:$0xff]   ;;  %v11457_v8 = vld [vmem:[#allocation34 + $0x18] sm:$0xff]  }
 0x91e   : > { %v3750_v11 = vpop.f32.mrb[34].mxu0  ;;  %v11459_v10 = vld [vmem:[#allocation34 + $0x20] sm:$0xff]  }
 0x91f   : > { %v3751_v12 = vadd.f32 %v3750_v11, %v3639_v6  ;;  %v10134_v13 = vpop.f32.mrb[35].mxu0  ;;  %v11455_v6 = vld [vmem:[#allocation34 + $0x10] sm:$0xff]  }
 0x920   : > { %v11460_v11 = vld [vmem:[#allocation34 + $0x70] sm:$0xff]   ;;  %v11462_v13 = vld [vmem:[#allocation34 + $0x78] sm:$0xff]  }
 0x935   : > { %v3877_v14 = vpop.f32.mrb[32].mxu1 }
 0x936   : > { %v3884_v16 = vadd.f32 %v3877_v14, %v3748_v9  ;;  %v10153_v17 = vpop.f32.mrb[33].mxu1  ;;  %v11458_v9 = vld [vmem:[#allocation34 + $0x68] sm:$0xff]   ;;  %v11463_v14 = vld [vmem:[#allocation34 + $0x30] sm:$0xff]  }
 0x937   : > { %v3880_v18 = vpop.f32.mrb[34].mxu1 }
 0x938   : > { %v3893_v19 = vadd.f32 %v8953_v15, %v3884_v16  ;;  %v3885_v20 = vadd.f32 %v3880_v18, %v3751_v12  ;;  %v10154_v21 = vpop.f32.mrb[35].mxu1  ;;  %v11461_v12 = vld [vmem:[#allocation34 + $0x28] sm:$0xff]  }
 0x93a   : > { %v3895_v22 = vmax.f32 %v3893_v19, 0.0  ;;  %v3894_v23 = vadd.f32 %v8953_v15, %v3885_v20  ;;  %v11466_v15 = vld [vmem:[#allocation34 + $0x38] sm:$0xff]  }
 0x93c   : > { %v9310_v24 = vpack.c.bf16 %v3895_v22, %v3895_v22  ;;  %v3896_v25 = vmax.f32 %v3894_v23, 0.0 }
 0x93e   : > { %3905 = vst [vmem:[#allocation2 + $0x4] sm:$0xf] %v9310_v24  ;;  %v9311_v26 = vpack.c.bf16 %v3896_v25, %v3896_v25 }
 0x940   : > { %3906 = vst [vmem:[#allocation2 + $0x8] sm:$0xf] %v9311_v26 }
 0x945   : > { %v3908_v28 = vld [vmem:[#allocation2 + $0x4] sm:$0xf] }
 0x946   : > { %v8965_v29 = vcombine.low %v3907_v27, %v3908_v28  ;;  %v8985_v27 = vld [vmem:[#allocation33] ss:$0 sm:$0xff] }
 0x947   : > { %v3909_v30 = vld [vmem:[#allocation2 + $0x8] sm:$0xf] }
 0x948   : > { %v8956_v32 = vcombine.low %v3908_v28, %v3909_v30  ;;  %v8966_v33 = vcombine.low %v3909_v30, %v3909_v30  ;;  %v4043_v34 = vshrl.u32 %v8965_v29, 16  ;;  %v4046_v35 = vshll.u32 %v8965_v29, 16  ;;  %v11447_v50 = vld [vmem:[#allocation2 + $0x4] sm:$0xff]  }
 0x949   : > { %v4180_v54 = vshll.u32 %v11447_v50, 16  ;;  %v4178_v59 = vshrl.u32 %v11447_v50, 16 }
 0x94a   : > { %10172 = vmatmul.mubr.bf16.vlgmr.msra.gmra.mrb[36].mxu0 %v8956_v32  ;;  %v4045_v36 = vrot.slane %v4043_v34, 3  ;;  %v4048_v37 = vrot.slane %v4046_v35, 4  ;;  %v4051_v38 = vshrl.u32 %v8966_v33, 16  ;;  %v4054_v39 = vshll.u32 %v8966_v33, 16 }
 0x94b   : > { %10196 = vmatpush3.bf16.msra.mxu0 %v11436_v31  ;;  %10211 = vmatprep.mubr.msk.bf16.mxu0 %vm12857_vm0, %v12855_v0  ;;  %v4182_v56 = vrot.slane %v4180_v54, 1 }
 0x94c   : > { %10197 = vmatprep.subr.bf16.mxu0 %v12855_v0  ;;  %v4053_v41 = vrot.slane %v4051_v38, 3  ;;  %v4056_v42 = vrot.slane %v4054_v39, 4  ;;  %v4049_v43 = vor.u32 %v4048_v37, %v4045_v36  ;;  %v4700_v39 = vld [vmem:[%s1304_s24] sm:$0xff] }
 0x94d   : > { %v4183_v60 = vor.u32 %v4182_v56, %v4178_v59  ;;  %v11467_v59 = vld [vmem:[#allocation34 + $0x88] sm:$0xff]  }
 0x94e   : > { %v4057_v44 = vor.u32 %v4056_v42, %v4053_v41  ;;  %v4306_v41 = vld [vmem:[#allocation2] sm:$0x8]  ;;  %v9314_v42 = vpack.c.bf16 %v4700_v39, %v4700_v39  ;;  %v11486_v39 = vld [vmem:[#allocation37 + $0x78] sm:$0xff]  }
 0x94f   : > { %10198 = vmatpush3.bf16.msra.mxu0 %v11438_v40  ;;  %v4188_v62 = vsel %vm1803_vm2, %v4183_v60, %v4187_v61  ;;  %v4701_v40 = vld [vmem:[%s1304_s24 + $0x8] sm:$0xff] }
 0x950   : > { %v4058_v46 = vsel %vm1667_vm1, %v4049_v43, %v4057_v44  ;;  %10199 = vmatprep.subr.bf16.mxu0 %v12855_v0  ;;  %v9315_v43 = vpack.c.bf16 %v4701_v40, %v4701_v40 }
 0x951   : > { %10192 = vmatmul.mubr.bf16.vlgmr.msra.gmra.mrb[36].mxu1 %v4058_v46 }
 0x952   : > { %10231 = vmatprep.mubr.msk.bf16.mxu1 %vm12857_vm0, %v12855_v0  ;;  %10216 = vmatpush3.bf16.msra.mxu1 %v11449_v63 }
 0x953   : > { %10200 = vmatpush3.bf16.msra.mxu0 %v11441_v45  ;;  %10217 = vmatprep.subr.bf16.mxu1 %v12855_v0  ;;  %v11465_v45 = vld [vmem:[#allocation34 + $0x80] sm:$0xff]  }
 0x954   : > { %10201 = vmatprep.subr.bf16.mxu0 %v12855_v0 }
 0x956   : > { %10218 = vmatpush3.bf16.msra.mxu1 %v11450_v2  ;;  %v11471_v2 = vld [vmem:[#allocation34 + $0x90] sm:$0xff]  }
 0x957   : > { %10202 = vmatpush3.bf16.msra.mxu0 %v11442_v47  ;;  %10219 = vmatprep.subr.bf16.mxu1 %v12855_v0 }
 0x958   : > { %10203 = vmatprep.subr.bf16.mxu0 %v12855_v0 }
 0x95a   : > { %10220 = vmatpush3.bf16.msra.mxu1 %v11452_v3 }
 0x95b   : > { %10204 = vmatpush3.bf16.msra.mxu0 %v11443_v48  ;;  %10221 = vmatprep.subr.bf16.mxu1 %v12855_v0 }
 0x95c   : > { %10205 = vmatprep.subr.bf16.mxu0 %v12855_v0 }
 0x95e   : > { %10222 = vmatpush3.bf16.msra.mxu1 %v11454_v5  ;;  %v11473_v5 = vld [vmem:[#allocation34 + $0x98] sm:$0xff]  }
 0x95f   : > { %10206 = vmatpush3.bf16.msra.mxu0 %v11444_v51  ;;  %10223 = vmatprep.subr.bf16.mxu1 %v12855_v0 }
 0x960   : > { %10207 = vmatprep.subr.bf16.mxu0 %v12855_v0 }
 0x962   : > { %10224 = vmatpush3.bf16.msra.mxu1 %v11456_v7  ;;  %v11475_v7 = vld [vmem:[#allocation34 + $0xa0] sm:$0xff]  }
 0x963   : > { %10208 = vmatpush3.bf16.msra.mxu0 %v11445_v55  ;;  %10225 = vmatprep.subr.bf16.mxu1 %v12855_v0 }
 0x964   : > { %10209 = vmatprep.subr.bf16.mxu0 %v12855_v0 }
 0x966   : > { %10226 = vmatpush3.bf16.msra.mxu1 %v11458_v9  ;;  %v11477_v9 = vld [vmem:[#allocation34 + $0xa8] sm:$0xff]  }
 0x967   : > { %10210 = vmatpush3.bf16.msra.mxu0 %v11446_v58  ;;  %10227 = vmatprep.subr.bf16.mxu1 %v12855_v0 }
 0x968   : > { %10235 = vmatprep.subr.bf16.mxu0 %v12855_v0 }
 0x96a   : > { %10212 = vmatmul.mubr.bf16.vlgmr.msra.gmra.mrb[40].mxu0 %v4188_v62  ;;  %10228 = vmatpush3.bf16.msra.mxu1 %v11460_v11 }
 0x96b   : > { %10251 = vmatprep.mubr.msk.bf16.mxu0 %vm12857_vm0, %v12855_v0  ;;  %10236 = vmatpush3.bf16.msra.mxu0 %v11451_v1  ;;  %v11470_v1 = vld [vmem:[#allocation37 + $0x40] sm:$0xff]  }
 0x96c   : > { %10237 = vmatprep.subr.bf16.mxu0 %v12855_v0  ;;  %10229 = vmatprep.subr.bf16.mxu1 %v12855_v0 }
 0x96e   : > { %10230 = vmatpush3.bf16.msra.mxu1 %v11462_v13  ;;  %v11483_v13 = vld [vmem:[#allocation2 + $0xc] ss:$0 sps:$4 sm:$0x11]  }
 0x96f   : > { %10238 = vmatpush3.bf16.msra.mxu0 %v11453_v4  ;;  %10255 = vmatprep.subr.bf16.mxu1 %v12855_v0  ;;  %v11472_v4 = vld [vmem:[#allocation37 + $0x48] sm:$0xff]  }
 0x970   : > { %10239 = vmatprep.subr.bf16.mxu0 %v12855_v0 }
 0x973   : > { %10240 = vmatpush3.bf16.msra.mxu0 %v11455_v6  ;;  %v11474_v6 = vld [vmem:[#allocation37 + $0x50] sm:$0xff]  }
 0x974   : > { %10241 = vmatprep.subr.bf16.mxu0 %v12855_v0 }
 0x977   : > { %10242 = vmatpush3.bf16.msra.mxu0 %v11457_v8  ;;  %v11476_v8 = vld [vmem:[#allocation37 + $0x58] sm:$0xff]  }
 0x978   : > { %10243 = vmatprep.subr.bf16.mxu0 %v12855_v0 }
 0x97b   : > { %10244 = vmatpush3.bf16.msra.mxu0 %v11459_v10  ;;  %v4712_v10 = vld [vmem:[#allocation2] sm:$0x8] }
 0x97c   : > { %10245 = vmatprep.subr.bf16.mxu0 %v12855_v0 }
 0x97f   : > { %10246 = vmatpush3.bf16.msra.mxu0 %v11461_v12 }
 0x980   : > { %10247 = vmatprep.subr.bf16.mxu0 %v12855_v0 }
 0x983   : > { %10248 = vmatpush3.bf16.msra.mxu0 %v11463_v14 }
 0x984   : > { %10249 = vmatprep.subr.bf16.mxu0 %v12855_v0 }
 0x987   : > { %10250 = vmatpush3.bf16.msra.mxu0 %v11466_v15  ;;  %v11478_v15 = vld [vmem:[#allocation37 + $0x60] sm:$0xff]  }
 0x988   : > { %10275 = vmatprep.subr.bf16.mxu0 %v12855_v0 }
 0xa1d   : > { %v4031_v16 = vpop.f32.mrb[36].mxu0 }
 0xa1e   : > { %v10173_v17 = vpop.f32.mrb[37].mxu0 }
 0xa1f   : > { %v4034_v18 = vpop.f32.mrb[38].mxu0 }
 0xa20   : > { %v10174_v19 = vpop.f32.mrb[39].mxu0 }
 0xa24   : > { %v4142_v20 = vpop.f32.mrb[36].mxu1 }
 0xa25   : > { %v4143_v21 = vadd.f32 %v4142_v20, %v4031_v16  ;;  %v10193_v22 = vpop.f32.mrb[37].mxu1  ;;  %v4584_v20 = vshll.u32 %v11483_v13, 16  ;;  %v11514_v13 = vld [vmem:[#allocation37 + $0x118] sm:$0xff]  }
 0xa26   : > { %v4145_v23 = vpop.f32.mrb[38].mxu1 }
 0xa27   : > { %v4146_v24 = vadd.f32 %v4145_v23, %v4034_v18  ;;  %v10194_v25 = vpop.f32.mrb[39].mxu1  ;;  %v11479_v18 = vld [vmem:[#allocation34 + $0xb0] sm:$0xff]  }
 0xa3d   : > { %v4272_v26 = vpop.f32.mrb[40].mxu0 }
 0xa3e   : > { %v4279_v28 = vadd.f32 %v4272_v26, %v4143_v21  ;;  %v10213_v29 = vpop.f32.mrb[41].mxu0  ;;  %v11480_v21 = vld [vmem:[#allocation37 + $0x68] sm:$0xff]   ;;  %v11481_v26 = vld [vmem:[#allocation34 + $0xb8] sm:$0xff]  }
 0xa3f   : > { %v4275_v30 = vpop.f32.mrb[42].mxu0  ;;  %v4586_v29 = vrot.slane %v4584_v20, 1 }
 0xa40   : > { %v4288_v31 = vadd.f32 %v8985_v27, %v4279_v28  ;;  %v4280_v32 = vadd.f32 %v4275_v30, %v4146_v24  ;;  %v10214_v33 = vpop.f32.mrb[43].mxu0  ;;  %v11484_v30 = vld [vmem:[#allocation37 + $0x70] sm:$0xff]  }
 0xa42   : > { %v13938_v34 = vmax.f32 %v4288_v31, 0.0  ;;  %v4289_v35 = vadd.f32 %v8985_v27, %v4280_v32 }
 0xa44   : > { %v9312_v36 = vpack.c.bf16 %v13938_v34, %v13938_v34  ;;  %v13942_v37 = vmax.f32 %v4289_v35, 0.0 }
 0xa46   : > { %4304 = vst [vmem:[#allocation2 + $0x4] sm:$0xf] %v9312_v36  ;;  %v9313_v38 = vpack.c.bf16 %v13942_v37, %v13942_v37  ;;  %v11485_v36 = vld [vmem:[#allocation37] sm:$0xff]  }
 0xa48   : > { %4305 = vst [vmem:[#allocation2 + $0x8] sm:$0xf] %v9313_v38 }
 0xa4d   : > { %v4307_v44 = vld [vmem:[#allocation2 + $0x4] sm:$0xf] }
 0xa4e   : > { %v8997_v46 = vcombine.low %v4306_v41, %v4307_v44 }
 0xa4f   : > { %v4308_v47 = vld [vmem:[#allocation2 + $0x8] sm:$0xf] }
 0xa50   : > { %v13950_v48 = vld [vmem:[#allocation2 + $0x4] sm:$0xff]   ;;  %v8988_v50 = vcombine.low %v4307_v44, %v4308_v47  ;;  %v8998_v51 = vcombine.low %v4308_v47, %v4308_v47  ;;  %v4442_v53 = vshrl.u32 %v8997_v46, 16  ;;  %v4445_v54 = vshll.u32 %v8997_v46, 16  ;;  %v11490_v44 = vld [vmem:[#allocation37 + $0x80] sm:$0xff]   ;;  %v11492_v46 = vld [vmem:[#allocation37 + $0x88] sm:$0xff]  }
 0xa51   : > { %4710 = vst [vmem:[#allocation2 + $0x4] sm:$0xf] %v9314_v42  ;;  %4711 = vst [vmem:[#allocation2 + $0x8] sm:$0xf] %v9315_v43  ;;  %v4579_v14 = vshll.u32 %v13950_v48, 16  ;;  %v4577_v27 = vshrl.u32 %v13950_v48, 16 }
 0xa52   : > { %10232 = vmatmul.mubr.bf16.vlgmr.msra.gmra.mrb[40].mxu1 %v8988_v50  ;;  %v4444_v55 = vrot.slane %v4442_v53, 3  ;;  %v4447_v56 = vrot.slane %v4445_v54, 4  ;;  %v4450_v57 = vshrl.u32 %v8998_v51, 16  ;;  %v4453_v58 = vshll.u32 %v8998_v51, 16  ;;  %v11487_v42 = vld [vmem:[#allocation37 + $0x8] sm:$0xff]   ;;  %v11493_v47 = vld [vmem:[#allocation37 + $0x18] sm:$0xff]  }
 0xa53   : > { %10256 = vmatpush3.bf16.msra.mxu1 %v11465_v45  ;;  %10271 = vmatprep.mubr.msk.bf16.mxu1 %vm12857_vm0, %v12855_v0  ;;  %v4581_v19 = vrot.slane %v4579_v14, 1  ;;  %v11491_v45 = vld [vmem:[#allocation37 + $0x10] sm:$0xff]   ;;  %v11495_v50 = vld [vmem:[#allocation37 + $0x20] sm:$0xff]   ;;  %v11496_v51 = vld [vmem:[#allocation37 + $0x98] sm:$0xff]  }
 0xa54   : > { %10257 = vmatprep.subr.bf16.mxu1 %v12855_v0  ;;  %v4452_v60 = vrot.slane %v4450_v57, 3  ;;  %v4455_v61 = vrot.slane %v4453_v58, 4  ;;  %v4448_v62 = vor.u32 %v4447_v56, %v4444_v55  ;;  %v11494_v48 = vld [vmem:[#allocation37 + $0x90] sm:$0xff]   ;;  %v11497_v53 = vld [vmem:[#allocation37 + $0x28] sm:$0xff]   ;;  %v11498_v54 = vld [vmem:[#allocation37 + $0xa0] sm:$0xff]  }
 0xa55   : > { %v4582_v28 = vor.u32 %v4581_v19, %v4577_v27  ;;  %v11499_v55 = vld [vmem:[#allocation37 + $0x30] sm:$0xff]   ;;  %v11500_v57 = vld [vmem:[#allocation37 + $0xa8] sm:$0xff]   ;;  %v11501_v58 = vld [vmem:[#allocation37 + $0x38] sm:$0xff]  }
 0xa56   : > { %v4456_v63 = vor.u32 %v4455_v61, %v4452_v60  ;;  %v11503_v61 = vld [vmem:[#allocation37 + $0xb0] sm:$0xff]   ;;  %v11515_v14 = vld [vmem:[#allocation37 + $0xe8] sm:$0xff]  }
 0xa57   : > { %10258 = vmatpush3.bf16.msra.mxu1 %v11467_v59  ;;  %v4587_v38 = vsel %vm1803_vm2, %v4582_v28, %v4586_v29  ;;  %v11522_v27 = vld [vmem:[#allocation37 + $0x130] sm:$0xff]  }
 0xa58   : > { %v4457_v3 = vsel %vm1667_vm1, %v4448_v62, %v4456_v63  ;;  %10259 = vmatprep.subr.bf16.mxu1 %v12855_v0  ;;  %v13964_v11 = vld [vmem:[#allocation2 + $0x4] sm:$0xf]  ;;  %v13966_v12 = vld [vmem:[#allocation2 + $0x8] sm:$0xf]  ;;  %v11504_v63 = vld [vmem:[#allocation37 + $0xc0] sm:$0xff]  }
 0xa59   : > { %10252 = vmatmul.mubr.bf16.vlgmr.msra.gmra.mrb[44].mxu0 %v4457_v3  ;;  %v13971_v16 = vcombine.low %v4712_v10, %v13964_v11  ;;  %v9021_v17 = vcombine.low %v13966_v12, %v13966_v12  ;;  %v11502_v56 = vld [vmem:[#allocation2 + $0x8] ss:$0 sps:$4 sm:$0x77]   ;;  %v9039_v3 = vcombine.low %v13964_v11, %v13966_v12  ;;  %v11512_v10 = vld [vmem:[#allocation37 + $0x110] sm:$0xff]   ;;  %v11513_v11 = vld [vmem:[#allocation37 + $0xe0] sm:$0xff]  }
 0xa5a   : > { %10276 = vmatpush3.bf16.msra.mxu0 %v11470_v1  ;;  %10291 = vmatprep.mubr.msk.bf16.mxu0 %vm12857_vm0, %v12855_v0  ;;  %v4869_v60 = vrot.slane %v11502_v56, 3  ;;  %v11505_v1 = vld [vmem:[#allocation37 + $0xb8] sm:$0xff]  }
 0xa5b   : > { %10260 = vmatpush3.bf16.msra.mxu1 %v11471_v2  ;;  %10277 = vmatprep.subr.bf16.mxu0 %v12855_v0  ;;  %v4758_v22 = vshrl.u32 %v13971_v16, 16  ;;  %v4761_v23 = vshll.u32 %v13971_v16, 16  ;;  %v4766_v24 = vshrl.u32 %v9021_v17, 16  ;;  %v4769_v25 = vshll.u32 %v9021_v17, 16  ;;  %v11506_v2 = vld [vmem:[#allocation37 + $0xc8] sm:$0xff]   ;;  %v11516_v17 = vld [vmem:[#allocation37 + $0x120] sm:$0xff]  }
 0xa5c   : > { %10261 = vmatprep.subr.bf16.mxu1 %v12855_v0  ;;  %v4868_v59 = vrot.slane %v13971_v16, 3 }
 0xa5d   : > { %v4760_v31 = vrot.slane %v4758_v22, 3  ;;  %v4763_v32 = vrot.slane %v4761_v23, 4  ;;  %v4768_v33 = vrot.slane %v4766_v24, 3  ;;  %v4771_v35 = vrot.slane %v4769_v25, 4  ;;  %v11518_v22 = vld [vmem:[#allocation37 + $0x128] sm:$0xff]   ;;  %v11519_v23 = vld [vmem:[#allocation37 + $0xf8] sm:$0xff]  }
 0xa5e   : > { %10278 = vmatpush3.bf16.msra.mxu0 %v11472_v4  ;;  %v4870_v62 = vsel %vm4867_vm4, %v4868_v59, %v4869_v60  ;;  %v11508_v4 = vld [vmem:[#allocation37 + $0x100] sm:$0xff]  }
 0xa5f   : > { %10262 = vmatpush3.bf16.msra.mxu1 %v11473_v5  ;;  %10279 = vmatprep.subr.bf16.mxu0 %v12855_v0  ;;  %v4764_v40 = vor.u32 %v4763_v32, %v4760_v31  ;;  %v4772_v41 = vor.u32 %v4771_v35, %v4768_v33  ;;  %v11509_v5 = vld [vmem:[#allocation37 + $0xd0] sm:$0xff]   ;;  %v11525_v35 = vld [vmem:[#allocation40] sm:$0xff]  }
 0xa60   : > { %10263 = vmatprep.subr.bf16.mxu1 %v12855_v0 }
 0xa61   : > { %v4773_v43 = vsel %vm1667_vm1, %v4764_v40, %v4772_v41  ;;  %v11528_v40 = vld [vmem:[#allocation40 + $0x48] sm:$0xff]   ;;  %v11531_v41 = vld [vmem:[#allocation40 + $0x18] sm:$0xff]  }
 0xa62   : > { %10280 = vmatpush3.bf16.msra.mxu0 %v11474_v6  ;;  %v11510_v6 = vld [vmem:[#allocation37 + $0x108] sm:$0xff]  }
 0xa63   : > { %10264 = vmatpush3.bf16.msra.mxu1 %v11475_v7  ;;  %10281 = vmatprep.subr.bf16.mxu0 %v12855_v0  ;;  %v11511_v7 = vld [vmem:[#allocation37 + $0xd8] sm:$0xff]  }
 0xa64   : > { %10265 = vmatprep.subr.bf16.mxu1 %v12855_v0 }
 0xa66   : > { %10282 = vmatpush3.bf16.msra.mxu0 %v11476_v8  ;;  %v5071_v8 = vld [vmem:[#allocation2 + $0x4] sm:$0xf] }
 0xa67   : > { %10266 = vmatpush3.bf16.msra.mxu1 %v11477_v9  ;;  %10283 = vmatprep.subr.bf16.mxu0 %v12855_v0  ;;  %v5072_v9 = vld [vmem:[#allocation2 + $0x8] sm:$0xf] }
 0xa68   : > { %10267 = vmatprep.subr.bf16.mxu1 %v12855_v0  ;;  %v9048_v12 = vcombine.low %v5071_v8, %v5072_v9 }
 0xa6a   : > { %10284 = vmatpush3.bf16.msra.mxu0 %v11478_v15  ;;  %v11521_v15 = vld [vmem:[#allocation2 + $0xc] ss:$0 sps:$4 sm:$0x11]   ;;  %v5102_v16 = vshll.u32 %v9048_v12, 16  ;;  %v5100_v19 = vshrl.u32 %v9048_v12, 16 }
 0xa6b   : > { %10268 = vmatpush3.bf16.msra.mxu1 %v11479_v18  ;;  %10285 = vmatprep.subr.bf16.mxu0 %v12855_v0  ;;  %v11517_v18 = vld [vmem:[#allocation37 + $0xf0] sm:$0xff]   ;;  %v5226_v32 = vrot.slane %v11521_v15, 1 }
 0xa6c   : > { %10269 = vmatprep.subr.bf16.mxu1 %v12855_v0  ;;  %v5104_v20 = vrot.slane %v5102_v16, 1 }
 0xa6e   : > { %10286 = vmatpush3.bf16.msra.mxu0 %v11480_v21  ;;  %v5107_v21 = vshll.u32 %v11521_v15, 16  ;;  %v5105_v24 = vor.u32 %v5104_v20, %v5100_v19 }
 0xa6f   : > { %10270 = vmatpush3.bf16.msra.mxu1 %v11481_v26  ;;  %10287 = vmatprep.subr.bf16.mxu0 %v12855_v0  ;;  %v5203_v26 = vld [vmem:[#allocation2 + $0x4] sm:$0xe] }
 0xa70   : > { %10295 = vmatprep.subr.bf16.mxu1 %v12855_v0  ;;  %v5109_v25 = vrot.slane %v5107_v21, 1  ;;  %v9058_v28 = vcombine.low %v5203_v26, %v5072_v9 }
 0xa72   : > { %10272 = vmatmul.mubr.bf16.vlgmr.msra.gmra.mrb[44].mxu1 %v4587_v38  ;;  %10288 = vmatpush3.bf16.msra.mxu0 %v11484_v30  ;;  %v5110_v29 = vsel %vm1803_vm2, %v5105_v24, %v5109_v25  ;;  %v11523_v30 = vld [vmem:[#allocation37 + $0x138] sm:$0xff]   ;;  %v5225_v31 = vrot.slane %v9058_v28, 1  ;;  %v11526_v38 = vld [vmem:[#allocation40 + $0x40] sm:$0xff]  }
 0xa73   : > { %10296 = vmatpush3.bf16.msra.mxu1 %v11485_v36  ;;  %10289 = vmatprep.subr.bf16.mxu0 %v12855_v0  ;;  %v11527_v36 = vld [vmem:[#allocation40 + $0x8] sm:$0xff]  }
 0xa74   : > { %10297 = vmatprep.subr.bf16.mxu1 %v12855_v0  ;;  %10311 = vmatprep.mubr.msk.bf16.mxu1 %vm12857_vm0, %v12855_v0  ;;  %v5227_v33 = vsel %vm5224_vm5, %v5225_v31, %v5226_v32 }
 0xa76   : > { %10290 = vmatpush3.bf16.msra.mxu0 %v11486_v39  ;;  %v11529_v39 = vld [vmem:[#allocation40 + $0x10] sm:$0xff]  }
 0xa77   : > { %10298 = vmatpush3.bf16.msra.mxu1 %v11487_v42  ;;  %10315 = vmatprep.subr.bf16.mxu0 %v12855_v0  ;;  %v11530_v42 = vld [vmem:[#allocation40 + $0x50] sm:$0xff]  }
 0xa78   : > { %10299 = vmatprep.subr.bf16.mxu1 %v12855_v0 }
 0xa79   : > { %10292 = vmatmul.mubr.bf16.vlgmr.msra.gmra.mrb[48].mxu0 %v4773_v43  ;;  %v11533_v43 = vld [vmem:[#allocation40 + $0x20] sm:$0xff]  }
 0xa7a   : > { %10316 = vmatpush3.bf16.msra.mxu0 %v11490_v44  ;;  %10331 = vmatprep.mubr.msk.bf16.mxu0 %vm12857_vm0, %v12855_v0  ;;  %v11532_v44 = vld [vmem:[#allocation40 + $0x58] sm:$0xff]  }
 0xa7b   : > { %10300 = vmatpush3.bf16.msra.mxu1 %v11491_v45  ;;  %10317 = vmatprep.subr.bf16.mxu0 %v12855_v0  ;;  %v11535_v45 = vld [vmem:[#allocation40 + $0x28] sm:$0xff]  }
 0xa7c   : > { %10301 = vmatprep.subr.bf16.mxu1 %v12855_v0 }
 0xa7e   : > { %10318 = vmatpush3.bf16.msra.mxu0 %v11492_v46  ;;  %v11534_v46 = vld [vmem:[#allocation40 + $0x60] sm:$0xff]  }
 0xa7f   : > { %10302 = vmatpush3.bf16.msra.mxu1 %v11493_v47  ;;  %10319 = vmatprep.subr.bf16.mxu0 %v12855_v0  ;;  %v11537_v47 = vld [vmem:[#allocation40 + $0x30] sm:$0xff]  }
 0xa80   : > { %10303 = vmatprep.subr.bf16.mxu1 %v12855_v0 }
 0xa82   : > { %10320 = vmatpush3.bf16.msra.mxu0 %v11494_v48  ;;  %v11536_v48 = vld [vmem:[#allocation40 + $0x68] sm:$0xff]  }
 0xa83   : > { %10304 = vmatpush3.bf16.msra.mxu1 %v11495_v50  ;;  %10321 = vmatprep.subr.bf16.mxu0 %v12855_v0  ;;  %v11539_v50 = vld [vmem:[#allocation40 + $0x38] sm:$0xff]  }
 0xa84   : > { %10305 = vmatprep.subr.bf16.mxu1 %v12855_v0 }
 0xa86   : > { %10322 = vmatpush3.bf16.msra.mxu0 %v11496_v51  ;;  %v11538_v51 = vld [vmem:[#allocation40 + $0x70] sm:$0xff]  }
 0xa87   : > { %10306 = vmatpush3.bf16.msra.mxu1 %v11497_v53  ;;  %10323 = vmatprep.subr.bf16.mxu0 %v12855_v0  ;;  %v11540_v53 = vld [vmem:[#allocation40 + $0x78] sm:$0xff]  }
 0xa88   : > { %10307 = vmatprep.subr.bf16.mxu1 %v12855_v0 }
 0xa8a   : > { %10324 = vmatpush3.bf16.msra.mxu0 %v11498_v54 }
 0xa8b   : > { %10308 = vmatpush3.bf16.msra.mxu1 %v11499_v55  ;;  %10325 = vmatprep.subr.bf16.mxu0 %v12855_v0 }
 0xa8c   : > { %10309 = vmatprep.subr.bf16.mxu1 %v12855_v0 }
 0xa8e   : > { %10326 = vmatpush3.bf16.msra.mxu0 %v11500_v57 }
 0xa8f   : > { %10310 = vmatpush3.bf16.msra.mxu1 %v11501_v58  ;;  %10327 = vmatprep.subr.bf16.mxu0 %v12855_v0 }
 0xa90   : > { %10335 = vmatprep.subr.bf16.mxu1 %v12855_v0 }
 0xa92   : > { %10312 = vmatmul.mubr.bf16.vlgmr.msra.gmra.mrb[48].mxu1 %v4870_v62  ;;  %10328 = vmatpush3.bf16.msra.mxu0 %v11503_v61 }
 0xa93   : > { %10336 = vmatpush3.bf16.msra.mxu1 %v11504_v63  ;;  %10329 = vmatprep.subr.bf16.mxu0 %v12855_v0 }
 0xa94   : > { %10337 = vmatprep.subr.bf16.mxu1 %v12855_v0  ;;  %10351 = vmatprep.mubr.msk.bf16.mxu1 %vm12857_vm0, %v12855_v0 }
 0xa96   : > { %10330 = vmatpush3.bf16.msra.mxu0 %v11505_v1 }
 0xa97   : > { %10338 = vmatpush3.bf16.msra.mxu1 %v11506_v2  ;;  %10355 = vmatprep.subr.bf16.mxu0 %v12855_v0  ;;  %v9017_v2 = vld [vmem:[#allocation36] ss:$0 sm:$0xff] }
 0xa98   : > { %10339 = vmatprep.subr.bf16.mxu1 %v12855_v0 }
 0xa99   : > { %10332 = vmatmul.mubr.bf16.vlgmr.msra.gmra.mrb[52].mxu0 %v9039_v3 }
 0xa9a   : > { %10356 = vmatpush3.bf16.msra.mxu0 %v11508_v4  ;;  %10371 = vmatprep.mubr.msk.bf16.mxu0 %vm12857_vm0, %v12855_v0 }
 0xa9b   : > { %10340 = vmatpush3.bf16.msra.mxu1 %v11509_v5  ;;  %10357 = vmatprep.subr.bf16.mxu0 %v12855_v0 }
 0xa9c   : > { %10341 = vmatprep.subr.bf16.mxu1 %v12855_v0 }
 0xa9e   : > { %10358 = vmatpush3.bf16.msra.mxu0 %v11510_v6 }
 0xa9f   : > { %10342 = vmatpush3.bf16.msra.mxu1 %v11511_v7  ;;  %10359 = vmatprep.subr.bf16.mxu0 %v12855_v0 }
 0xaa0   : > { %10343 = vmatprep.subr.bf16.mxu1 %v12855_v0 }
 0xaa2   : > { %10360 = vmatpush3.bf16.msra.mxu0 %v11512_v10 }
 0xaa3   : > { %10344 = vmatpush3.bf16.msra.mxu1 %v11513_v11  ;;  %10361 = vmatprep.subr.bf16.mxu0 %v12855_v0 }
 0xaa4   : > { %10345 = vmatprep.subr.bf16.mxu1 %v12855_v0 }
 0xaa6   : > { %10362 = vmatpush3.bf16.msra.mxu0 %v11514_v13 }
 0xaa7   : > { %10346 = vmatpush3.bf16.msra.mxu1 %v11515_v14  ;;  %10363 = vmatprep.subr.bf16.mxu0 %v12855_v0 }
 0xaa8   : > { %10347 = vmatprep.subr.bf16.mxu1 %v12855_v0 }
 0xaaa   : > { %10364 = vmatpush3.bf16.msra.mxu0 %v11516_v17 }
 0xaab   : > { %10348 = vmatpush3.bf16.msra.mxu1 %v11517_v18  ;;  %10365 = vmatprep.subr.bf16.mxu0 %v12855_v0 }
 0xaac   : > { %10349 = vmatprep.subr.bf16.mxu1 %v12855_v0 }
 0xaae   : > { %10366 = vmatpush3.bf16.msra.mxu0 %v11518_v22 }
 0xaaf   : > { %10350 = vmatpush3.bf16.msra.mxu1 %v11519_v23  ;;  %10367 = vmatprep.subr.bf16.mxu0 %v12855_v0 }
 0xab0   : > { %10375 = vmatprep.subr.bf16.mxu1 %v12855_v0 }
 0xab2   : > { %10352 = vmatmul.mubr.bf16.vlgmr.msra.gmra.mrb[52].mxu1 %v5110_v29  ;;  %10368 = vmatpush3.bf16.msra.mxu0 %v11522_v27 }
 0xab3   : > { %10369 = vmatprep.subr.bf16.mxu0 %v12855_v0  ;;  %10391 = vmatprep.mubr.msk.bf16.mxu1 %vm12857_vm0, %v12855_v0 }
 0xab4   : > { %10376 = vmatpush3.bf16.msra.mxu1 %v11526_v38 }
 0xab5   : > { %10377 = vmatprep.subr.bf16.mxu1 %v12855_v0 }
 0xab6   : > { %10370 = vmatpush3.bf16.msra.mxu0 %v11523_v30 }
 0xab7   : > { %10395 = vmatprep.subr.bf16.mxu0 %v12855_v0 }
 0xab8   : > { %10378 = vmatpush3.bf16.msra.mxu1 %v11528_v40 }
 0xab9   : > { %10372 = vmatmul.mubr.bf16.vlgmr.msra.gmra.mrb[56].mxu0 %v5227_v33  ;;  %10379 = vmatprep.subr.bf16.mxu1 %v12855_v0  ;;  %v9067_v33 = vld [vmem:[#allocation39] ss:$0 sm:$0xff] }
 0xaba   : > { %10411 = vmatprep.mubr.msk.bf16.mxu0 %vm12857_vm0, %v12855_v0  ;;  %10396 = vmatpush3.bf16.msra.mxu0 %v11525_v35 }
 0xabb   : > { %10397 = vmatprep.subr.bf16.mxu0 %v12855_v0 }
 0xabc   : > { %10380 = vmatpush3.bf16.msra.mxu1 %v11530_v42 }
 0xabd   : > { %10381 = vmatprep.subr.bf16.mxu1 %v12855_v0 }
 0xabe   : > { %10398 = vmatpush3.bf16.msra.mxu0 %v11527_v36 }
 0xabf   : > { %10399 = vmatprep.subr.bf16.mxu0 %v12855_v0 }
 0xac0   : > { %10382 = vmatpush3.bf16.msra.mxu1 %v11532_v44 }
 0xac1   : > { %10383 = vmatprep.subr.bf16.mxu1 %v12855_v0 }
 0xac2   : > { %10400 = vmatpush3.bf16.msra.mxu0 %v11529_v39 }
 0xac3   : > { %10401 = vmatprep.subr.bf16.mxu0 %v12855_v0 }
 0xac4   : > { %10384 = vmatpush3.bf16.msra.mxu1 %v11534_v46 }
 0xac5   : > { %10385 = vmatprep.subr.bf16.mxu1 %v12855_v0 }
 0xac6   : > { %10402 = vmatpush3.bf16.msra.mxu0 %v11531_v41 }
 0xac7   : > { %10403 = vmatprep.subr.bf16.mxu0 %v12855_v0 }
 0xac8   : > { %10386 = vmatpush3.bf16.msra.mxu1 %v11536_v48 }
 0xac9   : > { %10387 = vmatprep.subr.bf16.mxu1 %v12855_v0 }
 0xaca   : > { %10404 = vmatpush3.bf16.msra.mxu0 %v11533_v43 }
 0xacb   : > { %10405 = vmatprep.subr.bf16.mxu0 %v12855_v0 }
 0xacc   : > { %10388 = vmatpush3.bf16.msra.mxu1 %v11538_v51 }
 0xacd   : > { %10389 = vmatprep.subr.bf16.mxu1 %v12855_v0 }
 0xace   : > { %10406 = vmatpush3.bf16.msra.mxu0 %v11535_v45 }
 0xacf   : > { %10407 = vmatprep.subr.bf16.mxu0 %v12855_v0 }
 0xad0   : > { %10390 = vmatpush3.bf16.msra.mxu1 %v11540_v53 }
 0xad1   : > { %10415 = vmatprep.subr.bf16.mxu1 %v12855_v0 }
 0xad2   : > { %10408 = vmatpush3.bf16.msra.mxu0 %v11537_v47  ;;  %v5341_v47 = vld [vmem:[#allocation2] sm:$0x8] }
 0xad3   : > { %10409 = vmatprep.subr.bf16.mxu0 %v12855_v0 }
 0xad6   : > { %10410 = vmatpush3.bf16.msra.mxu0 %v11539_v50 }
 0xad7   : > { %10435 = vmatprep.subr.bf16.mxu0 %v12855_v0 }
 0xb25   : > { %v4430_v54 = vpop.f32.mrb[40].mxu1 }
 0xb26   : > { %v10233_v55 = vpop.f32.mrb[41].mxu1 }
 0xb27   : > { %v4433_v56 = vpop.f32.mrb[42].mxu1 }
 0xb28   : > { %v10234_v57 = vpop.f32.mrb[43].mxu1 }
 0xb2c   : > { %v4541_v58 = vpop.f32.mrb[44].mxu0 }
 0xb2d   : > { %v4542_v59 = vadd.f32 %v4541_v58, %v4430_v54  ;;  %v10253_v60 = vpop.f32.mrb[45].mxu0  ;;  %v11543_v58 = vld [vmem:[#allocation40 + $0xc0] sm:$0xff]  }
 0xb2e   : > { %v4544_v61 = vpop.f32.mrb[46].mxu0 }
 0xb2f   : > { %v4545_v62 = vadd.f32 %v4544_v61, %v4433_v56  ;;  %v10254_v63 = vpop.f32.mrb[47].mxu0 }
 0xb45   : > { %v4671_v1 = vpop.f32.mrb[44].mxu1 }
 0xb46   : > { %v4678_v3 = vadd.f32 %v4671_v1, %v4542_v59  ;;  %v10273_v4 = vpop.f32.mrb[45].mxu1 }
 0xb47   : > { %v4674_v5 = vpop.f32.mrb[46].mxu1  ;;  %v11546_v4 = vld [vmem:[#allocation40 + $0xc8] sm:$0xff]  }
 0xb48   : > { %v4679_v6 = vadd.f32 %v4674_v5, %v4545_v62  ;;  %v10274_v7 = vpop.f32.mrb[47].mxu1  ;;  %v4687_v8 = vadd.f32 %v9017_v2, %v4678_v3 }
 0xb49   : > { %v11545_v7 = vld [vmem:[#allocation40 + $0x80] sm:$0xff]  }
 0xb4a   : > { %4691 = vrot.lane.b32.xlu0 %v4687_v8, %s12858_s16  ;;  %v4688_v9 = vadd.f32 %v9017_v2, %v4679_v6 }
 0xb4c   : > { %v4857_v10 = vpop.f32.mrb[48].mxu0 }
 0xb4d   : > { %v10293_v11 = vpop.f32.mrb[49].mxu0 }
 0xb4e   : > { %v4860_v12 = vpop.f32.mrb[50].mxu0  ;;  %4693 = vrot.lane.b32.xlu0 %v4688_v9, %s12858_s16  ;;  %v11548_v9 = vld [vmem:[#allocation40 + $0xd0] sm:$0xff]   ;;  %v11550_v11 = vld [vmem:[#allocation40 + $0xd8] sm:$0xff]  }
 0xb4f   : > { %v10294_v13 = vpop.f32.mrb[51].mxu0 }
 0xb65   : > { %v4954_v14 = vpop.f32.mrb[48].mxu1 }
 0xb66   : > { %v4955_v15 = vadd.f32 %v4954_v14, %v4857_v10  ;;  %v10313_v16 = vpop.f32.mrb[49].mxu1  ;;  %v11547_v10 = vld [vmem:[#allocation40 + $0x88] sm:$0xff]   ;;  %v11552_v14 = vld [vmem:[#allocation40 + $0xe0] sm:$0xff]  }
 0xb67   : > { %v4957_v17 = vpop.f32.mrb[50].mxu1  ;;  %v11551_v16 = vld [vmem:[#allocation40 + $0x98] sm:$0xff]  }
 0xb68   : > { %v4958_v18 = vadd.f32 %v4957_v17, %v4860_v12  ;;  %v10314_v19 = vpop.f32.mrb[51].mxu1  ;;  %v11549_v12 = vld [vmem:[#allocation40 + $0x90] sm:$0xff]  }
 0xb69   : > { %v11553_v19 = vld [vmem:[#allocation40 + $0xa0] sm:$0xff]  }
 0xb6c   : > { %v5062_v20 = vpop.f32.mrb[52].mxu0 }
 0xb6d   : > { %v5069_v21 = vadd.f32 %v5062_v20, %v4955_v15  ;;  %v10333_v22 = vpop.f32.mrb[53].mxu0 }
 0xb6e   : > { %v5065_v23 = vpop.f32.mrb[54].mxu0  ;;  %v14079_v22 = vld [vmem:[#allocation2 + $0xc] ss:$0 sps:$4 sm:$0x11]  }
 0xb6f   : > { %v5070_v24 = vadd.f32 %v5065_v23, %v4958_v18  ;;  %v10334_v25 = vpop.f32.mrb[55].mxu0  ;;  %v11554_v18 = vld [vmem:[#allocation40 + $0xe8] sm:$0xff]  }
 0xb70   : > { %v11555_v23 = vld [vmem:[#allocation40 + $0xa8] sm:$0xff]   ;;  %v5735_v25 = vshll.u32 %v14079_v22, 16 }
 0xb85   : > { %v5194_v26 = vpop.f32.mrb[52].mxu1 }
 0xb86   : > { %v5201_v27 = vadd.f32 %v5194_v26, %v5069_v21  ;;  %v10353_v28 = vpop.f32.mrb[53].mxu1  ;;  %v11556_v21 = vld [vmem:[#allocation40 + $0xf0] sm:$0xff]  }
 0xb87   : > { %v5197_v29 = vpop.f32.mrb[54].mxu1 }
 0xb88   : > { %v5202_v30 = vadd.f32 %v5197_v29, %v5070_v24  ;;  %v10354_v31 = vpop.f32.mrb[55].mxu1  ;;  %v11557_v29 = vld [vmem:[#allocation40 + $0xb0] sm:$0xff]  }
 0xb89   : > { %v5737_v31 = vrot.slane %v5735_v25, 1 }
 0xb8c   : > { %v5311_v32 = vpop.f32.mrb[56].mxu0 }
 0xb8d   : > { %v5318_v35 = vadd.f32 %v5311_v32, %v5201_v27  ;;  %v10373_v36 = vpop.f32.mrb[57].mxu0  ;;  %v11558_v27 = vld [vmem:[#allocation40 + $0xf8] sm:$0xff]  }
 0xb8e   : > { %v5314_v38 = vpop.f32.mrb[58].mxu0  ;;  %v11562_v36 = vld [vmem:[#allocation40 + $0x100] sm:$0xff]  }
 0xb8f   : > { %v5327_v39 = vadd.f32 %v9067_v33, %v5318_v35  ;;  %v5319_v40 = vadd.f32 %v5314_v38, %v5202_v30  ;;  %v10374_v41 = vpop.f32.mrb[59].mxu0  ;;  %v11561_v35 = vld [vmem:[#allocation40 + $0xb8] sm:$0xff]  }
 0xb90   : > { %v11565_v41 = vld [vmem:[#allocation40 + $0x118] sm:$0xff]  }
 0xb91   : > { %v5329_v42 = vmax.f32 %v5327_v39, 0.0  ;;  %v5328_v43 = vadd.f32 %v9067_v33, %v5319_v40  ;;  %v11563_v39 = vld [vmem:[#allocation40 + $0x108] sm:$0xff]   ;;  %v11564_v40 = vld [vmem:[#allocation40 + $0x110] sm:$0xff]  }
 0xb93   : > { %v9316_v44 = vpack.c.bf16 %v5329_v42, %v5329_v42  ;;  %v5330_v45 = vmax.f32 %v5328_v43, 0.0  ;;  %v11566_v42 = vld [vmem:[#allocation40 + $0x120] sm:$0xff]   ;;  %v11567_v43 = vld [vmem:[#allocation40 + $0x128] sm:$0xff]  }
 0xb95   : > { %5339 = vst [vmem:[#allocation2 + $0x4] sm:$0xf] %v9316_v44  ;;  %v9317_v46 = vpack.c.bf16 %v5330_v45, %v5330_v45  ;;  %v11568_v44 = vld [vmem:[#allocation40 + $0x130] sm:$0xff]  }
 0xb97   : > { %5340 = vst [vmem:[#allocation2 + $0x8] sm:$0xf] %v9317_v46 }
 0xb9c   : > { %v14054_v48 = vld [vmem:[#allocation2 + $0x4] sm:$0xf] }
 0xb9d   : > { %v9070_v50 = vcombine.low %v5341_v47, %v14054_v48  ;;  %v5699_v15 = vld [vmem:[#allocation2 + $0x4] sm:$0xf]  ;;  %v11569_v47 = vld [vmem:[#allocation40 + $0x138] sm:$0xff]  }
 0xb9e   : > { %v11542_v51 = vld [vmem:[#allocation2 + $0x8] ss:$0 sps:$4 sm:$0x77]   ;;  %v5831_v45 = vld [vmem:[#allocation2 + $0x4] sm:$0xe] }
 0xb9f   : > { %v5496_v53 = vrot.slane %v9070_v50, 3  ;;  %v14057_v54 = vld [vmem:[#allocation2 + $0x8] sm:$0xf]  ;;  %v5387_v55 = vshrl.u32 %v9070_v50, 16  ;;  %v5390_v56 = vshll.u32 %v9070_v50, 16  ;;  %v5497_v57 = vrot.slane %v11542_v51, 3 }
 0xba0   : > { %v9071_v59 = vcombine.low %v14057_v54, %v14057_v54  ;;  %v14072_v13 = vld [vmem:[#allocation2 + $0x8] sm:$0xf]  ;;  %v9089_v38 = vcombine.low %v14054_v48, %v14057_v54  ;;  %v5853_v50 = vrot.slane %v14079_v22, 1  ;;  %v11572_v54 = vld [vmem:[#allocation43 + $0x40] sm:$0xff]  }
 0xba1   : > { %v5389_v60 = vrot.slane %v5387_v55, 3  ;;  %v5498_v61 = vsel %vm4867_vm4, %v5496_v53, %v5497_v57  ;;  %v5392_v62 = vrot.slane %v5390_v56, 4  ;;  %v9098_v17 = vcombine.low %v5699_v15, %v14072_v13  ;;  %v11571_v53 = vld [vmem:[#allocation43] sm:$0xff]   ;;  %v11573_v55 = vld [vmem:[#allocation43 + $0x8] sm:$0xff]   ;;  %v11575_v56 = vld [vmem:[#allocation43 + $0x10] sm:$0xff]  }
 0xba2   : > { %v5395_v63 = vshrl.u32 %v9071_v59, 16  ;;  %v5398_v1 = vshll.u32 %v9071_v59, 16  ;;  %10412 = vmatmul.mubr.bf16.vlgmr.msra.gmra.mrb[60].mxu0 %v5498_v61  ;;  %v9108_v46 = vcombine.low %v5831_v45, %v14072_v13  ;;  %v11574_v57 = vld [vmem:[#allocation43 + $0x48] sm:$0xff]   ;;  %v11576_v59 = vld [vmem:[#allocation43 + $0x50] sm:$0xff]   ;;  %v11578_v61 = vld [vmem:[#allocation43 + $0x58] sm:$0xff]  }
 0xba3   : > { %10436 = vmatpush3.bf16.msra.mxu0 %v11543_v58  ;;  %10451 = vmatprep.mubr.msk.bf16.mxu0 %vm12857_vm0, %v12855_v0  ;;  %v5393_v5 = vor.u32 %v5392_v62, %v5389_v60  ;;  %v5730_v20 = vshll.u32 %v9098_v17, 16  ;;  %v5728_v28 = vshrl.u32 %v9098_v17, 16  ;;  %v11577_v58 = vld [vmem:[#allocation43 + $0x18] sm:$0xff]   ;;  %v11579_v60 = vld [vmem:[#allocation43 + $0x20] sm:$0xff]   ;;  %v11581_v62 = vld [vmem:[#allocation43 + $0x28] sm:$0xff]  }
 0xba4   : > { %v5397_v2 = vrot.slane %v5395_v63, 3  ;;  %v5400_v3 = vrot.slane %v5398_v1, 4  ;;  %10437 = vmatprep.subr.bf16.mxu0 %v12855_v0  ;;  %v5852_v48 = vrot.slane %v9108_v46, 1  ;;  %v11580_v63 = vld [vmem:[#allocation43 + $0x60] sm:$0xff]   ;;  %v11583_v1 = vld [vmem:[#allocation43 + $0x30] sm:$0xff]  }
 0xba5   : > { %v5732_v24 = vrot.slane %v5730_v20, 1 }
 0xba6   : > { %v5401_v6 = vor.u32 %v5400_v3, %v5397_v2  ;;  %v5854_v51 = vsel %vm5224_vm5, %v5852_v48, %v5853_v50  ;;  %v11582_v2 = vld [vmem:[#allocation43 + $0x68] sm:$0xff]   ;;  %v11585_v3 = vld [vmem:[#allocation43 + $0x38] sm:$0xff]  }
 0xba7   : > { %10438 = vmatpush3.bf16.msra.mxu0 %v11546_v4  ;;  %v5733_v30 = vor.u32 %v5732_v24, %v5728_v28  ;;  %v11584_v4 = vld [vmem:[#allocation43 + $0x70] sm:$0xff]  }
 0xba8   : > { %v5402_v8 = vsel %vm1667_vm1, %v5393_v5, %v5401_v6  ;;  %10439 = vmatprep.subr.bf16.mxu0 %v12855_v0  ;;  %v11586_v5 = vld [vmem:[#allocation43 + $0x78] sm:$0xff]  }
 0xba9   : > { %10392 = vmatmul.mubr.bf16.vlgmr.msra.gmra.mrb[56].mxu1 %v5402_v8  ;;  %v5738_v33 = vsel %vm1803_vm2, %v5733_v30, %v5737_v31 }
 0xbaa   : > { %10416 = vmatpush3.bf16.msra.mxu1 %v11545_v7  ;;  %10431 = vmatprep.mubr.msk.bf16.mxu1 %vm12857_vm0, %v12855_v0 }
 0xbab   : > { %10417 = vmatprep.subr.bf16.mxu1 %v12855_v0  ;;  %10440 = vmatpush3.bf16.msra.mxu0 %v11548_v9 }
 0xbac   : > { %10441 = vmatprep.subr.bf16.mxu0 %v12855_v0 }
 0xbae   : > { %10418 = vmatpush3.bf16.msra.mxu1 %v11547_v10 }
 0xbaf   : > { %10419 = vmatprep.subr.bf16.mxu1 %v12855_v0  ;;  %10442 = vmatpush3.bf16.msra.mxu0 %v11550_v11 }
 0xbb0   : > { %10443 = vmatprep.subr.bf16.mxu0 %v12855_v0 }
 0xbb2   : > { %10420 = vmatpush3.bf16.msra.mxu1 %v11549_v12 }
 0xbb3   : > { %10421 = vmatprep.subr.bf16.mxu1 %v12855_v0  ;;  %10444 = vmatpush3.bf16.msra.mxu0 %v11552_v14 }
 0xbb4   : > { %10445 = vmatprep.subr.bf16.mxu0 %v12855_v0 }
 0xbb6   : > { %10422 = vmatpush3.bf16.msra.mxu1 %v11551_v16 }
 0xbb7   : > { %10423 = vmatprep.subr.bf16.mxu1 %v12855_v0  ;;  %10446 = vmatpush3.bf16.msra.mxu0 %v11554_v18 }
 0xbb8   : > { %10447 = vmatprep.subr.bf16.mxu0 %v12855_v0 }
 0xbba   : > { %10424 = vmatpush3.bf16.msra.mxu1 %v11553_v19 }
 0xbbb   : > { %10425 = vmatprep.subr.bf16.mxu1 %v12855_v0  ;;  %10448 = vmatpush3.bf16.msra.mxu0 %v11556_v21 }
 0xbbc   : > { %v4692_v26 = vpop.permute.xlu0 %4691  ;;  %10449 = vmatprep.subr.bf16.mxu0 %v12855_v0 }
 0xbbd   : > { %4698 = vst.msk [vmem:[#allocation3] sm:$0xff] %vm4697_vm6, %v4692_v26 }
 0xbbe   : > { %10426 = vmatpush3.bf16.msra.mxu1 %v11555_v23 }
 0xbbf   : > { %10427 = vmatprep.subr.bf16.mxu1 %v12855_v0  ;;  %10450 = vmatpush3.bf16.msra.mxu0 %v11558_v27 }
 0xbc0   : > { %v4694_v32 = vpop.permute.xlu0 %4693  ;;  %10475 = vmatprep.subr.bf16.mxu0 %v12855_v0 }
 0xbc1   : > { %4699 = vst.msk [vmem:[#allocation3 + $0x8] sm:$0xff] %vm4697_vm6, %v4694_v32 }
 0xbc2   : > { %10428 = vmatpush3.bf16.msra.mxu1 %v11557_v29  ;;  %10452 = vmatmul.mubr.bf16.vlgmr.msra.gmra.mrb[64].mxu0 %v5738_v33  ;;  %v9117_v29 = vld [vmem:[#allocation42] ss:$0 sm:$0xff] }
 0xbc3   : > { %10429 = vmatprep.subr.bf16.mxu1 %v12855_v0  ;;  %10491 = vmatprep.mubr.msk.bf16.mxu0 %vm12857_vm0, %v12855_v0 }
 0xbc4   : > { %10476 = vmatpush3.bf16.msra.mxu0 %v11572_v54  ;;  %v11589_v54 = vld [vmem:[#allocation43 + $0xc0] sm:$0xff]  }
 0xbc5   : > { %10477 = vmatprep.subr.bf16.mxu0 %v12855_v0 }
 0xbc6   : > { %10430 = vmatpush3.bf16.msra.mxu1 %v11561_v35 }
 0xbc7   : > { %10455 = vmatprep.subr.bf16.mxu1 %v12855_v0 }
 0xbc8   : > { %10478 = vmatpush3.bf16.msra.mxu0 %v11574_v57 }
 0xbc9   : > { %10432 = vmatmul.mubr.bf16.vlgmr.msra.gmra.mrb[60].mxu1 %v9089_v38  ;;  %10479 = vmatprep.subr.bf16.mxu0 %v12855_v0 }
 0xbca   : > { %10456 = vmatpush3.bf16.msra.mxu1 %v11562_v36  ;;  %10471 = vmatprep.mubr.msk.bf16.mxu1 %vm12857_vm0, %v12855_v0 }
 0xbcb   : > { %10457 = vmatprep.subr.bf16.mxu1 %v12855_v0 }
 0xbcc   : > { %10480 = vmatpush3.bf16.msra.mxu0 %v11576_v59 }
 0xbcd   : > { %10481 = vmatprep.subr.bf16.mxu0 %v12855_v0 }
 0xbce   : > { %10458 = vmatpush3.bf16.msra.mxu1 %v11563_v39 }
 0xbcf   : > { %10459 = vmatprep.subr.bf16.mxu1 %v12855_v0 }
 0xbd0   : > { %10482 = vmatpush3.bf16.msra.mxu0 %v11578_v61 }
 0xbd1   : > { %10483 = vmatprep.subr.bf16.mxu0 %v12855_v0 }
 0xbd2   : > { %10460 = vmatpush3.bf16.msra.mxu1 %v11564_v40 }
 0xbd3   : > { %10461 = vmatprep.subr.bf16.mxu1 %v12855_v0 }
 0xbd4   : > { %10484 = vmatpush3.bf16.msra.mxu0 %v11580_v63  ;;  %v11592_v63 = vld [vmem:[#allocation43 + $0xc8] sm:$0xff]  }
 0xbd5   : > { %10485 = vmatprep.subr.bf16.mxu0 %v12855_v0 }
 0xbd6   : > { %10462 = vmatpush3.bf16.msra.mxu1 %v11565_v41 }
 0xbd7   : > { %10463 = vmatprep.subr.bf16.mxu1 %v12855_v0 }
 0xbd8   : > { %10486 = vmatpush3.bf16.msra.mxu0 %v11582_v2 }
 0xbd9   : > { %10487 = vmatprep.subr.bf16.mxu0 %v12855_v0 }
 0xbda   : > { %10464 = vmatpush3.bf16.msra.mxu1 %v11566_v42 }
 0xbdb   : > { %10465 = vmatprep.subr.bf16.mxu1 %v12855_v0 }
 0xbdc   : > { %10488 = vmatpush3.bf16.msra.mxu0 %v11584_v4 }
 0xbdd   : > { %10489 = vmatprep.subr.bf16.mxu0 %v12855_v0 }
 0xbde   : > { %10466 = vmatpush3.bf16.msra.mxu1 %v11567_v43  ;;  %v5968_v43 = vld [vmem:[#allocation2] sm:$0x8] }
 0xbdf   : > { %10467 = vmatprep.subr.bf16.mxu1 %v12855_v0 }
 0xbe0   : > { %10490 = vmatpush3.bf16.msra.mxu0 %v11586_v5  ;;  %v11594_v5 = vld [vmem:[#allocation43 + $0xd0] sm:$0xff]  }
 0xbe1   : > { %10515 = vmatprep.subr.bf16.mxu0 %v12855_v0 }
 0xbe2   : > { %10468 = vmatpush3.bf16.msra.mxu1 %v11568_v44 }
 0xbe3   : > { %10469 = vmatprep.subr.bf16.mxu1 %v12855_v0 }
 0xbe6   : > { %10470 = vmatpush3.bf16.msra.mxu1 %v11569_v47 }
 0xbe7   : > { %10495 = vmatprep.subr.bf16.mxu1 %v12855_v0 }
 0xbe9   : > { %10472 = vmatmul.mubr.bf16.vlgmr.msra.gmra.mrb[64].mxu1 %v5854_v51 }
 0xbea   : > { %10511 = vmatprep.mubr.msk.bf16.mxu1 %vm12857_vm0, %v12855_v0  ;;  %10496 = vmatpush3.bf16.msra.mxu1 %v11571_v53 }
 0xbeb   : > { %10497 = vmatprep.subr.bf16.mxu1 %v12855_v0 }
 0xbee   : > { %10498 = vmatpush3.bf16.msra.mxu1 %v11573_v55 }
 0xbef   : > { %10499 = vmatprep.subr.bf16.mxu1 %v12855_v0 }
 0xbf2   : > { %10500 = vmatpush3.bf16.msra.mxu1 %v11575_v56 }
 0xbf3   : > { %10501 = vmatprep.subr.bf16.mxu1 %v12855_v0 }
 0xbf6   : > { %10502 = vmatpush3.bf16.msra.mxu1 %v11577_v58 }
 0xbf7   : > { %10503 = vmatprep.subr.bf16.mxu1 %v12855_v0 }
 0xbfa   : > { %10504 = vmatpush3.bf16.msra.mxu1 %v11579_v60 }
 0xbfb   : > { %10505 = vmatprep.subr.bf16.mxu1 %v12855_v0 }
 0xbfe   : > { %10506 = vmatpush3.bf16.msra.mxu1 %v11581_v62 }
 0xbff   : > { %10507 = vmatprep.subr.bf16.mxu1 %v12855_v0 }
 0xc02   : > { %10508 = vmatpush3.bf16.msra.mxu1 %v11583_v1 }
 0xc03   : > { %10509 = vmatprep.subr.bf16.mxu1 %v12855_v0 }
 0xc06   : > { %10510 = vmatpush3.bf16.msra.mxu1 %v11585_v3  ;;  %v11591_v3 = vld [vmem:[#allocation43 + $0x80] sm:$0xff]  }
 0xc07   : > { %10535 = vmatprep.subr.bf16.mxu1 %v12855_v0 }
 0xc75   : > { %v5582_v6 = vpop.f32.mrb[60].mxu0 }
 0xc76   : > { %v10413_v7 = vpop.f32.mrb[61].mxu0 }
 0xc77   : > { %v5585_v8 = vpop.f32.mrb[62].mxu0  ;;  %v11596_v7 = vld [vmem:[#allocation43 + $0xd8] sm:$0xff]  }
 0xc78   : > { %v10414_v9 = vpop.f32.mrb[63].mxu0 }
 0xc7c   : > { %v5486_v10 = vpop.f32.mrb[56].mxu1 }
 0xc7d   : > { %v5583_v11 = vadd.f32 %v5582_v6, %v5486_v10  ;;  %v10393_v12 = vpop.f32.mrb[57].mxu1  ;;  %v11593_v6 = vld [vmem:[#allocation43 + $0x88] sm:$0xff]   ;;  %v11598_v10 = vld [vmem:[#allocation43 + $0xe0] sm:$0xff]  }
 0xc7e   : > { %v5489_v13 = vpop.f32.mrb[58].mxu1  ;;  %v11597_v12 = vld [vmem:[#allocation43 + $0x98] sm:$0xff]  }
 0xc7f   : > { %v5586_v14 = vadd.f32 %v5585_v8, %v5489_v13  ;;  %v10394_v15 = vpop.f32.mrb[59].mxu1  ;;  %v11595_v8 = vld [vmem:[#allocation43 + $0x90] sm:$0xff]  }
 0xc80   : > { %v11599_v15 = vld [vmem:[#allocation43 + $0xa0] sm:$0xff]  }
 0xc95   : > { %v5822_v16 = vpop.f32.mrb[64].mxu0 }
 0xc96   : > { %v10453_v17 = vpop.f32.mrb[65].mxu0 }
 0xc97   : > { %v5825_v18 = vpop.f32.mrb[66].mxu0  ;;  %v11602_v17 = vld [vmem:[#allocation43 + $0xf0] sm:$0xff]  }
 0xc98   : > { %v10454_v19 = vpop.f32.mrb[67].mxu0 }
 0xc99   : > { %v11601_v19 = vld [vmem:[#allocation43 + $0xa8] sm:$0xff]  }
 0xc9c   : > { %v5690_v20 = vpop.f32.mrb[60].mxu1 }
 0xc9d   : > { %v5697_v21 = vadd.f32 %v5690_v20, %v5583_v11  ;;  %v10433_v22 = vpop.f32.mrb[61].mxu1 }
 0xc9e   : > { %v5693_v23 = vpop.f32.mrb[62].mxu1  ;;  %v11604_v22 = vld [vmem:[#allocation43 + $0xf8] sm:$0xff]  }
 0xc9f   : > { %v5698_v24 = vadd.f32 %v5693_v23, %v5586_v14  ;;  %v10434_v25 = vpop.f32.mrb[63].mxu1  ;;  %v5829_v26 = vadd.f32 %v5822_v16, %v5697_v21  ;;  %v11600_v14 = vld [vmem:[#allocation43 + $0xe8] sm:$0xff]  }
 0xca1   : > { %v5830_v27 = vadd.f32 %v5825_v18, %v5698_v24  ;;  %v11606_v18 = vld [vmem:[#allocation2 + $0xc] ss:$0 sps:$4 sm:$0x11]   ;;  %v11603_v24 = vld [vmem:[#allocation43 + $0xb0] sm:$0xff]  }
 0xca2   : > { %v6362_v21 = vshll.u32 %v11606_v18, 16 }
 0xcbc   : > { %v5938_v28 = vpop.f32.mrb[64].mxu1 }
 0xcbd   : > { %v5945_v30 = vadd.f32 %v5938_v28, %v5829_v26  ;;  %v10473_v31 = vpop.f32.mrb[65].mxu1  ;;  %v6364_v26 = vrot.slane %v6362_v21, 1  ;;  %v11607_v28 = vld [vmem:[#allocation43 + $0xb8] sm:$0xff]  }
 0xcbe   : > { %v5941_v32 = vpop.f32.mrb[66].mxu1  ;;  %v11610_v31 = vld [vmem:[#allocation43 + $0x108] sm:$0xff]  }
 0xcbf   : > { %v5954_v33 = vadd.f32 %v9117_v29, %v5945_v30  ;;  %v5946_v35 = vadd.f32 %v5941_v32, %v5830_v27  ;;  %v10474_v36 = vpop.f32.mrb[67].mxu1  ;;  %v11611_v32 = vld [vmem:[#allocation43 + $0x110] sm:$0xff]  }
 0xcc0   : > { %v11614_v36 = vld [vmem:[#allocation43 + $0x128] sm:$0xff]  }
 0xcc1   : > { %v5956_v38 = vmax.f32 %v5954_v33, 0.0  ;;  %v5955_v39 = vadd.f32 %v9117_v29, %v5946_v35  ;;  %v11609_v29 = vld [vmem:[#allocation43 + $0x100] sm:$0xff]   ;;  %v11612_v33 = vld [vmem:[#allocation43 + $0x118] sm:$0xff]  }
 0xcc2   : > { %v11613_v35 = vld [vmem:[#allocation43 + $0x120] sm:$0xff]  }
 0xcc3   : > { %v9318_v40 = vpack.c.bf16 %v5956_v38, %v5956_v38  ;;  %v5957_v41 = vmax.f32 %v5955_v39, 0.0  ;;  %v11615_v38 = vld [vmem:[#allocation43 + $0x130] sm:$0xff]  }
 0xcc5   : > { %5966 = vst [vmem:[#allocation2 + $0x4] sm:$0xf] %v9318_v40  ;;  %v9319_v42 = vpack.c.bf16 %v5957_v41, %v5957_v41  ;;  %v11616_v41 = vld [vmem:[#allocation43 + $0x138] sm:$0xff]  }
 0xcc7   : > { %5967 = vst [vmem:[#allocation2 + $0x8] sm:$0xf] %v9319_v42 }
 0xccc   : > { %v14127_v44 = vld [vmem:[#allocation2 + $0x4] sm:$0xf] }
 0xccd   : > { %v9120_v45 = vcombine.low %v5968_v43, %v14127_v44  ;;  %v6326_v11 = vld [vmem:[#allocation2 + $0x4] sm:$0xf]  ;;  %v6480_v43 = vrot.slane %v11606_v18, 1 }
 0xcce   : > { %v11588_v46 = vld [vmem:[#allocation2 + $0x8] ss:$0 sps:$4 sm:$0x77]   ;;  %v6458_v39 = vld [vmem:[#allocation2 + $0x4] sm:$0xe] }
 0xccf   : > { %v6123_v47 = vrot.slane %v9120_v45, 3  ;;  %v14130_v48 = vld [vmem:[#allocation2 + $0x8] sm:$0xf]  ;;  %v6014_v50 = vshrl.u32 %v9120_v45, 16  ;;  %v6017_v51 = vshll.u32 %v9120_v45, 16  ;;  %v6124_v53 = vrot.slane %v11588_v46, 3 }
 0xcd0   : > { %v9121_v55 = vcombine.low %v14130_v48, %v14130_v48  ;;  %v14145_v9 = vld [vmem:[#allocation2 + $0x8] sm:$0xf]  ;;  %v9139_v30 = vcombine.low %v14127_v44, %v14130_v48  ;;  %v11618_v45 = vld [vmem:[#allocation46 + $0x40] sm:$0xff]  }
 0xcd1   : > { %v6016_v56 = vrot.slane %v6014_v50, 3  ;;  %v6125_v57 = vsel %vm4867_vm4, %v6123_v47, %v6124_v53  ;;  %v6019_v58 = vrot.slane %v6017_v51, 4  ;;  %v9148_v13 = vcombine.low %v6326_v11, %v14145_v9  ;;  %v11620_v46 = vld [vmem:[#allocation46] sm:$0xff]   ;;  %v11619_v47 = vld [vmem:[#allocation46 + $0x48] sm:$0xff]   ;;  %v11621_v48 = vld [vmem:[#allocation46 + $0x50] sm:$0xff]  }
 0xcd2   : > { %v6022_v59 = vshrl.u32 %v9121_v55, 16  ;;  %v6025_v60 = vshll.u32 %v9121_v55, 16  ;;  %10512 = vmatmul.mubr.bf16.vlgmr.msra.gmra.mrb[68].mxu1 %v6125_v57  ;;  %v9158_v40 = vcombine.low %v6458_v39, %v14145_v9  ;;  %v11622_v50 = vld [vmem:[#allocation46 + $0x8] sm:$0xff]   ;;  %v11623_v51 = vld [vmem:[#allocation46 + $0x58] sm:$0xff]   ;;  %v11624_v53 = vld [vmem:[#allocation46 + $0x10] sm:$0xff]  }
 0xcd3   : > { %10536 = vmatpush3.bf16.msra.mxu1 %v11589_v54  ;;  %10551 = vmatprep.mubr.msk.bf16.mxu1 %vm12857_vm0, %v12855_v0  ;;  %v6020_v1 = vor.u32 %v6019_v58, %v6016_v56  ;;  %v6357_v16 = vshll.u32 %v9148_v13, 16  ;;  %v6355_v23 = vshrl.u32 %v9148_v13, 16  ;;  %v11625_v54 = vld [vmem:[#allocation46 + $0x60] sm:$0xff]   ;;  %v11626_v55 = vld [vmem:[#allocation46 + $0x18] sm:$0xff]   ;;  %v11627_v56 = vld [vmem:[#allocation46 + $0x68] sm:$0xff]  }
 0xcd4   : > { %v6024_v61 = vrot.slane %v6022_v59, 3  ;;  %v6027_v62 = vrot.slane %v6025_v60, 4  ;;  %10537 = vmatprep.subr.bf16.mxu1 %v12855_v0  ;;  %v6479_v42 = vrot.slane %v9158_v40, 1  ;;  %v11628_v57 = vld [vmem:[#allocation46 + $0x20] sm:$0xff]   ;;  %v11629_v58 = vld [vmem:[#allocation46 + $0x70] sm:$0xff]   ;;  %v11630_v59 = vld [vmem:[#allocation46 + $0x28] sm:$0xff]  }
 0xcd5   : > { %v6359_v20 = vrot.slane %v6357_v16, 1  ;;  %v11631_v60 = vld [vmem:[#allocation46 + $0x78] sm:$0xff]  }
 0xcd6   : > { %v6028_v2 = vor.u32 %v6027_v62, %v6024_v61  ;;  %v6481_v44 = vsel %vm5224_vm5, %v6479_v42, %v6480_v43  ;;  %v11632_v61 = vld [vmem:[#allocation46 + $0x30] sm:$0xff]   ;;  %v11635_v62 = vld [vmem:[#allocation46 + $0x38] sm:$0xff]   ;;  %v6599_v43 = vld [vmem:[#allocation2] sm:$0x8] }
 0xcd7   : > { %10538 = vmatpush3.bf16.msra.mxu1 %v11592_v63  ;;  %v6360_v25 = vor.u32 %v6359_v20, %v6355_v23  ;;  %v9167_v23 = vld [vmem:[#allocation45] ss:$0 sm:$0xff] }
 0xcd8   : > { %v6029_v4 = vsel %vm1667_vm1, %v6020_v1, %v6028_v2  ;;  %10539 = vmatprep.subr.bf16.mxu1 %v12855_v0 }
 0xcd9   : > { %10492 = vmatmul.mubr.bf16.vlgmr.msra.gmra.mrb[68].mxu0 %v6029_v4  ;;  %v6365_v27 = vsel %vm1803_vm2, %v6360_v25, %v6364_v26 }
 0xcda   : > { %10516 = vmatpush3.bf16.msra.mxu0 %v11591_v3  ;;  %10531 = vmatprep.mubr.msk.bf16.mxu0 %vm12857_vm0, %v12855_v0 }
 0xcdb   : > { %10517 = vmatprep.subr.bf16.mxu0 %v12855_v0  ;;  %10540 = vmatpush3.bf16.msra.mxu1 %v11594_v5 }
 0xcdc   : > { %10541 = vmatprep.subr.bf16.mxu1 %v12855_v0 }
 0xcde   : > { %10518 = vmatpush3.bf16.msra.mxu0 %v11593_v6 }
 0xcdf   : > { %10519 = vmatprep.subr.bf16.mxu0 %v12855_v0  ;;  %10542 = vmatpush3.bf16.msra.mxu1 %v11596_v7 }
 0xce0   : > { %10543 = vmatprep.subr.bf16.mxu1 %v12855_v0 }
 0xce2   : > { %10520 = vmatpush3.bf16.msra.mxu0 %v11595_v8 }
 0xce3   : > { %10521 = vmatprep.subr.bf16.mxu0 %v12855_v0  ;;  %10544 = vmatpush3.bf16.msra.mxu1 %v11598_v10 }
 0xce4   : > { %10545 = vmatprep.subr.bf16.mxu1 %v12855_v0 }
 0xce6   : > { %10522 = vmatpush3.bf16.msra.mxu0 %v11597_v12 }
 0xce7   : > { %10523 = vmatprep.subr.bf16.mxu0 %v12855_v0  ;;  %10546 = vmatpush3.bf16.msra.mxu1 %v11600_v14 }
 0xce8   : > { %10547 = vmatprep.subr.bf16.mxu1 %v12855_v0 }
 0xcea   : > { %10524 = vmatpush3.bf16.msra.mxu0 %v11599_v15 }
 0xceb   : > { %10525 = vmatprep.subr.bf16.mxu0 %v12855_v0  ;;  %10548 = vmatpush3.bf16.msra.mxu1 %v11602_v17 }
 0xcec   : > { %10549 = vmatprep.subr.bf16.mxu1 %v12855_v0 }
 0xcee   : > { %10526 = vmatpush3.bf16.msra.mxu0 %v11601_v19 }
 0xcef   : > { %10527 = vmatprep.subr.bf16.mxu0 %v12855_v0  ;;  %10550 = vmatpush3.bf16.msra.mxu1 %v11604_v22 }
 0xcf0   : > { %10575 = vmatprep.subr.bf16.mxu1 %v12855_v0 }
 0xcf2   : > { %10528 = vmatpush3.bf16.msra.mxu0 %v11603_v24  ;;  %10552 = vmatmul.mubr.bf16.vlgmr.msra.gmra.mrb[72].mxu1 %v6365_v27  ;;  %v4292_v24 = vadd.f32 %v13938_v34, %v13792_v49 }
 0xcf3   : > { %10529 = vmatprep.subr.bf16.mxu0 %v12855_v0  ;;  %10591 = vmatprep.mubr.msk.bf16.mxu1 %vm12857_vm0, %v12855_v0 }
 0xcf4   : > { %10576 = vmatpush3.bf16.msra.mxu1 %v11618_v45 }
 0xcf5   : > { %10577 = vmatprep.subr.bf16.mxu1 %v12855_v0 }
 0xcf6   : > { %10530 = vmatpush3.bf16.msra.mxu0 %v11607_v28  ;;  %v4293_v28 = vadd.f32 %v13942_v37, %v13796_v52  ;;  %v11634_v37 = vld [vmem:[#allocation46 + $0x80] sm:$0xff]  }
 0xcf7   : > { %10555 = vmatprep.subr.bf16.mxu0 %v12855_v0 }
 0xcf8   : > { %10578 = vmatpush3.bf16.msra.mxu1 %v11619_v47 }
 0xcf9   : > { %10532 = vmatmul.mubr.bf16.vlgmr.msra.gmra.mrb[72].mxu0 %v9139_v30  ;;  %10579 = vmatprep.subr.bf16.mxu1 %v12855_v0 }
 0xcfa   : > { %10556 = vmatpush3.bf16.msra.mxu0 %v11609_v29  ;;  %10571 = vmatprep.mubr.msk.bf16.mxu0 %vm12857_vm0, %v12855_v0 }
 0xcfb   : > { %10557 = vmatprep.subr.bf16.mxu0 %v12855_v0 }
 0xcfc   : > { %10580 = vmatpush3.bf16.msra.mxu1 %v11621_v48 }
 0xcfd   : > { %10581 = vmatprep.subr.bf16.mxu1 %v12855_v0 }
 0xcfe   : > { %10558 = vmatpush3.bf16.msra.mxu0 %v11610_v31 }
 0xcff   : > { %10559 = vmatprep.subr.bf16.mxu0 %v12855_v0 }
 0xd00   : > { %10582 = vmatpush3.bf16.msra.mxu1 %v11623_v51 }
 0xd01   : > { %10583 = vmatprep.subr.bf16.mxu1 %v12855_v0 }
 0xd02   : > { %10560 = vmatpush3.bf16.msra.mxu0 %v11611_v32  ;;  %v4294_v32 = vmax.f32 %v4292_v24, 0.0 }
 0xd03   : > { %10561 = vmatprep.subr.bf16.mxu0 %v12855_v0 }
 0xd04   : > { %10584 = vmatpush3.bf16.msra.mxu1 %v11625_v54 }
 0xd05   : > { %10585 = vmatprep.subr.bf16.mxu1 %v12855_v0 }
 0xd06   : > { %10562 = vmatpush3.bf16.msra.mxu0 %v11612_v33 }
 0xd07   : > { %10563 = vmatprep.subr.bf16.mxu0 %v12855_v0 }
 0xd08   : > { %10586 = vmatpush3.bf16.msra.mxu1 %v11627_v56 }
 0xd09   : > { %10587 = vmatprep.subr.bf16.mxu1 %v12855_v0 }
 0xd0a   : > { %10564 = vmatpush3.bf16.msra.mxu0 %v11613_v35 }
 0xd0b   : > { %10565 = vmatprep.subr.bf16.mxu0 %v12855_v0 }
 0xd0c   : > { %10588 = vmatpush3.bf16.msra.mxu1 %v11629_v58 }
 0xd0d   : > { %10589 = vmatprep.subr.bf16.mxu1 %v12855_v0 }
 0xd0e   : > { %10566 = vmatpush3.bf16.msra.mxu0 %v11614_v36  ;;  %v4295_v36 = vmax.f32 %v4293_v28, 0.0 }
 0xd0f   : > { %10567 = vmatprep.subr.bf16.mxu0 %v12855_v0 }
 0xd10   : > { %10590 = vmatpush3.bf16.msra.mxu1 %v11631_v60 }
 0xd11   : > { %10615 = vmatprep.subr.bf16.mxu1 %v12855_v0 }
 0xd12   : > { %10568 = vmatpush3.bf16.msra.mxu0 %v11615_v38 }
 0xd13   : > { %10569 = vmatprep.subr.bf16.mxu0 %v12855_v0 }
 0xd16   : > { %10570 = vmatpush3.bf16.msra.mxu0 %v11616_v41 }
 0xd17   : > { %10595 = vmatprep.subr.bf16.mxu0 %v12855_v0 }
 0xd19   : > { %10572 = vmatmul.mubr.bf16.vlgmr.msra.gmra.mrb[76].mxu0 %v6481_v44 }
 0xd1a   : > { %10611 = vmatprep.mubr.msk.bf16.mxu0 %vm12857_vm0, %v12855_v0  ;;  %10596 = vmatpush3.bf16.msra.mxu0 %v11620_v46 }
 0xd1b   : > { %10597 = vmatprep.subr.bf16.mxu0 %v12855_v0 }
 0xd1e   : > { %10598 = vmatpush3.bf16.msra.mxu0 %v11622_v50 }
 0xd1f   : > { %10599 = vmatprep.subr.bf16.mxu0 %v12855_v0 }
 0xd22   : > { %10600 = vmatpush3.bf16.msra.mxu0 %v11624_v53 }
 0xd23   : > { %10601 = vmatprep.subr.bf16.mxu0 %v12855_v0 }
 0xd26   : > { %10602 = vmatpush3.bf16.msra.mxu0 %v11626_v55 }
 0xd27   : > { %10603 = vmatprep.subr.bf16.mxu0 %v12855_v0 }
 0xd2a   : > { %10604 = vmatpush3.bf16.msra.mxu0 %v11628_v57 }
 0xd2b   : > { %10605 = vmatprep.subr.bf16.mxu0 %v12855_v0 }
 0xd2e   : > { %10606 = vmatpush3.bf16.msra.mxu0 %v11630_v59  ;;  %v11636_v59 = vld [vmem:[#allocation46 + $0x88] sm:$0xff]  }
 0xd2f   : > { %10607 = vmatprep.subr.bf16.mxu0 %v12855_v0 }
 0xd32   : > { %10608 = vmatpush3.bf16.msra.mxu0 %v11632_v61 }
 0xd33   : > { %10609 = vmatprep.subr.bf16.mxu0 %v12855_v0 }
 0xd36   : > { %10610 = vmatpush3.bf16.msra.mxu0 %v11635_v62 }
 0xd37   : > { %10635 = vmatprep.subr.bf16.mxu0 %v12855_v0 }
 0xda5   : > { %v6209_v63 = vpop.f32.mrb[68].mxu1 }
 0xda6   : > { %v10513_v1 = vpop.f32.mrb[69].mxu1 }
 0xda7   : > { %v6212_v2 = vpop.f32.mrb[70].mxu1  ;;  %v11639_v1 = vld [vmem:[#allocation49 + $0x40] sm:$0xff]  }
 0xda8   : > { %v10514_v3 = vpop.f32.mrb[71].mxu1 }
 0xdac   : > { %v6113_v4 = vpop.f32.mrb[68].mxu0 }
 0xdad   : > { %v6210_v5 = vadd.f32 %v6209_v63, %v6113_v4  ;;  %v10493_v6 = vpop.f32.mrb[69].mxu0  ;;  %v11641_v4 = vld [vmem:[#allocation49 + $0x48] sm:$0xff]  }
 0xdae   : > { %v6116_v7 = vpop.f32.mrb[70].mxu0  ;;  %v11643_v6 = vld [vmem:[#allocation49 + $0x50] sm:$0xff]  }
 0xdaf   : > { %v6213_v8 = vadd.f32 %v6212_v2, %v6116_v7  ;;  %v10494_v9 = vpop.f32.mrb[71].mxu0  ;;  %v11640_v2 = vld [vmem:[#allocation46 + $0x90] sm:$0xff]   ;;  %v11644_v7 = vld [vmem:[#allocation46 + $0xa0] sm:$0xff]  }
 0xdb0   : > { %v11646_v9 = vld [vmem:[#allocation46 + $0xa8] sm:$0xff]  }
 0xdc5   : > { %v6449_v10 = vpop.f32.mrb[72].mxu1 }
 0xdc6   : > { %v10553_v11 = vpop.f32.mrb[73].mxu1 }
 0xdc7   : > { %v6452_v12 = vpop.f32.mrb[74].mxu1  ;;  %v7003_v11 = vld [vmem:[#allocation2] sm:$0x8] }
 0xdc8   : > { %v10554_v13 = vpop.f32.mrb[75].mxu1 }
 0xdcc   : > { %v6317_v14 = vpop.f32.mrb[72].mxu0 }
 0xdcd   : > { %v6324_v15 = vadd.f32 %v6317_v14, %v6210_v5  ;;  %v10533_v16 = vpop.f32.mrb[73].mxu0  ;;  %v11642_v5 = vld [vmem:[#allocation46 + $0x98] sm:$0xff]  }
 0xdce   : > { %v6320_v17 = vpop.f32.mrb[74].mxu0  ;;  %v11648_v16 = vld [vmem:[#allocation46 + $0xb0] sm:$0xff]  }
 0xdcf   : > { %v6325_v18 = vadd.f32 %v6320_v17, %v6213_v8  ;;  %v10534_v19 = vpop.f32.mrb[75].mxu0  ;;  %v6456_v20 = vadd.f32 %v6449_v10, %v6324_v15  ;;  %v11645_v8 = vld [vmem:[#allocation49 + $0x58] sm:$0xff]   ;;  %v11652_v10 = vld [vmem:[#allocation2 + $0xc] ss:$0 sps:$4 sm:$0x11]   ;;  %v11647_v15 = vld [vmem:[#allocation49 + $0x60] sm:$0xff]  }
 0xdd1   : > { %v6457_v21 = vadd.f32 %v6452_v12, %v6325_v18 }
 0xdec   : > { %v6565_v22 = vpop.f32.mrb[76].mxu0 }
 0xded   : > { %v6572_v25 = vadd.f32 %v6565_v22, %v6456_v20  ;;  %v10573_v26 = vpop.f32.mrb[77].mxu0  ;;  %v6877_v20 = vshll.u32 %v11652_v10, 16  ;;  %v11650_v22 = vld [vmem:[#allocation46 + $0xb8] sm:$0xff]   ;;  %v11684_v10 = vld [vmem:[#allocation49 + $0xe8] sm:$0xff]  }
 0xdee   : > { %v6568_v27 = vpop.f32.mrb[78].mxu0 }
 0xdef   : > { %v6581_v29 = vadd.f32 %v9167_v23, %v6572_v25  ;;  %v6573_v30 = vadd.f32 %v6568_v27, %v6457_v21  ;;  %v10574_v31 = vpop.f32.mrb[79].mxu0  ;;  %v11649_v21 = vld [vmem:[#allocation49 + $0x68] sm:$0xff]  }
 0xdf0   : > { %v11654_v31 = vld [vmem:[#allocation49] sm:$0xff]  }
 0xdf1   : > { %v6583_v33 = vmax.f32 %v6581_v29, 0.0  ;;  %v6582_v35 = vadd.f32 %v9167_v23, %v6573_v30  ;;  %v6879_v29 = vrot.slane %v6877_v20, 1  ;;  %v11653_v30 = vld [vmem:[#allocation49 + $0x70] sm:$0xff]  }
 0xdf3   : > { %v6585_v38 = vadd.f32 %v6583_v33, %v4294_v32  ;;  %v9320_v39 = vpack.c.bf16 %v6583_v33, %v6583_v33  ;;  %v6584_v40 = vmax.f32 %v6582_v35, 0.0 }
 0xdf5   : > { %6597 = vst [vmem:[#allocation2 + $0x4] sm:$0xf] %v9320_v39  ;;  %v6586_v41 = vadd.f32 %v6584_v40, %v4295_v36  ;;  %v9321_v42 = vpack.c.bf16 %v6584_v40, %v6584_v40  ;;  %v6587_v49 = vmax.f32 %v6585_v38, 0.0  ;;  %v11655_v39 = vld [vmem:[#allocation49 + $0x78] sm:$0xff]   ;;  %v11656_v40 = vld [vmem:[#allocation49 + $0x8] sm:$0xff]  }
 0xdf7   : > { %6598 = vst [vmem:[#allocation2 + $0x8] sm:$0xf] %v9321_v42  ;;  %v6588_v34 = vmax.f32 %v6586_v41, 0.0  ;;  %v9322_v45 = vpack.c.bf16 %v6587_v49, %v6587_v49  ;;  %v11659_v49 = vld [vmem:[#allocation49 + $0x80] sm:$0xff]  }
 0xdf9   : > { %v9323_v52 = vpack.c.bf16 %v6588_v34, %v6588_v34  ;;  %v11660_v34 = vld [vmem:[#allocation49 + $0x10] sm:$0xff]  }
 0xdfc   : > { %v6600_v44 = vld [vmem:[#allocation2 + $0x4] sm:$0xf] }
 0xdfd   : > { %v9179_v46 = vcombine.low %v6599_v43, %v6600_v44 }
 0xdfe   : > { %v6601_v47 = vld [vmem:[#allocation2 + $0x8] sm:$0xf] }
 0xdff   : > { %v14198_v48 = vld [vmem:[#allocation2 + $0x4] sm:$0xff]   ;;  %v9170_v50 = vcombine.low %v6600_v44, %v6601_v47  ;;  %v9180_v51 = vcombine.low %v6601_v47, %v6601_v47  ;;  %v6735_v53 = vshrl.u32 %v9179_v46, 16  ;;  %v6738_v54 = vshll.u32 %v9179_v46, 16  ;;  %v11665_v46 = vld [vmem:[#allocation49 + $0x98] sm:$0xff]  }
 0xe00   : > { %7001 = vst [vmem:[#allocation2 + $0x4] sm:$0xf] %v9322_v45  ;;  %7002 = vst [vmem:[#allocation2 + $0x8] sm:$0xf] %v9323_v52  ;;  %v6872_v12 = vshll.u32 %v14198_v48, 16  ;;  %v6870_v23 = vshrl.u32 %v14198_v48, 16 }
 0xe01   : > { %10592 = vmatmul.mubr.bf16.vlgmr.msra.gmra.mrb[76].mxu1 %v9170_v50  ;;  %v6737_v55 = vrot.slane %v6735_v53, 3  ;;  %v6740_v56 = vrot.slane %v6738_v54, 4  ;;  %v6743_v57 = vshrl.u32 %v9180_v51, 16  ;;  %v6746_v58 = vshll.u32 %v9180_v51, 16  ;;  %v11661_v44 = vld [vmem:[#allocation49 + $0x88] sm:$0xff]   ;;  %v11662_v45 = vld [vmem:[#allocation49 + $0x18] sm:$0xff]  }
 0xe02   : > { %10616 = vmatpush3.bf16.msra.mxu1 %v11634_v37  ;;  %10631 = vmatprep.mubr.msk.bf16.mxu1 %vm12857_vm0, %v12855_v0  ;;  %v6874_v19 = vrot.slane %v6872_v12, 1  ;;  %v11663_v52 = vld [vmem:[#allocation49 + $0x90] sm:$0xff]   ;;  %v11664_v37 = vld [vmem:[#allocation49 + $0x20] sm:$0xff]   ;;  %v11666_v47 = vld [vmem:[#allocation49 + $0x28] sm:$0xff]  }
 0xe03   : > { %10617 = vmatprep.subr.bf16.mxu1 %v12855_v0  ;;  %v6745_v60 = vrot.slane %v6743_v57, 3  ;;  %v6748_v61 = vrot.slane %v6746_v58, 4  ;;  %v6741_v62 = vor.u32 %v6740_v56, %v6737_v55  ;;  %v11667_v48 = vld [vmem:[#allocation49 + $0xa0] sm:$0xff]   ;;  %v11668_v50 = vld [vmem:[#allocation49 + $0x30] sm:$0xff]   ;;  %v11669_v53 = vld [vmem:[#allocation49 + $0xa8] sm:$0xff]  }
 0xe04   : > { %v6875_v28 = vor.u32 %v6874_v19, %v6870_v23  ;;  %v11670_v54 = vld [vmem:[#allocation49 + $0x38] sm:$0xff]   ;;  %v11672_v57 = vld [vmem:[#allocation49 + $0xb0] sm:$0xff]   ;;  %v11673_v58 = vld [vmem:[#allocation49 + $0xc0] sm:$0xff]  }
 0xe05   : > { %v6749_v63 = vor.u32 %v6748_v61, %v6745_v60  ;;  %v11674_v60 = vld [vmem:[#allocation49 + $0xb8] sm:$0xff]   ;;  %v11675_v61 = vld [vmem:[#allocation49 + $0xc8] sm:$0xff]   ;;  %v11685_v12 = vld [vmem:[#allocation49 + $0x120] sm:$0xff]  }
 0xe06   : > { %10618 = vmatpush3.bf16.msra.mxu1 %v11636_v59  ;;  %v6880_v38 = vsel %vm1803_vm2, %v6875_v28, %v6879_v29  ;;  %v11691_v23 = vld [vmem:[#allocation49 + $0x130] sm:$0xff]  }
 0xe07   : > { %v6750_v3 = vsel %vm1667_vm1, %v6741_v62, %v6749_v63  ;;  %10619 = vmatprep.subr.bf16.mxu1 %v12855_v0  ;;  %v14214_v13 = vld [vmem:[#allocation2 + $0x4] sm:$0xf]  ;;  %v14216_v14 = vld [vmem:[#allocation2 + $0x8] sm:$0xf]  ;;  %v11677_v62 = vld [vmem:[#allocation49 + $0x100] sm:$0xff]  }
 0xe08   : > { %10612 = vmatmul.mubr.bf16.vlgmr.msra.gmra.mrb[80].mxu0 %v6750_v3  ;;  %v14221_v17 = vcombine.low %v7003_v11, %v14214_v13  ;;  %v9203_v18 = vcombine.low %v14216_v14, %v14216_v14  ;;  %v11671_v51 = vld [vmem:[#allocation2 + $0x8] ss:$0 sps:$4 sm:$0x77]   ;;  %v9221_v63 = vcombine.low %v14214_v13, %v14216_v14  ;;  %v11680_v3 = vld [vmem:[#allocation49 + $0xd8] sm:$0xff]  }
 0xe09   : > { %10636 = vmatpush3.bf16.msra.mxu0 %v11639_v1  ;;  %10651 = vmatprep.mubr.msk.bf16.mxu0 %vm12857_vm0, %v12855_v0  ;;  %v7159_v56 = vrot.slane %v11671_v51, 3  ;;  %v11678_v1 = vld [vmem:[#allocation49 + $0xd0] sm:$0xff]  }
 0xe0a   : > { %10620 = vmatpush3.bf16.msra.mxu1 %v11640_v2  ;;  %10637 = vmatprep.subr.bf16.mxu0 %v12855_v0  ;;  %v7049_v24 = vshrl.u32 %v14221_v17, 16  ;;  %v7052_v25 = vshll.u32 %v14221_v17, 16  ;;  %v7057_v26 = vshrl.u32 %v9203_v18, 16  ;;  %v7060_v27 = vshll.u32 %v9203_v18, 16  ;;  %v11679_v2 = vld [vmem:[#allocation49 + $0x108] sm:$0xff]   ;;  %v11686_v13 = vld [vmem:[#allocation49 + $0xf0] sm:$0xff]  }
 0xe0b   : > { %10621 = vmatprep.subr.bf16.mxu1 %v12855_v0  ;;  %v7158_v55 = vrot.slane %v14221_v17, 3  ;;  %v11690_v14 = vld [vmem:[#allocation2 + $0xc] ss:$0 sps:$4 sm:$0x11]   ;;  %v11687_v17 = vld [vmem:[#allocation49 + $0x128] sm:$0xff]   ;;  %v11688_v18 = vld [vmem:[#allocation49 + $0xf8] sm:$0xff]  }
 0xe0c   : > { %v7051_v32 = vrot.slane %v7049_v24, 3  ;;  %v7054_v33 = vrot.slane %v7052_v25, 4  ;;  %v7059_v35 = vrot.slane %v7057_v26, 3  ;;  %v7062_v36 = vrot.slane %v7060_v27, 4  ;;  %v11692_v26 = vld [vmem:[#allocation49 + $0x138] sm:$0xff]  }
 0xe0d   : > { %10638 = vmatpush3.bf16.msra.mxu0 %v11641_v4  ;;  %v7160_v59 = vsel %vm4867_vm4, %v7158_v55, %v7159_v56  ;;  %v11681_v4 = vld [vmem:[#allocation49 + $0x110] sm:$0xff]   ;;  %v7515_v28 = vrot.slane %v11690_v14, 1 }
 0xe0e   : > { %10622 = vmatpush3.bf16.msra.mxu1 %v11642_v5  ;;  %10639 = vmatprep.subr.bf16.mxu0 %v12855_v0  ;;  %v7055_v41 = vor.u32 %v7054_v33, %v7051_v32  ;;  %v7063_v42 = vor.u32 %v7062_v36, %v7059_v35  ;;  %v7361_v5 = vld [vmem:[#allocation2 + $0x4] sm:$0xf]  ;;  %v11696_v32 = vld [vmem:[#allocation52 + $0x50] sm:$0xff]   ;;  %v11697_v33 = vld [vmem:[#allocation52] sm:$0xff]  }
 0xe0f   : > { %10623 = vmatprep.subr.bf16.mxu1 %v12855_v0  ;;  %v11698_v35 = vld [vmem:[#allocation52 + $0x58] sm:$0xff]   ;;  %v11699_v36 = vld [vmem:[#allocation52 + $0x8] sm:$0xff]  }
 0xe10   : > { %v7064_v43 = vsel %vm1667_vm1, %v7055_v41, %v7063_v42  ;;  %v11703_v41 = vld [vmem:[#allocation52 + $0x18] sm:$0xff]   ;;  %v11704_v42 = vld [vmem:[#allocation52 + $0x70] sm:$0xff]  }
 0xe11   : > { %10640 = vmatpush3.bf16.msra.mxu0 %v11643_v6  ;;  %v7362_v6 = vld [vmem:[#allocation2 + $0x8] sm:$0xf] }
 0xe12   : > { %10624 = vmatpush3.bf16.msra.mxu1 %v11644_v7  ;;  %10641 = vmatprep.subr.bf16.mxu0 %v12855_v0  ;;  %v11682_v7 = vld [vmem:[#allocation49 + $0xe0] sm:$0xff]  }
 0xe13   : > { %10625 = vmatprep.subr.bf16.mxu1 %v12855_v0 }
 0xe15   : > { %10642 = vmatpush3.bf16.msra.mxu0 %v11645_v8  ;;  %v9230_v8 = vcombine.low %v7361_v5, %v7362_v6 }
 0xe16   : > { %10626 = vmatpush3.bf16.msra.mxu1 %v11646_v9  ;;  %10643 = vmatprep.subr.bf16.mxu0 %v12855_v0  ;;  %v11683_v9 = vld [vmem:[#allocation49 + $0x118] sm:$0xff]  }
 0xe17   : > { %10627 = vmatprep.subr.bf16.mxu1 %v12855_v0  ;;  %v7392_v11 = vshll.u32 %v9230_v8, 16  ;;  %v7390_v19 = vshrl.u32 %v9230_v8, 16 }
 0xe19   : > { %10644 = vmatpush3.bf16.msra.mxu0 %v11647_v15  ;;  %v7394_v15 = vrot.slane %v7392_v11, 1 }
 0xe1a   : > { %10628 = vmatpush3.bf16.msra.mxu1 %v11648_v16  ;;  %10645 = vmatprep.subr.bf16.mxu0 %v12855_v0  ;;  %v7397_v16 = vshll.u32 %v11690_v14, 16 }
 0xe1b   : > { %10629 = vmatprep.subr.bf16.mxu1 %v12855_v0  ;;  %v7395_v20 = vor.u32 %v7394_v15, %v7390_v19 }
 0xe1d   : > { %10646 = vmatpush3.bf16.msra.mxu0 %v11649_v21  ;;  %v7399_v21 = vrot.slane %v7397_v16, 1 }
 0xe1e   : > { %10630 = vmatpush3.bf16.msra.mxu1 %v11650_v22  ;;  %10647 = vmatprep.subr.bf16.mxu0 %v12855_v0  ;;  %v7493_v22 = vld [vmem:[#allocation2 + $0x4] sm:$0xe] }
 0xe1f   : > { %10655 = vmatprep.subr.bf16.mxu1 %v12855_v0  ;;  %v9240_v24 = vcombine.low %v7493_v22, %v7362_v6  ;;  %v7400_v25 = vsel %vm1803_vm2, %v7395_v20, %v7399_v21 }
 0xe21   : > { %10632 = vmatmul.mubr.bf16.vlgmr.msra.gmra.mrb[80].mxu1 %v6880_v38  ;;  %10648 = vmatpush3.bf16.msra.mxu0 %v11653_v30  ;;  %v7514_v27 = vrot.slane %v9240_v24, 1  ;;  %v11694_v30 = vld [vmem:[#allocation52 + $0x40] sm:$0xff]  }
 0xe22   : > { %10656 = vmatpush3.bf16.msra.mxu1 %v11654_v31  ;;  %10649 = vmatprep.subr.bf16.mxu0 %v12855_v0  ;;  %v11695_v31 = vld [vmem:[#allocation52 + $0x48] sm:$0xff]   ;;  %v11700_v38 = vld [vmem:[#allocation52 + $0x60] sm:$0xff]  }
 0xe23   : > { %10657 = vmatprep.subr.bf16.mxu1 %v12855_v0  ;;  %10671 = vmatprep.mubr.msk.bf16.mxu1 %vm12857_vm0, %v12855_v0  ;;  %v7516_v29 = vsel %vm5224_vm5, %v7514_v27, %v7515_v28 }
 0xe25   : > { %10650 = vmatpush3.bf16.msra.mxu0 %v11655_v39  ;;  %v11701_v39 = vld [vmem:[#allocation52 + $0x10] sm:$0xff]  }
 0xe26   : > { %10658 = vmatpush3.bf16.msra.mxu1 %v11656_v40  ;;  %10675 = vmatprep.subr.bf16.mxu0 %v12855_v0  ;;  %v11702_v40 = vld [vmem:[#allocation52 + $0x68] sm:$0xff]  }
 0xe27   : > { %10659 = vmatprep.subr.bf16.mxu1 %v12855_v0 }
 0xe28   : > { %10652 = vmatmul.mubr.bf16.vlgmr.msra.gmra.mrb[84].mxu0 %v7064_v43  ;;  %v11707_v43 = vld [vmem:[#allocation52 + $0x28] sm:$0xff]  }
 0xe29   : > { %10676 = vmatpush3.bf16.msra.mxu0 %v11659_v49  ;;  %10691 = vmatprep.mubr.msk.bf16.mxu0 %vm12857_vm0, %v12855_v0  ;;  %v11705_v49 = vld [vmem:[#allocation52 + $0x20] sm:$0xff]  }
 0xe2a   : > { %10660 = vmatpush3.bf16.msra.mxu1 %v11660_v34  ;;  %10677 = vmatprep.subr.bf16.mxu0 %v12855_v0  ;;  %v11706_v34 = vld [vmem:[#allocation52 + $0x78] sm:$0xff]  }
 0xe2b   : > { %10661 = vmatprep.subr.bf16.mxu1 %v12855_v0 }
 0xe2d   : > { %10678 = vmatpush3.bf16.msra.mxu0 %v11661_v44  ;;  %v11711_v44 = vld [vmem:[#allocation52 + $0x30] sm:$0xff]  }
 0xe2e   : > { %10662 = vmatpush3.bf16.msra.mxu1 %v11662_v45  ;;  %10679 = vmatprep.subr.bf16.mxu0 %v12855_v0  ;;  %v11713_v45 = vld [vmem:[#allocation52 + $0x38] sm:$0xff]  }
 0xe2f   : > { %10663 = vmatprep.subr.bf16.mxu1 %v12855_v0 }
 0xe31   : > { %10680 = vmatpush3.bf16.msra.mxu0 %v11663_v52 }
 0xe32   : > { %10664 = vmatpush3.bf16.msra.mxu1 %v11664_v37  ;;  %10681 = vmatprep.subr.bf16.mxu0 %v12855_v0 }
 0xe33   : > { %10665 = vmatprep.subr.bf16.mxu1 %v12855_v0 }
 0xe35   : > { %10682 = vmatpush3.bf16.msra.mxu0 %v11665_v46 }
 0xe36   : > { %10666 = vmatpush3.bf16.msra.mxu1 %v11666_v47  ;;  %10683 = vmatprep.subr.bf16.mxu0 %v12855_v0 }
 0xe37   : > { %10667 = vmatprep.subr.bf16.mxu1 %v12855_v0 }
 0xe39   : > { %10684 = vmatpush3.bf16.msra.mxu0 %v11667_v48 }
 0xe3a   : > { %10668 = vmatpush3.bf16.msra.mxu1 %v11668_v50  ;;  %10685 = vmatprep.subr.bf16.mxu0 %v12855_v0 }
 0xe3b   : > { %10669 = vmatprep.subr.bf16.mxu1 %v12855_v0 }
 0xe3d   : > { %10686 = vmatpush3.bf16.msra.mxu0 %v11669_v53 }
 0xe3e   : > { %10670 = vmatpush3.bf16.msra.mxu1 %v11670_v54  ;;  %10687 = vmatprep.subr.bf16.mxu0 %v12855_v0 }
 0xe3f   : > { %10695 = vmatprep.subr.bf16.mxu1 %v12855_v0 }
 0xe41   : > { %10672 = vmatmul.mubr.bf16.vlgmr.msra.gmra.mrb[84].mxu1 %v7160_v59  ;;  %10688 = vmatpush3.bf16.msra.mxu0 %v11672_v57  ;;  %v9199_v57 = vld [vmem:[#allocation48] ss:$0 sm:$0xff] }
 0xe42   : > { %10696 = vmatpush3.bf16.msra.mxu1 %v11673_v58  ;;  %10689 = vmatprep.subr.bf16.mxu0 %v12855_v0 }
 0xe43   : > { %10697 = vmatprep.subr.bf16.mxu1 %v12855_v0  ;;  %10711 = vmatprep.mubr.msk.bf16.mxu1 %vm12857_vm0, %v12855_v0 }
 0xe45   : > { %10690 = vmatpush3.bf16.msra.mxu0 %v11674_v60 }
 0xe46   : > { %10698 = vmatpush3.bf16.msra.mxu1 %v11675_v61  ;;  %10715 = vmatprep.subr.bf16.mxu0 %v12855_v0 }
 0xe47   : > { %10699 = vmatprep.subr.bf16.mxu1 %v12855_v0 }
 0xe48   : > { %10692 = vmatmul.mubr.bf16.vlgmr.msra.gmra.mrb[88].mxu0 %v9221_v63 }
 0xe49   : > { %10716 = vmatpush3.bf16.msra.mxu0 %v11677_v62  ;;  %10731 = vmatprep.mubr.msk.bf16.mxu0 %vm12857_vm0, %v12855_v0 }
 0xe4a   : > { %10700 = vmatpush3.bf16.msra.mxu1 %v11678_v1  ;;  %10717 = vmatprep.subr.bf16.mxu0 %v12855_v0 }
 0xe4b   : > { %10701 = vmatprep.subr.bf16.mxu1 %v12855_v0 }
 0xe4d   : > { %10718 = vmatpush3.bf16.msra.mxu0 %v11679_v2 }
 0xe4e   : > { %10702 = vmatpush3.bf16.msra.mxu1 %v11680_v3  ;;  %10719 = vmatprep.subr.bf16.mxu0 %v12855_v0 }
 0xe4f   : > { %10703 = vmatprep.subr.bf16.mxu1 %v12855_v0 }
 0xe51   : > { %10720 = vmatpush3.bf16.msra.mxu0 %v11681_v4 }
 0xe52   : > { %10704 = vmatpush3.bf16.msra.mxu1 %v11682_v7  ;;  %10721 = vmatprep.subr.bf16.mxu0 %v12855_v0 }
 0xe53   : > { %10705 = vmatprep.subr.bf16.mxu1 %v12855_v0 }
 0xe55   : > { %10722 = vmatpush3.bf16.msra.mxu0 %v11683_v9 }
 0xe56   : > { %10706 = vmatpush3.bf16.msra.mxu1 %v11684_v10  ;;  %10723 = vmatprep.subr.bf16.mxu0 %v12855_v0 }
 0xe57   : > { %10707 = vmatprep.subr.bf16.mxu1 %v12855_v0 }
 0xe59   : > { %10724 = vmatpush3.bf16.msra.mxu0 %v11685_v12 }
 0xe5a   : > { %10708 = vmatpush3.bf16.msra.mxu1 %v11686_v13  ;;  %10725 = vmatprep.subr.bf16.mxu0 %v12855_v0 }
 0xe5b   : > { %10709 = vmatprep.subr.bf16.mxu1 %v12855_v0 }
 0xe5d   : > { %10726 = vmatpush3.bf16.msra.mxu0 %v11687_v17 }
 0xe5e   : > { %10710 = vmatpush3.bf16.msra.mxu1 %v11688_v18  ;;  %10727 = vmatprep.subr.bf16.mxu0 %v12855_v0 }
 0xe5f   : > { %10735 = vmatprep.subr.bf16.mxu1 %v12855_v0 }
 0xe61   : > { %10712 = vmatmul.mubr.bf16.vlgmr.msra.gmra.mrb[88].mxu1 %v7400_v25  ;;  %10728 = vmatpush3.bf16.msra.mxu0 %v11691_v23  ;;  %v9249_v25 = vld [vmem:[#allocation51] ss:$0 sm:$0xff] }
 0xe62   : > { %10729 = vmatprep.subr.bf16.mxu0 %v12855_v0  ;;  %10751 = vmatprep.mubr.msk.bf16.mxu1 %vm12857_vm0, %v12855_v0 }
 0xe63   : > { %10736 = vmatpush3.bf16.msra.mxu1 %v11694_v30 }
 0xe64   : > { %10737 = vmatprep.subr.bf16.mxu1 %v12855_v0 }
 0xe65   : > { %10730 = vmatpush3.bf16.msra.mxu0 %v11692_v26 }
 0xe66   : > { %10755 = vmatprep.subr.bf16.mxu0 %v12855_v0 }
 0xe67   : > { %10738 = vmatpush3.bf16.msra.mxu1 %v11695_v31 }
 0xe68   : > { %10732 = vmatmul.mubr.bf16.vlgmr.msra.gmra.mrb[92].mxu0 %v7516_v29  ;;  %10739 = vmatprep.subr.bf16.mxu1 %v12855_v0 }
 0xe69   : > { %10771 = vmatprep.mubr.msk.bf16.mxu0 %vm12857_vm0, %v12855_v0  ;;  %10756 = vmatpush3.bf16.msra.mxu0 %v11697_v33 }
 0xe6a   : > { %10757 = vmatprep.subr.bf16.mxu0 %v12855_v0 }
 0xe6b   : > { %10740 = vmatpush3.bf16.msra.mxu1 %v11696_v32 }
 0xe6c   : > { %10741 = vmatprep.subr.bf16.mxu1 %v12855_v0 }
 0xe6d   : > { %10758 = vmatpush3.bf16.msra.mxu0 %v11699_v36 }
 0xe6e   : > { %10759 = vmatprep.subr.bf16.mxu0 %v12855_v0 }
 0xe6f   : > { %10742 = vmatpush3.bf16.msra.mxu1 %v11698_v35 }
 0xe70   : > { %10743 = vmatprep.subr.bf16.mxu1 %v12855_v0 }
 0xe71   : > { %10760 = vmatpush3.bf16.msra.mxu0 %v11701_v39  ;;  %v7630_v39 = vld [vmem:[#allocation2] sm:$0x8] }
 0xe72   : > { %10761 = vmatprep.subr.bf16.mxu0 %v12855_v0 }
 0xe73   : > { %10744 = vmatpush3.bf16.msra.mxu1 %v11700_v38 }
 0xe74   : > { %10745 = vmatprep.subr.bf16.mxu1 %v12855_v0 }
 0xe75   : > { %10762 = vmatpush3.bf16.msra.mxu0 %v11703_v41 }
 0xe76   : > { %10763 = vmatprep.subr.bf16.mxu0 %v12855_v0 }
 0xe77   : > { %10746 = vmatpush3.bf16.msra.mxu1 %v11702_v40 }
 0xe78   : > { %10747 = vmatprep.subr.bf16.mxu1 %v12855_v0 }
 0xe79   : > { %10764 = vmatpush3.bf16.msra.mxu0 %v11705_v49  ;;  %v11712_v49 = vld [vmem:[#allocation52 + $0x80] sm:$0xff]  }
 0xe7a   : > { %10765 = vmatprep.subr.bf16.mxu0 %v12855_v0 }
 0xe7b   : > { %10748 = vmatpush3.bf16.msra.mxu1 %v11704_v42 }
 0xe7c   : > { %10749 = vmatprep.subr.bf16.mxu1 %v12855_v0 }
 0xe7d   : > { %10766 = vmatpush3.bf16.msra.mxu0 %v11707_v43 }
 0xe7e   : > { %10767 = vmatprep.subr.bf16.mxu0 %v12855_v0 }
 0xe7f   : > { %10750 = vmatpush3.bf16.msra.mxu1 %v11706_v34 }
 0xe80   : > { %10775 = vmatprep.subr.bf16.mxu1 %v12855_v0 }
 0xe81   : > { %10768 = vmatpush3.bf16.msra.mxu0 %v11711_v44 }
 0xe82   : > { %10769 = vmatprep.subr.bf16.mxu0 %v12855_v0 }
 0xe85   : > { %10770 = vmatpush3.bf16.msra.mxu0 %v11713_v45 }
 0xed4   : > { %v6723_v52 = vpop.f32.mrb[76].mxu1 }
 0xed5   : > { %v10593_v37 = vpop.f32.mrb[77].mxu1 }
 0xed6   : > { %v6726_v46 = vpop.f32.mrb[78].mxu1 }
 0xed7   : > { %v10594_v47 = vpop.f32.mrb[79].mxu1 }
 0xedb   : > { %v6834_v48 = vpop.f32.mrb[80].mxu0 }
 0xedc   : > { %v6835_v50 = vadd.f32 %v6834_v48, %v6723_v52  ;;  %v10613_v51 = vpop.f32.mrb[81].mxu0  ;;  %v11714_v48 = vld [vmem:[#allocation52 + $0x88] sm:$0xff]  }
 0xedd   : > { %v6837_v53 = vpop.f32.mrb[82].mxu0 }
 0xede   : > { %v6838_v54 = vadd.f32 %v6837_v53, %v6726_v46  ;;  %v10614_v55 = vpop.f32.mrb[83].mxu0 }
 0xedf   : > { %v11715_v55 = vld [vmem:[#allocation52 + $0x90] sm:$0xff]  }
 0xef4   : > { %v6964_v56 = vpop.f32.mrb[80].mxu1 }
 0xef5   : > { %v6971_v58 = vadd.f32 %v6964_v56, %v6835_v50  ;;  %v10633_v59 = vpop.f32.mrb[81].mxu1 }
 0xef6   : > { %v6967_v60 = vpop.f32.mrb[82].mxu1 }
 0xef7   : > { %v6972_v61 = vadd.f32 %v6967_v60, %v6838_v54  ;;  %v10634_v62 = vpop.f32.mrb[83].mxu1  ;;  %v6980_v63 = vadd.f32 %v9199_v57, %v6971_v58  ;;  %v11717_v58 = vld [vmem:[#allocation52 + $0xa0] sm:$0xff]   ;;  %v11718_v60 = vld [vmem:[#allocation52 + $0xa8] sm:$0xff]  }
 0xef9   : > { %6984 = vrot.lane.b32.xlu1 %v6980_v63, %s12859_s26  ;;  %v6981_v1 = vadd.f32 %v9199_v57, %v6972_v61  ;;  %v11716_v57 = vld [vmem:[#allocation52 + $0x98] sm:$0xff]   ;;  %v11722_v61 = vld [vmem:[#allocation2 + $0xc] ss:$0 sps:$4 sm:$0x11]  }
 0xefa   : > { %v11719_v63 = vld [vmem:[#allocation52 + $0xb0] sm:$0xff]  }
 0xefb   : > { %v7148_v2 = vpop.f32.mrb[84].mxu0 }
 0xefc   : > { %v10653_v3 = vpop.f32.mrb[85].mxu0 }
 0xefd   : > { %v7151_v4 = vpop.f32.mrb[86].mxu0  ;;  %6986 = vrot.lane.b32.xlu1 %v6981_v1, %s12859_s26  ;;  %v11720_v3 = vld [vmem:[#allocation52 + $0xb8] sm:$0xff]  }
 0xefe   : > { %v10654_v5 = vpop.f32.mrb[87].mxu0 }
 0xf14   : > { %v7244_v6 = vpop.f32.mrb[84].mxu1 }
 0xf15   : > { %v7245_v7 = vadd.f32 %v7244_v6, %v7148_v2  ;;  %v10673_v8 = vpop.f32.mrb[85].mxu1  ;;  %v7908_v2 = vshll.u32 %v11722_v61, 16 }
 0xf16   : > { %v7247_v9 = vpop.f32.mrb[86].mxu1 }
 0xf17   : > { %v7248_v10 = vadd.f32 %v7247_v9, %v7151_v4  ;;  %v10674_v11 = vpop.f32.mrb[87].mxu1 }
 0xf1b   : > { %v7352_v12 = vpop.f32.mrb[88].mxu0 }
 0xf1c   : > { %v7359_v13 = vadd.f32 %v7352_v12, %v7245_v7  ;;  %v10693_v14 = vpop.f32.mrb[89].mxu0  ;;  %v7910_v7 = vrot.slane %v7908_v2, 1 }
 0xf1d   : > { %v7355_v15 = vpop.f32.mrb[90].mxu0 }
 0xf1e   : > { %v7360_v16 = vadd.f32 %v7355_v15, %v7248_v10  ;;  %v10694_v17 = vpop.f32.mrb[91].mxu0 }
 0xf34   : > { %v7484_v18 = vpop.f32.mrb[88].mxu1 }
 0xf35   : > { %v7491_v19 = vadd.f32 %v7484_v18, %v7359_v13  ;;  %v10713_v20 = vpop.f32.mrb[89].mxu1 }
 0xf36   : > { %v7487_v21 = vpop.f32.mrb[90].mxu1  ;;  %v9281_v20 = vld [vmem:[#allocation54] ss:$0 sm:$0xff] }
 0xf37   : > { %v7492_v22 = vadd.f32 %v7487_v21, %v7360_v16  ;;  %v10714_v23 = vpop.f32.mrb[91].mxu1 }
 0xf3b   : > { %v7600_v24 = vpop.f32.mrb[92].mxu0 }
 0xf3c   : > { %v7607_v26 = vadd.f32 %v7600_v24, %v7491_v19  ;;  %v10733_v27 = vpop.f32.mrb[93].mxu0 }
 0xf3d   : > { %v7603_v28 = vpop.f32.mrb[94].mxu0 }
 0xf3e   : > { %v7616_v29 = vadd.f32 %v9249_v25, %v7607_v26  ;;  %v7608_v30 = vadd.f32 %v7603_v28, %v7492_v22  ;;  %v10734_v31 = vpop.f32.mrb[95].mxu0  ;;  %v8024_v28 = vld [vmem:[#allocation10] sm:$0xff] }
 0xf3f   : > { %v8129_v31 = vld [vmem:[#allocation12 + $0x10] sm:$0xff] }
 0xf40   : > { %v7618_v32 = vmax.f32 %v7616_v29, 0.0  ;;  %v7617_v33 = vadd.f32 %v9249_v25, %v7608_v30  ;;  %v8127_v29 = vld [vmem:[#allocation12] sm:$0xff]  ;;  %v8128_v30 = vld [vmem:[#allocation12 + $0x8] sm:$0xff] }
 0xf42   : > { %v9324_v35 = vpack.c.bf16 %v7618_v32, %v7618_v32  ;;  %v7619_v36 = vmax.f32 %v7617_v33, 0.0  ;;  %v10831_v32 = vpack.c.bf16 %v8128_v30, %v8127_v29  ;;  %v8130_v33 = vld [vmem:[#allocation12 + $0x18] sm:$0xff] }
 0xf44   : > { %7628 = vst [vmem:[#allocation2 + $0x4] sm:$0xf] %v9324_v35  ;;  %v9325_v38 = vpack.c.bf16 %v7619_v36, %v7619_v36  ;;  %v10835_v35 = vpack.c.bf16 %v8130_v33, %v8129_v31  ;;  %v8131_v36 = vld [vmem:[#allocation12 + $0x20] sm:$0xff] }
 0xf46   : > { %7629 = vst [vmem:[#allocation2 + $0x8] sm:$0xf] %v9325_v38  ;;  %v8132_v38 = vld [vmem:[#allocation12 + $0x28] sm:$0xff] }
 0xf4b   : > { %v7631_v40 = vld [vmem:[#allocation2 + $0x4] sm:$0xf] }
 0xf4c   : > { %v9261_v41 = vcombine.low %v7630_v39, %v7631_v40  ;;  %v10839_v39 = vpack.c.bf16 %v8132_v38, %v8131_v36 }
 0xf4d   : > { %v7632_v42 = vld [vmem:[#allocation2 + $0x8] sm:$0xf] }
 0xf4e   : > { %v9252_v34 = vcombine.low %v7631_v40, %v7632_v42  ;;  %v9262_v43 = vcombine.low %v7632_v42, %v7632_v42  ;;  %v7766_v44 = vshrl.u32 %v9261_v41, 16  ;;  %v7769_v45 = vshll.u32 %v9261_v41, 16  ;;  %v11721_v59 = vld [vmem:[#allocation2 + $0x4] sm:$0xff]   ;;  %v8133_v40 = vld [vmem:[#allocation12 + $0x30] sm:$0xff]  ;;  %v8134_v41 = vld [vmem:[#allocation12 + $0x38] sm:$0xff] }
 0xf4f   : > { %v7903_v62 = vshll.u32 %v11721_v59, 16  ;;  %v7901_v4 = vshrl.u32 %v11721_v59, 16  ;;  %v10843_v42 = vpack.c.bf16 %v8134_v41, %v8133_v40 }
 0xf50   : > { %10752 = vmatmul.mubr.bf16.vlgmr.msra.gmra.mrb[92].mxu1 %v9252_v34  ;;  %v7768_v52 = vrot.slane %v7766_v44, 3  ;;  %v7771_v37 = vrot.slane %v7769_v45, 4  ;;  %v7774_v46 = vshrl.u32 %v9262_v43, 16  ;;  %v7777_v47 = vshll.u32 %v9262_v43, 16 }
 0xf51   : > { %10776 = vmatpush3.bf16.msra.mxu1 %v11712_v49  ;;  %10791 = vmatprep.mubr.msk.bf16.mxu1 %vm12857_vm0, %v12855_v0  ;;  %v7905_v1 = vrot.slane %v7903_v62, 1 }
 0xf52   : > { %10777 = vmatprep.subr.bf16.mxu1 %v12855_v0  ;;  %v7776_v50 = vrot.slane %v7774_v46, 3  ;;  %v7779_v51 = vrot.slane %v7777_v47, 4  ;;  %v7772_v53 = vor.u32 %v7771_v37, %v7768_v52  ;;  %v8025_v52 = vld [vmem:[#allocation10 + $0x8] sm:$0xff]  ;;  %v8026_v37 = vld [vmem:[#allocation10 + $0x10] sm:$0xff]  ;;  %v8027_v46 = vld [vmem:[#allocation10 + $0x18] sm:$0xff] }
 0xf53   : > { %v7906_v6 = vor.u32 %v7905_v1, %v7901_v4 }
 0xf54   : > { %v7780_v54 = vor.u32 %v7779_v51, %v7776_v50 }
 0xf55   : > { %10778 = vmatpush3.bf16.msra.mxu1 %v11714_v48  ;;  %v7911_v9 = vsel %vm1803_vm2, %v7906_v6, %v7910_v7 }
 0xf56   : > { %v7781_v56 = vsel %vm1667_vm1, %v7772_v53, %v7780_v54  ;;  %10779 = vmatprep.subr.bf16.mxu1 %v12855_v0 }
 0xf57   : > { %10772 = vmatmul.mubr.bf16.vlgmr.msra.gmra.mrb[96].mxu0 %v7781_v56 }
 0xf58   : > { %10799 = vmatprep.mubr.msk.f32.mxu0 %vm3102_vm3, %v8024_v28 }
 0xf59   : > { %10780 = vmatpush3.bf16.msra.mxu1 %v11715_v55 }
 0xf5a   : > { %10781 = vmatprep.subr.bf16.mxu1 %v12855_v0 }
 0xf5d   : > { %10782 = vmatpush3.bf16.msra.mxu1 %v11716_v57 }
 0xf5e   : > { %10783 = vmatprep.subr.bf16.mxu1 %v12855_v0 }
 0xf61   : > { %10784 = vmatpush3.bf16.msra.mxu1 %v11717_v58 }
 0xf62   : > { %10785 = vmatprep.subr.bf16.mxu1 %v12855_v0 }
 0xf65   : > { %10786 = vmatpush3.bf16.msra.mxu1 %v11718_v60 }
 0xf66   : > { %10787 = vmatprep.subr.bf16.mxu1 %v12855_v0 }
 0xf69   : > { %10788 = vmatpush3.bf16.msra.mxu1 %v11719_v63 }
 0xf6a   : > { %10789 = vmatprep.subr.bf16.mxu1 %v12855_v0 }
 0xf6b   : > { %v6985_v5 = vpop.permute.xlu1 %6984 }
 0xf6c   : > { %6991 = vst.msk [vmem:[#allocation3] sm:$0xff] %vm6990_vm7, %v6985_v5 }
 0xf6d   : > { %10790 = vmatpush3.bf16.msra.mxu1 %v11720_v3 }
 0xf6e   : > { %10832 = vmatprep.subr.bf16.mxu1 %v10831_v32 }
 0xf6f   : > { %v6987_v8 = vpop.permute.xlu1 %6986 }
 0xf70   : > { %6992 = vst.msk [vmem:[#allocation3 + $0x8] sm:$0xff] %vm6990_vm7, %v6987_v8  ;;  %10792 = vmatmul.mubr.bf16.vlgmr.msra.gmra.mrb[96].mxu1 %v7911_v9 }
 0xf71   : > { %10834 = vmatpush3.bf16.msra.mxu1 %v10831_v32 }
 0xf72   : > { %10836 = vmatprep.subr.bf16.mxu1 %v10835_v35 }
 0xf75   : > { %10838 = vmatpush3.bf16.msra.mxu1 %v10835_v35 }
 0xf76   : > { %10840 = vmatprep.subr.bf16.mxu1 %v10839_v39 }
 0xf79   : > { %10842 = vmatpush3.bf16.msra.mxu1 %v10839_v39 }
 0xf7a   : > { %10844 = vmatprep.subr.bf16.mxu1 %v10843_v42 }
 0xf7d   : > { %10846 = vmatpush3.bf16.msra.mxu1 %v10843_v42 }
0x1023   : > { %v7754_v10 = vpop.f32.mrb[92].mxu1 }
0x1024   : > { %v10753_v11 = vpop.f32.mrb[93].mxu1 }
0x1025   : > { %v7757_v12 = vpop.f32.mrb[94].mxu1 }
0x1026   : > { %v10754_v13 = vpop.f32.mrb[95].mxu1 }
0x102a   : > { %v7865_v14 = vpop.f32.mrb[96].mxu0 }
0x102b   : > { %v7866_v15 = vadd.f32 %v7865_v14, %v7754_v10  ;;  %v10773_v16 = vpop.f32.mrb[97].mxu0 }
0x102c   : > { %v7868_v17 = vpop.f32.mrb[98].mxu0 }
0x102d   : > { %v7869_v18 = vadd.f32 %v7868_v17, %v7757_v12  ;;  %v10774_v0 = vpop.f32.mrb[99].mxu0 }
0x1043   : > { %v7995_v19 = vpop.f32.mrb[96].mxu1 }
0x1044   : > { %v8002_v21 = vadd.f32 %v7995_v19, %v7866_v15  ;;  %v10793_v22 = vpop.f32.mrb[97].mxu1 }
0x1045   : > { %v7998_v23 = vpop.f32.mrb[98].mxu1 }
0x1046   : > { %v8011_v24 = vadd.f32 %v9281_v20, %v8002_v21  ;;  %v8003_v25 = vadd.f32 %v7998_v23, %v7869_v18  ;;  %v10794_v26 = vpop.f32.mrb[99].mxu1 }
0x1048   : > { %v8012_v27 = vadd.f32 %v9281_v20, %v8003_v25  ;;  %8015 = vrot.lane.b32.xlu0 %v8011_v24, %s12860_s28 }
0x104a   : > { %8017 = vrot.lane.b32.xlu1 %v8012_v27, %s12860_s28 }
0x10ba   : > { %v8016_v49 = vpop.permute.xlu0 %8015 }
0x10bb   : > { %8022 = vst.msk [vmem:[#allocation3] sm:$0xff] %vm8021_vm8, %v8016_v49 }
0x10bc   : > { %v8018_v34 = vpop.permute.xlu1 %8017 }
0x10bd   : > { %8023 = vst.msk [vmem:[#allocation3 + $0x8] sm:$0xff] %vm8021_vm8, %v8018_v34 }
0x10c2   : > { %v8028_v43 = vld [vmem:[#allocation3] sm:$0xff] }
0x10c4   : > { %v8029_v44 = vld [vmem:[#allocation3 + $0x8] sm:$0xff] }
0x10c5   : > { %v10827_v45 = vpack.c.bf16 %v8029_v44, %v8028_v43 }
0x10c7   : > { %10828 = vmatprep.subr.bf16.mxu0 %v10827_v45 }
0x10c8   : > { %10830 = vmatpush3.bf16.msra.mxu0 %v10827_v45 }
0x10cb   : > { %10800 = vmatmul.mubr.msk.f32.vlgmr.msra.gmra.mrb[100].mxu0 %vm3102_vm3, %v8025_v52 }
0x10cc   : > { %10802 = vmatprep.mubr.msk.f32.mxu0 %vm3102_vm3, %v8026_v37 }
0x10cf   : > { %10803 = vmatmul.mubr.msk.f32.gmra.mrb[102].mxu0 %vm3102_vm3, %v8027_v46 }
0x119e   : > { %v10801_v47 = vpop.f32.mrb[100].mxu0 }
0x119f   : > { %v8108_v48 = vpop.f32.mrb[101].mxu0 }
0x11a0   : > { %10821 = vmatprep.mubr.msk.f32.mxu1 %vm8135_vm9, %v8108_v48 }
0x11a1   : > { %10822 = vmatmul.mubr.msk.f32.vlgmr.msra.gmra.mrb[100].mxu1 %vm8135_vm9, %v10801_v47 }
0x11a2   : > { %v10804_v50 = vpop.f32.mrb[102].mxu0 }
0x11a3   : > { %v8118_v51 = vpop.f32.mrb[103].mxu0 }
0x11a4   : > { %10824 = vmatprep.mubr.msk.f32.mxu1 %vm8135_vm9, %v8118_v51 }
0x11a5   : > { %10825 = vmatmul.mubr.msk.f32.gmra.mrb[102].mxu1 %vm8135_vm9, %v10804_v50 }
0x1274   : > { %v10823_v53 = vpop.f32.mrb[100].mxu1 }
0x1275   : > { %8234 = vst [vmem:[%s1516_s9 + $0x8] sm:$0xff] %v10823_v53  ;;  %v8214_v54 = vpop.f32.mrb[101].mxu1 }
0x1276   : > { %8233 = vst [vmem:[%s1516_s9] sm:$0xff] %v8214_v54 }
0x1278   : > { %v10826_v55 = vpop.f32.mrb[102].mxu1 }
0x1279   : > { %8236 = vst [vmem:[%s1516_s9 + $0x18] sm:$0xff] %v10826_v55  ;;  %v8224_v56 = vpop.f32.mrb[103].mxu1 }
0x127a   : > { %8235 = vst [vmem:[%s1516_s9 + $0x10] sm:$0xff] %v8224_v56 }
0x127b   : > { %12666 = shalt.err (!%p12663_p9)
}
0x127c   : > { %s12667_s12 = scalar_lea.hbm %s14321_s30, 512  ;;  %s12671_s24 = scalar_lea.hbm %s14536_s3, 1024 }
0x127d   : > { %p12668_p0 = scmp.ne.s32.totalorder %s14321_s30, %s12667_s12  ;;  %p12672_p7 = scmp.lt.u32.totalorder %s14321_s30, %s14536_s3 }
0x127e   : > { %p12673_p13 = scmp.lt.u32.totalorder %s12671_s24, %s12667_s12  ;;  %p12675_p3 = scmp.lt.u32.totalorder %s12667_s12, %s14321_s30 }
0x127f   : > { %p12669_p2 = pnand %p12668_p0, %p14537_p10 }
0x1280   : > { %p12674_p4 = por %p12673_p13, %p12672_p7 }
0x1281   : > { %p12670_p6 = pneg %p12669_p2 }
0x1282   : > { %p12676_p11 = por %p12675_p3, %p12674_p4 }
0x1284   : > { %p12677_p8 = pnand %p12676_p11, %p12670_p6 }
0x1286   : > { %12680 = shalt.err (!%p12677_p8)
}
0x1287   : > { %s12862_s16 = smov 128   ;;  %s12863_s26 = smov 8  }
0x1288   : > { %10973 = dma.vmem_to_hbm [thread:$0]  (%p14537_p10), %s14318_s29, 512, %s14321_s30, %s8238_s4, %s12862_s16, %s12862_s16, %s12863_s26  }
0x1289 PF: > { %s8266_s28 = sand.u32 1, %s12771_s0   ;;  %p14538_p12 = scmp.ne.s32.totalorder %s14479_s2, 0 }
0x128a   : > { %p14539_p1 = scmp.ge.s32.totalorder %s12783_s11, 2  ;;  %s8267_s15 = scalar_lea.sflag [#allocation6], %s8266_s28 }
0x128c   : > { %p11077_p5 = pnand %p14539_p1, %p14538_p12 }
0x128e   : > { %12766 = dma.done.wait (!%p11077_p5), %s8267_s15, 512  }
0x128f   : > { %12768 = vsyncadd (!%p11077_p5), %s8267_s15, 4294966784  ;;  %p98_p9 = scmp.ge.s32.totalorder %s13298_s25, 4   ;;  %s14540_s0 = smov %s12775_s7 }
0x1290   : > { %s14541_s7 = smov %s12779_s10  ;;  %s14542_s10 = smov %s13310_s17 }
0x1291   : > { %s14543_s11 = smov %s13298_s25  ;;  %100 = sbr.rel (!%p98_p9) target bundleno = 93 (0x5d), region = 410 }
0x1298   :  { %8272 = vsyncpa [#allocation5], 1 }
0x1299   :  { %8274 = vsyncpa [#allocation5 + $0x1], 1 }
0x129a   :  { %8275 = vsyncpa [#allocation8], 1 }
0x129b   :  { %8277 = vsyncpa [#allocation8 + $0x1], 1 }
0x129c   :  { %8278 = vsyncpa [#allocation11], 1 }
0x129d   :  { %8279 = vsyncpa [#allocation14], 1 }
0x129e   :  { %8280 = vsyncpa [#allocation17], 1 }
0x129f   :  { %8281 = vsyncpa [#allocation20], 1 }
0x12a0   :  { %8282 = vsyncpa [#allocation23], 1 }
0x12a1   :  { %8283 = vsyncpa [#allocation26], 1 }
0x12a2   :  { %8284 = vsyncpa [#allocation29], 1 }
0x12a3   :  { %8285 = vsyncpa [#allocation32], 1 }
0x12a4   :  { %8286 = vsyncpa [#allocation35], 1 }
0x12a5   :  { %8287 = vsyncpa [#allocation38], 1 }
0x12a6   :  { %8288 = vsyncpa [#allocation41], 1 }
0x12a7   :  { %8289 = vsyncpa [#allocation44], 1 }
0x12a8   :  { %8290 = vsyncpa [#allocation47], 1 }
0x12a9   :  { %8291 = vsyncpa [#allocation50], 1 }
0x12aa   :  { %8292 = vsyncpa [#allocation53], 1 }
0x12ab   :  { %8293 = vsyncpa [#allocation6], 1 }
0x12ac   :  { %8295 = vsyncpa [#allocation6 + $0x1], 1 }

</bundles_post_ra>
